<compile_context>
chip_gen: v6e
topology: v6e:2x2x1
jax: 0.10.0
libtpu: 0.0.40
codegen_flags: <defaults>
</compile_context>

<pallas_src>
import functools

import jax
import jax.numpy as jnp
from jax.experimental import pallas as pl
from jax.experimental.pallas import tpu as pltpu

BN_EPS = 1e-5
TM_MAX = 256  # max M tile (rows of the flattened batch*spatial axis)


def _round_up(x, m):
    return (x + m - 1) // m * m


# ----------------------------------------------------------------------------
# Pallas kernels
# ----------------------------------------------------------------------------
def _gemm_bn_act_kernel(p_ref, w_ref, s_ref, b_ref, o_ref, *, relu):
    # p: [tm, K]   w: [K, N]   s/b: [1, N]   o: [tm, N]
    acc = jnp.dot(p_ref[...], w_ref[...], preferred_element_type=jnp.float32)
    acc = acc * s_ref[...] + b_ref[...]
    if relu:
        acc = jnp.maximum(acc, 0.0)
    o_ref[...] = acc.astype(o_ref.dtype)


def _gemm_bn_add_relu_kernel(p_ref, w_ref, s_ref, b_ref, r_ref, o_ref):
    # Fused BasicBlock tail:  relu( bn(conv(x)) + identity )
    acc = jnp.dot(p_ref[...], w_ref[...], preferred_element_type=jnp.float32)
    acc = acc * s_ref[...] + b_ref[...] + r_ref[...]
    o_ref[...] = jnp.maximum(acc, 0.0).astype(o_ref.dtype)


def _maxpool_kernel(v_ref, o_ref):
    # v: [9, tm, C] (the 9 shifted 3x3 window views), o: [tm, C]
    o_ref[...] = jnp.max(v_ref[...], axis=0)


# ----------------------------------------------------------------------------
# Wrappers
# ----------------------------------------------------------------------------
def _choose_m_tiling(M):
    if M >= TM_MAX:
        M_pad = _round_up(M, TM_MAX)
        tm = TM_MAX
    else:
        M_pad = _round_up(M, 8)
        tm = M_pad
    return M_pad, tm


def _gemm_bn_act(patches, w_mat, scale, shift, residual=None, relu=True):
    """out[:M] = act(patches @ w_mat * scale + shift (+ residual)).  f32."""
    M, K = patches.shape
    _, N = w_mat.shape
    M_pad, tm = _choose_m_tiling(M)
    if M_pad != M:
        patches = jnp.pad(patches, ((0, M_pad - M), (0, 0)))
        if residual is not None:
            residual = jnp.pad(residual, ((0, M_pad - M), (0, 0)))

    scale2 = scale.reshape(1, N).astype(jnp.float32)
    shift2 = shift.reshape(1, N).astype(jnp.float32)

    in_specs = [
        pl.BlockSpec((tm, K), lambda i: (i, 0)),    # activations: tiled over M
        pl.BlockSpec((K, N), lambda i: (0, 0)),     # weights: VMEM-resident
        pl.BlockSpec((1, N), lambda i: (0, 0)),
        pl.BlockSpec((1, N), lambda i: (0, 0)),
    ]
    args = [patches, w_mat, scale2, shift2]
    if residual is not None:
        in_specs.append(pl.BlockSpec((tm, N), lambda i: (i, 0)))
        args.append(residual)
        kernel = _gemm_bn_add_relu_kernel
    else:
        kernel = functools.partial(_gemm_bn_act_kernel, relu=relu)

    res_bytes = M_pad * N * 4 if residual is not None else 0
    cost = pl.CostEstimate(
        flops=2 * M_pad * K * N,
        transcendentals=0,
        bytes_accessed=4 * (M_pad * K + K * N + 2 * N + M_pad * N) + res_bytes,
    )

    out = pl.pallas_call(
        kernel,
        out_shape=jax.ShapeDtypeStruct((M_pad, N), jnp.float32),
        grid_spec=pltpu.PrefetchScalarGridSpec(
            num_scalar_prefetch=0,
            grid=(M_pad // tm,),
            in_specs=in_specs,
            out_specs=pl.BlockSpec((tm, N), lambda i: (i, 0)),
        ),
        compiler_params=pltpu.CompilerParams(dimension_semantics=("parallel",)),
        cost_estimate=cost,
    )(*args)
    return out[:M]


def _extract_patches(x_nhwc, K, stride, padding):
    """im2col: [B,H,W,C] -> ([B*Ho*Wo, K*K*C], (B,Ho,Wo)).  Pure layout work."""
    B, H, W, C = x_nhwc.shape
    xp = jnp.pad(x_nhwc, ((0, 0), (padding, padding), (padding, padding), (0, 0)))
    Ho = (H + 2 * padding - K) // stride + 1
    Wo = (W + 2 * padding - K) // stride + 1
    cols = []
    for ky in range(K):
        for kx in range(K):
            sl = xp[:, ky: ky + stride * (Ho - 1) + 1: stride,
                       kx: kx + stride * (Wo - 1) + 1: stride, :]
            cols.append(sl)  # [B, Ho, Wo, C]
    patches = jnp.concatenate(cols, axis=-1)  # feature order (ky, kx, cin)
    return patches.reshape(B * Ho * Wo, K * K * C), (B, Ho, Wo)


def conv_bn(x_nhwc, p, stride, padding, relu=True, residual_nhwc=None):
    """conv (no bias) + folded inference BatchNorm + optional (residual, ReLU)."""
    w = p["w"]  # [Cout, Cin, K, K] (PyTorch layout)
    Cout, Cin, K, _ = w.shape
    # reorder to match the (ky, kx, cin) im2col feature ordering
    w_mat = jnp.transpose(w, (2, 3, 1, 0)).reshape(K * K * Cin, Cout)
    scale = p["gamma"] / jnp.sqrt(p["var"] + BN_EPS)
    shift = p["beta"] - p["mean"] * scale

    patches, (B, Ho, Wo) = _extract_patches(x_nhwc, K, stride, padding)
    residual = None
    if residual_nhwc is not None:
        residual = residual_nhwc.reshape(B * Ho * Wo, Cout)
    out = _gemm_bn_act(patches, w_mat, scale, shift, residual=residual, relu=relu)
    return out.reshape(B, Ho, Wo, Cout)


def _maxpool_3x3_s2(x_nhwc):
    """MaxPool2d(kernel=3, stride=2, padding=1) in NHWC via a Pallas max kernel."""
    B, H, W, C = x_nhwc.shape
    pad_val = float(jnp.finfo(jnp.float32).min)
    xp = jnp.pad(x_nhwc, ((0, 0), (1, 1), (1, 1), (0, 0)), constant_values=pad_val)
    Ho = (H + 2 - 3) // 2 + 1
    Wo = (W + 2 - 3) // 2 + 1
    M = B * Ho * Wo
    views = []
    for ky in range(3):
        for kx in range(3):
            sl = xp[:, ky: ky + 2 * (Ho - 1) + 1: 2,
                       kx: kx + 2 * (Wo - 1) + 1: 2, :]
            views.append(sl.reshape(M, C))
    stacked = jnp.stack(views, axis=0)  # [9, M, C]

    M_pad, tm = _choose_m_tiling(M)
    if M_pad != M:
        stacked = jnp.pad(stacked, ((0, 0), (0, M_pad - M), (0, 0)),
                          constant_values=pad_val)

    cost = pl.CostEstimate(flops=8 * M_pad * C, transcendentals=0,
                           bytes_accessed=4 * (9 * M_pad * C + M_pad * C))
    out = pl.pallas_call(
        _maxpool_kernel,
        out_shape=jax.ShapeDtypeStruct((M_pad, C), jnp.float32),
        grid_spec=pltpu.PrefetchScalarGridSpec(
            num_scalar_prefetch=0,
            grid=(M_pad // tm,),
            in_specs=[pl.BlockSpec((9, tm, C), lambda i: (0, i, 0))],
            out_specs=pl.BlockSpec((tm, C), lambda i: (i, 0)),
        ),
        compiler_params=pltpu.CompilerParams(dimension_semantics=("parallel",)),
        cost_estimate=cost,
    )(stacked)
    return out[:M].reshape(B, Ho, Wo, C)


def basic_block(x_nhwc, bp, stride):
    """ResNet BasicBlock: relu(bn2(conv2(relu(bn1(conv1(x))))) + identity)."""
    if "ds" in bp:  # 1x1 stride-s conv + BN, no ReLU
        identity = conv_bn(x_nhwc, bp["ds"], stride, 0, relu=False)
    else:
        identity = x_nhwc
    h = conv_bn(x_nhwc, bp["conv1"], stride, 1, relu=True)
    # conv2 + bn2 + residual add + relu fused into one kernel
    return conv_bn(h, bp["conv2"], 1, 1, residual_nhwc=identity)


def feature_generator_resnet_forward(x_nchw, params):
    """Matches Feature_Generator_ResNet('resnet18').forward.  NCHW in, NCHW out."""
    x = jnp.transpose(x_nchw, (0, 2, 3, 1))  # channels-last (lane-dense) layout
    x = conv_bn(x, params["stem"], stride=2, padding=3, relu=True)  # conv1+bn1+relu
    x = _maxpool_3x3_s2(x)
    for blk, s in zip(params["layer1"], (1, 1)):
        x = basic_block(x, blk, s)
    for blk, s in zip(params["layer2"], (2, 1)):
        x = basic_block(x, blk, s)
    for blk, s in zip(params["layer3"], (2, 1)):
        x = basic_block(x, blk, s)
    return jnp.transpose(x, (0, 3, 1, 2))


# ----------------------------------------------------------------------------
# Parameter init (PyTorch shapes, random — pretrained weights unavailable)
# ----------------------------------------------------------------------------
def _init_conv_bn(key, cin, cout, k):
    kw, kg, kb, km, kv = jax.random.split(key, 5)
    fan_in = cin * k * k
    return dict(
        w=jax.random.normal(kw, (cout, cin, k, k), jnp.float32) * jnp.sqrt(2.0 / fan_in),
        gamma=1.0 + 0.1 * jax.random.normal(kg, (cout,), jnp.float32),
        beta=0.1 * jax.random.normal(kb, (cout,), jnp.float32),
        mean=0.1 * jax.random.normal(km, (cout,), jnp.float32),
        var=1.0 + 0.5 * jax.random.uniform(kv, (cout,), jnp.float32),
    )


def init_params(key, model="resnet18"):
    assert model == "resnet18"
    keys = iter(jax.random.split(key, 20))

    def make_block(cin, cout, stride):
        blk = {"conv1": _init_conv_bn(next(keys), cin, cout, 3),
               "conv2": _init_conv_bn(next(keys), cout, cout, 3)}
        if stride != 1 or cin != cout:
            blk["ds"] = _init_conv_bn(next(keys), cin, cout, 1)
        return blk

    return {
        "stem": _init_conv_bn(next(keys), 3, 64, 7),
        "layer1": [make_block(64, 64, 1), make_block(64, 64, 1)],
        "layer2": [make_block(64, 128, 2), make_block(128, 128, 1)],
        "layer3": [make_block(128, 256, 2), make_block(256, 256, 1)],
    }


# ----------------------------------------------------------------------------
# Pure-JAX reference (lax.conv / reduce_window) for correctness check
# ----------------------------------------------------------------------------
def _ref_conv_bn(x, p, stride, padding, relu=True):
    y = jax.lax.conv_general_dilated(
        x, p["w"], (stride, stride), [(padding, padding)] * 2,
        dimension_numbers=("NCHW", "OIHW", "NCHW"),
        precision=jax.lax.Precision.HIGHEST)
    s = p["gamma"] / jnp.sqrt(p["var"] + BN_EPS)
    b = p["beta"] - p["mean"] * s
    y = y * s[None, :, None, None] + b[None, :, None, None]
    return jnp.maximum(y, 0.0) if relu else y


def _ref_block(x, bp, stride):
    identity = _ref_conv_bn(x, bp["ds"], stride, 0, relu=False) if "ds" in bp else x
    h = _ref_conv_bn(x, bp["conv1"], stride, 1, relu=True)
    y = _ref_conv_bn(h, bp["conv2"], 1, 1, relu=False)
    return jnp.maximum(y + identity, 0.0)


def reference_forward(x, params):
    y = _ref_conv_bn(x, params["stem"], 2, 3, relu=True)
    y = jax.lax.reduce_window(y, -jnp.inf, jax.lax.max, (1, 1, 3, 3), (1, 1, 2, 2),
                              [(0, 0), (0, 0), (1, 1), (1, 1)])
    for blk, s in zip(params["layer1"], (1, 1)):
        y = _ref_block(y, blk, s)
    for blk, s in zip(params["layer2"], (2, 1)):
        y = _ref_block(y, blk, s)
    for blk, s in zip(params["layer3"], (2, 1)):
        y = _ref_block(y, blk, s)
    return y


if __name__ == "__main__":
    key = jax.random.PRNGKey(0)
    kx, kp = jax.random.split(key)

    B, H, W = 2, 32, 32
    x = jax.random.normal(kx, (B, 3, H, W), dtype=jnp.float32)
    params = init_params(kp)

    out = jax.jit(feature_generator_resnet_forward)(x, params)
    out = jax.block_until_ready(out)

    ref = reference_forward(x, params)
    assert out.shape == (B, 256, H // 16, W // 16), out.shape
    max_err = float(jnp.max(jnp.abs(out - ref)))
    assert jnp.allclose(out, ref, atol=2e-2, rtol=2e-2), f"mismatch, max abs err {max_err}"

    print("KERNEL_OK")
</pallas_src>

<mosaic_0001>
module attributes {stable_mosaic.version = 11 : i64} {
  func.func @_gemm_bn_act_kernel(%arg0: i32, %arg1: memref<256x147xf32, #tpu.memory_space<vmem>>, %arg2: memref<147x64xf32, #tpu.memory_space<vmem>>, %arg3: memref<1x64xf32, #tpu.memory_space<vmem>>, %arg4: memref<1x64xf32, #tpu.memory_space<vmem>>, %arg5: memref<256x64xf32, #tpu.memory_space<vmem>>) attributes {dimension_semantics = [#tpu.dimension_semantics<parallel>], iteration_bounds = array<i64: 2>, scalar_prefetch = 0 : i64, scratch_operands = 0 : i64, tpu.core_type = #tpu.core_type<tc>, window_params = [{transform_indices = @transform_0, window_bounds = array<i64: 256, 147>}, {pipeline_mode = #tpu.pipeline_mode<synchronous>, transform_indices = @transform_1, window_bounds = array<i64: 147, 64>}, {pipeline_mode = #tpu.pipeline_mode<synchronous>, transform_indices = @transform_2, window_bounds = array<i64: 1, 64>}, {pipeline_mode = #tpu.pipeline_mode<synchronous>, transform_indices = @transform_3, window_bounds = array<i64: 1, 64>}, {transform_indices = @transform_4, window_bounds = array<i64: 256, 64>}]} {
    %c0 = arith.constant 0 : index
    %c0_0 = arith.constant 0 : index
    %0 = vector.load %arg1[%c0, %c0_0] : memref<256x147xf32, #tpu.memory_space<vmem>>, vector<256x147xf32>
    %c0_1 = arith.constant 0 : index
    %c0_2 = arith.constant 0 : index
    %1 = vector.load %arg2[%c0_1, %c0_2] : memref<147x64xf32, #tpu.memory_space<vmem>>, vector<147x64xf32>
    %cst = arith.constant dense<0.000000e+00> : vector<256x64xf32>
    %2 = tpu.matmul %0, %1, %cst {dimension_numbers = #tpu.dot_dimension_numbers<[1], [0], [0], [1], [0, 0, 1, 1], [], []>} : vector<256x147xf32>, vector<147x64xf32>, vector<256x64xf32> -> vector<256x64xf32>
    %c0_3 = arith.constant 0 : index
    %c0_4 = arith.constant 0 : index
    %3 = vector.load %arg3[%c0_3, %c0_4] : memref<1x64xf32, #tpu.memory_space<vmem>>, vector<1x64xf32>
    %4 = vector.broadcast %3 : vector<1x64xf32> to vector<256x64xf32>
    %5 = arith.mulf %2, %4 : vector<256x64xf32>
    %c0_5 = arith.constant 0 : index
    %c0_6 = arith.constant 0 : index
    %6 = vector.load %arg4[%c0_5, %c0_6] : memref<1x64xf32, #tpu.memory_space<vmem>>, vector<1x64xf32>
    %7 = vector.broadcast %6 : vector<1x64xf32> to vector<256x64xf32>
    %8 = arith.addf %5, %7 : vector<256x64xf32>
    %cst_7 = arith.constant 0.000000e+00 : f32
    %9 = vector.broadcast %cst_7 : f32 to vector<256x64xf32>
    %10 = arith.maximumf %8, %9 : vector<256x64xf32>
    %c0_8 = arith.constant 0 : index
    %c0_9 = arith.constant 0 : index
    %11 = vector.load %arg5[%c0_8, %c0_9] : memref<256x64xf32, #tpu.memory_space<vmem>>, vector<256x64xf32>
    tpu.vector_store %arg5[%c0_8, %c0_9], %10 {strides = array<i32>} : memref<256x64xf32, #tpu.memory_space<vmem>>, vector<256x64xf32>,
    return
  }
  func.func @transform_0(%arg0: i32) -> (i32, i32) {
    %c0_i32 = arith.constant 0 : i32
    %c0_i32_0 = arith.constant 0 : i32
    return %arg0, %c0_i32 : i32, i32
  }
  func.func @transform_1(%arg0: i32) -> (i32, i32) {
    %c0_i32 = arith.constant 0 : i32
    %c0_i32_0 = arith.constant 0 : i32
    %c0_i32_1 = arith.constant 0 : i32
    return %c0_i32, %c0_i32_0 : i32, i32
  }
  func.func @transform_2(%arg0: i32) -> (i32, i32) {
    %c0_i32 = arith.constant 0 : i32
    %c0_i32_0 = arith.constant 0 : i32
    %c0_i32_1 = arith.constant 0 : i32
    return %c0_i32, %c0_i32_0 : i32, i32
  }
  func.func @transform_3(%arg0: i32) -> (i32, i32) {
    %c0_i32 = arith.constant 0 : i32
    %c0_i32_0 = arith.constant 0 : i32
    %c0_i32_1 = arith.constant 0 : i32
    return %c0_i32, %c0_i32_0 : i32, i32
  }
  func.func @transform_4(%arg0: i32) -> (i32, i32) {
    %c0_i32 = arith.constant 0 : i32
    %c0_i32_0 = arith.constant 0 : i32
    return %arg0, %c0_i32 : i32, i32
  }
}

module attributes {stable_mosaic.version = 11 : i64} {
  func.func @_maxpool_kernel(%arg0: i32, %arg1: memref<9x128x64xf32, #tpu.memory_space<vmem>>, %arg2: memref<128x64xf32, #tpu.memory_space<vmem>>) attributes {dimension_semantics = [#tpu.dimension_semantics<parallel>], iteration_bounds = array<i64: 1>, scalar_prefetch = 0 : i64, scratch_operands = 0 : i64, tpu.core_type = #tpu.core_type<tc>, window_params = [{transform_indices = @transform_0, window_bounds = array<i64: 9, 128, 64>}, {transform_indices = @transform_1, window_bounds = array<i64: 128, 64>}]} {
    %c0 = arith.constant 0 : index
    %c0_0 = arith.constant 0 : index
    %c0_1 = arith.constant 0 : index
    %0 = vector.load %arg1[%c0, %c0_0, %c0_1] : memref<9x128x64xf32, #tpu.memory_space<vmem>>, vector<9x128x64xf32>
    %cst = arith.constant dense<0xFF800000> : vector<128x64xf32>
    %1 = vector.multi_reduction <maximumf>, %0, %cst [0] : vector<9x128x64xf32> to vector<128x64xf32>
    %c0_2 = arith.constant 0 : index
    %c0_3 = arith.constant 0 : index
    %2 = vector.load %arg2[%c0_2, %c0_3] : memref<128x64xf32, #tpu.memory_space<vmem>>, vector<128x64xf32>
    tpu.vector_store %arg2[%c0_2, %c0_3], %1 {strides = array<i32>} : memref<128x64xf32, #tpu.memory_space<vmem>>, vector<128x64xf32>,
    return
  }
  func.func @transform_0(%arg0: i32) -> (i32, i32, i32) {
    %c0_i32 = arith.constant 0 : i32
    %c0_i32_0 = arith.constant 0 : i32
    %c0_i32_1 = arith.constant 0 : i32
    return %c0_i32, %arg0, %c0_i32_0 : i32, i32, i32
  }
  func.func @transform_1(%arg0: i32) -> (i32, i32) {
    %c0_i32 = arith.constant 0 : i32
    %c0_i32_0 = arith.constant 0 : i32
    return %arg0, %c0_i32 : i32, i32
  }
}

module attributes {stable_mosaic.version = 11 : i64} {
  func.func @_gemm_bn_act_kernel(%arg0: i32, %arg1: memref<128x576xf32, #tpu.memory_space<vmem>>, %arg2: memref<576x64xf32, #tpu.memory_space<vmem>>, %arg3: memref<1x64xf32, #tpu.memory_space<vmem>>, %arg4: memref<1x64xf32, #tpu.memory_space<vmem>>, %arg5: memref<128x64xf32, #tpu.memory_space<vmem>>) attributes {dimension_semantics = [#tpu.dimension_semantics<parallel>], iteration_bounds = array<i64: 1>, scalar_prefetch = 0 : i64, scratch_operands = 0 : i64, tpu.core_type = #tpu.core_type<tc>, window_params = [{transform_indices = @transform_0, window_bounds = array<i64: 128, 576>}, {pipeline_mode = #tpu.pipeline_mode<synchronous>, transform_indices = @transform_1, window_bounds = array<i64: 576, 64>}, {pipeline_mode = #tpu.pipeline_mode<synchronous>, transform_indices = @transform_2, window_bounds = array<i64: 1, 64>}, {pipeline_mode = #tpu.pipeline_mode<synchronous>, transform_indices = @transform_3, window_bounds = array<i64: 1, 64>}, {transform_indices = @transform_4, window_bounds = array<i64: 128, 64>}]} {
    %c0 = arith.constant 0 : index
    %c0_0 = arith.constant 0 : index
    %0 = vector.load %arg1[%c0, %c0_0] : memref<128x576xf32, #tpu.memory_space<vmem>>, vector<128x576xf32>
    %c0_1 = arith.constant 0 : index
    %c0_2 = arith.constant 0 : index
    %1 = vector.load %arg2[%c0_1, %c0_2] : memref<576x64xf32, #tpu.memory_space<vmem>>, vector<576x64xf32>
    %cst = arith.constant dense<0.000000e+00> : vector<128x64xf32>
    %2 = tpu.matmul %0, %1, %cst {dimension_numbers = #tpu.dot_dimension_numbers<[1], [0], [0], [1], [0, 0, 1, 1], [], []>} : vector<128x576xf32>, vector<576x64xf32>, vector<128x64xf32> -> vector<128x64xf32>
    %c0_3 = arith.constant 0 : index
    %c0_4 = arith.constant 0 : index
    %3 = vector.load %arg3[%c0_3, %c0_4] : memref<1x64xf32, #tpu.memory_space<vmem>>, vector<1x64xf32>
    %4 = vector.broadcast %3 : vector<1x64xf32> to vector<128x64xf32>
    %5 = arith.mulf %2, %4 : vector<128x64xf32>
    %c0_5 = arith.constant 0 : index
    %c0_6 = arith.constant 0 : index
    %6 = vector.load %arg4[%c0_5, %c0_6] : memref<1x64xf32, #tpu.memory_space<vmem>>, vector<1x64xf32>
    %7 = vector.broadcast %6 : vector<1x64xf32> to vector<128x64xf32>
    %8 = arith.addf %5, %7 : vector<128x64xf32>
    %cst_7 = arith.constant 0.000000e+00 : f32
    %9 = vector.broadcast %cst_7 : f32 to vector<128x64xf32>
    %10 = arith.maximumf %8, %9 : vector<128x64xf32>
    %c0_8 = arith.constant 0 : index
    %c0_9 = arith.constant 0 : index
    %11 = vector.load %arg5[%c0_8, %c0_9] : memref<128x64xf32, #tpu.memory_space<vmem>>, vector<128x64xf32>
    tpu.vector_store %arg5[%c0_8, %c0_9], %10 {strides = array<i32>} : memref<128x64xf32, #tpu.memory_space<vmem>>, vector<128x64xf32>,
    return
  }
  func.func @transform_0(%arg0: i32) -> (i32, i32) {
    %c0_i32 = arith.constant 0 : i32
    %c0_i32_0 = arith.constant 0 : i32
    return %arg0, %c0_i32 : i32, i32
  }
  func.func @transform_1(%arg0: i32) -> (i32, i32) {
    %c0_i32 = arith.constant 0 : i32
    %c0_i32_0 = arith.constant 0 : i32
    %c0_i32_1 = arith.constant 0 : i32
    return %c0_i32, %c0_i32_0 : i32, i32
  }
  func.func @transform_2(%arg0: i32) -> (i32, i32) {
    %c0_i32 = arith.constant 0 : i32
    %c0_i32_0 = arith.constant 0 : i32
    %c0_i32_1 = arith.constant 0 : i32
    return %c0_i32, %c0_i32_0 : i32, i32
  }
  func.func @transform_3(%arg0: i32) -> (i32, i32) {
    %c0_i32 = arith.constant 0 : i32
    %c0_i32_0 = arith.constant 0 : i32
    %c0_i32_1 = arith.constant 0 : i32
    return %c0_i32, %c0_i32_0 : i32, i32
  }
  func.func @transform_4(%arg0: i32) -> (i32, i32) {
    %c0_i32 = arith.constant 0 : i32
    %c0_i32_0 = arith.constant 0 : i32
    return %arg0, %c0_i32 : i32, i32
  }
}

module attributes {stable_mosaic.version = 11 : i64} {
  func.func @_gemm_bn_add_relu_kernel(%arg0: i32, %arg1: memref<128x576xf32, #tpu.memory_space<vmem>>, %arg2: memref<576x64xf32, #tpu.memory_space<vmem>>, %arg3: memref<1x64xf32, #tpu.memory_space<vmem>>, %arg4: memref<1x64xf32, #tpu.memory_space<vmem>>, %arg5: memref<128x64xf32, #tpu.memory_space<vmem>>, %arg6: memref<128x64xf32, #tpu.memory_space<vmem>>) attributes {dimension_semantics = [#tpu.dimension_semantics<parallel>], iteration_bounds = array<i64: 1>, scalar_prefetch = 0 : i64, scratch_operands = 0 : i64, tpu.core_type = #tpu.core_type<tc>, window_params = [{transform_indices = @transform_0, window_bounds = array<i64: 128, 576>}, {pipeline_mode = #tpu.pipeline_mode<synchronous>, transform_indices = @transform_1, window_bounds = array<i64: 576, 64>}, {pipeline_mode = #tpu.pipeline_mode<synchronous>, transform_indices = @transform_2, window_bounds = array<i64: 1, 64>}, {pipeline_mode = #tpu.pipeline_mode<synchronous>, transform_indices = @transform_3, window_bounds = array<i64: 1, 64>}, {transform_indices = @transform_4, window_bounds = array<i64: 128, 64>}, {transform_indices = @transform_5, window_bounds = array<i64: 128, 64>}]} {
    %c0 = arith.constant 0 : index
    %c0_0 = arith.constant 0 : index
    %0 = vector.load %arg1[%c0, %c0_0] : memref<128x576xf32, #tpu.memory_space<vmem>>, vector<128x576xf32>
    %c0_1 = arith.constant 0 : index
    %c0_2 = arith.constant 0 : index
    %1 = vector.load %arg2[%c0_1, %c0_2] : memref<576x64xf32, #tpu.memory_space<vmem>>, vector<576x64xf32>
    %cst = arith.constant dense<0.000000e+00> : vector<128x64xf32>
    %2 = tpu.matmul %0, %1, %cst {dimension_numbers = #tpu.dot_dimension_numbers<[1], [0], [0], [1], [0, 0, 1, 1], [], []>} : vector<128x576xf32>, vector<576x64xf32>, vector<128x64xf32> -> vector<128x64xf32>
    %c0_3 = arith.constant 0 : index
    %c0_4 = arith.constant 0 : index
    %3 = vector.load %arg3[%c0_3, %c0_4] : memref<1x64xf32, #tpu.memory_space<vmem>>, vector<1x64xf32>
    %4 = vector.broadcast %3 : vector<1x64xf32> to vector<128x64xf32>
    %5 = arith.mulf %2, %4 : vector<128x64xf32>
    %c0_5 = arith.constant 0 : index
    %c0_6 = arith.constant 0 : index
    %6 = vector.load %arg4[%c0_5, %c0_6] : memref<1x64xf32, #tpu.memory_space<vmem>>, vector<1x64xf32>
    %7 = vector.broadcast %6 : vector<1x64xf32> to vector<128x64xf32>
    %8 = arith.addf %5, %7 : vector<128x64xf32>
    %c0_7 = arith.constant 0 : index
    %c0_8 = arith.constant 0 : index
    %9 = vector.load %arg5[%c0_7, %c0_8] : memref<128x64xf32, #tpu.memory_space<vmem>>, vector<128x64xf32>
    %10 = arith.addf %8, %9 : vector<128x64xf32>
    %cst_9 = arith.constant 0.000000e+00 : f32
    %11 = vector.broadcast %cst_9 : f32 to vector<128x64xf32>
    %12 = arith.maximumf %10, %11 : vector<128x64xf32>
    %c0_10 = arith.constant 0 : index
    %c0_11 = arith.constant 0 : index
    %13 = vector.load %arg6[%c0_10, %c0_11] : memref<128x64xf32, #tpu.memory_space<vmem>>, vector<128x64xf32>
    tpu.vector_store %arg6[%c0_10, %c0_11], %12 {strides = array<i32>} : memref<128x64xf32, #tpu.memory_space<vmem>>, vector<128x64xf32>,
    return
  }
  func.func @transform_0(%arg0: i32) -> (i32, i32) {
    %c0_i32 = arith.constant 0 : i32
    %c0_i32_0 = arith.constant 0 : i32
    return %arg0, %c0_i32 : i32, i32
  }
  func.func @transform_1(%arg0: i32) -> (i32, i32) {
    %c0_i32 = arith.constant 0 : i32
    %c0_i32_0 = arith.constant 0 : i32
    %c0_i32_1 = arith.constant 0 : i32
    return %c0_i32, %c0_i32_0 : i32, i32
  }
  func.func @transform_2(%arg0: i32) -> (i32, i32) {
    %c0_i32 = arith.constant 0 : i32
    %c0_i32_0 = arith.constant 0 : i32
    %c0_i32_1 = arith.constant 0 : i32
    return %c0_i32, %c0_i32_0 : i32, i32
  }
  func.func @transform_3(%arg0: i32) -> (i32, i32) {
    %c0_i32 = arith.constant 0 : i32
    %c0_i32_0 = arith.constant 0 : i32
    %c0_i32_1 = arith.constant 0 : i32
    return %c0_i32, %c0_i32_0 : i32, i32
  }
  func.func @transform_4(%arg0: i32) -> (i32, i32) {
    %c0_i32 = arith.constant 0 : i32
    %c0_i32_0 = arith.constant 0 : i32
    return %arg0, %c0_i32 : i32, i32
  }
  func.func @transform_5(%arg0: i32) -> (i32, i32) {
    %c0_i32 = arith.constant 0 : i32
    %c0_i32_0 = arith.constant 0 : i32
    return %arg0, %c0_i32 : i32, i32
  }
}

module attributes {stable_mosaic.version = 11 : i64} {
  func.func @_gemm_bn_act_kernel(%arg0: i32, %arg1: memref<32x576xf32, #tpu.memory_space<vmem>>, %arg2: memref<576x128xf32, #tpu.memory_space<vmem>>, %arg3: memref<1x128xf32, #tpu.memory_space<vmem>>, %arg4: memref<1x128xf32, #tpu.memory_space<vmem>>, %arg5: memref<32x128xf32, #tpu.memory_space<vmem>>) attributes {dimension_semantics = [#tpu.dimension_semantics<parallel>], iteration_bounds = array<i64: 1>, scalar_prefetch = 0 : i64, scratch_operands = 0 : i64, tpu.core_type = #tpu.core_type<tc>, window_params = [{transform_indices = @transform_0, window_bounds = array<i64: 32, 576>}, {pipeline_mode = #tpu.pipeline_mode<synchronous>, transform_indices = @transform_1, window_bounds = array<i64: 576, 128>}, {pipeline_mode = #tpu.pipeline_mode<synchronous>, transform_indices = @transform_2, window_bounds = array<i64: 1, 128>}, {pipeline_mode = #tpu.pipeline_mode<synchronous>, transform_indices = @transform_3, window_bounds = array<i64: 1, 128>}, {transform_indices = @transform_4, window_bounds = array<i64: 32, 128>}]} {
    %c0 = arith.constant 0 : index
    %c0_0 = arith.constant 0 : index
    %0 = vector.load %arg1[%c0, %c0_0] : memref<32x576xf32, #tpu.memory_space<vmem>>, vector<32x576xf32>
    %c0_1 = arith.constant 0 : index
    %c0_2 = arith.constant 0 : index
    %1 = vector.load %arg2[%c0_1, %c0_2] : memref<576x128xf32, #tpu.memory_space<vmem>>, vector<576x128xf32>
    %cst = arith.constant dense<0.000000e+00> : vector<32x128xf32>
    %2 = tpu.matmul %0, %1, %cst {dimension_numbers = #tpu.dot_dimension_numbers<[1], [0], [0], [1], [0, 0, 1, 1], [], []>} : vector<32x576xf32>, vector<576x128xf32>, vector<32x128xf32> -> vector<32x128xf32>
    %c0_3 = arith.constant 0 : index
    %c0_4 = arith.constant 0 : index
    %3 = vector.load %arg3[%c0_3, %c0_4] : memref<1x128xf32, #tpu.memory_space<vmem>>, vector<1x128xf32>
    %4 = vector.broadcast %3 : vector<1x128xf32> to vector<32x128xf32>
    %5 = arith.mulf %2, %4 : vector<32x128xf32>
    %c0_5 = arith.constant 0 : index
    %c0_6 = arith.constant 0 : index
    %6 = vector.load %arg4[%c0_5, %c0_6] : memref<1x128xf32, #tpu.memory_space<vmem>>, vector<1x128xf32>
    %7 = vector.broadcast %6 : vector<1x128xf32> to vector<32x128xf32>
    %8 = arith.addf %5, %7 : vector<32x128xf32>
    %cst_7 = arith.constant 0.000000e+00 : f32
    %9 = vector.broadcast %cst_7 : f32 to vector<32x128xf32>
    %10 = arith.maximumf %8, %9 : vector<32x128xf32>
    %c0_8 = arith.constant 0 : index
    %c0_9 = arith.constant 0 : index
    %11 = vector.load %arg5[%c0_8, %c0_9] : memref<32x128xf32, #tpu.memory_space<vmem>>, vector<32x128xf32>
    tpu.vector_store %arg5[%c0_8, %c0_9], %10 {strides = array<i32>} : memref<32x128xf32, #tpu.memory_space<vmem>>, vector<32x128xf32>,
    return
  }
  func.func @transform_0(%arg0: i32) -> (i32, i32) {
    %c0_i32 = arith.constant 0 : i32
    %c0_i32_0 = arith.constant 0 : i32
    return %arg0, %c0_i32 : i32, i32
  }
  func.func @transform_1(%arg0: i32) -> (i32, i32) {
    %c0_i32 = arith.constant 0 : i32
    %c0_i32_0 = arith.constant 0 : i32
    %c0_i32_1 = arith.constant 0 : i32
    return %c0_i32, %c0_i32_0 : i32, i32
  }
  func.func @transform_2(%arg0: i32) -> (i32, i32) {
    %c0_i32 = arith.constant 0 : i32
    %c0_i32_0 = arith.constant 0 : i32
    %c0_i32_1 = arith.constant 0 : i32
    return %c0_i32, %c0_i32_0 : i32, i32
  }
  func.func @transform_3(%arg0: i32) -> (i32, i32) {
    %c0_i32 = arith.constant 0 : i32
    %c0_i32_0 = arith.constant 0 : i32
    %c0_i32_1 = arith.constant 0 : i32
    return %c0_i32, %c0_i32_0 : i32, i32
  }
  func.func @transform_4(%arg0: i32) -> (i32, i32) {
    %c0_i32 = arith.constant 0 : i32
    %c0_i32_0 = arith.constant 0 : i32
    return %arg0, %c0_i32 : i32, i32
  }
}

module attributes {stable_mosaic.version = 11 : i64} {
  func.func @_gemm_bn_act_kernel(%arg0: i32, %arg1: memref<32x64xf32, #tpu.memory_space<vmem>>, %arg2: memref<64x128xf32, #tpu.memory_space<vmem>>, %arg3: memref<1x128xf32, #tpu.memory_space<vmem>>, %arg4: memref<1x128xf32, #tpu.memory_space<vmem>>, %arg5: memref<32x128xf32, #tpu.memory_space<vmem>>) attributes {dimension_semantics = [#tpu.dimension_semantics<parallel>], iteration_bounds = array<i64: 1>, scalar_prefetch = 0 : i64, scratch_operands = 0 : i64, tpu.core_type = #tpu.core_type<tc>, window_params = [{transform_indices = @transform_0, window_bounds = array<i64: 32, 64>}, {pipeline_mode = #tpu.pipeline_mode<synchronous>, transform_indices = @transform_1, window_bounds = array<i64: 64, 128>}, {pipeline_mode = #tpu.pipeline_mode<synchronous>, transform_indices = @transform_2, window_bounds = array<i64: 1, 128>}, {pipeline_mode = #tpu.pipeline_mode<synchronous>, transform_indices = @transform_3, window_bounds = array<i64: 1, 128>}, {transform_indices = @transform_4, window_bounds = array<i64: 32, 128>}]} {
    %c0 = arith.constant 0 : index
    %c0_0 = arith.constant 0 : index
    %0 = vector.load %arg1[%c0, %c0_0] : memref<32x64xf32, #tpu.memory_space<vmem>>, vector<32x64xf32>
    %c0_1 = arith.constant 0 : index
    %c0_2 = arith.constant 0 : index
    %1 = vector.load %arg2[%c0_1, %c0_2] : memref<64x128xf32, #tpu.memory_space<vmem>>, vector<64x128xf32>
    %cst = arith.constant dense<0.000000e+00> : vector<32x128xf32>
    %2 = tpu.matmul %0, %1, %cst {dimension_numbers = #tpu.dot_dimension_numbers<[1], [0], [0], [1], [0, 0, 1, 1], [], []>} : vector<32x64xf32>, vector<64x128xf32>, vector<32x128xf32> -> vector<32x128xf32>
    %c0_3 = arith.constant 0 : index
    %c0_4 = arith.constant 0 : index
    %3 = vector.load %arg3[%c0_3, %c0_4] : memref<1x128xf32, #tpu.memory_space<vmem>>, vector<1x128xf32>
    %4 = vector.broadcast %3 : vector<1x128xf32> to vector<32x128xf32>
    %5 = arith.mulf %2, %4 : vector<32x128xf32>
    %c0_5 = arith.constant 0 : index
    %c0_6 = arith.constant 0 : index
    %6 = vector.load %arg4[%c0_5, %c0_6] : memref<1x128xf32, #tpu.memory_space<vmem>>, vector<1x128xf32>
    %7 = vector.broadcast %6 : vector<1x128xf32> to vector<32x128xf32>
    %8 = arith.addf %5, %7 : vector<32x128xf32>
    %c0_7 = arith.constant 0 : index
    %c0_8 = arith.constant 0 : index
    %9 = vector.load %arg5[%c0_7, %c0_8] : memref<32x128xf32, #tpu.memory_space<vmem>>, vector<32x128xf32>
    tpu.vector_store %arg5[%c0_7, %c0_8], %8 {strides = array<i32>} : memref<32x128xf32, #tpu.memory_space<vmem>>, vector<32x128xf32>,
    return
  }
  func.func @transform_0(%arg0: i32) -> (i32, i32) {
    %c0_i32 = arith.constant 0 : i32
    %c0_i32_0 = arith.constant 0 : i32
    return %arg0, %c0_i32 : i32, i32
  }
  func.func @transform_1(%arg0: i32) -> (i32, i32) {
    %c0_i32 = arith.constant 0 : i32
    %c0_i32_0 = arith.constant 0 : i32
    %c0_i32_1 = arith.constant 0 : i32
    return %c0_i32, %c0_i32_0 : i32, i32
  }
  func.func @transform_2(%arg0: i32) -> (i32, i32) {
    %c0_i32 = arith.constant 0 : i32
    %c0_i32_0 = arith.constant 0 : i32
    %c0_i32_1 = arith.constant 0 : i32
    return %c0_i32, %c0_i32_0 : i32, i32
  }
  func.func @transform_3(%arg0: i32) -> (i32, i32) {
    %c0_i32 = arith.constant 0 : i32
    %c0_i32_0 = arith.constant 0 : i32
    %c0_i32_1 = arith.constant 0 : i32
    return %c0_i32, %c0_i32_0 : i32, i32
  }
  func.func @transform_4(%arg0: i32) -> (i32, i32) {
    %c0_i32 = arith.constant 0 : i32
    %c0_i32_0 = arith.constant 0 : i32
    return %arg0, %c0_i32 : i32, i32
  }
}

module attributes {stable_mosaic.version = 11 : i64} {
  func.func @_gemm_bn_add_relu_kernel(%arg0: i32, %arg1: memref<32x1152xf32, #tpu.memory_space<vmem>>, %arg2: memref<1152x128xf32, #tpu.memory_space<vmem>>, %arg3: memref<1x128xf32, #tpu.memory_space<vmem>>, %arg4: memref<1x128xf32, #tpu.memory_space<vmem>>, %arg5: memref<32x128xf32, #tpu.memory_space<vmem>>, %arg6: memref<32x128xf32, #tpu.memory_space<vmem>>) attributes {dimension_semantics = [#tpu.dimension_semantics<parallel>], iteration_bounds = array<i64: 1>, scalar_prefetch = 0 : i64, scratch_operands = 0 : i64, tpu.core_type = #tpu.core_type<tc>, window_params = [{transform_indices = @transform_0, window_bounds = array<i64: 32, 1152>}, {pipeline_mode = #tpu.pipeline_mode<synchronous>, transform_indices = @transform_1, window_bounds = array<i64: 1152, 128>}, {pipeline_mode = #tpu.pipeline_mode<synchronous>, transform_indices = @transform_2, window_bounds = array<i64: 1, 128>}, {pipeline_mode = #tpu.pipeline_mode<synchronous>, transform_indices = @transform_3, window_bounds = array<i64: 1, 128>}, {transform_indices = @transform_4, window_bounds = array<i64: 32, 128>}, {transform_indices = @transform_5, window_bounds = array<i64: 32, 128>}]} {
    %c0 = arith.constant 0 : index
    %c0_0 = arith.constant 0 : index
    %0 = vector.load %arg1[%c0, %c0_0] : memref<32x1152xf32, #tpu.memory_space<vmem>>, vector<32x1152xf32>
    %c0_1 = arith.constant 0 : index
    %c0_2 = arith.constant 0 : index
    %1 = vector.load %arg2[%c0_1, %c0_2] : memref<1152x128xf32, #tpu.memory_space<vmem>>, vector<1152x128xf32>
    %cst = arith.constant dense<0.000000e+00> : vector<32x128xf32>
    %2 = tpu.matmul %0, %1, %cst {dimension_numbers = #tpu.dot_dimension_numbers<[1], [0], [0], [1], [0, 0, 1, 1], [], []>} : vector<32x1152xf32>, vector<1152x128xf32>, vector<32x128xf32> -> vector<32x128xf32>
    %c0_3 = arith.constant 0 : index
    %c0_4 = arith.constant 0 : index
    %3 = vector.load %arg3[%c0_3, %c0_4] : memref<1x128xf32, #tpu.memory_space<vmem>>, vector<1x128xf32>
    %4 = vector.broadcast %3 : vector<1x128xf32> to vector<32x128xf32>
    %5 = arith.mulf %2, %4 : vector<32x128xf32>
    %c0_5 = arith.constant 0 : index
    %c0_6 = arith.constant 0 : index
    %6 = vector.load %arg4[%c0_5, %c0_6] : memref<1x128xf32, #tpu.memory_space<vmem>>, vector<1x128xf32>
    %7 = vector.broadcast %6 : vector<1x128xf32> to vector<32x128xf32>
    %8 = arith.addf %5, %7 : vector<32x128xf32>
    %c0_7 = arith.constant 0 : index
    %c0_8 = arith.constant 0 : index
    %9 = vector.load %arg5[%c0_7, %c0_8] : memref<32x128xf32, #tpu.memory_space<vmem>>, vector<32x128xf32>
    %10 = arith.addf %8, %9 : vector<32x128xf32>
    %cst_9 = arith.constant 0.000000e+00 : f32
    %11 = vector.broadcast %cst_9 : f32 to vector<32x128xf32>
    %12 = arith.maximumf %10, %11 : vector<32x128xf32>
    %c0_10 = arith.constant 0 : index
    %c0_11 = arith.constant 0 : index
    %13 = vector.load %arg6[%c0_10, %c0_11] : memref<32x128xf32, #tpu.memory_space<vmem>>, vector<32x128xf32>
    tpu.vector_store %arg6[%c0_10, %c0_11], %12 {strides = array<i32>} : memref<32x128xf32, #tpu.memory_space<vmem>>, vector<32x128xf32>,
    return
  }
  func.func @transform_0(%arg0: i32) -> (i32, i32) {
    %c0_i32 = arith.constant 0 : i32
    %c0_i32_0 = arith.constant 0 : i32
    return %arg0, %c0_i32 : i32, i32
  }
  func.func @transform_1(%arg0: i32) -> (i32, i32) {
    %c0_i32 = arith.constant 0 : i32
    %c0_i32_0 = arith.constant 0 : i32
    %c0_i32_1 = arith.constant 0 : i32
    return %c0_i32, %c0_i32_0 : i32, i32
  }
  func.func @transform_2(%arg0: i32) -> (i32, i32) {
    %c0_i32 = arith.constant 0 : i32
    %c0_i32_0 = arith.constant 0 : i32
    %c0_i32_1 = arith.constant 0 : i32
    return %c0_i32, %c0_i32_0 : i32, i32
  }
  func.func @transform_3(%arg0: i32) -> (i32, i32) {
    %c0_i32 = arith.constant 0 : i32
    %c0_i32_0 = arith.constant 0 : i32
    %c0_i32_1 = arith.constant 0 : i32
    return %c0_i32, %c0_i32_0 : i32, i32
  }
  func.func @transform_4(%arg0: i32) -> (i32, i32) {
    %c0_i32 = arith.constant 0 : i32
    %c0_i32_0 = arith.constant 0 : i32
    return %arg0, %c0_i32 : i32, i32
  }
  func.func @transform_5(%arg0: i32) -> (i32, i32) {
    %c0_i32 = arith.constant 0 : i32
    %c0_i32_0 = arith.constant 0 : i32
    return %arg0, %c0_i32 : i32, i32
  }
}

module attributes {stable_mosaic.version = 11 : i64} {
  func.func @_gemm_bn_act_kernel(%arg0: i32, %arg1: memref<32x1152xf32, #tpu.memory_space<vmem>>, %arg2: memref<1152x128xf32, #tpu.memory_space<vmem>>, %arg3: memref<1x128xf32, #tpu.memory_space<vmem>>, %arg4: memref<1x128xf32, #tpu.memory_space<vmem>>, %arg5: memref<32x128xf32, #tpu.memory_space<vmem>>) attributes {dimension_semantics = [#tpu.dimension_semantics<parallel>], iteration_bounds = array<i64: 1>, scalar_prefetch = 0 : i64, scratch_operands = 0 : i64, tpu.core_type = #tpu.core_type<tc>, window_params = [{transform_indices = @transform_0, window_bounds = array<i64: 32, 1152>}, {pipeline_mode = #tpu.pipeline_mode<synchronous>, transform_indices = @transform_1, window_bounds = array<i64: 1152, 128>}, {pipeline_mode = #tpu.pipeline_mode<synchronous>, transform_indices = @transform_2, window_bounds = array<i64: 1, 128>}, {pipeline_mode = #tpu.pipeline_mode<synchronous>, transform_indices = @transform_3, window_bounds = array<i64: 1, 128>}, {transform_indices = @transform_4, window_bounds = array<i64: 32, 128>}]} {
    %c0 = arith.constant 0 : index
    %c0_0 = arith.constant 0 : index
    %0 = vector.load %arg1[%c0, %c0_0] : memref<32x1152xf32, #tpu.memory_space<vmem>>, vector<32x1152xf32>
    %c0_1 = arith.constant 0 : index
    %c0_2 = arith.constant 0 : index
    %1 = vector.load %arg2[%c0_1, %c0_2] : memref<1152x128xf32, #tpu.memory_space<vmem>>, vector<1152x128xf32>
    %cst = arith.constant dense<0.000000e+00> : vector<32x128xf32>
    %2 = tpu.matmul %0, %1, %cst {dimension_numbers = #tpu.dot_dimension_numbers<[1], [0], [0], [1], [0, 0, 1, 1], [], []>} : vector<32x1152xf32>, vector<1152x128xf32>, vector<32x128xf32> -> vector<32x128xf32>
    %c0_3 = arith.constant 0 : index
    %c0_4 = arith.constant 0 : index
    %3 = vector.load %arg3[%c0_3, %c0_4] : memref<1x128xf32, #tpu.memory_space<vmem>>, vector<1x128xf32>
    %4 = vector.broadcast %3 : vector<1x128xf32> to vector<32x128xf32>
    %5 = arith.mulf %2, %4 : vector<32x128xf32>
    %c0_5 = arith.constant 0 : index
    %c0_6 = arith.constant 0 : index
    %6 = vector.load %arg4[%c0_5, %c0_6] : memref<1x128xf32, #tpu.memory_space<vmem>>, vector<1x128xf32>
    %7 = vector.broadcast %6 : vector<1x128xf32> to vector<32x128xf32>
    %8 = arith.addf %5, %7 : vector<32x128xf32>
    %cst_7 = arith.constant 0.000000e+00 : f32
    %9 = vector.broadcast %cst_7 : f32 to vector<32x128xf32>
    %10 = arith.maximumf %8, %9 : vector<32x128xf32>
    %c0_8 = arith.constant 0 : index
    %c0_9 = arith.constant 0 : index
    %11 = vector.load %arg5[%c0_8, %c0_9] : memref<32x128xf32, #tpu.memory_space<vmem>>, vector<32x128xf32>
    tpu.vector_store %arg5[%c0_8, %c0_9], %10 {strides = array<i32>} : memref<32x128xf32, #tpu.memory_space<vmem>>, vector<32x128xf32>,
    return
  }
  func.func @transform_0(%arg0: i32) -> (i32, i32) {
    %c0_i32 = arith.constant 0 : i32
    %c0_i32_0 = arith.constant 0 : i32
    return %arg0, %c0_i32 : i32, i32
  }
  func.func @transform_1(%arg0: i32) -> (i32, i32) {
    %c0_i32 = arith.constant 0 : i32
    %c0_i32_0 = arith.constant 0 : i32
    %c0_i32_1 = arith.constant 0 : i32
    return %c0_i32, %c0_i32_0 : i32, i32
  }
  func.func @transform_2(%arg0: i32) -> (i32, i32) {
    %c0_i32 = arith.constant 0 : i32
    %c0_i32_0 = arith.constant 0 : i32
    %c0_i32_1 = arith.constant 0 : i32
    return %c0_i32, %c0_i32_0 : i32, i32
  }
  func.func @transform_3(%arg0: i32) -> (i32, i32) {
    %c0_i32 = arith.constant 0 : i32
    %c0_i32_0 = arith.constant 0 : i32
    %c0_i32_1 = arith.constant 0 : i32
    return %c0_i32, %c0_i32_0 : i32, i32
  }
  func.func @transform_4(%arg0: i32) -> (i32, i32) {
    %c0_i32 = arith.constant 0 : i32
    %c0_i32_0 = arith.constant 0 : i32
    return %arg0, %c0_i32 : i32, i32
  }
}

module attributes {stable_mosaic.version = 11 : i64} {
  func.func @_gemm_bn_act_kernel(%arg0: i32, %arg1: memref<8x1152xf32, #tpu.memory_space<vmem>>, %arg2: memref<1152x256xf32, #tpu.memory_space<vmem>>, %arg3: memref<1x256xf32, #tpu.memory_space<vmem>>, %arg4: memref<1x256xf32, #tpu.memory_space<vmem>>, %arg5: memref<8x256xf32, #tpu.memory_space<vmem>>) attributes {dimension_semantics = [#tpu.dimension_semantics<parallel>], iteration_bounds = array<i64: 1>, scalar_prefetch = 0 : i64, scratch_operands = 0 : i64, tpu.core_type = #tpu.core_type<tc>, window_params = [{transform_indices = @transform_0, window_bounds = array<i64: 8, 1152>}, {pipeline_mode = #tpu.pipeline_mode<synchronous>, transform_indices = @transform_1, window_bounds = array<i64: 1152, 256>}, {pipeline_mode = #tpu.pipeline_mode<synchronous>, transform_indices = @transform_2, window_bounds = array<i64: 1, 256>}, {pipeline_mode = #tpu.pipeline_mode<synchronous>, transform_indices = @transform_3, window_bounds = array<i64: 1, 256>}, {transform_indices = @transform_4, window_bounds = array<i64: 8, 256>}]} {
    %c0 = arith.constant 0 : index
    %c0_0 = arith.constant 0 : index
    %0 = vector.load %arg1[%c0, %c0_0] : memref<8x1152xf32, #tpu.memory_space<vmem>>, vector<8x1152xf32>
    %c0_1 = arith.constant 0 : index
    %c0_2 = arith.constant 0 : index
    %1 = vector.load %arg2[%c0_1, %c0_2] : memref<1152x256xf32, #tpu.memory_space<vmem>>, vector<1152x256xf32>
    %cst = arith.constant dense<0.000000e+00> : vector<8x256xf32>
    %2 = tpu.matmul %0, %1, %cst {dimension_numbers = #tpu.dot_dimension_numbers<[1], [0], [0], [1], [0, 0, 1, 1], [], []>} : vector<8x1152xf32>, vector<1152x256xf32>, vector<8x256xf32> -> vector<8x256xf32>
    %c0_3 = arith.constant 0 : index
    %c0_4 = arith.constant 0 : index
    %3 = vector.load %arg3[%c0_3, %c0_4] : memref<1x256xf32, #tpu.memory_space<vmem>>, vector<1x256xf32>
    %4 = vector.broadcast %3 : vector<1x256xf32> to vector<8x256xf32>
    %5 = arith.mulf %2, %4 : vector<8x256xf32>
    %c0_5 = arith.constant 0 : index
    %c0_6 = arith.constant 0 : index
    %6 = vector.load %arg4[%c0_5, %c0_6] : memref<1x256xf32, #tpu.memory_space<vmem>>, vector<1x256xf32>
    %7 = vector.broadcast %6 : vector<1x256xf32> to vector<8x256xf32>
    %8 = arith.addf %5, %7 : vector<8x256xf32>
    %cst_7 = arith.constant 0.000000e+00 : f32
    %9 = vector.broadcast %cst_7 : f32 to vector<8x256xf32>
    %10 = arith.maximumf %8, %9 : vector<8x256xf32>
    %c0_8 = arith.constant 0 : index
    %c0_9 = arith.constant 0 : index
    %11 = vector.load %arg5[%c0_8, %c0_9] : memref<8x256xf32, #tpu.memory_space<vmem>>, vector<8x256xf32>
    tpu.vector_store %arg5[%c0_8, %c0_9], %10 {strides = array<i32>} : memref<8x256xf32, #tpu.memory_space<vmem>>, vector<8x256xf32>,
    return
  }
  func.func @transform_0(%arg0: i32) -> (i32, i32) {
    %c0_i32 = arith.constant 0 : i32
    %c0_i32_0 = arith.constant 0 : i32
    return %arg0, %c0_i32 : i32, i32
  }
  func.func @transform_1(%arg0: i32) -> (i32, i32) {
    %c0_i32 = arith.constant 0 : i32
    %c0_i32_0 = arith.constant 0 : i32
    %c0_i32_1 = arith.constant 0 : i32
    return %c0_i32, %c0_i32_0 : i32, i32
  }
  func.func @transform_2(%arg0: i32) -> (i32, i32) {
    %c0_i32 = arith.constant 0 : i32
    %c0_i32_0 = arith.constant 0 : i32
    %c0_i32_1 = arith.constant 0 : i32
    return %c0_i32, %c0_i32_0 : i32, i32
  }
  func.func @transform_3(%arg0: i32) -> (i32, i32) {
    %c0_i32 = arith.constant 0 : i32
    %c0_i32_0 = arith.constant 0 : i32
    %c0_i32_1 = arith.constant 0 : i32
    return %c0_i32, %c0_i32_0 : i32, i32
  }
  func.func @transform_4(%arg0: i32) -> (i32, i32) {
    %c0_i32 = arith.constant 0 : i32
    %c0_i32_0 = arith.constant 0 : i32
    return %arg0, %c0_i32 : i32, i32
  }
}

module attributes {stable_mosaic.version = 11 : i64} {
  func.func @_gemm_bn_act_kernel(%arg0: i32, %arg1: memref<8x128xf32, #tpu.memory_space<vmem>>, %arg2: memref<128x256xf32, #tpu.memory_space<vmem>>, %arg3: memref<1x256xf32, #tpu.memory_space<vmem>>, %arg4: memref<1x256xf32, #tpu.memory_space<vmem>>, %arg5: memref<8x256xf32, #tpu.memory_space<vmem>>) attributes {dimension_semantics = [#tpu.dimension_semantics<parallel>], iteration_bounds = array<i64: 1>, scalar_prefetch = 0 : i64, scratch_operands = 0 : i64, tpu.core_type = #tpu.core_type<tc>, window_params = [{transform_indices = @transform_0, window_bounds = array<i64: 8, 128>}, {pipeline_mode = #tpu.pipeline_mode<synchronous>, transform_indices = @transform_1, window_bounds = array<i64: 128, 256>}, {pipeline_mode = #tpu.pipeline_mode<synchronous>, transform_indices = @transform_2, window_bounds = array<i64: 1, 256>}, {pipeline_mode = #tpu.pipeline_mode<synchronous>, transform_indices = @transform_3, window_bounds = array<i64: 1, 256>}, {transform_indices = @transform_4, window_bounds = array<i64: 8, 256>}]} {
    %c0 = arith.constant 0 : index
    %c0_0 = arith.constant 0 : index
    %0 = vector.load %arg1[%c0, %c0_0] : memref<8x128xf32, #tpu.memory_space<vmem>>, vector<8x128xf32>
    %c0_1 = arith.constant 0 : index
    %c0_2 = arith.constant 0 : index
    %1 = vector.load %arg2[%c0_1, %c0_2] : memref<128x256xf32, #tpu.memory_space<vmem>>, vector<128x256xf32>
    %cst = arith.constant dense<0.000000e+00> : vector<8x256xf32>
    %2 = tpu.matmul %0, %1, %cst {dimension_numbers = #tpu.dot_dimension_numbers<[1], [0], [0], [1], [0, 0, 1, 1], [], []>} : vector<8x128xf32>, vector<128x256xf32>, vector<8x256xf32> -> vector<8x256xf32>
    %c0_3 = arith.constant 0 : index
    %c0_4 = arith.constant 0 : index
    %3 = vector.load %arg3[%c0_3, %c0_4] : memref<1x256xf32, #tpu.memory_space<vmem>>, vector<1x256xf32>
    %4 = vector.broadcast %3 : vector<1x256xf32> to vector<8x256xf32>
    %5 = arith.mulf %2, %4 : vector<8x256xf32>
    %c0_5 = arith.constant 0 : index
    %c0_6 = arith.constant 0 : index
    %6 = vector.load %arg4[%c0_5, %c0_6] : memref<1x256xf32, #tpu.memory_space<vmem>>, vector<1x256xf32>
    %7 = vector.broadcast %6 : vector<1x256xf32> to vector<8x256xf32>
    %8 = arith.addf %5, %7 : vector<8x256xf32>
    %c0_7 = arith.constant 0 : index
    %c0_8 = arith.constant 0 : index
    %9 = vector.load %arg5[%c0_7, %c0_8] : memref<8x256xf32, #tpu.memory_space<vmem>>, vector<8x256xf32>
    tpu.vector_store %arg5[%c0_7, %c0_8], %8 {strides = array<i32>} : memref<8x256xf32, #tpu.memory_space<vmem>>, vector<8x256xf32>,
    return
  }
  func.func @transform_0(%arg0: i32) -> (i32, i32) {
    %c0_i32 = arith.constant 0 : i32
    %c0_i32_0 = arith.constant 0 : i32
    return %arg0, %c0_i32 : i32, i32
  }
  func.func @transform_1(%arg0: i32) -> (i32, i32) {
    %c0_i32 = arith.constant 0 : i32
    %c0_i32_0 = arith.constant 0 : i32
    %c0_i32_1 = arith.constant 0 : i32
    return %c0_i32, %c0_i32_0 : i32, i32
  }
  func.func @transform_2(%arg0: i32) -> (i32, i32) {
    %c0_i32 = arith.constant 0 : i32
    %c0_i32_0 = arith.constant 0 : i32
    %c0_i32_1 = arith.constant 0 : i32
    return %c0_i32, %c0_i32_0 : i32, i32
  }
  func.func @transform_3(%arg0: i32) -> (i32, i32) {
    %c0_i32 = arith.constant 0 : i32
    %c0_i32_0 = arith.constant 0 : i32
    %c0_i32_1 = arith.constant 0 : i32
    return %c0_i32, %c0_i32_0 : i32, i32
  }
  func.func @transform_4(%arg0: i32) -> (i32, i32) {
    %c0_i32 = arith.constant 0 : i32
    %c0_i32_0 = arith.constant 0 : i32
    return %arg0, %c0_i32 : i32, i32
  }
}

module attributes {stable_mosaic.version = 11 : i64} {
  func.func @_gemm_bn_add_relu_kernel(%arg0: i32, %arg1: memref<8x2304xf32, #tpu.memory_space<vmem>>, %arg2: memref<2304x256xf32, #tpu.memory_space<vmem>>, %arg3: memref<1x256xf32, #tpu.memory_space<vmem>>, %arg4: memref<1x256xf32, #tpu.memory_space<vmem>>, %arg5: memref<8x256xf32, #tpu.memory_space<vmem>>, %arg6: memref<8x256xf32, #tpu.memory_space<vmem>>) attributes {dimension_semantics = [#tpu.dimension_semantics<parallel>], iteration_bounds = array<i64: 1>, scalar_prefetch = 0 : i64, scratch_operands = 0 : i64, tpu.core_type = #tpu.core_type<tc>, window_params = [{transform_indices = @transform_0, window_bounds = array<i64: 8, 2304>}, {pipeline_mode = #tpu.pipeline_mode<synchronous>, transform_indices = @transform_1, window_bounds = array<i64: 2304, 256>}, {pipeline_mode = #tpu.pipeline_mode<synchronous>, transform_indices = @transform_2, window_bounds = array<i64: 1, 256>}, {pipeline_mode = #tpu.pipeline_mode<synchronous>, transform_indices = @transform_3, window_bounds = array<i64: 1, 256>}, {transform_indices = @transform_4, window_bounds = array<i64: 8, 256>}, {transform_indices = @transform_5, window_bounds = array<i64: 8, 256>}]} {
    %c0 = arith.constant 0 : index
    %c0_0 = arith.constant 0 : index
    %0 = vector.load %arg1[%c0, %c0_0] : memref<8x2304xf32, #tpu.memory_space<vmem>>, vector<8x2304xf32>
    %c0_1 = arith.constant 0 : index
    %c0_2 = arith.constant 0 : index
    %1 = vector.load %arg2[%c0_1, %c0_2] : memref<2304x256xf32, #tpu.memory_space<vmem>>, vector<2304x256xf32>
    %cst = arith.constant dense<0.000000e+00> : vector<8x256xf32>
    %2 = tpu.matmul %0, %1, %cst {dimension_numbers = #tpu.dot_dimension_numbers<[1], [0], [0], [1], [0, 0, 1, 1], [], []>} : vector<8x2304xf32>, vector<2304x256xf32>, vector<8x256xf32> -> vector<8x256xf32>
    %c0_3 = arith.constant 0 : index
    %c0_4 = arith.constant 0 : index
    %3 = vector.load %arg3[%c0_3, %c0_4] : memref<1x256xf32, #tpu.memory_space<vmem>>, vector<1x256xf32>
    %4 = vector.broadcast %3 : vector<1x256xf32> to vector<8x256xf32>
    %5 = arith.mulf %2, %4 : vector<8x256xf32>
    %c0_5 = arith.constant 0 : index
    %c0_6 = arith.constant 0 : index
    %6 = vector.load %arg4[%c0_5, %c0_6] : memref<1x256xf32, #tpu.memory_space<vmem>>, vector<1x256xf32>
    %7 = vector.broadcast %6 : vector<1x256xf32> to vector<8x256xf32>
    %8 = arith.addf %5, %7 : vector<8x256xf32>
    %c0_7 = arith.constant 0 : index
    %c0_8 = arith.constant 0 : index
    %9 = vector.load %arg5[%c0_7, %c0_8] : memref<8x256xf32, #tpu.memory_space<vmem>>, vector<8x256xf32>
    %10 = arith.addf %8, %9 : vector<8x256xf32>
    %cst_9 = arith.constant 0.000000e+00 : f32
    %11 = vector.broadcast %cst_9 : f32 to vector<8x256xf32>
    %12 = arith.maximumf %10, %11 : vector<8x256xf32>
    %c0_10 = arith.constant 0 : index
    %c0_11 = arith.constant 0 : index
    %13 = vector.load %arg6[%c0_10, %c0_11] : memref<8x256xf32, #tpu.memory_space<vmem>>, vector<8x256xf32>
    tpu.vector_store %arg6[%c0_10, %c0_11], %12 {strides = array<i32>} : memref<8x256xf32, #tpu.memory_space<vmem>>, vector<8x256xf32>,
    return
  }
  func.func @transform_0(%arg0: i32) -> (i32, i32) {
    %c0_i32 = arith.constant 0 : i32
    %c0_i32_0 = arith.constant 0 : i32
    return %arg0, %c0_i32 : i32, i32
  }
  func.func @transform_1(%arg0: i32) -> (i32, i32) {
    %c0_i32 = arith.constant 0 : i32
    %c0_i32_0 = arith.constant 0 : i32
    %c0_i32_1 = arith.constant 0 : i32
    return %c0_i32, %c0_i32_0 : i32, i32
  }
  func.func @transform_2(%arg0: i32) -> (i32, i32) {
    %c0_i32 = arith.constant 0 : i32
    %c0_i32_0 = arith.constant 0 : i32
    %c0_i32_1 = arith.constant 0 : i32
    return %c0_i32, %c0_i32_0 : i32, i32
  }
  func.func @transform_3(%arg0: i32) -> (i32, i32) {
    %c0_i32 = arith.constant 0 : i32
    %c0_i32_0 = arith.constant 0 : i32
    %c0_i32_1 = arith.constant 0 : i32
    return %c0_i32, %c0_i32_0 : i32, i32
  }
  func.func @transform_4(%arg0: i32) -> (i32, i32) {
    %c0_i32 = arith.constant 0 : i32
    %c0_i32_0 = arith.constant 0 : i32
    return %arg0, %c0_i32 : i32, i32
  }
  func.func @transform_5(%arg0: i32) -> (i32, i32) {
    %c0_i32 = arith.constant 0 : i32
    %c0_i32_0 = arith.constant 0 : i32
    return %arg0, %c0_i32 : i32, i32
  }
}

module attributes {stable_mosaic.version = 11 : i64} {
  func.func @_gemm_bn_act_kernel(%arg0: i32, %arg1: memref<8x2304xf32, #tpu.memory_space<vmem>>, %arg2: memref<2304x256xf32, #tpu.memory_space<vmem>>, %arg3: memref<1x256xf32, #tpu.memory_space<vmem>>, %arg4: memref<1x256xf32, #tpu.memory_space<vmem>>, %arg5: memref<8x256xf32, #tpu.memory_space<vmem>>) attributes {dimension_semantics = [#tpu.dimension_semantics<parallel>], iteration_bounds = array<i64: 1>, scalar_prefetch = 0 : i64, scratch_operands = 0 : i64, tpu.core_type = #tpu.core_type<tc>, window_params = [{transform_indices = @transform_0, window_bounds = array<i64: 8, 2304>}, {pipeline_mode = #tpu.pipeline_mode<synchronous>, transform_indices = @transform_1, window_bounds = array<i64: 2304, 256>}, {pipeline_mode = #tpu.pipeline_mode<synchronous>, transform_indices = @transform_2, window_bounds = array<i64: 1, 256>}, {pipeline_mode = #tpu.pipeline_mode<synchronous>, transform_indices = @transform_3, window_bounds = array<i64: 1, 256>}, {transform_indices = @transform_4, window_bounds = array<i64: 8, 256>}]} {
    %c0 = arith.constant 0 : index
    %c0_0 = arith.constant 0 : index
    %0 = vector.load %arg1[%c0, %c0_0] : memref<8x2304xf32, #tpu.memory_space<vmem>>, vector<8x2304xf32>
    %c0_1 = arith.constant 0 : index
    %c0_2 = arith.constant 0 : index
    %1 = vector.load %arg2[%c0_1, %c0_2] : memref<2304x256xf32, #tpu.memory_space<vmem>>, vector<2304x256xf32>
    %cst = arith.constant dense<0.000000e+00> : vector<8x256xf32>
    %2 = tpu.matmul %0, %1, %cst {dimension_numbers = #tpu.dot_dimension_numbers<[1], [0], [0], [1], [0, 0, 1, 1], [], []>} : vector<8x2304xf32>, vector<2304x256xf32>, vector<8x256xf32> -> vector<8x256xf32>
    %c0_3 = arith.constant 0 : index
    %c0_4 = arith.constant 0 : index
    %3 = vector.load %arg3[%c0_3, %c0_4] : memref<1x256xf32, #tpu.memory_space<vmem>>, vector<1x256xf32>
    %4 = vector.broadcast %3 : vector<1x256xf32> to vector<8x256xf32>
    %5 = arith.mulf %2, %4 : vector<8x256xf32>
    %c0_5 = arith.constant 0 : index
    %c0_6 = arith.constant 0 : index
    %6 = vector.load %arg4[%c0_5, %c0_6] : memref<1x256xf32, #tpu.memory_space<vmem>>, vector<1x256xf32>
    %7 = vector.broadcast %6 : vector<1x256xf32> to vector<8x256xf32>
    %8 = arith.addf %5, %7 : vector<8x256xf32>
    %cst_7 = arith.constant 0.000000e+00 : f32
    %9 = vector.broadcast %cst_7 : f32 to vector<8x256xf32>
    %10 = arith.maximumf %8, %9 : vector<8x256xf32>
    %c0_8 = arith.constant 0 : index
    %c0_9 = arith.constant 0 : index
    %11 = vector.load %arg5[%c0_8, %c0_9] : memref<8x256xf32, #tpu.memory_space<vmem>>, vector<8x256xf32>
    tpu.vector_store %arg5[%c0_8, %c0_9], %10 {strides = array<i32>} : memref<8x256xf32, #tpu.memory_space<vmem>>, vector<8x256xf32>,
    return
  }
  func.func @transform_0(%arg0: i32) -> (i32, i32) {
    %c0_i32 = arith.constant 0 : i32
    %c0_i32_0 = arith.constant 0 : i32
    return %arg0, %c0_i32 : i32, i32
  }
  func.func @transform_1(%arg0: i32) -> (i32, i32) {
    %c0_i32 = arith.constant 0 : i32
    %c0_i32_0 = arith.constant 0 : i32
    %c0_i32_1 = arith.constant 0 : i32
    return %c0_i32, %c0_i32_0 : i32, i32
  }
  func.func @transform_2(%arg0: i32) -> (i32, i32) {
    %c0_i32 = arith.constant 0 : i32
    %c0_i32_0 = arith.constant 0 : i32
    %c0_i32_1 = arith.constant 0 : i32
    return %c0_i32, %c0_i32_0 : i32, i32
  }
  func.func @transform_3(%arg0: i32) -> (i32, i32) {
    %c0_i32 = arith.constant 0 : i32
    %c0_i32_0 = arith.constant 0 : i32
    %c0_i32_1 = arith.constant 0 : i32
    return %c0_i32, %c0_i32_0 : i32, i32
  }
  func.func @transform_4(%arg0: i32) -> (i32, i32) {
    %c0_i32 = arith.constant 0 : i32
    %c0_i32_0 = arith.constant 0 : i32
    return %arg0, %c0_i32 : i32, i32
  }
}

</mosaic_0001>

<bundles_post_ra>
// kernel: feature_generator_resnet_forward.16
= control target key start
LH: loop header
LB: loop body
LE: loop exit
PB: predicated region body
PF: predicated region fallthrough
CT: control target
= control target key end

     0   :  { %s941_s15 = smov 0   ;;  %s1297_s0 = inlined_call_operand.vmem [shape: f32[512,147], index: 0, kind: input, shape index: {}]   ;;  %s1298_s1 = inlined_call_operand.vmem [shape: f32[147,64], index: 1, kind: input, shape index: {}]   ;;  %s1299_s2 = inlined_call_operand.vmem [shape: f32[1,64], index: 2, kind: input, shape index: {}]   ;;  %s1300_s3 = inlined_call_operand.vmem [shape: f32[1,64], index: 3, kind: input, shape index: {}]   ;;  %s1301_s4 = inlined_call_operand.vmem [shape: f32[512,64], index: 4, kind: output, shape index: {}]  }
   0x1 LB: > { %s812_s16 = sadd.s32 4294967295, %s913_s15   ;;  %p816_p0 = scmp.ge.s32.totalorder %s913_s15, 1  ;;  %s913_s15 = sphi %s941_s15, %s14_s15  }
   0x2   : > { %p164_p1 = scmp.lt.s32.totalorder %s913_s15, 3 }
   0x4   : > { %p165_p2 = pnand %p816_p0, %p164_p1 }
   0x5   : > { %s817_s13 = sshll.u32 (!%p165_p2), %s812_s16, 5 }
   0x6   : > { %168 = sbr.rel (%p165_p2) target bundleno = 311 (0x137), region = 36  ;;  %p192_p3 = scmp.lt.s32.totalorder (!%p165_p2), %s817_s13, 63 }
   0xb   : > { %v283_v0 = vld [vmem:[%s1298_s1 + $0x78] sm:$0xff]  ;;  %v915_v1 = vmov 0.0   ;;  %v282_v2 = vld [vmem:[%s1298_s1 + $0x70] sm:$0xff]  ;;  %v281_v3 = vld [vmem:[%s1298_s1 + $0x68] sm:$0xff]  ;;  %s1303_s13 = smov (!%p192_p3, %s817_s13), 63  ;;  %vm384_vm0 = vcmask 1042432  }
   0xc   : > { %388 = vmatprep.subr.mxu0 %v915_v1  ;;  %860 = vmatprep.subr.mxu1 %v915_v1  ;;  %v280_v4 = vld [vmem:[%s1298_s1 + $0x60] sm:$0xff]  ;;  %v279_v5 = vld [vmem:[%s1298_s1 + $0x58] sm:$0xff]  ;;  %v278_v6 = vld [vmem:[%s1298_s1 + $0x50] sm:$0xff]  ;;  %s859_s25 = sshll.u32 %s1303_s13, 4  ;;  %vm287_vm1 = vcmask 154624   ;;  %s821_s14 = sshll.u32 %s1303_s13, 3 }
   0xd   : > { %389 = vmatpush1.msra.mxu0 %v283_v0  ;;  %879 = vmatpush1.msra.mxu1 %v283_v0  ;;  %v277_v7 = vld [vmem:[%s1298_s1 + $0x48] sm:$0xff]  ;;  %v276_v8 = vld [vmem:[%s1298_s1 + $0x40] sm:$0xff]  ;;  %v275_v9 = vld [vmem:[%s1298_s1 + $0x38] sm:$0xff]  ;;  %s1045_s6 = scalar_lea.vmem %s1297_s0, %s859_s25  ;;  %s1168_s19 = scalar_lea.vmem %s1301_s4, %s821_s14  ;;  %vm723_vm2 = vcmask 523264  }
   0xe   : > { %390 = vmatprep.subr.mxu0 %v915_v1  ;;  %861 = vmatprep.subr.mxu1 %v915_v1  ;;  %v274_v10 = vld [vmem:[%s1298_s1 + $0x30] sm:$0xff]  ;;  %v273_v11 = vld [vmem:[%s1298_s1 + $0x28] sm:$0xff]  ;;  %v272_v12 = vld [vmem:[%s1298_s1 + $0x20] sm:$0xff] }
   0xf   : > { %391 = vmatpush1.msra.mxu0 %v282_v2  ;;  %880 = vmatpush1.msra.mxu1 %v282_v2  ;;  %v271_v13 = vld [vmem:[%s1298_s1 + $0x18] sm:$0xff]  ;;  %v270_v14 = vld [vmem:[%s1298_s1 + $0x10] sm:$0xff]  ;;  %v269_v15 = vld [vmem:[%s1298_s1 + $0x8] sm:$0xff] }
  0x10   : > { %392 = vmatprep.subr.mxu0 %v915_v1  ;;  %862 = vmatprep.subr.mxu1 %v915_v1  ;;  %v268_v16 = vld [vmem:[%s1298_s1] sm:$0xff]  ;;  %v286_v17 = vld [vmem:[%s1298_s1 + $0x90] sm:$0x7]  ;;  %v285_v18 = vld [vmem:[%s1298_s1 + $0x88] sm:$0xff] }
  0x11   : > { %393 = vmatpush1.msra.mxu0 %v281_v3  ;;  %881 = vmatpush1.msra.mxu1 %v281_v3  ;;  %v284_v19 = vld [vmem:[%s1298_s1 + $0x80] sm:$0xff]  ;;  %v205_v20 = vld [vmem:[%s1045_s6 + $0x8] sm:$0xff]  ;;  %v207_v24 = vld [vmem:[%s1045_s6 + $0x18] sm:$0xff] }
  0x12   : > { %394 = vmatprep.subr.mxu0 %v915_v1  ;;  %863 = vmatprep.subr.mxu1 %v915_v1  ;;  %v237_v21 = vld [vmem:[%s1045_s6 + $0x108] sm:$0xff]  ;;  %v204_v22 = vld [vmem:[%s1045_s6] sm:$0xff]  ;;  %v239_v25 = vld [vmem:[%s1045_s6 + $0x118] sm:$0xff] }
  0x13   : > { %395 = vmatpush1.msra.mxu0 %v280_v4  ;;  %882 = vmatpush1.msra.mxu1 %v280_v4  ;;  %v236_v23 = vld [vmem:[%s1045_s6 + $0x100] sm:$0xff]  ;;  %v206_v26 = vld [vmem:[%s1045_s6 + $0x10] sm:$0xff]  ;;  %v209_v28 = vld [vmem:[%s1045_s6 + $0x28] sm:$0xff] }
  0x14   : > { %396 = vmatprep.subr.mxu0 %v915_v1  ;;  %864 = vmatprep.subr.mxu1 %v915_v1  ;;  %v238_v27 = vld [vmem:[%s1045_s6 + $0x110] sm:$0xff]  ;;  %v241_v29 = vld [vmem:[%s1045_s6 + $0x128] sm:$0xff]  ;;  %v208_v30 = vld [vmem:[%s1045_s6 + $0x20] sm:$0xff] }
  0x15   : > { %397 = vmatpush1.msra.mxu0 %v279_v5  ;;  %883 = vmatpush1.msra.mxu1 %v279_v5  ;;  %v240_v31 = vld [vmem:[%s1045_s6 + $0x120] sm:$0xff]  ;;  %v211_v32 = vld [vmem:[%s1045_s6 + $0x38] sm:$0xff]  ;;  %v210_v34 = vld [vmem:[%s1045_s6 + $0x30] sm:$0xff] }
  0x16   : > { %398 = vmatprep.subr.mxu0 %v915_v1  ;;  %865 = vmatprep.subr.mxu1 %v915_v1  ;;  %v243_v33 = vld [vmem:[%s1045_s6 + $0x138] sm:$0xff]  ;;  %v242_v35 = vld [vmem:[%s1045_s6 + $0x130] sm:$0xff]  ;;  %v213_v36 = vld [vmem:[%s1045_s6 + $0x48] sm:$0xff] }
  0x17   : > { %399 = vmatpush1.msra.mxu0 %v278_v6  ;;  %884 = vmatpush1.msra.mxu1 %v278_v6  ;;  %v245_v37 = vld [vmem:[%s1045_s6 + $0x148] sm:$0xff]  ;;  %v212_v38 = vld [vmem:[%s1045_s6 + $0x40] sm:$0xff]  ;;  %v215_v40 = vld [vmem:[%s1045_s6 + $0x58] sm:$0xff] }
  0x18   : > { %400 = vmatprep.subr.mxu0 %v915_v1  ;;  %866 = vmatprep.subr.mxu1 %v915_v1  ;;  %v244_v39 = vld [vmem:[%s1045_s6 + $0x140] sm:$0xff]  ;;  %v247_v41 = vld [vmem:[%s1045_s6 + $0x158] sm:$0xff]  ;;  %v214_v42 = vld [vmem:[%s1045_s6 + $0x50] sm:$0xff] }
  0x19   : > { %401 = vmatpush1.msra.mxu0 %v277_v7  ;;  %885 = vmatpush1.msra.mxu1 %v277_v7  ;;  %v246_v43 = vld [vmem:[%s1045_s6 + $0x150] sm:$0xff]  ;;  %v217_v44 = vld [vmem:[%s1045_s6 + $0x68] sm:$0xff]  ;;  %v216_v46 = vld [vmem:[%s1045_s6 + $0x60] sm:$0xff] }
  0x1a   : > { %402 = vmatprep.subr.mxu0 %v915_v1  ;;  %867 = vmatprep.subr.mxu1 %v915_v1  ;;  %v249_v45 = vld [vmem:[%s1045_s6 + $0x168] sm:$0xff]  ;;  %v248_v47 = vld [vmem:[%s1045_s6 + $0x160] sm:$0xff]  ;;  %v219_v48 = vld [vmem:[%s1045_s6 + $0x78] sm:$0xff] }
  0x1b   : > { %403 = vmatpush1.msra.mxu0 %v276_v8  ;;  %886 = vmatpush1.msra.mxu1 %v276_v8  ;;  %v251_v49 = vld [vmem:[%s1045_s6 + $0x178] sm:$0xff]  ;;  %v218_v50 = vld [vmem:[%s1045_s6 + $0x70] sm:$0xff]  ;;  %v221_v52 = vld [vmem:[%s1045_s6 + $0x88] sm:$0xff] }
  0x1c   : > { %404 = vmatprep.subr.mxu0 %v915_v1  ;;  %868 = vmatprep.subr.mxu1 %v915_v1  ;;  %v250_v51 = vld [vmem:[%s1045_s6 + $0x170] sm:$0xff]  ;;  %v253_v53 = vld [vmem:[%s1045_s6 + $0x188] sm:$0xff]  ;;  %v220_v54 = vld [vmem:[%s1045_s6 + $0x80] sm:$0xff] }
  0x1d   : > { %405 = vmatpush1.msra.mxu0 %v275_v9  ;;  %887 = vmatpush1.msra.mxu1 %v275_v9  ;;  %v252_v55 = vld [vmem:[%s1045_s6 + $0x180] sm:$0xff]  ;;  %v223_v56 = vld [vmem:[%s1045_s6 + $0x98] sm:$0xff]  ;;  %v222_v58 = vld [vmem:[%s1045_s6 + $0x90] sm:$0xff] }
  0x1e   : > { %406 = vmatprep.subr.mxu0 %v915_v1  ;;  %869 = vmatprep.subr.mxu1 %v915_v1  ;;  %v255_v57 = vld [vmem:[%s1045_s6 + $0x198] sm:$0xff]  ;;  %v254_v59 = vld [vmem:[%s1045_s6 + $0x190] sm:$0xff]  ;;  %v225_v60 = vld [vmem:[%s1045_s6 + $0xa8] sm:$0xff] }
  0x1f   : > { %407 = vmatpush1.msra.mxu0 %v274_v10  ;;  %888 = vmatpush1.msra.mxu1 %v274_v10  ;;  %v257_v61 = vld [vmem:[%s1045_s6 + $0x1a8] sm:$0xff]  ;;  %v224_v62 = vld [vmem:[%s1045_s6 + $0xa0] sm:$0xff]  ;;  %v227_v0 = vld [vmem:[%s1045_s6 + $0xb8] sm:$0xff] }
  0x20   : > { %408 = vmatprep.subr.mxu0 %v915_v1  ;;  %870 = vmatprep.subr.mxu1 %v915_v1  ;;  %v256_v63 = vld [vmem:[%s1045_s6 + $0x1a0] sm:$0xff]  ;;  %v226_v2 = vld [vmem:[%s1045_s6 + $0xb0] sm:$0xff]  ;;  %v229_v4 = vld [vmem:[%s1045_s6 + $0xc8] sm:$0xff] }
  0x21   : > { %409 = vmatpush1.msra.mxu0 %v273_v11  ;;  %889 = vmatpush1.msra.mxu1 %v273_v11  ;;  %v258_v3 = vld [vmem:[%s1045_s6 + $0x1b0] sm:$0xff]  ;;  %v261_v5 = vld [vmem:[%s1045_s6 + $0x1c8] sm:$0xff]  ;;  %v228_v6 = vld [vmem:[%s1045_s6 + $0xc0] sm:$0xff] }
  0x22   : > { %410 = vmatprep.subr.mxu0 %v915_v1  ;;  %871 = vmatprep.subr.mxu1 %v915_v1  ;;  %v260_v7 = vld [vmem:[%s1045_s6 + $0x1c0] sm:$0xff]  ;;  %v231_v8 = vld [vmem:[%s1045_s6 + $0xd8] sm:$0xff]  ;;  %v230_v10 = vld [vmem:[%s1045_s6 + $0xd0] sm:$0xff] }
  0x23   : > { %411 = vmatpush1.msra.mxu0 %v272_v12  ;;  %890 = vmatpush1.msra.mxu1 %v272_v12  ;;  %v263_v9 = vld [vmem:[%s1045_s6 + $0x1d8] sm:$0xff]  ;;  %v262_v11 = vld [vmem:[%s1045_s6 + $0x1d0] sm:$0xff]  ;;  %v233_v12 = vld [vmem:[%s1045_s6 + $0xe8] sm:$0xff] }
  0x24   : > { %412 = vmatprep.subr.mxu0 %v915_v1  ;;  %872 = vmatprep.subr.mxu1 %v915_v1 }
  0x25   : > { %413 = vmatpush1.msra.mxu0 %v271_v13  ;;  %891 = vmatpush1.msra.mxu1 %v271_v13  ;;  %v265_v13 = vld [vmem:[%s1045_s6 + $0x1e8] sm:$0xff] }
  0x26   : > { %414 = vmatprep.subr.mxu0 %v915_v1  ;;  %873 = vmatprep.subr.mxu1 %v915_v1 }
  0x27   : > { %415 = vmatpush1.msra.mxu0 %v270_v14  ;;  %892 = vmatpush1.msra.mxu1 %v270_v14  ;;  %v232_v14 = vld [vmem:[%s1045_s6 + $0xe0] sm:$0xff] }
  0x28   : > { %416 = vmatprep.subr.mxu0 %v915_v1  ;;  %874 = vmatprep.subr.mxu1 %v915_v1 }
  0x29   : > { %417 = vmatpush1.msra.mxu0 %v269_v15  ;;  %893 = vmatpush1.msra.mxu1 %v269_v15  ;;  %v264_v15 = vld [vmem:[%s1045_s6 + $0x1e0] sm:$0xff] }
  0x2a   : > { %418 = vmatprep.subr.mxu0 %v915_v1  ;;  %875 = vmatprep.subr.mxu1 %v915_v1 }
  0x2b   : > { %419 = vmatpush1.msra.mxu0 %v268_v16  ;;  %894 = vmatpush1.msra.mxu1 %v268_v16  ;;  %v235_v16 = vld [vmem:[%s1045_s6 + $0xf8] sm:$0xff] }
  0x2c   : > { %446 = vmatprep.subr.mxu0 %v915_v1  ;;  %876 = vmatprep.subr.mxu1 %v915_v1 }
  0x2d   : > { %822 = vmatpush2.msk.msra.mxu0 %vm384_vm0, %v286_v17  ;;  %895 = vmatpush2.msk.msra.mxu1 %vm384_vm0, %v286_v17  ;;  %v267_v17 = vld [vmem:[%s1045_s6 + $0x1f8] sm:$0xff] }
  0x2e   : > { %448 = vmatprep.subr.mxu0 %v915_v1  ;;  %877 = vmatprep.subr.mxu1 %v915_v1 }
  0x2f   : > { %449 = vmatpush2.msra.mxu0 %v285_v18  ;;  %896 = vmatpush2.msra.mxu1 %v285_v18  ;;  %v234_v18 = vld [vmem:[%s1045_s6 + $0xf0] sm:$0xff] }
  0x30   : > { %450 = vmatprep.subr.mxu0 %v915_v1  ;;  %878 = vmatprep.subr.mxu1 %v915_v1  ;;  %v259_v1 = vld [vmem:[%s1045_s6 + $0x1b8] sm:$0xff] }
  0x31   : > { %451 = vmatpush2.msra.mxu0 %v284_v19  ;;  %897 = vmatpush2.msra.mxu1 %v284_v19  ;;  %v266_v19 = vld [vmem:[%s1045_s6 + $0x1f0] sm:$0xff] }
  0x32   : > { %823 = vmatprep.mubr.msk.f32.mxu0 %vm287_vm1, %v205_v20  ;;  %839 = vmatprep.mubr.msk.f32.mxu1 %vm287_vm1, %v237_v21  ;;  %v1153_v20 = vld [vmem:[%s1299_s2] ss:$0 sm:$0xff] }
  0x33   : > { %453 = vmatmul.mubr.f32.vlgmr.msra.gmra.mxu0 %v204_v22  ;;  %533 = vmatmul.mubr.f32.vlgmr.msra.gmra.mxu1 %v236_v23  ;;  %v1158_v22 = vld [vmem:[%s1300_s3] ss:$0 sm:$0xff] }
  0x34   : > { %824 = vmatprep.mubr.msk.f32.mxu0 %vm287_vm1, %v207_v24  ;;  %840 = vmatprep.mubr.msk.f32.mxu1 %vm287_vm1, %v239_v25 }
  0x37   : > { %458 = vmatmul.mubr.f32.gmra.mxu0 %v206_v26  ;;  %538 = vmatmul.mubr.f32.gmra.mxu1 %v238_v27 }
  0x38   : > { %825 = vmatprep.mubr.msk.f32.mxu0 %vm287_vm1, %v209_v28  ;;  %841 = vmatprep.mubr.msk.f32.mxu1 %vm287_vm1, %v241_v29 }
  0x3b   : > { %463 = vmatmul.mubr.f32.gmra.mxu0 %v208_v30  ;;  %543 = vmatmul.mubr.f32.gmra.mxu1 %v240_v31 }
  0x3c   : > { %826 = vmatprep.mubr.msk.f32.mxu0 %vm287_vm1, %v211_v32  ;;  %842 = vmatprep.mubr.msk.f32.mxu1 %vm287_vm1, %v243_v33 }
  0x3f   : > { %468 = vmatmul.mubr.f32.gmra.mxu0 %v210_v34  ;;  %548 = vmatmul.mubr.f32.gmra.mxu1 %v242_v35 }
  0x40   : > { %827 = vmatprep.mubr.msk.f32.mxu0 %vm287_vm1, %v213_v36  ;;  %843 = vmatprep.mubr.msk.f32.mxu1 %vm287_vm1, %v245_v37 }
  0x43   : > { %473 = vmatmul.mubr.f32.gmra.mxu0 %v212_v38  ;;  %553 = vmatmul.mubr.f32.gmra.mxu1 %v244_v39 }
  0x44   : > { %828 = vmatprep.mubr.msk.f32.mxu0 %vm287_vm1, %v215_v40  ;;  %844 = vmatprep.mubr.msk.f32.mxu1 %vm287_vm1, %v247_v41 }
  0x47   : > { %478 = vmatmul.mubr.f32.gmra.mxu0 %v214_v42  ;;  %558 = vmatmul.mubr.f32.gmra.mxu1 %v246_v43 }
  0x48   : > { %829 = vmatprep.mubr.msk.f32.mxu0 %vm287_vm1, %v217_v44  ;;  %845 = vmatprep.mubr.msk.f32.mxu1 %vm287_vm1, %v249_v45 }
  0x4b   : > { %483 = vmatmul.mubr.f32.gmra.mxu0 %v216_v46  ;;  %563 = vmatmul.mubr.f32.gmra.mxu1 %v248_v47 }
  0x4c   : > { %830 = vmatprep.mubr.msk.f32.mxu0 %vm287_vm1, %v219_v48  ;;  %846 = vmatprep.mubr.msk.f32.mxu1 %vm287_vm1, %v251_v49 }
  0x4f   : > { %488 = vmatmul.mubr.f32.gmra.mxu0 %v218_v50  ;;  %568 = vmatmul.mubr.f32.gmra.mxu1 %v250_v51 }
  0x50   : > { %831 = vmatprep.mubr.msk.f32.mxu0 %vm287_vm1, %v221_v52  ;;  %847 = vmatprep.mubr.msk.f32.mxu1 %vm287_vm1, %v253_v53 }
  0x53   : > { %493 = vmatmul.mubr.f32.gmra.mxu0 %v220_v54  ;;  %573 = vmatmul.mubr.f32.gmra.mxu1 %v252_v55 }
  0x54   : > { %832 = vmatprep.mubr.msk.f32.mxu0 %vm287_vm1, %v223_v56  ;;  %848 = vmatprep.mubr.msk.f32.mxu1 %vm287_vm1, %v255_v57 }
  0x57   : > { %498 = vmatmul.mubr.f32.gmra.mxu0 %v222_v58  ;;  %578 = vmatmul.mubr.f32.gmra.mxu1 %v254_v59 }
  0x58   : > { %833 = vmatprep.mubr.msk.f32.mxu0 %vm287_vm1, %v225_v60  ;;  %849 = vmatprep.mubr.msk.f32.mxu1 %vm287_vm1, %v257_v61 }
  0x5b   : > { %503 = vmatmul.mubr.f32.gmra.mxu0 %v224_v62  ;;  %583 = vmatmul.mubr.f32.gmra.mxu1 %v256_v63 }
  0x5c   : > { %834 = vmatprep.mubr.msk.f32.mxu0 %vm287_vm1, %v227_v0  ;;  %850 = vmatprep.mubr.msk.f32.mxu1 %vm287_vm1, %v259_v1 }
  0x5f   : > { %508 = vmatmul.mubr.f32.gmra.mxu0 %v226_v2  ;;  %588 = vmatmul.mubr.f32.gmra.mxu1 %v258_v3 }
  0x60   : > { %835 = vmatprep.mubr.msk.f32.mxu0 %vm287_vm1, %v229_v4  ;;  %851 = vmatprep.mubr.msk.f32.mxu1 %vm287_vm1, %v261_v5 }
  0x63   : > { %513 = vmatmul.mubr.f32.gmra.mxu0 %v228_v6  ;;  %593 = vmatmul.mubr.f32.gmra.mxu1 %v260_v7 }
  0x64   : > { %836 = vmatprep.mubr.msk.f32.mxu0 %vm287_vm1, %v231_v8  ;;  %852 = vmatprep.mubr.msk.f32.mxu1 %vm287_vm1, %v263_v9 }
  0x67   : > { %518 = vmatmul.mubr.f32.gmra.mxu0 %v230_v10  ;;  %598 = vmatmul.mubr.f32.gmra.mxu1 %v262_v11 }
  0x68   : > { %837 = vmatprep.mubr.msk.f32.mxu0 %vm287_vm1, %v233_v12  ;;  %853 = vmatprep.mubr.msk.f32.mxu1 %vm287_vm1, %v265_v13 }
  0x6b   : > { %523 = vmatmul.mubr.f32.gmra.mxu0 %v232_v14  ;;  %603 = vmatmul.mubr.f32.gmra.mxu1 %v264_v15 }
  0x6c   : > { %838 = vmatprep.mubr.msk.f32.mxu0 %vm287_vm1, %v235_v16  ;;  %854 = vmatprep.mubr.msk.f32.mxu1 %vm287_vm1, %v267_v17 }
  0x6f   : > { %528 = vmatmul.mubr.f32.gmra.mxu0 %v234_v18  ;;  %608 = vmatmul.mubr.f32.gmra.mxu1 %v266_v19 }
  0xf3   : > { %v454_v21 = vpop.f32.mrf.mxu0  ;;  %v534_v23 = vpop.f32.mrf.mxu1 }
  0xf4   : > { %v620_v24 = vmul.f32 %v1153_v20, %v454_v21  ;;  %v636_v25 = vmul.f32 %v1153_v20, %v534_v23 }
  0xf5   : > { %v456_v26 = vpop.f32.mrf.mxu0  ;;  %v536_v27 = vpop.f32.mrf.mxu1 }
  0xf6   : > { %v659_v28 = vadd.f32 %v1158_v22, %v620_v24  ;;  %v675_v29 = vadd.f32 %v1158_v22, %v636_v25 }
  0xf7   : > { %v459_v30 = vpop.f32.mrf.mxu0  ;;  %v539_v31 = vpop.f32.mrf.mxu1 }
  0xf8   : > { %v691_v32 = vmax.f32 %v659_v28, 0.0  ;;  %v707_v33 = vmax.f32 %v675_v29, 0.0  ;;  %v621_v34 = vmul.f32 %v1153_v20, %v459_v30  ;;  %v637_v35 = vmul.f32 %v1153_v20, %v539_v31 }
  0xf9   : > { %v461_v36 = vpop.f32.mrf.mxu0  ;;  %v541_v37 = vpop.f32.mrf.mxu1 }
  0xfa   : > { %724 = vst.msk [vmem:[%s1168_s19] sm:$0xff] %vm723_vm2, %v691_v32  ;;  %740 = vst.msk [vmem:[%s1168_s19 + $0x80] sm:$0xff] %vm723_vm2, %v707_v33  ;;  %v660_v38 = vadd.f32 %v1158_v22, %v621_v34  ;;  %v676_v39 = vadd.f32 %v1158_v22, %v637_v35 }
  0xfb   : > { %v464_v40 = vpop.f32.mrf.mxu0  ;;  %v544_v41 = vpop.f32.mrf.mxu1 }
  0xfc   : > { %v692_v42 = vmax.f32 %v660_v38, 0.0  ;;  %v708_v43 = vmax.f32 %v676_v39, 0.0  ;;  %v622_v44 = vmul.f32 %v1153_v20, %v464_v40  ;;  %v638_v45 = vmul.f32 %v1153_v20, %v544_v41 }
  0xfd   : > { %v466_v46 = vpop.f32.mrf.mxu0  ;;  %v546_v47 = vpop.f32.mrf.mxu1 }
  0xfe   : > { %725 = vst.msk [vmem:[%s1168_s19 + $0x8] sm:$0xff] %vm723_vm2, %v692_v42  ;;  %741 = vst.msk [vmem:[%s1168_s19 + $0x88] sm:$0xff] %vm723_vm2, %v708_v43  ;;  %v661_v48 = vadd.f32 %v1158_v22, %v622_v44  ;;  %v677_v49 = vadd.f32 %v1158_v22, %v638_v45 }
  0xff   : > { %v469_v50 = vpop.f32.mrf.mxu0  ;;  %v549_v51 = vpop.f32.mrf.mxu1 }
 0x100   : > { %v693_v52 = vmax.f32 %v661_v48, 0.0  ;;  %v709_v53 = vmax.f32 %v677_v49, 0.0  ;;  %v623_v54 = vmul.f32 %v1153_v20, %v469_v50  ;;  %v639_v55 = vmul.f32 %v1153_v20, %v549_v51 }
 0x101   : > { %v471_v56 = vpop.f32.mrf.mxu0  ;;  %v551_v57 = vpop.f32.mrf.mxu1 }
 0x102   : > { %726 = vst.msk [vmem:[%s1168_s19 + $0x10] sm:$0xff] %vm723_vm2, %v693_v52  ;;  %742 = vst.msk [vmem:[%s1168_s19 + $0x90] sm:$0xff] %vm723_vm2, %v709_v53  ;;  %v662_v58 = vadd.f32 %v1158_v22, %v623_v54  ;;  %v678_v59 = vadd.f32 %v1158_v22, %v639_v55 }
 0x103   : > { %v474_v60 = vpop.f32.mrf.mxu0  ;;  %v554_v61 = vpop.f32.mrf.mxu1 }
 0x104   : > { %v694_v62 = vmax.f32 %v662_v58, 0.0  ;;  %v710_v63 = vmax.f32 %v678_v59, 0.0  ;;  %v624_v0 = vmul.f32 %v1153_v20, %v474_v60  ;;  %v640_v1 = vmul.f32 %v1153_v20, %v554_v61 }
 0x105   : > { %v476_v2 = vpop.f32.mrf.mxu0  ;;  %v556_v3 = vpop.f32.mrf.mxu1 }
 0x106   : > { %727 = vst.msk [vmem:[%s1168_s19 + $0x18] sm:$0xff] %vm723_vm2, %v694_v62  ;;  %743 = vst.msk [vmem:[%s1168_s19 + $0x98] sm:$0xff] %vm723_vm2, %v710_v63  ;;  %v663_v4 = vadd.f32 %v1158_v22, %v624_v0  ;;  %v679_v5 = vadd.f32 %v1158_v22, %v640_v1 }
 0x107   : > { %v479_v6 = vpop.f32.mrf.mxu0  ;;  %v559_v7 = vpop.f32.mrf.mxu1 }
 0x108   : > { %v695_v8 = vmax.f32 %v663_v4, 0.0  ;;  %v711_v9 = vmax.f32 %v679_v5, 0.0  ;;  %v625_v10 = vmul.f32 %v1153_v20, %v479_v6  ;;  %v641_v11 = vmul.f32 %v1153_v20, %v559_v7 }
 0x109   : > { %v481_v12 = vpop.f32.mrf.mxu0  ;;  %v561_v13 = vpop.f32.mrf.mxu1 }
 0x10a   : > { %728 = vst.msk [vmem:[%s1168_s19 + $0x20] sm:$0xff] %vm723_vm2, %v695_v8  ;;  %744 = vst.msk [vmem:[%s1168_s19 + $0xa0] sm:$0xff] %vm723_vm2, %v711_v9  ;;  %v664_v14 = vadd.f32 %v1158_v22, %v625_v10  ;;  %v680_v15 = vadd.f32 %v1158_v22, %v641_v11 }
 0x10b   : > { %v484_v16 = vpop.f32.mrf.mxu0  ;;  %v564_v17 = vpop.f32.mrf.mxu1 }
 0x10c   : > { %v696_v18 = vmax.f32 %v664_v14, 0.0  ;;  %v712_v19 = vmax.f32 %v680_v15, 0.0  ;;  %v626_v21 = vmul.f32 %v1153_v20, %v484_v16  ;;  %v642_v23 = vmul.f32 %v1153_v20, %v564_v17 }
 0x10d   : > { %v486_v24 = vpop.f32.mrf.mxu0  ;;  %v566_v25 = vpop.f32.mrf.mxu1 }
 0x10e   : > { %729 = vst.msk [vmem:[%s1168_s19 + $0x28] sm:$0xff] %vm723_vm2, %v696_v18  ;;  %745 = vst.msk [vmem:[%s1168_s19 + $0xa8] sm:$0xff] %vm723_vm2, %v712_v19  ;;  %v665_v26 = vadd.f32 %v1158_v22, %v626_v21  ;;  %v681_v27 = vadd.f32 %v1158_v22, %v642_v23 }
 0x10f   : > { %v489_v28 = vpop.f32.mrf.mxu0  ;;  %v569_v29 = vpop.f32.mrf.mxu1 }
 0x110   : > { %v697_v30 = vmax.f32 %v665_v26, 0.0  ;;  %v713_v31 = vmax.f32 %v681_v27, 0.0  ;;  %v627_v32 = vmul.f32 %v1153_v20, %v489_v28  ;;  %v643_v33 = vmul.f32 %v1153_v20, %v569_v29 }
 0x111   : > { %v491_v34 = vpop.f32.mrf.mxu0  ;;  %v571_v35 = vpop.f32.mrf.mxu1 }
 0x112   : > { %730 = vst.msk [vmem:[%s1168_s19 + $0x30] sm:$0xff] %vm723_vm2, %v697_v30  ;;  %746 = vst.msk [vmem:[%s1168_s19 + $0xb0] sm:$0xff] %vm723_vm2, %v713_v31  ;;  %v666_v36 = vadd.f32 %v1158_v22, %v627_v32  ;;  %v682_v37 = vadd.f32 %v1158_v22, %v643_v33 }
 0x113   : > { %v494_v38 = vpop.f32.mrf.mxu0  ;;  %v574_v39 = vpop.f32.mrf.mxu1 }
 0x114   : > { %v698_v40 = vmax.f32 %v666_v36, 0.0  ;;  %v714_v41 = vmax.f32 %v682_v37, 0.0  ;;  %v628_v42 = vmul.f32 %v1153_v20, %v494_v38  ;;  %v644_v43 = vmul.f32 %v1153_v20, %v574_v39 }
 0x115   : > { %v496_v44 = vpop.f32.mrf.mxu0  ;;  %v576_v45 = vpop.f32.mrf.mxu1 }
 0x116   : > { %731 = vst.msk [vmem:[%s1168_s19 + $0x38] sm:$0xff] %vm723_vm2, %v698_v40  ;;  %747 = vst.msk [vmem:[%s1168_s19 + $0xb8] sm:$0xff] %vm723_vm2, %v714_v41  ;;  %v667_v46 = vadd.f32 %v1158_v22, %v628_v42  ;;  %v683_v47 = vadd.f32 %v1158_v22, %v644_v43 }
 0x117   : > { %v499_v48 = vpop.f32.mrf.mxu0  ;;  %v579_v49 = vpop.f32.mrf.mxu1 }
 0x118   : > { %v699_v50 = vmax.f32 %v667_v46, 0.0  ;;  %v715_v51 = vmax.f32 %v683_v47, 0.0  ;;  %v629_v52 = vmul.f32 %v1153_v20, %v499_v48  ;;  %v645_v53 = vmul.f32 %v1153_v20, %v579_v49 }
 0x119   : > { %v501_v54 = vpop.f32.mrf.mxu0  ;;  %v581_v55 = vpop.f32.mrf.mxu1 }
 0x11a   : > { %732 = vst.msk [vmem:[%s1168_s19 + $0x40] sm:$0xff] %vm723_vm2, %v699_v50  ;;  %748 = vst.msk [vmem:[%s1168_s19 + $0xc0] sm:$0xff] %vm723_vm2, %v715_v51  ;;  %v668_v56 = vadd.f32 %v1158_v22, %v629_v52  ;;  %v684_v57 = vadd.f32 %v1158_v22, %v645_v53 }
 0x11b   : > { %v504_v58 = vpop.f32.mrf.mxu0  ;;  %v584_v59 = vpop.f32.mrf.mxu1 }
 0x11c   : > { %v700_v60 = vmax.f32 %v668_v56, 0.0  ;;  %v716_v61 = vmax.f32 %v684_v57, 0.0  ;;  %v630_v62 = vmul.f32 %v1153_v20, %v504_v58  ;;  %v646_v63 = vmul.f32 %v1153_v20, %v584_v59 }
 0x11d   : > { %v506_v0 = vpop.f32.mrf.mxu0  ;;  %v586_v1 = vpop.f32.mrf.mxu1 }
 0x11e   : > { %733 = vst.msk [vmem:[%s1168_s19 + $0x48] sm:$0xff] %vm723_vm2, %v700_v60  ;;  %749 = vst.msk [vmem:[%s1168_s19 + $0xc8] sm:$0xff] %vm723_vm2, %v716_v61  ;;  %v669_v2 = vadd.f32 %v1158_v22, %v630_v62  ;;  %v685_v3 = vadd.f32 %v1158_v22, %v646_v63 }
 0x11f   : > { %v509_v4 = vpop.f32.mrf.mxu0  ;;  %v589_v5 = vpop.f32.mrf.mxu1 }
 0x120   : > { %v701_v6 = vmax.f32 %v669_v2, 0.0  ;;  %v717_v7 = vmax.f32 %v685_v3, 0.0  ;;  %v631_v8 = vmul.f32 %v1153_v20, %v509_v4  ;;  %v647_v9 = vmul.f32 %v1153_v20, %v589_v5 }
 0x121   : > { %v511_v10 = vpop.f32.mrf.mxu0  ;;  %v591_v11 = vpop.f32.mrf.mxu1 }
 0x122   : > { %734 = vst.msk [vmem:[%s1168_s19 + $0x50] sm:$0xff] %vm723_vm2, %v701_v6  ;;  %750 = vst.msk [vmem:[%s1168_s19 + $0xd0] sm:$0xff] %vm723_vm2, %v717_v7  ;;  %v670_v12 = vadd.f32 %v1158_v22, %v631_v8  ;;  %v686_v13 = vadd.f32 %v1158_v22, %v647_v9 }
 0x123   : > { %v514_v14 = vpop.f32.mrf.mxu0  ;;  %v594_v15 = vpop.f32.mrf.mxu1 }
 0x124   : > { %v702_v16 = vmax.f32 %v670_v12, 0.0  ;;  %v718_v17 = vmax.f32 %v686_v13, 0.0  ;;  %v632_v18 = vmul.f32 %v1153_v20, %v514_v14  ;;  %v648_v19 = vmul.f32 %v1153_v20, %v594_v15 }
 0x125   : > { %v516_v21 = vpop.f32.mrf.mxu0  ;;  %v596_v23 = vpop.f32.mrf.mxu1 }
 0x126   : > { %735 = vst.msk [vmem:[%s1168_s19 + $0x58] sm:$0xff] %vm723_vm2, %v702_v16  ;;  %751 = vst.msk [vmem:[%s1168_s19 + $0xd8] sm:$0xff] %vm723_vm2, %v718_v17  ;;  %v671_v24 = vadd.f32 %v1158_v22, %v632_v18  ;;  %v687_v25 = vadd.f32 %v1158_v22, %v648_v19 }
 0x127   : > { %v519_v26 = vpop.f32.mrf.mxu0  ;;  %v599_v27 = vpop.f32.mrf.mxu1 }
 0x128   : > { %v703_v28 = vmax.f32 %v671_v24, 0.0  ;;  %v719_v29 = vmax.f32 %v687_v25, 0.0  ;;  %v633_v30 = vmul.f32 %v1153_v20, %v519_v26  ;;  %v649_v31 = vmul.f32 %v1153_v20, %v599_v27 }
 0x129   : > { %v521_v32 = vpop.f32.mrf.mxu0  ;;  %v601_v33 = vpop.f32.mrf.mxu1 }
 0x12a   : > { %736 = vst.msk [vmem:[%s1168_s19 + $0x60] sm:$0xff] %vm723_vm2, %v703_v28  ;;  %752 = vst.msk [vmem:[%s1168_s19 + $0xe0] sm:$0xff] %vm723_vm2, %v719_v29  ;;  %v672_v34 = vadd.f32 %v1158_v22, %v633_v30  ;;  %v688_v35 = vadd.f32 %v1158_v22, %v649_v31 }
 0x12b   : > { %v524_v36 = vpop.f32.mrf.mxu0  ;;  %v604_v37 = vpop.f32.mrf.mxu1 }
 0x12c   : > { %v704_v38 = vmax.f32 %v672_v34, 0.0  ;;  %v720_v39 = vmax.f32 %v688_v35, 0.0  ;;  %v634_v40 = vmul.f32 %v1153_v20, %v524_v36  ;;  %v650_v41 = vmul.f32 %v1153_v20, %v604_v37 }
 0x12d   : > { %v526_v42 = vpop.f32.mrf.mxu0  ;;  %v606_v43 = vpop.f32.mrf.mxu1 }
 0x12e   : > { %737 = vst.msk [vmem:[%s1168_s19 + $0x68] sm:$0xff] %vm723_vm2, %v704_v38  ;;  %753 = vst.msk [vmem:[%s1168_s19 + $0xe8] sm:$0xff] %vm723_vm2, %v720_v39  ;;  %v673_v44 = vadd.f32 %v1158_v22, %v634_v40  ;;  %v689_v45 = vadd.f32 %v1158_v22, %v650_v41 }
 0x12f   : > { %v529_v46 = vpop.f32.mrf.mxu0  ;;  %v609_v47 = vpop.f32.mrf.mxu1 }
 0x130   : > { %v705_v48 = vmax.f32 %v673_v44, 0.0  ;;  %v721_v49 = vmax.f32 %v689_v45, 0.0  ;;  %v635_v50 = vmul.f32 %v1153_v20, %v529_v46  ;;  %v651_v51 = vmul.f32 %v1153_v20, %v609_v47 }
 0x131   : > { %v531_v52 = vpop.f32.mrf.mxu0  ;;  %v611_v53 = vpop.f32.mrf.mxu1 }
 0x132   : > { %738 = vst.msk [vmem:[%s1168_s19 + $0x70] sm:$0xff] %vm723_vm2, %v705_v48  ;;  %754 = vst.msk [vmem:[%s1168_s19 + $0xf0] sm:$0xff] %vm723_vm2, %v721_v49  ;;  %v674_v54 = vadd.f32 %v1158_v22, %v635_v50  ;;  %v690_v55 = vadd.f32 %v1158_v22, %v651_v51 }
 0x134   : > { %v706_v56 = vmax.f32 %v674_v54, 0.0  ;;  %v722_v57 = vmax.f32 %v690_v55, 0.0 }
 0x136   : > { %739 = vst.msk [vmem:[%s1168_s19 + $0x78] sm:$0xff] %vm723_vm2, %v706_v56  ;;  %755 = vst.msk [vmem:[%s1168_s19 + $0xf8] sm:$0xff] %vm723_vm2, %v722_v57 }
 0x137 PF: > { %s14_s15 = sadd.s32 1, %s913_s15  }
 0x138   : > { %p11_p4 = scmp.ge.s32.totalorder %s14_s15, 4  }
 0x13a   :  { %13 = sbr.rel (!%p11_p4) target bundleno = 1 (0x1), region = 66 }

// kernel: feature_generator_resnet_forward.17
= control target key start
LH: loop header
LB: loop body
LE: loop exit
PB: predicated region body
PF: predicated region fallthrough
CT: control target
= control target key end

     0   :  { %vm152_vm0 = vcmask 523264   ;;  %s1095_s0 = inlined_call_operand.vmem [shape: f32[9,128,64], index: 0, kind: input, shape index: {}]   ;;  %s1096_s1 = inlined_call_operand.vmem [shape: f32[128,64], index: 1, kind: output, shape index: {}]  }
   0x1   :  { %v8_v0 = vld [vmem:[%s1095_s0] sm:$0xff]  ;;  %v9_v13 = vld [vmem:[%s1095_s0 + $0x8] sm:$0xff]  ;;  %v10_v32 = vld [vmem:[%s1095_s0 + $0x10] sm:$0xff] }
   0x2   :  { %v24_v1 = vld [vmem:[%s1095_s0 + $0x80] sm:$0xff]  ;;  %v153_v5 = vsel %vm152_vm0, %v8_v0, -inf  ;;  %v25_v14 = vld [vmem:[%s1095_s0 + $0x88] sm:$0xff]  ;;  %v170_v19 = vsel %vm152_vm0, %v9_v13, -inf  ;;  %v26_v33 = vld [vmem:[%s1095_s0 + $0x90] sm:$0xff]  ;;  %v187_v38 = vsel %vm152_vm0, %v10_v32, -inf }
   0x3   :  { %v40_v2 = vld [vmem:[%s1095_s0 + $0x100] sm:$0xff]  ;;  %v154_v6 = vsel %vm152_vm0, %v24_v1, -inf  ;;  %v41_v15 = vld [vmem:[%s1095_s0 + $0x108] sm:$0xff]  ;;  %v171_v20 = vsel %vm152_vm0, %v25_v14, -inf  ;;  %v42_v34 = vld [vmem:[%s1095_s0 + $0x110] sm:$0xff]  ;;  %v188_v39 = vsel %vm152_vm0, %v26_v33, -inf }
   0x4   :  { %v56_v3 = vld [vmem:[%s1095_s0 + $0x180] sm:$0xff]  ;;  %v156_v7 = vsel %vm152_vm0, %v40_v2, -inf  ;;  %v155_v11 = vmax.f32 %v153_v5, %v154_v6  ;;  %v57_v18 = vld [vmem:[%s1095_s0 + $0x188] sm:$0xff]  ;;  %v173_v21 = vsel %vm152_vm0, %v41_v15, -inf  ;;  %v172_v27 = vmax.f32 %v170_v19, %v171_v20  ;;  %v58_v37 = vld [vmem:[%s1095_s0 + $0x190] sm:$0xff] }
   0x5   :  { %v72_v4 = vld [vmem:[%s1095_s0 + $0x200] sm:$0xff]  ;;  %v158_v12 = vsel %vm152_vm0, %v56_v3, -inf  ;;  %v73_v24 = vld [vmem:[%s1095_s0 + $0x208] sm:$0xff]  ;;  %v175_v31 = vsel %vm152_vm0, %v57_v18, -inf  ;;  %v190_v40 = vsel %vm152_vm0, %v42_v34, -inf  ;;  %v74_v45 = vld [vmem:[%s1095_s0 + $0x210] sm:$0xff]  ;;  %v189_v46 = vmax.f32 %v187_v38, %v188_v39 }
   0x6   :  { %v88_v8 = vld [vmem:[%s1095_s0 + $0x280] sm:$0xff]  ;;  %v157_v17 = vmax.f32 %v155_v11, %v156_v7  ;;  %v160_v22 = vsel %vm152_vm0, %v72_v4, -inf  ;;  %v89_v25 = vld [vmem:[%s1095_s0 + $0x288] sm:$0xff]  ;;  %v174_v36 = vmax.f32 %v172_v27, %v173_v21  ;;  %v177_v44 = vsel %vm152_vm0, %v73_v24, -inf  ;;  %v11_v51 = vld [vmem:[%s1095_s0 + $0x18] sm:$0xff] }
   0x7   :  { %v104_v9 = vld [vmem:[%s1095_s0 + $0x300] sm:$0xff]  ;;  %v162_v23 = vsel %vm152_vm0, %v88_v8, -inf  ;;  %v105_v26 = vld [vmem:[%s1095_s0 + $0x308] sm:$0xff]  ;;  %v179_v48 = vsel %vm152_vm0, %v89_v25, -inf  ;;  %v192_v50 = vsel %vm152_vm0, %v58_v37, -inf  ;;  %v27_v52 = vld [vmem:[%s1095_s0 + $0x98] sm:$0xff]  ;;  %v191_v58 = vmax.f32 %v189_v46, %v190_v40 }
   0x8   :  { %v120_v10 = vld [vmem:[%s1095_s0 + $0x380] sm:$0xff]  ;;  %v159_v28 = vmax.f32 %v157_v17, %v158_v12  ;;  %v164_v29 = vsel %vm152_vm0, %v104_v9, -inf  ;;  %v121_v35 = vld [vmem:[%s1095_s0 + $0x388] sm:$0xff]  ;;  %v176_v47 = vmax.f32 %v174_v36, %v175_v31  ;;  %v181_v49 = vsel %vm152_vm0, %v105_v26, -inf  ;;  %v43_v53 = vld [vmem:[%s1095_s0 + $0x118] sm:$0xff] }
   0x9   :  { %v136_v16 = vld [vmem:[%s1095_s0 + $0x400] sm:$0xff]  ;;  %v166_v30 = vsel %vm152_vm0, %v120_v10, -inf  ;;  %v137_v43 = vld [vmem:[%s1095_s0 + $0x408] sm:$0xff]  ;;  %v183_v55 = vsel %vm152_vm0, %v121_v35, -inf  ;;  %v90_v56 = vld [vmem:[%s1095_s0 + $0x290] sm:$0xff]  ;;  %v204_v60 = vsel %vm152_vm0, %v11_v51, -inf  ;;  %v193_v4 = vmax.f32 %v191_v58, %v192_v50 }
   0xa   :  { %v161_v41 = vmax.f32 %v159_v28, %v160_v22  ;;  %v168_v42 = vsel %vm152_vm0, %v136_v16, -inf  ;;  %v106_v57 = vld [vmem:[%s1095_s0 + $0x310] sm:$0xff]  ;;  %v59_v59 = vld [vmem:[%s1095_s0 + $0x198] sm:$0xff]  ;;  %v178_v61 = vmax.f32 %v176_v47, %v177_v44  ;;  %v194_v62 = vsel %vm152_vm0, %v74_v45, -inf  ;;  %v12_v6 = vld [vmem:[%s1095_s0 + $0x20] sm:$0xff] }
   0xb   :  { %v75_v63 = vld [vmem:[%s1095_s0 + $0x218] sm:$0xff]  ;;  %v205_v0 = vsel %vm152_vm0, %v27_v52, -inf  ;;  %v207_v1 = vsel %vm152_vm0, %v43_v53, -inf  ;;  %v185_v3 = vsel %vm152_vm0, %v137_v43, -inf  ;;  %v28_v7 = vld [vmem:[%s1095_s0 + $0xa0] sm:$0xff]  ;;  %v196_v10 = vsel %vm152_vm0, %v90_v56, -inf }
   0xc   :  { %v163_v54 = vmax.f32 %v161_v41, %v162_v23  ;;  %v206_v5 = vmax.f32 %v204_v60, %v205_v0  ;;  %v44_v8 = vld [vmem:[%s1095_s0 + $0x120] sm:$0xff]  ;;  %v180_v9 = vmax.f32 %v178_v61, %v179_v48  ;;  %v198_v11 = vsel %vm152_vm0, %v106_v57, -inf  ;;  %v122_v14 = vld [vmem:[%s1095_s0 + $0x390] sm:$0xff]  ;;  %v91_v16 = vld [vmem:[%s1095_s0 + $0x298] sm:$0xff] }
   0xd   :  { %v209_v12 = vsel %vm152_vm0, %v59_v59, -inf  ;;  %v195_v15 = vmax.f32 %v193_v4, %v194_v62  ;;  %v211_v18 = vsel %vm152_vm0, %v75_v63, -inf  ;;  %v60_v19 = vld [vmem:[%s1095_s0 + $0x1a0] sm:$0xff]  ;;  %v138_v21 = vld [vmem:[%s1095_s0 + $0x410] sm:$0xff]  ;;  %v221_v22 = vsel %vm152_vm0, %v12_v6, -inf  ;;  %v107_v27 = vld [vmem:[%s1095_s0 + $0x318] sm:$0xff] }
   0xe   :  { %v165_v2 = vmax.f32 %v163_v54, %v164_v29  ;;  %v208_v17 = vmax.f32 %v206_v5, %v207_v1  ;;  %v182_v20 = vmax.f32 %v180_v9, %v181_v49  ;;  %v222_v23 = vsel %vm152_vm0, %v28_v7, -inf  ;;  %v76_v29 = vld [vmem:[%s1095_s0 + $0x220] sm:$0xff]  ;;  %v13_v31 = vld [vmem:[%s1095_s0 + $0x28] sm:$0xff]  ;;  %v123_v39 = vld [vmem:[%s1095_s0 + $0x398] sm:$0xff] }
   0xf   :  { %v224_v24 = vsel %vm152_vm0, %v44_v8, -inf  ;;  %v197_v26 = vmax.f32 %v195_v15, %v196_v10  ;;  %v200_v33 = vsel %vm152_vm0, %v122_v14, -inf  ;;  %v213_v34 = vsel %vm152_vm0, %v91_v16, -inf  ;;  %v29_v36 = vld [vmem:[%s1095_s0 + $0xa8] sm:$0xff]  ;;  %v92_v41 = vld [vmem:[%s1095_s0 + $0x2a0] sm:$0xff]  ;;  %v139_v50 = vld [vmem:[%s1095_s0 + $0x418] sm:$0xff] }
  0x10   :  { %v167_v13 = vmax.f32 %v165_v2, %v166_v30  ;;  %v210_v28 = vmax.f32 %v208_v17, %v209_v12  ;;  %v223_v30 = vmax.f32 %v221_v22, %v222_v23  ;;  %v184_v32 = vmax.f32 %v182_v20, %v183_v55  ;;  %v45_v43 = vld [vmem:[%s1095_s0 + $0x128] sm:$0xff]  ;;  %v108_v52 = vld [vmem:[%s1095_s0 + $0x320] sm:$0xff]  ;;  %v14_v60 = vld [vmem:[%s1095_s0 + $0x30] sm:$0xff] }
  0x11   :  { %v226_v35 = vsel %vm152_vm0, %v60_v19, -inf  ;;  %v199_v37 = vmax.f32 %v197_v26, %v198_v11  ;;  %v202_v38 = vsel %vm152_vm0, %v138_v21, -inf  ;;  %v215_v45 = vsel %vm152_vm0, %v107_v27, -inf  ;;  %v61_v47 = vld [vmem:[%s1095_s0 + $0x1a8] sm:$0xff]  ;;  %v30_v61 = vld [vmem:[%s1095_s0 + $0xb0] sm:$0xff]  ;;  %v124_v0 = vld [vmem:[%s1095_s0 + $0x3a0] sm:$0xff] }
  0x12   :  { %v169_v25 = vmax.f32 %v167_v13, %v168_v42  ;;  %v212_v40 = vmax.f32 %v210_v28, %v211_v18  ;;  %v225_v42 = vmax.f32 %v223_v30, %v224_v24  ;;  %v186_v44 = vmax.f32 %v184_v32, %v185_v3  ;;  %v77_v54 = vld [vmem:[%s1095_s0 + $0x228] sm:$0xff]  ;;  %v46_v3 = vld [vmem:[%s1095_s0 + $0x130] sm:$0xff]  ;;  %v140_v11 = vld [vmem:[%s1095_s0 + $0x420] sm:$0xff] }
  0x13   :  { %v228_v46 = vsel %vm152_vm0, %v76_v29, -inf  ;;  %v238_v48 = vsel %vm152_vm0, %v13_v31, -inf  ;;  %v201_v49 = vmax.f32 %v199_v37, %v200_v33  ;;  %v239_v55 = vsel %vm152_vm0, %v29_v36, -inf  ;;  %v93_v6 = vld [vmem:[%s1095_s0 + $0x2a8] sm:$0xff]  ;;  %v62_v9 = vld [vmem:[%s1095_s0 + $0x1b0] sm:$0xff]  ;;  %v15_v21 = vld [vmem:[%s1095_s0 + $0x38] sm:$0xff] }
  0x14   :  { %425 = vst.msk [vmem:[%s1096_s1] sm:$0xff] %vm152_vm0, %v169_v25  ;;  %v214_v51 = vmax.f32 %v212_v40, %v213_v34  ;;  %v227_v53 = vmax.f32 %v225_v42, %v226_v35  ;;  %426 = vst.msk [vmem:[%s1096_s1 + $0x8] sm:$0xff] %vm152_vm0, %v186_v44  ;;  %v217_v56 = vsel %vm152_vm0, %v123_v39, -inf  ;;  %v230_v57 = vsel %vm152_vm0, %v92_v41, -inf  ;;  %v109_v13 = vld [vmem:[%s1095_s0 + $0x328] sm:$0xff]  ;;  %v78_v18 = vld [vmem:[%s1095_s0 + $0x230] sm:$0xff] }
  0x15   :  { %v240_v58 = vmax.f32 %v238_v48, %v239_v55  ;;  %v241_v59 = vsel %vm152_vm0, %v45_v43, -inf  ;;  %v203_v62 = vmax.f32 %v201_v49, %v202_v38  ;;  %v243_v2 = vsel %vm152_vm0, %v61_v47, -inf  ;;  %v31_v22 = vld [vmem:[%s1095_s0 + $0xb8] sm:$0xff]  ;;  %v125_v29 = vld [vmem:[%s1095_s0 + $0x3a8] sm:$0xff]  ;;  %v94_v32 = vld [vmem:[%s1095_s0 + $0x2b0] sm:$0xff] }
  0x16   :  { %v216_v63 = vmax.f32 %v214_v51, %v215_v45  ;;  %v229_v1 = vmax.f32 %v227_v53, %v228_v46  ;;  %v219_v4 = vsel %vm152_vm0, %v139_v50, -inf  ;;  %v232_v5 = vsel %vm152_vm0, %v108_v52, -inf  ;;  %v47_v27 = vld [vmem:[%s1095_s0 + $0x138] sm:$0xff]  ;;  %v141_v36 = vld [vmem:[%s1095_s0 + $0x428] sm:$0xff]  ;;  %v110_v37 = vld [vmem:[%s1095_s0 + $0x330] sm:$0xff] }
  0x17   :  { %v242_v7 = vmax.f32 %v240_v58, %v241_v59  ;;  %v245_v8 = vsel %vm152_vm0, %v77_v54, -inf  ;;  %427 = vst.msk [vmem:[%s1096_s1 + $0x10] sm:$0xff] %vm152_vm0, %v203_v62  ;;  %v255_v14 = vsel %vm152_vm0, %v14_v60, -inf  ;;  %v256_v15 = vsel %vm152_vm0, %v30_v61, -inf  ;;  %v63_v34 = vld [vmem:[%s1095_s0 + $0x1b8] sm:$0xff]  ;;  %v16_v46 = vld [vmem:[%s1095_s0 + $0x40] sm:$0xff] }
  0x18   :  { %v218_v10 = vmax.f32 %v216_v63, %v217_v56  ;;  %v231_v12 = vmax.f32 %v229_v1, %v230_v57  ;;  %v234_v16 = vsel %vm152_vm0, %v124_v0, -inf  ;;  %v257_v19 = vmax.f32 %v255_v14, %v256_v15  ;;  %v79_v43 = vld [vmem:[%s1095_s0 + $0x238] sm:$0xff]  ;;  %v32_v47 = vld [vmem:[%s1095_s0 + $0xc0] sm:$0xff]  ;;  %v126_v50 = vld [vmem:[%s1095_s0 + $0x3b0] sm:$0xff] }
  0x19   :  { %v244_v17 = vmax.f32 %v242_v7, %v243_v2  ;;  %v258_v20 = vsel %vm152_vm0, %v46_v3, -inf  ;;  %v247_v25 = vsel %vm152_vm0, %v93_v6, -inf  ;;  %v260_v26 = vsel %vm152_vm0, %v62_v9, -inf  ;;  %v95_v56 = vld [vmem:[%s1095_s0 + $0x2b8] sm:$0xff]  ;;  %v48_v58 = vld [vmem:[%s1095_s0 + $0x140] sm:$0xff]  ;;  %v142_v60 = vld [vmem:[%s1095_s0 + $0x430] sm:$0xff] }
  0x1a   :  { %v220_v23 = vmax.f32 %v218_v10, %v219_v4  ;;  %v233_v24 = vmax.f32 %v231_v12, %v232_v5  ;;  %v236_v28 = vsel %vm152_vm0, %v140_v11, -inf  ;;  %v249_v31 = vsel %vm152_vm0, %v109_v13, -inf  ;;  %v64_v59 = vld [vmem:[%s1095_s0 + $0x1c0] sm:$0xff]  ;;  %v111_v3 = vld [vmem:[%s1095_s0 + $0x338] sm:$0xff]  ;;  %v17_v7 = vld [vmem:[%s1095_s0 + $0x48] sm:$0xff] }
  0x1b   :  { %v246_v30 = vmax.f32 %v244_v17, %v245_v8  ;;  %v259_v33 = vmax.f32 %v257_v19, %v258_v20  ;;  %v262_v38 = vsel %vm152_vm0, %v78_v18, -inf  ;;  %v272_v39 = vsel %vm152_vm0, %v15_v21, -inf  ;;  %v80_v5 = vld [vmem:[%s1095_s0 + $0x240] sm:$0xff]  ;;  %v33_v12 = vld [vmem:[%s1095_s0 + $0xc8] sm:$0xff]  ;;  %v127_v15 = vld [vmem:[%s1095_s0 + $0x3b8] sm:$0xff] }
  0x1c   :  { %428 = vst.msk [vmem:[%s1096_s1 + $0x18] sm:$0xff] %vm152_vm0, %v220_v23  ;;  %v235_v35 = vmax.f32 %v233_v24, %v234_v16  ;;  %v273_v40 = vsel %vm152_vm0, %v31_v22, -inf  ;;  %v275_v45 = vsel %vm152_vm0, %v47_v27, -inf  ;;  %v251_v49 = vsel %vm152_vm0, %v125_v29, -inf  ;;  %v96_v17 = vld [vmem:[%s1095_s0 + $0x2c0] sm:$0xff]  ;;  %v49_v19 = vld [vmem:[%s1095_s0 + $0x148] sm:$0xff] }
  0x1d   :  { %v248_v41 = vmax.f32 %v246_v30, %v247_v25  ;;  %v261_v42 = vmax.f32 %v259_v33, %v260_v26  ;;  %v274_v44 = vmax.f32 %v272_v39, %v273_v40  ;;  %v264_v51 = vsel %vm152_vm0, %v94_v32, -inf  ;;  %v65_v23 = vld [vmem:[%s1095_s0 + $0x1c8] sm:$0xff]  ;;  %v143_v26 = vld [vmem:[%s1095_s0 + $0x438] sm:$0xff]  ;;  %v128_v40 = vld [vmem:[%s1095_s0 + $0x3c0] sm:$0xff] }
  0x1e   :  { %v237_v48 = vmax.f32 %v235_v35, %v236_v28  ;;  %v277_v52 = vsel %vm152_vm0, %v63_v34, -inf  ;;  %v253_v54 = vsel %vm152_vm0, %v141_v36, -inf  ;;  %v266_v61 = vsel %vm152_vm0, %v110_v37, -inf  ;;  %v112_v28 = vld [vmem:[%s1095_s0 + $0x340] sm:$0xff]  ;;  %v81_v30 = vld [vmem:[%s1095_s0 + $0x248] sm:$0xff]  ;;  %v18_v36 = vld [vmem:[%s1095_s0 + $0x50] sm:$0xff] }
  0x1f   :  { %v250_v53 = vmax.f32 %v248_v41, %v249_v31  ;;  %v263_v55 = vmax.f32 %v261_v42, %v262_v38  ;;  %v276_v57 = vmax.f32 %v274_v44, %v275_v45  ;;  %v279_v62 = vsel %vm152_vm0, %v79_v43, -inf  ;;  %v34_v37 = vld [vmem:[%s1095_s0 + $0xd0] sm:$0xff] }
  0x20   :  { %429 = vst.msk [vmem:[%s1096_s1 + $0x20] sm:$0xff] %vm152_vm0, %v237_v48  ;;  %v289_v63 = vsel %vm152_vm0, %v16_v46, -inf  ;;  %v290_v0 = vsel %vm152_vm0, %v32_v47, -inf  ;;  %v268_v8 = vsel %vm152_vm0, %v126_v50, -inf  ;;  %v281_v9 = vsel %vm152_vm0, %v95_v56, -inf  ;;  %v50_v43 = vld [vmem:[%s1095_s0 + $0x150] sm:$0xff] }
  0x21   :  { %v252_v1 = vmax.f32 %v250_v53, %v251_v49  ;;  %v265_v2 = vmax.f32 %v263_v55, %v264_v51  ;;  %v278_v4 = vmax.f32 %v276_v57, %v277_v52  ;;  %v291_v6 = vmax.f32 %v289_v63, %v290_v0  ;;  %v97_v46 = vld [vmem:[%s1095_s0 + $0x2c8] sm:$0xff]  ;;  %v66_v49 = vld [vmem:[%s1095_s0 + $0x1d0] sm:$0xff]  ;;  %v144_v51 = vld [vmem:[%s1095_s0 + $0x440] sm:$0xff] }
  0x22   :  { %v292_v10 = vsel %vm152_vm0, %v48_v58, -inf  ;;  %v294_v11 = vsel %vm152_vm0, %v64_v59, -inf  ;;  %v270_v20 = vsel %vm152_vm0, %v142_v60, -inf  ;;  %v283_v21 = vsel %vm152_vm0, %v111_v3, -inf  ;;  %v113_v53 = vld [vmem:[%s1095_s0 + $0x348] sm:$0xff]  ;;  %v82_v58 = vld [vmem:[%s1095_s0 + $0x250] sm:$0xff] }
  0x23   :  { %v254_v13 = vmax.f32 %v252_v1, %v253_v54  ;;  %v267_v14 = vmax.f32 %v265_v2, %v266_v61  ;;  %v280_v16 = vmax.f32 %v278_v4, %v279_v62  ;;  %v293_v18 = vmax.f32 %v291_v6, %v292_v10  ;;  %v19_v61 = vld [vmem:[%s1095_s0 + $0x58] sm:$0xff] }
  0x24   :  { %v296_v22 = vsel %vm152_vm0, %v80_v5, -inf  ;;  %v306_v24 = vsel %vm152_vm0, %v17_v7, -inf  ;;  %v307_v31 = vsel %vm152_vm0, %v33_v12, -inf  ;;  %v285_v32 = vsel %vm152_vm0, %v127_v15, -inf  ;;  %v35_v62 = vld [vmem:[%s1095_s0 + $0xd8] sm:$0xff]  ;;  %v129_v5 = vld [vmem:[%s1095_s0 + $0x3c8] sm:$0xff] }
  0x25   :  { %430 = vst.msk [vmem:[%s1096_s1 + $0x28] sm:$0xff] %vm152_vm0, %v254_v13  ;;  %v269_v25 = vmax.f32 %v267_v14, %v268_v8  ;;  %v282_v27 = vmax.f32 %v280_v16, %v281_v9  ;;  %v295_v29 = vmax.f32 %v293_v18, %v294_v11  ;;  %v298_v33 = vsel %vm152_vm0, %v96_v17, -inf  ;;  %v51_v3 = vld [vmem:[%s1095_s0 + $0x158] sm:$0xff]  ;;  %v98_v8 = vld [vmem:[%s1095_s0 + $0x2d0] sm:$0xff]  ;;  %v145_v12 = vld [vmem:[%s1095_s0 + $0x448] sm:$0xff] }
  0x26   :  { %v308_v34 = vmax.f32 %v306_v24, %v307_v31  ;;  %v309_v35 = vsel %vm152_vm0, %v49_v19, -inf  ;;  %v311_v42 = vsel %vm152_vm0, %v65_v23, -inf  ;;  %v287_v44 = vsel %vm152_vm0, %v143_v26, -inf  ;;  %v67_v10 = vld [vmem:[%s1095_s0 + $0x1d8] sm:$0xff]  ;;  %v114_v13 = vld [vmem:[%s1095_s0 + $0x350] sm:$0xff]  ;;  %v36_v23 = vld [vmem:[%s1095_s0 + $0xe0] sm:$0xff] }
  0x27   :  { %v271_v38 = vmax.f32 %v269_v25, %v270_v20  ;;  %v284_v39 = vmax.f32 %v282_v27, %v283_v21  ;;  %v297_v41 = vmax.f32 %v295_v29, %v296_v22  ;;  %v300_v45 = vsel %vm152_vm0, %v112_v28, -inf  ;;  %v83_v19 = vld [vmem:[%s1095_s0 + $0x258] sm:$0xff]  ;;  %v20_v22 = vld [vmem:[%s1095_s0 + $0x60] sm:$0xff]  ;;  %v130_v26 = vld [vmem:[%s1095_s0 + $0x3d0] sm:$0xff] }
  0x28   :  { %v310_v47 = vmax.f32 %v308_v34, %v309_v35  ;;  %v313_v48 = vsel %vm152_vm0, %v81_v30, -inf  ;;  %v323_v54 = vsel %vm152_vm0, %v18_v36, -inf  ;;  %v324_v55 = vsel %vm152_vm0, %v34_v37, -inf  ;;  %v52_v34 = vld [vmem:[%s1095_s0 + $0x160] sm:$0xff]  ;;  %v146_v36 = vld [vmem:[%s1095_s0 + $0x450] sm:$0xff] }
  0x29   :  { %431 = vst.msk [vmem:[%s1096_s1 + $0x30] sm:$0xff] %vm152_vm0, %v271_v38  ;;  %v286_v50 = vmax.f32 %v284_v39, %v285_v32  ;;  %v299_v52 = vmax.f32 %v297_v41, %v298_v33  ;;  %v302_v56 = vsel %vm152_vm0, %v128_v40, -inf  ;;  %v325_v59 = vmax.f32 %v323_v54, %v324_v55  ;;  %v99_v32 = vld [vmem:[%s1095_s0 + $0x2d8] sm:$0xff]  ;;  %v68_v35 = vld [vmem:[%s1095_s0 + $0x1e0] sm:$0xff] }
  0x2a   :  { %v312_v57 = vmax.f32 %v310_v47, %v311_v42  ;;  %v326_v60 = vsel %vm152_vm0, %v50_v43, -inf  ;;  %v315_v1 = vsel %vm152_vm0, %v97_v46, -inf  ;;  %v328_v2 = vsel %vm152_vm0, %v66_v49, -inf  ;;  %v115_v43 = vld [vmem:[%s1095_s0 + $0x358] sm:$0xff]  ;;  %v21_v47 = vld [vmem:[%s1095_s0 + $0x68] sm:$0xff] }
  0x2b   :  { %v288_v63 = vmax.f32 %v286_v50, %v287_v44  ;;  %v301_v0 = vmax.f32 %v299_v52, %v300_v45  ;;  %v304_v4 = vsel %vm152_vm0, %v144_v51, -inf  ;;  %v317_v7 = vsel %vm152_vm0, %v113_v53, -inf  ;;  %v84_v45 = vld [vmem:[%s1095_s0 + $0x260] sm:$0xff]  ;;  %v37_v52 = vld [vmem:[%s1095_s0 + $0xe8] sm:$0xff]  ;;  %v131_v55 = vld [vmem:[%s1095_s0 + $0x3d8] sm:$0xff] }
  0x2c   :  { %v314_v6 = vmax.f32 %v312_v57, %v313_v48  ;;  %v327_v9 = vmax.f32 %v325_v59, %v326_v60  ;;  %v330_v14 = vsel %vm152_vm0, %v82_v58, -inf  ;;  %v340_v15 = vsel %vm152_vm0, %v19_v61, -inf  ;;  %v100_v57 = vld [vmem:[%s1095_s0 + $0x2e0] sm:$0xff]  ;;  %v53_v59 = vld [vmem:[%s1095_s0 + $0x168] sm:$0xff] }
  0x2d   :  { %432 = vst.msk [vmem:[%s1096_s1 + $0x38] sm:$0xff] %vm152_vm0, %v288_v63  ;;  %v303_v11 = vmax.f32 %v301_v0, %v302_v56  ;;  %v341_v16 = vsel %vm152_vm0, %v35_v62, -inf  ;;  %v343_v21 = vsel %vm152_vm0, %v51_v3, -inf  ;;  %v319_v25 = vsel %vm152_vm0, %v129_v5, -inf  ;;  %v69_v63 = vld [vmem:[%s1095_s0 + $0x1e8] sm:$0xff] }
  0x2e   :  { %v316_v17 = vmax.f32 %v314_v6, %v315_v1  ;;  %v329_v18 = vmax.f32 %v327_v9, %v328_v2  ;;  %v342_v20 = vmax.f32 %v340_v15, %v341_v16  ;;  %v332_v27 = vsel %vm152_vm0, %v98_v8, -inf  ;;  %v147_v2 = vld [vmem:[%s1095_s0 + $0x458] sm:$0xff]  ;;  %v85_v6 = vld [vmem:[%s1095_s0 + $0x268] sm:$0xff]  ;;  %v132_v16 = vld [vmem:[%s1095_s0 + $0x3e0] sm:$0xff] }
  0x2f   :  { %v305_v24 = vmax.f32 %v303_v11, %v304_v4  ;;  %v345_v28 = vsel %vm152_vm0, %v67_v10, -inf  ;;  %v321_v30 = vsel %vm152_vm0, %v145_v12, -inf  ;;  %v334_v37 = vsel %vm152_vm0, %v114_v13, -inf  ;;  %v116_v4 = vld [vmem:[%s1095_s0 + $0x360] sm:$0xff]  ;;  %v22_v12 = vld [vmem:[%s1095_s0 + $0x70] sm:$0xff] }
  0x30   :  { %v318_v29 = vmax.f32 %v316_v17, %v317_v7  ;;  %v331_v31 = vmax.f32 %v329_v18, %v330_v14  ;;  %v344_v33 = vmax.f32 %v342_v20, %v343_v21  ;;  %v347_v38 = vsel %vm152_vm0, %v83_v19, -inf  ;;  %v38_v13 = vld [vmem:[%s1095_s0 + $0xf0] sm:$0xff] }
  0x31   :  { %433 = vst.msk [vmem:[%s1096_s1 + $0x40] sm:$0xff] %vm152_vm0, %v305_v24  ;;  %v357_v39 = vsel %vm152_vm0, %v20_v22, -inf  ;;  %v358_v40 = vsel %vm152_vm0, %v36_v23, -inf  ;;  %v336_v48 = vsel %vm152_vm0, %v130_v26, -inf  ;;  %v349_v49 = vsel %vm152_vm0, %v99_v32, -inf  ;;  %v54_v19 = vld [vmem:[%s1095_s0 + $0x170] sm:$0xff] }
  0x32   :  { %v320_v41 = vmax.f32 %v318_v29, %v319_v25  ;;  %v333_v42 = vmax.f32 %v331_v31, %v332_v27  ;;  %v346_v44 = vmax.f32 %v344_v33, %v345_v28  ;;  %v359_v46 = vmax.f32 %v357_v39, %v358_v40  ;;  %v101_v22 = vld [vmem:[%s1095_s0 + $0x2e8] sm:$0xff]  ;;  %v70_v25 = vld [vmem:[%s1095_s0 + $0x1f0] sm:$0xff]  ;;  %v148_v27 = vld [vmem:[%s1095_s0 + $0x460] sm:$0xff] }
  0x33   :  { %v360_v50 = vsel %vm152_vm0, %v52_v34, -inf  ;;  %v362_v51 = vsel %vm152_vm0, %v68_v35, -inf  ;;  %v338_v60 = vsel %vm152_vm0, %v146_v36, -inf  ;;  %v351_v61 = vsel %vm152_vm0, %v115_v43, -inf  ;;  %v117_v29 = vld [vmem:[%s1095_s0 + $0x368] sm:$0xff]  ;;  %v86_v34 = vld [vmem:[%s1095_s0 + $0x270] sm:$0xff] }
  0x34   :  { %v322_v53 = vmax.f32 %v320_v41, %v321_v30  ;;  %v335_v54 = vmax.f32 %v333_v42, %v334_v37  ;;  %v348_v56 = vmax.f32 %v346_v44, %v347_v38  ;;  %v361_v58 = vmax.f32 %v359_v46, %v360_v50  ;;  %v23_v37 = vld [vmem:[%s1095_s0 + $0x78] sm:$0xff] }
  0x35   :  { %v364_v62 = vsel %vm152_vm0, %v84_v45, -inf  ;;  %v374_v0 = vsel %vm152_vm0, %v21_v47, -inf  ;;  %v375_v7 = vsel %vm152_vm0, %v37_v52, -inf  ;;  %v353_v8 = vsel %vm152_vm0, %v131_v55, -inf  ;;  %v39_v38 = vld [vmem:[%s1095_s0 + $0xf8] sm:$0xff]  ;;  %v133_v45 = vld [vmem:[%s1095_s0 + $0x3e8] sm:$0xff] }
  0x36   :  { %434 = vst.msk [vmem:[%s1096_s1 + $0x48] sm:$0xff] %vm152_vm0, %v322_v53  ;;  %v337_v1 = vmax.f32 %v335_v54, %v336_v48  ;;  %v350_v3 = vmax.f32 %v348_v56, %v349_v49  ;;  %v363_v5 = vmax.f32 %v361_v58, %v362_v51  ;;  %v366_v9 = vsel %vm152_vm0, %v100_v57, -inf  ;;  %v55_v43 = vld [vmem:[%s1095_s0 + $0x178] sm:$0xff]  ;;  %v102_v48 = vld [vmem:[%s1095_s0 + $0x2f0] sm:$0xff]  ;;  %v149_v55 = vld [vmem:[%s1095_s0 + $0x468] sm:$0xff] }
  0x37   :  { %v376_v10 = vmax.f32 %v374_v0, %v375_v7  ;;  %v377_v11 = vsel %vm152_vm0, %v53_v59, -inf  ;;  %v379_v18 = vsel %vm152_vm0, %v69_v63, -inf  ;;  %v355_v20 = vsel %vm152_vm0, %v147_v2, -inf  ;;  %v71_v50 = vld [vmem:[%s1095_s0 + $0x1f8] sm:$0xff]  ;;  %v118_v57 = vld [vmem:[%s1095_s0 + $0x370] sm:$0xff] }
  0x38   :  { %v339_v14 = vmax.f32 %v337_v1, %v338_v60  ;;  %v352_v15 = vmax.f32 %v350_v3, %v351_v61  ;;  %v365_v17 = vmax.f32 %v363_v5, %v364_v62  ;;  %v368_v21 = vsel %vm152_vm0, %v116_v4, -inf  ;;  %v87_v59 = vld [vmem:[%s1095_s0 + $0x278] sm:$0xff]  ;;  %v134_v3 = vld [vmem:[%s1095_s0 + $0x3f0] sm:$0xff] }
  0x39   :  { %v378_v23 = vmax.f32 %v376_v10, %v377_v11  ;;  %v381_v24 = vsel %vm152_vm0, %v85_v6, -inf  ;;  %v391_v30 = vsel %vm152_vm0, %v22_v12, -inf  ;;  %v392_v31 = vsel %vm152_vm0, %v38_v13, -inf  ;;  %v103_v5 = vld [vmem:[%s1095_s0 + $0x2f8] sm:$0xff]  ;;  %v150_v11 = vld [vmem:[%s1095_s0 + $0x470] sm:$0xff] }
  0x3a   :  { %435 = vst.msk [vmem:[%s1096_s1 + $0x50] sm:$0xff] %vm152_vm0, %v339_v14  ;;  %v354_v26 = vmax.f32 %v352_v15, %v353_v8  ;;  %v367_v28 = vmax.f32 %v365_v17, %v366_v9  ;;  %v370_v32 = vsel %vm152_vm0, %v132_v16, -inf  ;;  %v393_v35 = vmax.f32 %v391_v30, %v392_v31  ;;  %v119_v13 = vld [vmem:[%s1095_s0 + $0x378] sm:$0xff] }
  0x3b   :  { %v380_v33 = vmax.f32 %v378_v23, %v379_v18  ;;  %v394_v36 = vsel %vm152_vm0, %v54_v19, -inf  ;;  %v383_v41 = vsel %vm152_vm0, %v101_v22, -inf  ;;  %v396_v42 = vsel %vm152_vm0, %v70_v25, -inf  ;;  %v135_v19 = vld [vmem:[%s1095_s0 + $0x3f8] sm:$0xff] }
  0x3c   :  { %v356_v39 = vmax.f32 %v354_v26, %v355_v20  ;;  %v369_v40 = vmax.f32 %v367_v28, %v368_v21  ;;  %v372_v44 = vsel %vm152_vm0, %v148_v27, -inf  ;;  %v385_v47 = vsel %vm152_vm0, %v117_v29, -inf }
  0x3d   :  { %v382_v46 = vmax.f32 %v380_v33, %v381_v24  ;;  %v395_v49 = vmax.f32 %v393_v35, %v394_v36  ;;  %v398_v52 = vsel %vm152_vm0, %v86_v34, -inf  ;;  %v408_v53 = vsel %vm152_vm0, %v23_v37, -inf  ;;  %v151_v24 = vld [vmem:[%s1095_s0 + $0x478] sm:$0xff] }
  0x3e   :  { %436 = vst.msk [vmem:[%s1096_s1 + $0x58] sm:$0xff] %vm152_vm0, %v356_v39  ;;  %v371_v51 = vmax.f32 %v369_v40, %v370_v32  ;;  %v409_v54 = vsel %vm152_vm0, %v39_v38, -inf  ;;  %v411_v61 = vsel %vm152_vm0, %v55_v43, -inf  ;;  %v387_v63 = vsel %vm152_vm0, %v133_v45, -inf }
  0x3f   :  { %v384_v56 = vmax.f32 %v382_v46, %v383_v41  ;;  %v397_v58 = vmax.f32 %v395_v49, %v396_v42  ;;  %v410_v60 = vmax.f32 %v408_v53, %v409_v54  ;;  %v400_v0 = vsel %vm152_vm0, %v102_v48, -inf }
  0x40   :  { %v373_v62 = vmax.f32 %v371_v51, %v372_v44  ;;  %v413_v1 = vsel %vm152_vm0, %v71_v50, -inf  ;;  %v389_v7 = vsel %vm152_vm0, %v149_v55, -inf  ;;  %v402_v8 = vsel %vm152_vm0, %v118_v57, -inf }
  0x41   :  { %v386_v2 = vmax.f32 %v384_v56, %v385_v47  ;;  %v399_v4 = vmax.f32 %v397_v58, %v398_v52  ;;  %v412_v6 = vmax.f32 %v410_v60, %v411_v61  ;;  %v415_v9 = vsel %vm152_vm0, %v87_v59, -inf }
  0x42   :  { %437 = vst.msk [vmem:[%s1096_s1 + $0x60] sm:$0xff] %vm152_vm0, %v373_v62  ;;  %v404_v15 = vsel %vm152_vm0, %v134_v3, -inf  ;;  %v417_v16 = vsel %vm152_vm0, %v103_v5, -inf  ;;  %v406_v21 = vsel %vm152_vm0, %v150_v11, -inf  ;;  %v419_v22 = vsel %vm152_vm0, %v119_v13, -inf }
  0x43   :  { %v388_v10 = vmax.f32 %v386_v2, %v387_v63  ;;  %v401_v12 = vmax.f32 %v399_v4, %v400_v0  ;;  %v414_v14 = vmax.f32 %v412_v6, %v413_v1  ;;  %v421_v26 = vsel %vm152_vm0, %v135_v19, -inf }
  0x44   :  { %v423_v29 = vsel %vm152_vm0, %v151_v24, -inf }
  0x45   :  { %v390_v17 = vmax.f32 %v388_v10, %v389_v7  ;;  %v403_v18 = vmax.f32 %v401_v12, %v402_v8  ;;  %v416_v20 = vmax.f32 %v414_v14, %v415_v9 }
  0x47   :  { %438 = vst.msk [vmem:[%s1096_s1 + $0x68] sm:$0xff] %vm152_vm0, %v390_v17  ;;  %v405_v23 = vmax.f32 %v403_v18, %v404_v15  ;;  %v418_v25 = vmax.f32 %v416_v20, %v417_v16 }
  0x49   :  { %v407_v27 = vmax.f32 %v405_v23, %v406_v21  ;;  %v420_v28 = vmax.f32 %v418_v25, %v419_v22 }
  0x4b   :  { %439 = vst.msk [vmem:[%s1096_s1 + $0x70] sm:$0xff] %vm152_vm0, %v407_v27  ;;  %v422_v30 = vmax.f32 %v420_v28, %v421_v26 }
  0x4d   :  { %v424_v31 = vmax.f32 %v422_v30, %v423_v29 }
  0x4f   :  { %440 = vst.msk [vmem:[%s1096_s1 + $0x78] sm:$0xff] %vm152_vm0, %v424_v31 }

// kernel: feature_generator_resnet_forward.18
= control target key start
LH: loop header
LB: loop body
LE: loop exit
PB: predicated region body
PF: predicated region fallthrough
CT: control target
= control target key end

     0   :  { %vm169_vm0 = vcmask 523264   ;;  %s1605_s1 = inlined_call_operand.vmem [shape: f32[576,64], index: 1, kind: input, shape index: {}]   ;;  %s1606_s0 = inlined_call_operand.vmem [shape: f32[128,576], index: 0, kind: input, shape index: {}]   ;;  %s1607_s2 = inlined_call_operand.vmem [shape: f32[1,64], index: 2, kind: input, shape index: {}]   ;;  %s1608_s3 = inlined_call_operand.vmem [shape: f32[1,64], index: 3, kind: input, shape index: {}]   ;;  %s1609_s4 = inlined_call_operand.vmem [shape: f32[128,64], index: 4, kind: output, shape index: {}]  }
   0x1   :  { %v128_v0 = vld [vmem:[%s1605_s1 + $0xf8] sm:$0xff]  ;;  %v127_v4 = vld [vmem:[%s1605_s1 + $0xf0] sm:$0xff]  ;;  %v126_v8 = vld [vmem:[%s1605_s1 + $0xe8] sm:$0xff] }
   0x2   :  { %v160_v1 = vld [vmem:[%s1605_s1 + $0x1f8] sm:$0xff]  ;;  %753 = vmatprep.subr.mxu0 %v128_v0  ;;  %v159_v5 = vld [vmem:[%s1605_s1 + $0x1f0] sm:$0xff]  ;;  %v158_v9 = vld [vmem:[%s1605_s1 + $0x1e8] sm:$0xff] }
   0x3   :  { %v112_v2 = vld [vmem:[%s1605_s1 + $0x78] sm:$0xff]  ;;  %833 = vmatprep.subr.mxu1 %v160_v1  ;;  %v111_v6 = vld [vmem:[%s1605_s1 + $0x70] sm:$0xff]  ;;  %v110_v10 = vld [vmem:[%s1605_s1 + $0x68] sm:$0xff] }
   0x4   :  { %v144_v3 = vld [vmem:[%s1605_s1 + $0x178] sm:$0xff]  ;;  %754 = vmatpush3.msra.mxu0 %v112_v2  ;;  %v143_v7 = vld [vmem:[%s1605_s1 + $0x170] sm:$0xff]  ;;  %v142_v11 = vld [vmem:[%s1605_s1 + $0x168] sm:$0xff] }
   0x5   :  { %834 = vmatpush3.msra.mxu1 %v144_v3  ;;  %755 = vmatprep.subr.mxu0 %v127_v4  ;;  %v125_v12 = vld [vmem:[%s1605_s1 + $0xe0] sm:$0xff]  ;;  %v124_v16 = vld [vmem:[%s1605_s1 + $0xd8] sm:$0xff]  ;;  %v123_v20 = vld [vmem:[%s1605_s1 + $0xd0] sm:$0xff] }
   0x6   :  { %835 = vmatprep.subr.mxu1 %v159_v5  ;;  %756 = vmatpush3.msra.mxu0 %v111_v6  ;;  %v157_v13 = vld [vmem:[%s1605_s1 + $0x1e0] sm:$0xff]  ;;  %v156_v17 = vld [vmem:[%s1605_s1 + $0x1d8] sm:$0xff]  ;;  %v155_v21 = vld [vmem:[%s1605_s1 + $0x1d0] sm:$0xff] }
   0x7   :  { %836 = vmatpush3.msra.mxu1 %v143_v7  ;;  %757 = vmatprep.subr.mxu0 %v126_v8  ;;  %v109_v14 = vld [vmem:[%s1605_s1 + $0x60] sm:$0xff]  ;;  %v108_v18 = vld [vmem:[%s1605_s1 + $0x58] sm:$0xff]  ;;  %v107_v22 = vld [vmem:[%s1605_s1 + $0x50] sm:$0xff] }
   0x8   :  { %837 = vmatprep.subr.mxu1 %v158_v9  ;;  %v141_v15 = vld [vmem:[%s1605_s1 + $0x160] sm:$0xff]  ;;  %758 = vmatpush3.msra.mxu0 %v110_v10  ;;  %v140_v19 = vld [vmem:[%s1605_s1 + $0x158] sm:$0xff]  ;;  %v139_v23 = vld [vmem:[%s1605_s1 + $0x150] sm:$0xff] }
   0x9   :  { %838 = vmatpush3.msra.mxu1 %v142_v11  ;;  %759 = vmatprep.subr.mxu0 %v125_v12  ;;  %v122_v24 = vld [vmem:[%s1605_s1 + $0xc8] sm:$0xff]  ;;  %v121_v28 = vld [vmem:[%s1605_s1 + $0xc0] sm:$0xff]  ;;  %v120_v32 = vld [vmem:[%s1605_s1 + $0xb8] sm:$0xff] }
   0xa   :  { %839 = vmatprep.subr.mxu1 %v157_v13  ;;  %760 = vmatpush3.msra.mxu0 %v109_v14  ;;  %v154_v25 = vld [vmem:[%s1605_s1 + $0x1c8] sm:$0xff]  ;;  %v153_v29 = vld [vmem:[%s1605_s1 + $0x1c0] sm:$0xff]  ;;  %v152_v33 = vld [vmem:[%s1605_s1 + $0x1b8] sm:$0xff] }
   0xb   :  { %840 = vmatpush3.msra.mxu1 %v141_v15  ;;  %761 = vmatprep.subr.mxu0 %v124_v16  ;;  %v106_v26 = vld [vmem:[%s1605_s1 + $0x48] sm:$0xff]  ;;  %v105_v30 = vld [vmem:[%s1605_s1 + $0x40] sm:$0xff]  ;;  %v104_v34 = vld [vmem:[%s1605_s1 + $0x38] sm:$0xff] }
   0xc   :  { %841 = vmatprep.subr.mxu1 %v156_v17  ;;  %762 = vmatpush3.msra.mxu0 %v108_v18  ;;  %v138_v27 = vld [vmem:[%s1605_s1 + $0x148] sm:$0xff]  ;;  %v137_v31 = vld [vmem:[%s1605_s1 + $0x140] sm:$0xff]  ;;  %v136_v35 = vld [vmem:[%s1605_s1 + $0x138] sm:$0xff] }
   0xd   :  { %842 = vmatpush3.msra.mxu1 %v140_v19  ;;  %763 = vmatprep.subr.mxu0 %v123_v20  ;;  %v119_v36 = vld [vmem:[%s1605_s1 + $0xb0] sm:$0xff]  ;;  %v118_v40 = vld [vmem:[%s1605_s1 + $0xa8] sm:$0xff]  ;;  %v117_v44 = vld [vmem:[%s1605_s1 + $0xa0] sm:$0xff] }
   0xe   :  { %843 = vmatprep.subr.mxu1 %v155_v21  ;;  %764 = vmatpush3.msra.mxu0 %v107_v22  ;;  %v151_v37 = vld [vmem:[%s1605_s1 + $0x1b0] sm:$0xff]  ;;  %v150_v41 = vld [vmem:[%s1605_s1 + $0x1a8] sm:$0xff]  ;;  %v149_v45 = vld [vmem:[%s1605_s1 + $0x1a0] sm:$0xff] }
   0xf   :  { %844 = vmatpush3.msra.mxu1 %v139_v23  ;;  %765 = vmatprep.subr.mxu0 %v122_v24  ;;  %v103_v38 = vld [vmem:[%s1605_s1 + $0x30] sm:$0xff]  ;;  %v102_v42 = vld [vmem:[%s1605_s1 + $0x28] sm:$0xff]  ;;  %v101_v46 = vld [vmem:[%s1605_s1 + $0x20] sm:$0xff] }
  0x10   :  { %845 = vmatprep.subr.mxu1 %v154_v25  ;;  %766 = vmatpush3.msra.mxu0 %v106_v26  ;;  %v135_v39 = vld [vmem:[%s1605_s1 + $0x130] sm:$0xff]  ;;  %v134_v43 = vld [vmem:[%s1605_s1 + $0x128] sm:$0xff]  ;;  %v133_v47 = vld [vmem:[%s1605_s1 + $0x120] sm:$0xff] }
  0x11   :  { %846 = vmatpush3.msra.mxu1 %v138_v27  ;;  %767 = vmatprep.subr.mxu0 %v121_v28  ;;  %v116_v48 = vld [vmem:[%s1605_s1 + $0x98] sm:$0xff]  ;;  %v115_v52 = vld [vmem:[%s1605_s1 + $0x90] sm:$0xff]  ;;  %v114_v56 = vld [vmem:[%s1605_s1 + $0x88] sm:$0xff] }
  0x12   :  { %847 = vmatprep.subr.mxu1 %v153_v29  ;;  %768 = vmatpush3.msra.mxu0 %v105_v30  ;;  %v148_v49 = vld [vmem:[%s1605_s1 + $0x198] sm:$0xff]  ;;  %v147_v53 = vld [vmem:[%s1605_s1 + $0x190] sm:$0xff]  ;;  %v146_v57 = vld [vmem:[%s1605_s1 + $0x188] sm:$0xff] }
  0x13   :  { %848 = vmatpush3.msra.mxu1 %v137_v31  ;;  %769 = vmatprep.subr.mxu0 %v120_v32  ;;  %v100_v50 = vld [vmem:[%s1605_s1 + $0x18] sm:$0xff]  ;;  %v99_v54 = vld [vmem:[%s1605_s1 + $0x10] sm:$0xff]  ;;  %v98_v58 = vld [vmem:[%s1605_s1 + $0x8] sm:$0xff] }
  0x14   :  { %849 = vmatprep.subr.mxu1 %v152_v33  ;;  %770 = vmatpush3.msra.mxu0 %v104_v34  ;;  %v132_v51 = vld [vmem:[%s1605_s1 + $0x118] sm:$0xff]  ;;  %v131_v55 = vld [vmem:[%s1605_s1 + $0x110] sm:$0xff]  ;;  %v130_v59 = vld [vmem:[%s1605_s1 + $0x108] sm:$0xff] }
  0x15   :  { %850 = vmatpush3.msra.mxu1 %v136_v35  ;;  %771 = vmatprep.subr.mxu0 %v119_v36  ;;  %v113_v60 = vld [vmem:[%s1605_s1 + $0x80] sm:$0xff]  ;;  %v18_v63 = vld [vmem:[%s1606_s0 + $0x8] sm:$0xff]  ;;  %v20_v1 = vld [vmem:[%s1606_s0 + $0x18] sm:$0xff] }
  0x16   :  { %851 = vmatprep.subr.mxu1 %v151_v37  ;;  %772 = vmatpush3.msra.mxu0 %v103_v38  ;;  %v145_v61 = vld [vmem:[%s1605_s1 + $0x180] sm:$0xff]  ;;  %v19_v3 = vld [vmem:[%s1606_s0 + $0x10] sm:$0xff]  ;;  %v168_v4 = vld [vmem:[%s1605_s1 + $0x238] sm:$0xff] }
  0x17   :  { %852 = vmatpush3.msra.mxu1 %v135_v39  ;;  %773 = vmatprep.subr.mxu0 %v118_v40  ;;  %v97_v62 = vld [vmem:[%s1605_s1] sm:$0xff]  ;;  %v23_v5 = vld [vmem:[%s1606_s0 + $0x30] sm:$0xff]  ;;  %v22_v7 = vld [vmem:[%s1606_s0 + $0x28] sm:$0xff] }
  0x18   :  { %853 = vmatprep.subr.mxu1 %v150_v41  ;;  %774 = vmatpush3.msra.mxu0 %v102_v42  ;;  %v129_v0 = vld [vmem:[%s1605_s1 + $0x100] sm:$0xff]  ;;  %v24_v8 = vld [vmem:[%s1606_s0 + $0x38] sm:$0xff]  ;;  %v30_v10 = vld [vmem:[%s1606_s0 + $0x68] sm:$0xff] }
  0x19   :  { %854 = vmatpush3.msra.mxu1 %v134_v43  ;;  %775 = vmatprep.subr.mxu0 %v117_v44  ;;  %v17_v2 = vld [vmem:[%s1606_s0] sm:$0xff]  ;;  %v28_v9 = vld [vmem:[%s1606_s0 + $0x58] sm:$0xff]  ;;  %v167_v11 = vld [vmem:[%s1605_s1 + $0x230] sm:$0xff] }
  0x1a   :  { %855 = vmatprep.subr.mxu1 %v149_v45  ;;  %776 = vmatpush3.msra.mxu0 %v101_v46  ;;  %v25_v6 = vld [vmem:[%s1606_s0 + $0x40] sm:$0xff]  ;;  %v27_v12 = vld [vmem:[%s1606_s0 + $0x50] sm:$0xff]  ;;  %v166_v16 = vld [vmem:[%s1605_s1 + $0x228] sm:$0xff] }
  0x1b   :  { %856 = vmatpush3.msra.mxu1 %v133_v47  ;;  %777 = vmatprep.subr.mxu0 %v116_v48  ;;  %v29_v13 = vld [vmem:[%s1606_s0 + $0x60] sm:$0xff]  ;;  %v35_v15 = vld [vmem:[%s1606_s0 + $0x90] sm:$0xff]  ;;  %v32_v17 = vld [vmem:[%s1606_s0 + $0x78] sm:$0xff] }
  0x1c   :  { %857 = vmatprep.subr.mxu1 %v148_v49  ;;  %778 = vmatpush3.msra.mxu0 %v100_v50  ;;  %v33_v14 = vld [vmem:[%s1606_s0 + $0x80] sm:$0xff]  ;;  %v34_v18 = vld [vmem:[%s1606_s0 + $0x88] sm:$0xff]  ;;  %v40_v20 = vld [vmem:[%s1606_s0 + $0xb8] sm:$0xff] }
  0x1d   :  { %858 = vmatpush3.msra.mxu1 %v132_v51  ;;  %779 = vmatprep.subr.mxu0 %v115_v52  ;;  %v38_v19 = vld [vmem:[%s1606_s0 + $0xa8] sm:$0xff]  ;;  %v165_v21 = vld [vmem:[%s1605_s1 + $0x220] sm:$0xff]  ;;  %v39_v23 = vld [vmem:[%s1606_s0 + $0xb0] sm:$0xff] }
  0x1e   :  { %859 = vmatprep.subr.mxu1 %v147_v53  ;;  %780 = vmatpush3.msra.mxu0 %v99_v54  ;;  %v37_v22 = vld [vmem:[%s1606_s0 + $0xa0] sm:$0xff]  ;;  %v43_v24 = vld [vmem:[%s1606_s0 + $0xd0] sm:$0xff]  ;;  %v164_v26 = vld [vmem:[%s1605_s1 + $0x218] sm:$0xff] }
  0x1f   :  { %860 = vmatpush3.msra.mxu1 %v131_v55  ;;  %781 = vmatprep.subr.mxu0 %v114_v56  ;;  %v45_v25 = vld [vmem:[%s1606_s0 + $0xe0] sm:$0xff]  ;;  %v42_v27 = vld [vmem:[%s1606_s0 + $0xc8] sm:$0xff]  ;;  %v44_v28 = vld [vmem:[%s1606_s0 + $0xd8] sm:$0xff] }
  0x20   :  { %861 = vmatprep.subr.mxu1 %v146_v57  ;;  %782 = vmatpush3.msra.mxu0 %v98_v58  ;;  %v48_v29 = vld [vmem:[%s1606_s0 + $0xf8] sm:$0xff]  ;;  %v50_v30 = vld [vmem:[%s1606_s0 + $0x108] sm:$0xff]  ;;  %v163_v31 = vld [vmem:[%s1605_s1 + $0x210] sm:$0xff] }
  0x21   :  { %862 = vmatpush3.msra.mxu1 %v130_v59  ;;  %783 = vmatprep.subr.mxu0 %v113_v60  ;;  %v47_v32 = vld [vmem:[%s1606_s0 + $0xf0] sm:$0xff]  ;;  %v49_v33 = vld [vmem:[%s1606_s0 + $0x100] sm:$0xff]  ;;  %v162_v36 = vld [vmem:[%s1605_s1 + $0x208] sm:$0xff] }
  0x22   :  { %863 = vmatprep.subr.mxu1 %v145_v61  ;;  %784 = vmatpush3.msra.mxu0 %v97_v62  ;;  %v53_v34 = vld [vmem:[%s1606_s0 + $0x120] sm:$0xff]  ;;  %v55_v35 = vld [vmem:[%s1606_s0 + $0x130] sm:$0xff]  ;;  %v52_v37 = vld [vmem:[%s1606_s0 + $0x118] sm:$0xff] }
  0x23   :  { %282 = vmatprep.mubr.f32.mxu0 %v18_v63  ;;  %864 = vmatpush3.msra.mxu1 %v129_v0  ;;  %v54_v38 = vld [vmem:[%s1606_s0 + $0x128] sm:$0xff]  ;;  %v60_v40 = vld [vmem:[%s1606_s0 + $0x158] sm:$0xff]  ;;  %v161_v41 = vld [vmem:[%s1605_s1 + $0x200] sm:$0xff] }
  0x24   :  { %427 = vmatprep.mubr.f32.mxu1 %v20_v1  ;;  %283 = vmatmul.mubr.f32.vlgmr.msra.gmra.mxu0 %v17_v2  ;;  %v58_v39 = vld [vmem:[%s1606_s0 + $0x148] sm:$0xff]  ;;  %v57_v42 = vld [vmem:[%s1606_s0 + $0x140] sm:$0xff]  ;;  %v59_v43 = vld [vmem:[%s1606_s0 + $0x150] sm:$0xff] }
  0x25   :  { %428 = vmatmul.mubr.f32.vlgmr.msra.gmra.mxu1 %v19_v3  ;;  %937 = vmatprep.subr.mxu0 %v168_v4  ;;  %v63_v44 = vld [vmem:[%s1606_s0 + $0x170] sm:$0xff]  ;;  %v65_v45 = vld [vmem:[%s1606_s0 + $0x180] sm:$0xff]  ;;  %v62_v46 = vld [vmem:[%s1606_s0 + $0x168] sm:$0xff] }
  0x26   :  { %977 = vmatprep.subr.mxu1 %v168_v4  ;;  %938 = vmatpush3.msra.mxu0 %v168_v4  ;;  %v64_v47 = vld [vmem:[%s1606_s0 + $0x178] sm:$0xff]  ;;  %v70_v49 = vld [vmem:[%s1606_s0 + $0x1a8] sm:$0xff]  ;;  %v67_v50 = vld [vmem:[%s1606_s0 + $0x190] sm:$0xff] }
  0x27   :  { %985 = vmatpush3.msra.mxu1 %v168_v4  ;;  %287 = vmatprep.mubr.f32.mxu0 %v23_v5  ;;  %v68_v48 = vld [vmem:[%s1606_s0 + $0x198] sm:$0xff]  ;;  %v69_v51 = vld [vmem:[%s1606_s0 + $0x1a0] sm:$0xff]  ;;  %v75_v53 = vld [vmem:[%s1606_s0 + $0x1d0] sm:$0xff] }
  0x28   :  { %432 = vmatprep.mubr.f32.mxu1 %v25_v6  ;;  %288 = vmatmul.mubr.f32.gmra.mxu0 %v22_v7  ;;  %v73_v52 = vld [vmem:[%s1606_s0 + $0x1c0] sm:$0xff]  ;;  %v72_v54 = vld [vmem:[%s1606_s0 + $0x1b8] sm:$0xff]  ;;  %v74_v55 = vld [vmem:[%s1606_s0 + $0x1c8] sm:$0xff] }
  0x29   :  { %433 = vmatmul.mubr.f32.gmra.mxu1 %v24_v8  ;;  %292 = vmatprep.mubr.f32.mxu0 %v28_v9  ;;  %v78_v56 = vld [vmem:[%s1606_s0 + $0x1e8] sm:$0xff]  ;;  %v80_v57 = vld [vmem:[%s1606_s0 + $0x1f8] sm:$0xff]  ;;  %v77_v58 = vld [vmem:[%s1606_s0 + $0x1e0] sm:$0xff] }
  0x2a   :  { %437 = vmatprep.mubr.f32.mxu1 %v30_v10  ;;  %939 = vmatprep.subr.mxu0 %v167_v11  ;;  %v79_v59 = vld [vmem:[%s1606_s0 + $0x1f0] sm:$0xff]  ;;  %v85_v61 = vld [vmem:[%s1606_s0 + $0x220] sm:$0xff]  ;;  %v82_v62 = vld [vmem:[%s1606_s0 + $0x208] sm:$0xff] }
  0x2b   :  { %978 = vmatprep.subr.mxu1 %v167_v11  ;;  %940 = vmatpush3.msra.mxu0 %v167_v11  ;;  %v83_v60 = vld [vmem:[%s1606_s0 + $0x210] sm:$0xff]  ;;  %v84_v63 = vld [vmem:[%s1606_s0 + $0x218] sm:$0xff]  ;;  %v90_v1 = vld [vmem:[%s1606_s0 + $0x248] sm:$0xff] }
  0x2c   :  { %986 = vmatpush3.msra.mxu1 %v167_v11  ;;  %293 = vmatmul.mubr.f32.gmra.mxu0 %v27_v12  ;;  %v88_v0 = vld [vmem:[%s1606_s0 + $0x238] sm:$0xff]  ;;  %v87_v2 = vld [vmem:[%s1606_s0 + $0x230] sm:$0xff]  ;;  %v89_v3 = vld [vmem:[%s1606_s0 + $0x240] sm:$0xff] }
  0x2d   :  { %438 = vmatmul.mubr.f32.gmra.mxu1 %v29_v13  ;;  %297 = vmatprep.mubr.f32.mxu0 %v33_v14  ;;  %v93_v4 = vld [vmem:[%s1606_s0 + $0x260] sm:$0xff]  ;;  %v95_v5 = vld [vmem:[%s1606_s0 + $0x270] sm:$0xff]  ;;  %v92_v6 = vld [vmem:[%s1606_s0 + $0x258] sm:$0xff] }
  0x2e   :  { %442 = vmatprep.mubr.f32.mxu1 %v35_v15  ;;  %941 = vmatprep.subr.mxu0 %v166_v16  ;;  %v94_v7 = vld [vmem:[%s1606_s0 + $0x268] sm:$0xff]  ;;  %v21_v8 = vld [vmem:[%s1606_s0 + $0x20] sm:$0xff]  ;;  %v31_v12 = vld [vmem:[%s1606_s0 + $0x70] sm:$0xff] }
  0x2f   :  { %979 = vmatprep.subr.mxu1 %v166_v16  ;;  %942 = vmatpush3.msra.mxu0 %v166_v16  ;;  %v61_v9 = vld [vmem:[%s1606_s0 + $0x160] sm:$0xff]  ;;  %v26_v10 = vld [vmem:[%s1606_s0 + $0x48] sm:$0xff]  ;;  %v71_v13 = vld [vmem:[%s1606_s0 + $0x1b0] sm:$0xff] }
  0x30   :  { %987 = vmatpush3.msra.mxu1 %v166_v16  ;;  %298 = vmatmul.mubr.f32.gmra.mxu0 %v32_v17  ;;  %v66_v11 = vld [vmem:[%s1606_s0 + $0x188] sm:$0xff]  ;;  %v36_v14 = vld [vmem:[%s1606_s0 + $0x98] sm:$0xff]  ;;  %v41_v16 = vld [vmem:[%s1606_s0 + $0xc0] sm:$0xff] }
  0x31   :  { %443 = vmatmul.mubr.f32.gmra.mxu1 %v34_v18  ;;  %302 = vmatprep.mubr.f32.mxu0 %v38_v19  ;;  %v76_v15 = vld [vmem:[%s1606_s0 + $0x1d8] sm:$0xff]  ;;  %v81_v17 = vld [vmem:[%s1606_s0 + $0x200] sm:$0xff]  ;;  %v46_v18 = vld [vmem:[%s1606_s0 + $0xe8] sm:$0xff] }
  0x32   :  { %447 = vmatprep.mubr.f32.mxu1 %v40_v20  ;;  %943 = vmatprep.subr.mxu0 %v165_v21  ;;  %v86_v19 = vld [vmem:[%s1606_s0 + $0x228] sm:$0xff]  ;;  %v51_v20 = vld [vmem:[%s1606_s0 + $0x110] sm:$0xff] }
  0x33   :  { %980 = vmatprep.subr.mxu1 %v165_v21  ;;  %944 = vmatpush3.msra.mxu0 %v165_v21 }
  0x34   :  { %988 = vmatpush3.msra.mxu1 %v165_v21  ;;  %303 = vmatmul.mubr.f32.gmra.mxu0 %v37_v22  ;;  %v91_v21 = vld [vmem:[%s1606_s0 + $0x250] sm:$0xff]  ;;  %v56_v22 = vld [vmem:[%s1606_s0 + $0x138] sm:$0xff] }
  0x35   :  { %448 = vmatmul.mubr.f32.gmra.mxu1 %v39_v23  ;;  %307 = vmatprep.mubr.f32.mxu0 %v43_v24  ;;  %v96_v23 = vld [vmem:[%s1606_s0 + $0x278] sm:$0xff] }
  0x36   :  { %452 = vmatprep.mubr.f32.mxu1 %v45_v25  ;;  %945 = vmatprep.subr.mxu0 %v164_v26 }
  0x37   :  { %981 = vmatprep.subr.mxu1 %v164_v26  ;;  %946 = vmatpush3.msra.mxu0 %v164_v26 }
  0x38   :  { %989 = vmatpush3.msra.mxu1 %v164_v26  ;;  %308 = vmatmul.mubr.f32.gmra.mxu0 %v42_v27 }
  0x39   :  { %453 = vmatmul.mubr.f32.gmra.mxu1 %v44_v28  ;;  %312 = vmatprep.mubr.f32.mxu0 %v48_v29 }
  0x3a   :  { %457 = vmatprep.mubr.f32.mxu1 %v50_v30  ;;  %947 = vmatprep.subr.mxu0 %v163_v31 }
  0x3b   :  { %982 = vmatprep.subr.mxu1 %v163_v31  ;;  %948 = vmatpush3.msra.mxu0 %v163_v31 }
  0x3c   :  { %990 = vmatpush3.msra.mxu1 %v163_v31  ;;  %313 = vmatmul.mubr.f32.gmra.mxu0 %v47_v32 }
  0x3d   :  { %458 = vmatmul.mubr.f32.gmra.mxu1 %v49_v33  ;;  %317 = vmatprep.mubr.f32.mxu0 %v53_v34 }
  0x3e   :  { %462 = vmatprep.mubr.f32.mxu1 %v55_v35  ;;  %949 = vmatprep.subr.mxu0 %v162_v36 }
  0x3f   :  { %983 = vmatprep.subr.mxu1 %v162_v36  ;;  %950 = vmatpush3.msra.mxu0 %v162_v36 }
  0x40   :  { %991 = vmatpush3.msra.mxu1 %v162_v36  ;;  %318 = vmatmul.mubr.f32.gmra.mxu0 %v52_v37 }
  0x41   :  { %463 = vmatmul.mubr.f32.gmra.mxu1 %v54_v38  ;;  %322 = vmatprep.mubr.f32.mxu0 %v58_v39 }
  0x42   :  { %467 = vmatprep.mubr.f32.mxu1 %v60_v40  ;;  %951 = vmatprep.subr.mxu0 %v161_v41 }
  0x43   :  { %984 = vmatprep.subr.mxu1 %v161_v41  ;;  %952 = vmatpush3.msra.mxu0 %v161_v41 }
  0x44   :  { %992 = vmatpush3.msra.mxu1 %v161_v41  ;;  %323 = vmatmul.mubr.f32.gmra.mxu0 %v57_v42 }
  0x45   :  { %468 = vmatmul.mubr.f32.gmra.mxu1 %v59_v43  ;;  %327 = vmatprep.mubr.f32.mxu0 %v63_v44 }
  0x46   :  { %472 = vmatprep.mubr.f32.mxu1 %v65_v45 }
  0x48   :  { %328 = vmatmul.mubr.f32.gmra.mxu0 %v62_v46 }
  0x49   :  { %473 = vmatmul.mubr.f32.gmra.mxu1 %v64_v47  ;;  %332 = vmatprep.mubr.f32.mxu0 %v68_v48 }
  0x4a   :  { %477 = vmatprep.mubr.f32.mxu1 %v70_v49 }
  0x4c   :  { %333 = vmatmul.mubr.f32.gmra.mxu0 %v67_v50 }
  0x4d   :  { %478 = vmatmul.mubr.f32.gmra.mxu1 %v69_v51  ;;  %337 = vmatprep.mubr.f32.mxu0 %v73_v52 }
  0x4e   :  { %482 = vmatprep.mubr.f32.mxu1 %v75_v53 }
  0x50   :  { %338 = vmatmul.mubr.f32.gmra.mxu0 %v72_v54 }
  0x51   :  { %483 = vmatmul.mubr.f32.gmra.mxu1 %v74_v55  ;;  %342 = vmatprep.mubr.f32.mxu0 %v78_v56 }
  0x52   :  { %487 = vmatprep.mubr.f32.mxu1 %v80_v57 }
  0x54   :  { %343 = vmatmul.mubr.f32.gmra.mxu0 %v77_v58 }
  0x55   :  { %488 = vmatmul.mubr.f32.gmra.mxu1 %v79_v59  ;;  %347 = vmatprep.mubr.f32.mxu0 %v83_v60 }
  0x56   :  { %492 = vmatprep.mubr.f32.mxu1 %v85_v61 }
  0x58   :  { %348 = vmatmul.mubr.f32.gmra.mxu0 %v82_v62 }
  0x59   :  { %493 = vmatmul.mubr.f32.gmra.mxu1 %v84_v63  ;;  %352 = vmatprep.mubr.f32.mxu0 %v88_v0 }
  0x5a   :  { %497 = vmatprep.mubr.f32.mxu1 %v90_v1 }
  0x5c   :  { %353 = vmatmul.mubr.f32.gmra.mxu0 %v87_v2 }
  0x5d   :  { %498 = vmatmul.mubr.f32.gmra.mxu1 %v89_v3  ;;  %357 = vmatprep.mubr.f32.mxu0 %v93_v4 }
  0x5e   :  { %502 = vmatprep.mubr.f32.mxu1 %v95_v5 }
  0x60   :  { %358 = vmatmul.mubr.f32.gmra.mxu0 %v92_v6 }
  0x61   :  { %503 = vmatmul.mubr.f32.gmra.mxu1 %v94_v7  ;;  %953 = vmatprep.mubr.msk.f32.mxu0 %vm169_vm0, %v21_v8 }
  0x62   :  { %965 = vmatprep.mubr.msk.f32.mxu1 %vm169_vm0, %v61_v9 }
  0x64   :  { %954 = vmatmul.mubr.msk.f32.vlgmr.msra.gmra.mxu0 %vm169_vm0, %v26_v10 }
  0x65   :  { %966 = vmatmul.mubr.msk.f32.vlgmr.msra.gmra.mxu1 %vm169_vm0, %v66_v11  ;;  %956 = vmatprep.mubr.msk.f32.mxu0 %vm169_vm0, %v31_v12 }
  0x66   :  { %968 = vmatprep.mubr.msk.f32.mxu1 %vm169_vm0, %v71_v13 }
  0x68   :  { %957 = vmatmul.mubr.msk.f32.gmra.mxu0 %vm169_vm0, %v36_v14 }
  0x69   :  { %969 = vmatmul.mubr.msk.f32.gmra.mxu1 %vm169_vm0, %v76_v15  ;;  %959 = vmatprep.mubr.msk.f32.mxu0 %vm169_vm0, %v41_v16 }
  0x6a   :  { %971 = vmatprep.mubr.msk.f32.mxu1 %vm169_vm0, %v81_v17 }
  0x6c   :  { %960 = vmatmul.mubr.msk.f32.gmra.mxu0 %vm169_vm0, %v46_v18 }
  0x6d   :  { %972 = vmatmul.mubr.msk.f32.gmra.mxu1 %vm169_vm0, %v86_v19  ;;  %962 = vmatprep.mubr.msk.f32.mxu0 %vm169_vm0, %v51_v20 }
  0x6e   :  { %974 = vmatprep.mubr.msk.f32.mxu1 %vm169_vm0, %v91_v21 }
  0x70   :  { %963 = vmatmul.mubr.msk.f32.gmra.mxu0 %vm169_vm0, %v56_v22 }
  0x71   :  { %975 = vmatmul.mubr.msk.f32.gmra.mxu1 %vm169_vm0, %v96_v23 }
  0xe4   :  { %v785_v24 = vpop.f32.mrf.mxu0 }
  0xe5   :  { %v865_v25 = vpop.f32.mrf.mxu1 }
  0xe6   :  { %v786_v26 = vpop.f32.mrf.mxu0 }
  0xe7   :  { %v866_v27 = vpop.f32.mrf.mxu1  ;;  %v787_v16 = vadd.f32 %v786_v26, %v785_v24 }
  0xe8   :  { %v788_v28 = vpop.f32.mrf.mxu0  ;;  %v867_v17 = vadd.f32 %v866_v27, %v865_v25 }
  0xe9   :  { %v868_v29 = vpop.f32.mrf.mxu1 }
  0xea   :  { %v789_v30 = vpop.f32.mrf.mxu0 }
  0xeb   :  { %v869_v31 = vpop.f32.mrf.mxu1  ;;  %v790_v18 = vadd.f32 %v789_v30, %v788_v28 }
  0xec   :  { %v791_v32 = vpop.f32.mrf.mxu0  ;;  %v870_v19 = vadd.f32 %v869_v31, %v868_v29 }
  0xed   :  { %v871_v33 = vpop.f32.mrf.mxu1 }
  0xee   :  { %v792_v34 = vpop.f32.mrf.mxu0 }
  0xef   :  { %v872_v35 = vpop.f32.mrf.mxu1  ;;  %v793_v20 = vadd.f32 %v792_v34, %v791_v32 }
  0xf0   :  { %v794_v36 = vpop.f32.mrf.mxu0  ;;  %v873_v21 = vadd.f32 %v872_v35, %v871_v33 }
  0xf1   :  { %v874_v37 = vpop.f32.mrf.mxu1 }
  0xf2   :  { %v795_v38 = vpop.f32.mrf.mxu0 }
  0xf3   :  { %v875_v39 = vpop.f32.mrf.mxu1  ;;  %v796_v22 = vadd.f32 %v795_v38, %v794_v36 }
  0xf4   :  { %v797_v40 = vpop.f32.mrf.mxu0  ;;  %v876_v23 = vadd.f32 %v875_v39, %v874_v37  ;;  %v435_v37 = vadd.f32 %v870_v19, %v790_v18  ;;  %v430_v39 = vadd.f32 %v867_v17, %v787_v16 }
  0xf5   :  { %v877_v41 = vpop.f32.mrf.mxu1 }
  0xf6   :  { %v798_v42 = vpop.f32.mrf.mxu0 }
  0xf7   :  { %v878_v43 = vpop.f32.mrf.mxu1  ;;  %v799_v25 = vadd.f32 %v798_v42, %v797_v40  ;;  %v445_v40 = vadd.f32 %v876_v23, %v796_v22  ;;  %v440_v42 = vadd.f32 %v873_v21, %v793_v20 }
  0xf8   :  { %v800_v44 = vpop.f32.mrf.mxu0  ;;  %v879_v27 = vadd.f32 %v878_v43, %v877_v41 }
  0xf9   :  { %v880_v45 = vpop.f32.mrf.mxu1 }
  0xfa   :  { %v801_v46 = vpop.f32.mrf.mxu0 }
  0xfb   :  { %v881_v47 = vpop.f32.mrf.mxu1  ;;  %v802_v28 = vadd.f32 %v801_v46, %v800_v44 }
  0xfc   :  { %v803_v48 = vpop.f32.mrf.mxu0  ;;  %v882_v30 = vadd.f32 %v881_v47, %v880_v45 }
  0xfd   :  { %v883_v49 = vpop.f32.mrf.mxu1 }
  0xfe   :  { %v804_v50 = vpop.f32.mrf.mxu0 }
  0xff   :  { %v884_v51 = vpop.f32.mrf.mxu1  ;;  %v805_v29 = vadd.f32 %v804_v50, %v803_v48  ;;  %v455_v50 = vadd.f32 %v882_v30, %v802_v28 }
 0x100   :  { %v806_v52 = vpop.f32.mrf.mxu0  ;;  %v885_v31 = vadd.f32 %v884_v51, %v883_v49  ;;  %v1490_v49 = vadd.f32 %v879_v27, %v799_v25 }
 0x101   :  { %v886_v53 = vpop.f32.mrf.mxu1 }
 0x102   :  { %v807_v54 = vpop.f32.mrf.mxu0  ;;  %v1492_v51 = vadd.f32 %v885_v31, %v805_v29 }
 0x103   :  { %v887_v55 = vpop.f32.mrf.mxu1  ;;  %v808_v41 = vadd.f32 %v807_v54, %v806_v52 }
 0x104   :  { %v809_v56 = vpop.f32.mrf.mxu0  ;;  %v888_v43 = vadd.f32 %v887_v55, %v886_v53  ;;  %v1497_v53 = vld [vmem:[%s1607_s2] ss:$0 sm:$0xff] }
 0x105   :  { %v889_v57 = vpop.f32.mrf.mxu1 }
 0x106   :  { %v810_v58 = vpop.f32.mrf.mxu0 }
 0x107   :  { %v890_v59 = vpop.f32.mrf.mxu1  ;;  %v811_v44 = vadd.f32 %v810_v58, %v809_v56  ;;  %v1499_v58 = vadd.f32 %v888_v43, %v808_v41 }
 0x108   :  { %v812_v60 = vpop.f32.mrf.mxu0  ;;  %v891_v46 = vadd.f32 %v890_v59, %v889_v57 }
 0x109   :  { %v892_v61 = vpop.f32.mrf.mxu1 }
 0x10a   :  { %v813_v62 = vpop.f32.mrf.mxu0  ;;  %v470_v57 = vadd.f32 %v891_v46, %v811_v44 }
 0x10b   :  { %v893_v63 = vpop.f32.mrf.mxu1  ;;  %v814_v32 = vadd.f32 %v813_v62, %v812_v60 }
 0x10c   :  { %v815_v0 = vpop.f32.mrf.mxu0  ;;  %v894_v34 = vadd.f32 %v893_v63, %v892_v61 }
 0x10d   :  { %v895_v1 = vpop.f32.mrf.mxu1 }
 0x10e   :  { %v816_v2 = vpop.f32.mrf.mxu0  ;;  %v475_v48 = vadd.f32 %v894_v34, %v814_v32 }
 0x10f   :  { %v896_v3 = vpop.f32.mrf.mxu1  ;;  %v817_v60 = vadd.f32 %v816_v2, %v815_v0 }
 0x110   :  { %v818_v4 = vpop.f32.mrf.mxu0  ;;  %v897_v61 = vadd.f32 %v896_v3, %v895_v1  ;;  %v1504_v3 = vld [vmem:[%s1608_s3] ss:$0 sm:$0xff] }
 0x111   :  { %v898_v5 = vpop.f32.mrf.mxu1 }
 0x112   :  { %v819_v6 = vpop.f32.mrf.mxu0 }
 0x113   :  { %v899_v7 = vpop.f32.mrf.mxu1  ;;  %v820_v62 = vadd.f32 %v819_v6, %v818_v4 }
 0x114   :  { %v821_v8 = vpop.f32.mrf.mxu0  ;;  %v900_v63 = vadd.f32 %v899_v7, %v898_v5 }
 0x115   :  { %v901_v9 = vpop.f32.mrf.mxu1 }
 0x116   :  { %v822_v10 = vpop.f32.mrf.mxu0 }
 0x117   :  { %v902_v11 = vpop.f32.mrf.mxu1  ;;  %v823_v18 = vadd.f32 %v822_v10, %v821_v8 }
 0x118   :  { %v824_v12 = vpop.f32.mrf.mxu0  ;;  %v903_v16 = vadd.f32 %v902_v11, %v901_v9  ;;  %v485_v11 = vadd.f32 %v900_v63, %v820_v62 }
 0x119   :  { %v904_v13 = vpop.f32.mrf.mxu1 }
 0x11a   :  { %v825_v14 = vpop.f32.mrf.mxu0 }
 0x11b   :  { %v905_v15 = vpop.f32.mrf.mxu1  ;;  %v826_v17 = vadd.f32 %v825_v14, %v824_v12 }
 0x11c   :  { %v827_v24 = vpop.f32.mrf.mxu0  ;;  %v906_v19 = vadd.f32 %v905_v15, %v904_v13  ;;  %v480_v13 = vadd.f32 %v897_v61, %v817_v60  ;;  %v490_v15 = vadd.f32 %v903_v16, %v823_v18 }
 0x11d   :  { %v907_v26 = vpop.f32.mrf.mxu1 }
 0x11e   :  { %v828_v33 = vpop.f32.mrf.mxu0  ;;  %v495_v14 = vadd.f32 %v906_v19, %v826_v17 }
 0x11f   :  { %v908_v35 = vpop.f32.mrf.mxu1  ;;  %v829_v59 = vadd.f32 %v828_v33, %v827_v24 }
 0x120   :  { %v830_v36 = vpop.f32.mrf.mxu0  ;;  %v909_v0 = vadd.f32 %v908_v35, %v907_v26 }
 0x121   :  { %v910_v38 = vpop.f32.mrf.mxu1 }
 0x122   :  { %v831_v45 = vpop.f32.mrf.mxu0  ;;  %v500_v30 = vadd.f32 %v909_v0, %v829_v59 }
 0x123   :  { %v911_v47 = vpop.f32.mrf.mxu1  ;;  %v832_v1 = vadd.f32 %v831_v45, %v830_v36 }
 0x124   :  { %v955_v52 = vpop.f32.mrf.mxu0  ;;  %v912_v2 = vadd.f32 %v911_v47, %v910_v38 }
 0x125   :  { %v967_v54 = vpop.f32.mrf.mxu1  ;;  %v580_v55 = vadd.f32 %v955_v52, %v435_v37 }
 0x126   :  { %v620_v56 = vadd.f32 %v967_v54, %v475_v48  ;;  %v574_v4 = vpop.f32.mrf.mxu0  ;;  %v505_v28 = vadd.f32 %v912_v2, %v832_v1 }
 0x127   :  { %v614_v5 = vpop.f32.mrf.mxu1  ;;  %v661_v6 = vmul.f32 %v1497_v53, %v580_v55  ;;  %v575_v8 = vadd.f32 %v574_v4, %v430_v39 }
 0x128   :  { %v669_v7 = vmul.f32 %v1497_v53, %v620_v56  ;;  %v615_v9 = vadd.f32 %v614_v5, %v470_v57  ;;  %v958_v10 = vpop.f32.mrf.mxu0 }
 0x129   :  { %v970_v12 = vpop.f32.mrf.mxu1  ;;  %v684_v20 = vadd.f32 %v1504_v3, %v661_v6  ;;  %v660_v22 = vmul.f32 %v1497_v53, %v575_v8  ;;  %v590_v24 = vadd.f32 %v958_v10, %v445_v40 }
 0x12a   :  { %v692_v21 = vadd.f32 %v1504_v3, %v669_v7  ;;  %v668_v23 = vmul.f32 %v1497_v53, %v615_v9  ;;  %v630_v26 = vadd.f32 %v970_v12, %v485_v11  ;;  %v584_v25 = vpop.f32.mrf.mxu0 }
 0x12b   :  { %v624_v27 = vpop.f32.mrf.mxu1  ;;  %v700_v29 = vmax.f32 %v684_v20, 0.0  ;;  %v683_v32 = vadd.f32 %v1504_v3, %v660_v22  ;;  %v663_v33 = vmul.f32 %v1497_v53, %v590_v24  ;;  %v585_v36 = vadd.f32 %v584_v25, %v440_v42 }
 0x12c   :  { %v708_v31 = vmax.f32 %v692_v21, 0.0  ;;  %v691_v34 = vadd.f32 %v1504_v3, %v668_v23  ;;  %v671_v35 = vmul.f32 %v1497_v53, %v630_v26  ;;  %v625_v38 = vadd.f32 %v624_v27, %v480_v13  ;;  %v961_v37 = vpop.f32.mrf.mxu0 }
 0x12d   :  { %v973_v39 = vpop.f32.mrf.mxu1  ;;  %716 = vst.msk [vmem:[%s1609_s4 + $0x8] sm:$0xff] %vm169_vm0, %v700_v29  ;;  %v699_v40 = vmax.f32 %v683_v32, 0.0  ;;  %v600_v43 = vadd.f32 %v961_v37, %v455_v50  ;;  %v686_v46 = vadd.f32 %v1504_v3, %v663_v33  ;;  %v662_v45 = vmul.f32 %v1497_v53, %v585_v36 }
 0x12e   :  { %724 = vst.msk [vmem:[%s1609_s4 + $0x48] sm:$0xff] %vm169_vm0, %v708_v31  ;;  %v707_v41 = vmax.f32 %v691_v34, 0.0  ;;  %v640_v44 = vadd.f32 %v973_v39, %v495_v14  ;;  %v694_v42 = vadd.f32 %v1504_v3, %v671_v35  ;;  %v670_v47 = vmul.f32 %v1497_v53, %v625_v38  ;;  %v594_v48 = vpop.f32.mrf.mxu0 }
 0x12f   :  { %v634_v60 = vpop.f32.mrf.mxu1  ;;  %715 = vst.msk [vmem:[%s1609_s4] sm:$0xff] %vm169_vm0, %v699_v40  ;;  %v665_v50 = vmul.f32 %v1497_v53, %v600_v43  ;;  %v595_v62 = vadd.f32 %v594_v48, %v1490_v49  ;;  %v702_v18 = vmax.f32 %v686_v46, 0.0  ;;  %v685_v17 = vadd.f32 %v1504_v3, %v662_v45 }
 0x130   :  { %723 = vst.msk [vmem:[%s1609_s4 + $0x40] sm:$0xff] %vm169_vm0, %v707_v41  ;;  %v673_v61 = vmul.f32 %v1497_v53, %v640_v44  ;;  %v635_v63 = vadd.f32 %v634_v60, %v490_v15  ;;  %v710_v16 = vmax.f32 %v694_v42, 0.0  ;;  %v693_v19 = vadd.f32 %v1504_v3, %v670_v47  ;;  %v964_v52 = vpop.f32.mrf.mxu0 }
 0x131   :  { %v976_v54 = vpop.f32.mrf.mxu1  ;;  %v688_v55 = vadd.f32 %v1504_v3, %v665_v50  ;;  %v664_v57 = vmul.f32 %v1497_v53, %v595_v62  ;;  %718 = vst.msk [vmem:[%s1609_s4 + $0x18] sm:$0xff] %vm169_vm0, %v702_v18  ;;  %v701_v49 = vmax.f32 %v685_v17, 0.0  ;;  %v610_v1 = vadd.f32 %v964_v52, %v1499_v58 }
 0x132   :  { %v696_v56 = vadd.f32 %v1504_v3, %v673_v61  ;;  %v672_v59 = vmul.f32 %v1497_v53, %v635_v63  ;;  %726 = vst.msk [vmem:[%s1609_s4 + $0x58] sm:$0xff] %vm169_vm0, %v710_v16  ;;  %v709_v0 = vmax.f32 %v693_v19, 0.0  ;;  %v650_v2 = vadd.f32 %v976_v54, %v505_v28  ;;  %v604_v4 = vpop.f32.mrf.mxu0 }
 0x133   :  { %v644_v5 = vpop.f32.mrf.mxu1  ;;  %v704_v6 = vmax.f32 %v688_v55, 0.0  ;;  %v687_v8 = vadd.f32 %v1504_v3, %v664_v57  ;;  %717 = vst.msk [vmem:[%s1609_s4 + $0x10] sm:$0xff] %vm169_vm0, %v701_v49  ;;  %v667_v58 = vmul.f32 %v1497_v53, %v610_v1  ;;  %v605_v11 = vadd.f32 %v604_v4, %v1492_v51 }
 0x134   :  { %v712_v7 = vmax.f32 %v696_v56, 0.0  ;;  %v695_v9 = vadd.f32 %v1504_v3, %v672_v59  ;;  %725 = vst.msk [vmem:[%s1609_s4 + $0x50] sm:$0xff] %vm169_vm0, %v709_v0  ;;  %v675_v10 = vmul.f32 %v1497_v53, %v650_v2  ;;  %v645_v12 = vadd.f32 %v644_v5, %v500_v30 }
 0x135   :  { %720 = vst.msk [vmem:[%s1609_s4 + $0x28] sm:$0xff] %vm169_vm0, %v704_v6  ;;  %v703_v13 = vmax.f32 %v687_v8, 0.0  ;;  %v690_v15 = vadd.f32 %v1504_v3, %v667_v58  ;;  %v666_v21 = vmul.f32 %v1497_v53, %v605_v11 }
 0x136   :  { %728 = vst.msk [vmem:[%s1609_s4 + $0x68] sm:$0xff] %vm169_vm0, %v712_v7  ;;  %v711_v14 = vmax.f32 %v695_v9, 0.0  ;;  %v698_v20 = vadd.f32 %v1504_v3, %v675_v10  ;;  %v674_v51 = vmul.f32 %v1497_v53, %v645_v12 }
 0x137   :  { %719 = vst.msk [vmem:[%s1609_s4 + $0x20] sm:$0xff] %vm169_vm0, %v703_v13  ;;  %v706_v22 = vmax.f32 %v690_v15, 0.0  ;;  %v689_v24 = vadd.f32 %v1504_v3, %v666_v21 }
 0x138   :  { %727 = vst.msk [vmem:[%s1609_s4 + $0x60] sm:$0xff] %vm169_vm0, %v711_v14  ;;  %v714_v23 = vmax.f32 %v698_v20, 0.0  ;;  %v697_v26 = vadd.f32 %v1504_v3, %v674_v51 }
 0x139   :  { %722 = vst.msk [vmem:[%s1609_s4 + $0x38] sm:$0xff] %vm169_vm0, %v706_v22  ;;  %v705_v53 = vmax.f32 %v689_v24, 0.0 }
 0x13a   :  { %730 = vst.msk [vmem:[%s1609_s4 + $0x78] sm:$0xff] %vm169_vm0, %v714_v23  ;;  %v713_v25 = vmax.f32 %v697_v26, 0.0 }
 0x13b   :  { %721 = vst.msk [vmem:[%s1609_s4 + $0x30] sm:$0xff] %vm169_vm0, %v705_v53 }
 0x13c   :  { %729 = vst.msk [vmem:[%s1609_s4 + $0x70] sm:$0xff] %vm169_vm0, %v713_v25 }

// kernel: feature_generator_resnet_forward.19
= control target key start
LH: loop header
LB: loop body
LE: loop exit
PB: predicated region body
PF: predicated region fallthrough
CT: control target
= control target key end

     0   :  { %vm172_vm0 = vcmask 523264   ;;  %s1705_s1 = inlined_call_operand.vmem [shape: f32[576,64], index: 1, kind: input, shape index: {}]   ;;  %s1706_s0 = inlined_call_operand.vmem [shape: f32[128,576], index: 0, kind: input, shape index: {}]   ;;  %s1707_s2 = inlined_call_operand.vmem [shape: f32[1,64], index: 2, kind: input, shape index: {}]   ;;  %s1708_s3 = inlined_call_operand.vmem [shape: f32[1,64], index: 3, kind: input, shape index: {}]   ;;  %s1709_s4 = inlined_call_operand.vmem [shape: f32[128,64], index: 4, kind: input, shape index: {}]   ;;  %s1710_s5 = inlined_call_operand.vmem [shape: f32[128,64], index: 5, kind: output, shape index: {}]  }
   0x1   :  { %v131_v0 = vld [vmem:[%s1705_s1 + $0xf8] sm:$0xff]  ;;  %v130_v4 = vld [vmem:[%s1705_s1 + $0xf0] sm:$0xff]  ;;  %v129_v8 = vld [vmem:[%s1705_s1 + $0xe8] sm:$0xff] }
   0x2   :  { %v163_v1 = vld [vmem:[%s1705_s1 + $0x1f8] sm:$0xff]  ;;  %788 = vmatprep.subr.mxu0 %v131_v0  ;;  %v162_v5 = vld [vmem:[%s1705_s1 + $0x1f0] sm:$0xff]  ;;  %v161_v9 = vld [vmem:[%s1705_s1 + $0x1e8] sm:$0xff] }
   0x3   :  { %v115_v2 = vld [vmem:[%s1705_s1 + $0x78] sm:$0xff]  ;;  %868 = vmatprep.subr.mxu1 %v163_v1  ;;  %v114_v6 = vld [vmem:[%s1705_s1 + $0x70] sm:$0xff]  ;;  %v113_v10 = vld [vmem:[%s1705_s1 + $0x68] sm:$0xff] }
   0x4   :  { %v147_v3 = vld [vmem:[%s1705_s1 + $0x178] sm:$0xff]  ;;  %789 = vmatpush3.msra.mxu0 %v115_v2  ;;  %v146_v7 = vld [vmem:[%s1705_s1 + $0x170] sm:$0xff]  ;;  %v145_v11 = vld [vmem:[%s1705_s1 + $0x168] sm:$0xff] }
   0x5   :  { %869 = vmatpush3.msra.mxu1 %v147_v3  ;;  %790 = vmatprep.subr.mxu0 %v130_v4  ;;  %v128_v12 = vld [vmem:[%s1705_s1 + $0xe0] sm:$0xff]  ;;  %v127_v16 = vld [vmem:[%s1705_s1 + $0xd8] sm:$0xff]  ;;  %v126_v20 = vld [vmem:[%s1705_s1 + $0xd0] sm:$0xff] }
   0x6   :  { %870 = vmatprep.subr.mxu1 %v162_v5  ;;  %791 = vmatpush3.msra.mxu0 %v114_v6  ;;  %v160_v13 = vld [vmem:[%s1705_s1 + $0x1e0] sm:$0xff]  ;;  %v159_v17 = vld [vmem:[%s1705_s1 + $0x1d8] sm:$0xff]  ;;  %v158_v21 = vld [vmem:[%s1705_s1 + $0x1d0] sm:$0xff] }
   0x7   :  { %871 = vmatpush3.msra.mxu1 %v146_v7  ;;  %792 = vmatprep.subr.mxu0 %v129_v8  ;;  %v112_v14 = vld [vmem:[%s1705_s1 + $0x60] sm:$0xff]  ;;  %v111_v18 = vld [vmem:[%s1705_s1 + $0x58] sm:$0xff]  ;;  %v110_v22 = vld [vmem:[%s1705_s1 + $0x50] sm:$0xff] }
   0x8   :  { %872 = vmatprep.subr.mxu1 %v161_v9  ;;  %v144_v15 = vld [vmem:[%s1705_s1 + $0x160] sm:$0xff]  ;;  %793 = vmatpush3.msra.mxu0 %v113_v10  ;;  %v143_v19 = vld [vmem:[%s1705_s1 + $0x158] sm:$0xff]  ;;  %v142_v23 = vld [vmem:[%s1705_s1 + $0x150] sm:$0xff] }
   0x9   :  { %873 = vmatpush3.msra.mxu1 %v145_v11  ;;  %794 = vmatprep.subr.mxu0 %v128_v12  ;;  %v125_v24 = vld [vmem:[%s1705_s1 + $0xc8] sm:$0xff]  ;;  %v124_v28 = vld [vmem:[%s1705_s1 + $0xc0] sm:$0xff]  ;;  %v123_v32 = vld [vmem:[%s1705_s1 + $0xb8] sm:$0xff] }
   0xa   :  { %874 = vmatprep.subr.mxu1 %v160_v13  ;;  %795 = vmatpush3.msra.mxu0 %v112_v14  ;;  %v157_v25 = vld [vmem:[%s1705_s1 + $0x1c8] sm:$0xff]  ;;  %v156_v29 = vld [vmem:[%s1705_s1 + $0x1c0] sm:$0xff]  ;;  %v155_v33 = vld [vmem:[%s1705_s1 + $0x1b8] sm:$0xff] }
   0xb   :  { %875 = vmatpush3.msra.mxu1 %v144_v15  ;;  %796 = vmatprep.subr.mxu0 %v127_v16  ;;  %v109_v26 = vld [vmem:[%s1705_s1 + $0x48] sm:$0xff]  ;;  %v108_v30 = vld [vmem:[%s1705_s1 + $0x40] sm:$0xff]  ;;  %v107_v34 = vld [vmem:[%s1705_s1 + $0x38] sm:$0xff] }
   0xc   :  { %876 = vmatprep.subr.mxu1 %v159_v17  ;;  %797 = vmatpush3.msra.mxu0 %v111_v18  ;;  %v141_v27 = vld [vmem:[%s1705_s1 + $0x148] sm:$0xff]  ;;  %v140_v31 = vld [vmem:[%s1705_s1 + $0x140] sm:$0xff]  ;;  %v139_v35 = vld [vmem:[%s1705_s1 + $0x138] sm:$0xff] }
   0xd   :  { %877 = vmatpush3.msra.mxu1 %v143_v19  ;;  %798 = vmatprep.subr.mxu0 %v126_v20  ;;  %v122_v36 = vld [vmem:[%s1705_s1 + $0xb0] sm:$0xff]  ;;  %v121_v40 = vld [vmem:[%s1705_s1 + $0xa8] sm:$0xff]  ;;  %v120_v44 = vld [vmem:[%s1705_s1 + $0xa0] sm:$0xff] }
   0xe   :  { %878 = vmatprep.subr.mxu1 %v158_v21  ;;  %799 = vmatpush3.msra.mxu0 %v110_v22  ;;  %v154_v37 = vld [vmem:[%s1705_s1 + $0x1b0] sm:$0xff]  ;;  %v153_v41 = vld [vmem:[%s1705_s1 + $0x1a8] sm:$0xff]  ;;  %v152_v45 = vld [vmem:[%s1705_s1 + $0x1a0] sm:$0xff] }
   0xf   :  { %879 = vmatpush3.msra.mxu1 %v142_v23  ;;  %800 = vmatprep.subr.mxu0 %v125_v24  ;;  %v106_v38 = vld [vmem:[%s1705_s1 + $0x30] sm:$0xff]  ;;  %v105_v42 = vld [vmem:[%s1705_s1 + $0x28] sm:$0xff]  ;;  %v104_v46 = vld [vmem:[%s1705_s1 + $0x20] sm:$0xff] }
  0x10   :  { %880 = vmatprep.subr.mxu1 %v157_v25  ;;  %801 = vmatpush3.msra.mxu0 %v109_v26  ;;  %v138_v39 = vld [vmem:[%s1705_s1 + $0x130] sm:$0xff]  ;;  %v137_v43 = vld [vmem:[%s1705_s1 + $0x128] sm:$0xff]  ;;  %v136_v47 = vld [vmem:[%s1705_s1 + $0x120] sm:$0xff] }
  0x11   :  { %881 = vmatpush3.msra.mxu1 %v141_v27  ;;  %802 = vmatprep.subr.mxu0 %v124_v28  ;;  %v119_v48 = vld [vmem:[%s1705_s1 + $0x98] sm:$0xff]  ;;  %v118_v52 = vld [vmem:[%s1705_s1 + $0x90] sm:$0xff]  ;;  %v117_v56 = vld [vmem:[%s1705_s1 + $0x88] sm:$0xff] }
  0x12   :  { %882 = vmatprep.subr.mxu1 %v156_v29  ;;  %803 = vmatpush3.msra.mxu0 %v108_v30  ;;  %v151_v49 = vld [vmem:[%s1705_s1 + $0x198] sm:$0xff]  ;;  %v150_v53 = vld [vmem:[%s1705_s1 + $0x190] sm:$0xff]  ;;  %v149_v57 = vld [vmem:[%s1705_s1 + $0x188] sm:$0xff] }
  0x13   :  { %883 = vmatpush3.msra.mxu1 %v140_v31  ;;  %804 = vmatprep.subr.mxu0 %v123_v32  ;;  %v103_v50 = vld [vmem:[%s1705_s1 + $0x18] sm:$0xff]  ;;  %v102_v54 = vld [vmem:[%s1705_s1 + $0x10] sm:$0xff]  ;;  %v101_v58 = vld [vmem:[%s1705_s1 + $0x8] sm:$0xff] }
  0x14   :  { %884 = vmatprep.subr.mxu1 %v155_v33  ;;  %805 = vmatpush3.msra.mxu0 %v107_v34  ;;  %v135_v51 = vld [vmem:[%s1705_s1 + $0x118] sm:$0xff]  ;;  %v134_v55 = vld [vmem:[%s1705_s1 + $0x110] sm:$0xff]  ;;  %v133_v59 = vld [vmem:[%s1705_s1 + $0x108] sm:$0xff] }
  0x15   :  { %885 = vmatpush3.msra.mxu1 %v139_v35  ;;  %806 = vmatprep.subr.mxu0 %v122_v36  ;;  %v116_v60 = vld [vmem:[%s1705_s1 + $0x80] sm:$0xff]  ;;  %v21_v63 = vld [vmem:[%s1706_s0 + $0x8] sm:$0xff]  ;;  %v23_v1 = vld [vmem:[%s1706_s0 + $0x18] sm:$0xff] }
  0x16   :  { %886 = vmatprep.subr.mxu1 %v154_v37  ;;  %807 = vmatpush3.msra.mxu0 %v106_v38  ;;  %v148_v61 = vld [vmem:[%s1705_s1 + $0x180] sm:$0xff]  ;;  %v22_v3 = vld [vmem:[%s1706_s0 + $0x10] sm:$0xff]  ;;  %v171_v4 = vld [vmem:[%s1705_s1 + $0x238] sm:$0xff] }
  0x17   :  { %887 = vmatpush3.msra.mxu1 %v138_v39  ;;  %808 = vmatprep.subr.mxu0 %v121_v40  ;;  %v100_v62 = vld [vmem:[%s1705_s1] sm:$0xff]  ;;  %v26_v5 = vld [vmem:[%s1706_s0 + $0x30] sm:$0xff]  ;;  %v25_v7 = vld [vmem:[%s1706_s0 + $0x28] sm:$0xff] }
  0x18   :  { %888 = vmatprep.subr.mxu1 %v153_v41  ;;  %809 = vmatpush3.msra.mxu0 %v105_v42  ;;  %v132_v0 = vld [vmem:[%s1705_s1 + $0x100] sm:$0xff]  ;;  %v27_v8 = vld [vmem:[%s1706_s0 + $0x38] sm:$0xff]  ;;  %v33_v10 = vld [vmem:[%s1706_s0 + $0x68] sm:$0xff] }
  0x19   :  { %889 = vmatpush3.msra.mxu1 %v137_v43  ;;  %810 = vmatprep.subr.mxu0 %v120_v44  ;;  %v20_v2 = vld [vmem:[%s1706_s0] sm:$0xff]  ;;  %v31_v9 = vld [vmem:[%s1706_s0 + $0x58] sm:$0xff]  ;;  %v170_v11 = vld [vmem:[%s1705_s1 + $0x230] sm:$0xff] }
  0x1a   :  { %890 = vmatprep.subr.mxu1 %v152_v45  ;;  %811 = vmatpush3.msra.mxu0 %v104_v46  ;;  %v28_v6 = vld [vmem:[%s1706_s0 + $0x40] sm:$0xff]  ;;  %v30_v12 = vld [vmem:[%s1706_s0 + $0x50] sm:$0xff]  ;;  %v169_v16 = vld [vmem:[%s1705_s1 + $0x228] sm:$0xff] }
  0x1b   :  { %891 = vmatpush3.msra.mxu1 %v136_v47  ;;  %812 = vmatprep.subr.mxu0 %v119_v48  ;;  %v32_v13 = vld [vmem:[%s1706_s0 + $0x60] sm:$0xff]  ;;  %v38_v15 = vld [vmem:[%s1706_s0 + $0x90] sm:$0xff]  ;;  %v35_v17 = vld [vmem:[%s1706_s0 + $0x78] sm:$0xff] }
  0x1c   :  { %892 = vmatprep.subr.mxu1 %v151_v49  ;;  %813 = vmatpush3.msra.mxu0 %v103_v50  ;;  %v36_v14 = vld [vmem:[%s1706_s0 + $0x80] sm:$0xff]  ;;  %v37_v18 = vld [vmem:[%s1706_s0 + $0x88] sm:$0xff]  ;;  %v43_v20 = vld [vmem:[%s1706_s0 + $0xb8] sm:$0xff] }
  0x1d   :  { %893 = vmatpush3.msra.mxu1 %v135_v51  ;;  %814 = vmatprep.subr.mxu0 %v118_v52  ;;  %v41_v19 = vld [vmem:[%s1706_s0 + $0xa8] sm:$0xff]  ;;  %v168_v21 = vld [vmem:[%s1705_s1 + $0x220] sm:$0xff]  ;;  %v42_v23 = vld [vmem:[%s1706_s0 + $0xb0] sm:$0xff] }
  0x1e   :  { %894 = vmatprep.subr.mxu1 %v150_v53  ;;  %815 = vmatpush3.msra.mxu0 %v102_v54  ;;  %v40_v22 = vld [vmem:[%s1706_s0 + $0xa0] sm:$0xff]  ;;  %v46_v24 = vld [vmem:[%s1706_s0 + $0xd0] sm:$0xff]  ;;  %v167_v26 = vld [vmem:[%s1705_s1 + $0x218] sm:$0xff] }
  0x1f   :  { %895 = vmatpush3.msra.mxu1 %v134_v55  ;;  %816 = vmatprep.subr.mxu0 %v117_v56  ;;  %v48_v25 = vld [vmem:[%s1706_s0 + $0xe0] sm:$0xff]  ;;  %v45_v27 = vld [vmem:[%s1706_s0 + $0xc8] sm:$0xff]  ;;  %v47_v28 = vld [vmem:[%s1706_s0 + $0xd8] sm:$0xff] }
  0x20   :  { %896 = vmatprep.subr.mxu1 %v149_v57  ;;  %817 = vmatpush3.msra.mxu0 %v101_v58  ;;  %v51_v29 = vld [vmem:[%s1706_s0 + $0xf8] sm:$0xff]  ;;  %v53_v30 = vld [vmem:[%s1706_s0 + $0x108] sm:$0xff]  ;;  %v166_v31 = vld [vmem:[%s1705_s1 + $0x210] sm:$0xff] }
  0x21   :  { %897 = vmatpush3.msra.mxu1 %v133_v59  ;;  %818 = vmatprep.subr.mxu0 %v116_v60  ;;  %v50_v32 = vld [vmem:[%s1706_s0 + $0xf0] sm:$0xff]  ;;  %v52_v33 = vld [vmem:[%s1706_s0 + $0x100] sm:$0xff]  ;;  %v165_v36 = vld [vmem:[%s1705_s1 + $0x208] sm:$0xff] }
  0x22   :  { %898 = vmatprep.subr.mxu1 %v148_v61  ;;  %819 = vmatpush3.msra.mxu0 %v100_v62  ;;  %v56_v34 = vld [vmem:[%s1706_s0 + $0x120] sm:$0xff]  ;;  %v58_v35 = vld [vmem:[%s1706_s0 + $0x130] sm:$0xff]  ;;  %v55_v37 = vld [vmem:[%s1706_s0 + $0x118] sm:$0xff] }
  0x23   :  { %285 = vmatprep.mubr.f32.mxu0 %v21_v63  ;;  %899 = vmatpush3.msra.mxu1 %v132_v0  ;;  %v57_v38 = vld [vmem:[%s1706_s0 + $0x128] sm:$0xff]  ;;  %v63_v40 = vld [vmem:[%s1706_s0 + $0x158] sm:$0xff]  ;;  %v164_v41 = vld [vmem:[%s1705_s1 + $0x200] sm:$0xff] }
  0x24   :  { %430 = vmatprep.mubr.f32.mxu1 %v23_v1  ;;  %286 = vmatmul.mubr.f32.vlgmr.msra.gmra.mxu0 %v20_v2  ;;  %v61_v39 = vld [vmem:[%s1706_s0 + $0x148] sm:$0xff]  ;;  %v60_v42 = vld [vmem:[%s1706_s0 + $0x140] sm:$0xff]  ;;  %v62_v43 = vld [vmem:[%s1706_s0 + $0x150] sm:$0xff] }
  0x25   :  { %431 = vmatmul.mubr.f32.vlgmr.msra.gmra.mxu1 %v22_v3  ;;  %972 = vmatprep.subr.mxu0 %v171_v4  ;;  %v66_v44 = vld [vmem:[%s1706_s0 + $0x170] sm:$0xff]  ;;  %v68_v45 = vld [vmem:[%s1706_s0 + $0x180] sm:$0xff]  ;;  %v65_v46 = vld [vmem:[%s1706_s0 + $0x168] sm:$0xff] }
  0x26   :  { %1012 = vmatprep.subr.mxu1 %v171_v4  ;;  %973 = vmatpush3.msra.mxu0 %v171_v4  ;;  %v67_v47 = vld [vmem:[%s1706_s0 + $0x178] sm:$0xff]  ;;  %v73_v49 = vld [vmem:[%s1706_s0 + $0x1a8] sm:$0xff]  ;;  %v70_v50 = vld [vmem:[%s1706_s0 + $0x190] sm:$0xff] }
  0x27   :  { %1020 = vmatpush3.msra.mxu1 %v171_v4  ;;  %290 = vmatprep.mubr.f32.mxu0 %v26_v5  ;;  %v71_v48 = vld [vmem:[%s1706_s0 + $0x198] sm:$0xff]  ;;  %v72_v51 = vld [vmem:[%s1706_s0 + $0x1a0] sm:$0xff]  ;;  %v78_v53 = vld [vmem:[%s1706_s0 + $0x1d0] sm:$0xff] }
  0x28   :  { %435 = vmatprep.mubr.f32.mxu1 %v28_v6  ;;  %291 = vmatmul.mubr.f32.gmra.mxu0 %v25_v7  ;;  %v76_v52 = vld [vmem:[%s1706_s0 + $0x1c0] sm:$0xff]  ;;  %v75_v54 = vld [vmem:[%s1706_s0 + $0x1b8] sm:$0xff]  ;;  %v77_v55 = vld [vmem:[%s1706_s0 + $0x1c8] sm:$0xff] }
  0x29   :  { %436 = vmatmul.mubr.f32.gmra.mxu1 %v27_v8  ;;  %295 = vmatprep.mubr.f32.mxu0 %v31_v9  ;;  %v81_v56 = vld [vmem:[%s1706_s0 + $0x1e8] sm:$0xff]  ;;  %v83_v57 = vld [vmem:[%s1706_s0 + $0x1f8] sm:$0xff]  ;;  %v80_v58 = vld [vmem:[%s1706_s0 + $0x1e0] sm:$0xff] }
  0x2a   :  { %440 = vmatprep.mubr.f32.mxu1 %v33_v10  ;;  %974 = vmatprep.subr.mxu0 %v170_v11  ;;  %v82_v59 = vld [vmem:[%s1706_s0 + $0x1f0] sm:$0xff]  ;;  %v88_v61 = vld [vmem:[%s1706_s0 + $0x220] sm:$0xff]  ;;  %v85_v62 = vld [vmem:[%s1706_s0 + $0x208] sm:$0xff] }
  0x2b   :  { %1013 = vmatprep.subr.mxu1 %v170_v11  ;;  %975 = vmatpush3.msra.mxu0 %v170_v11  ;;  %v86_v60 = vld [vmem:[%s1706_s0 + $0x210] sm:$0xff]  ;;  %v87_v63 = vld [vmem:[%s1706_s0 + $0x218] sm:$0xff]  ;;  %v93_v1 = vld [vmem:[%s1706_s0 + $0x248] sm:$0xff] }
  0x2c   :  { %1021 = vmatpush3.msra.mxu1 %v170_v11  ;;  %296 = vmatmul.mubr.f32.gmra.mxu0 %v30_v12  ;;  %v91_v0 = vld [vmem:[%s1706_s0 + $0x238] sm:$0xff]  ;;  %v90_v2 = vld [vmem:[%s1706_s0 + $0x230] sm:$0xff]  ;;  %v92_v3 = vld [vmem:[%s1706_s0 + $0x240] sm:$0xff] }
  0x2d   :  { %441 = vmatmul.mubr.f32.gmra.mxu1 %v32_v13  ;;  %300 = vmatprep.mubr.f32.mxu0 %v36_v14  ;;  %v96_v4 = vld [vmem:[%s1706_s0 + $0x260] sm:$0xff]  ;;  %v98_v5 = vld [vmem:[%s1706_s0 + $0x270] sm:$0xff]  ;;  %v95_v6 = vld [vmem:[%s1706_s0 + $0x258] sm:$0xff] }
  0x2e   :  { %445 = vmatprep.mubr.f32.mxu1 %v38_v15  ;;  %976 = vmatprep.subr.mxu0 %v169_v16  ;;  %v97_v7 = vld [vmem:[%s1706_s0 + $0x268] sm:$0xff]  ;;  %v24_v8 = vld [vmem:[%s1706_s0 + $0x20] sm:$0xff]  ;;  %v34_v12 = vld [vmem:[%s1706_s0 + $0x70] sm:$0xff] }
  0x2f   :  { %1014 = vmatprep.subr.mxu1 %v169_v16  ;;  %977 = vmatpush3.msra.mxu0 %v169_v16  ;;  %v64_v9 = vld [vmem:[%s1706_s0 + $0x160] sm:$0xff]  ;;  %v29_v10 = vld [vmem:[%s1706_s0 + $0x48] sm:$0xff]  ;;  %v74_v13 = vld [vmem:[%s1706_s0 + $0x1b0] sm:$0xff] }
  0x30   :  { %1022 = vmatpush3.msra.mxu1 %v169_v16  ;;  %301 = vmatmul.mubr.f32.gmra.mxu0 %v35_v17  ;;  %v69_v11 = vld [vmem:[%s1706_s0 + $0x188] sm:$0xff]  ;;  %v39_v14 = vld [vmem:[%s1706_s0 + $0x98] sm:$0xff]  ;;  %v44_v16 = vld [vmem:[%s1706_s0 + $0xc0] sm:$0xff] }
  0x31   :  { %446 = vmatmul.mubr.f32.gmra.mxu1 %v37_v18  ;;  %305 = vmatprep.mubr.f32.mxu0 %v41_v19  ;;  %v79_v15 = vld [vmem:[%s1706_s0 + $0x1d8] sm:$0xff]  ;;  %v84_v17 = vld [vmem:[%s1706_s0 + $0x200] sm:$0xff]  ;;  %v49_v18 = vld [vmem:[%s1706_s0 + $0xe8] sm:$0xff] }
  0x32   :  { %450 = vmatprep.mubr.f32.mxu1 %v43_v20  ;;  %978 = vmatprep.subr.mxu0 %v168_v21  ;;  %v89_v19 = vld [vmem:[%s1706_s0 + $0x228] sm:$0xff]  ;;  %v54_v20 = vld [vmem:[%s1706_s0 + $0x110] sm:$0xff] }
  0x33   :  { %1015 = vmatprep.subr.mxu1 %v168_v21  ;;  %979 = vmatpush3.msra.mxu0 %v168_v21 }
  0x34   :  { %1023 = vmatpush3.msra.mxu1 %v168_v21  ;;  %306 = vmatmul.mubr.f32.gmra.mxu0 %v40_v22  ;;  %v94_v21 = vld [vmem:[%s1706_s0 + $0x250] sm:$0xff]  ;;  %v59_v22 = vld [vmem:[%s1706_s0 + $0x138] sm:$0xff] }
  0x35   :  { %451 = vmatmul.mubr.f32.gmra.mxu1 %v42_v23  ;;  %310 = vmatprep.mubr.f32.mxu0 %v46_v24  ;;  %v99_v23 = vld [vmem:[%s1706_s0 + $0x278] sm:$0xff] }
  0x36   :  { %455 = vmatprep.mubr.f32.mxu1 %v48_v25  ;;  %980 = vmatprep.subr.mxu0 %v167_v26 }
  0x37   :  { %1016 = vmatprep.subr.mxu1 %v167_v26  ;;  %981 = vmatpush3.msra.mxu0 %v167_v26 }
  0x38   :  { %1024 = vmatpush3.msra.mxu1 %v167_v26  ;;  %311 = vmatmul.mubr.f32.gmra.mxu0 %v45_v27 }
  0x39   :  { %456 = vmatmul.mubr.f32.gmra.mxu1 %v47_v28  ;;  %315 = vmatprep.mubr.f32.mxu0 %v51_v29 }
  0x3a   :  { %460 = vmatprep.mubr.f32.mxu1 %v53_v30  ;;  %982 = vmatprep.subr.mxu0 %v166_v31 }
  0x3b   :  { %1017 = vmatprep.subr.mxu1 %v166_v31  ;;  %983 = vmatpush3.msra.mxu0 %v166_v31 }
  0x3c   :  { %1025 = vmatpush3.msra.mxu1 %v166_v31  ;;  %316 = vmatmul.mubr.f32.gmra.mxu0 %v50_v32 }
  0x3d   :  { %461 = vmatmul.mubr.f32.gmra.mxu1 %v52_v33  ;;  %320 = vmatprep.mubr.f32.mxu0 %v56_v34 }
  0x3e   :  { %465 = vmatprep.mubr.f32.mxu1 %v58_v35  ;;  %984 = vmatprep.subr.mxu0 %v165_v36 }
  0x3f   :  { %1018 = vmatprep.subr.mxu1 %v165_v36  ;;  %985 = vmatpush3.msra.mxu0 %v165_v36 }
  0x40   :  { %1026 = vmatpush3.msra.mxu1 %v165_v36  ;;  %321 = vmatmul.mubr.f32.gmra.mxu0 %v55_v37 }
  0x41   :  { %466 = vmatmul.mubr.f32.gmra.mxu1 %v57_v38  ;;  %325 = vmatprep.mubr.f32.mxu0 %v61_v39 }
  0x42   :  { %470 = vmatprep.mubr.f32.mxu1 %v63_v40  ;;  %986 = vmatprep.subr.mxu0 %v164_v41 }
  0x43   :  { %1019 = vmatprep.subr.mxu1 %v164_v41  ;;  %987 = vmatpush3.msra.mxu0 %v164_v41 }
  0x44   :  { %1027 = vmatpush3.msra.mxu1 %v164_v41  ;;  %326 = vmatmul.mubr.f32.gmra.mxu0 %v60_v42 }
  0x45   :  { %471 = vmatmul.mubr.f32.gmra.mxu1 %v62_v43  ;;  %330 = vmatprep.mubr.f32.mxu0 %v66_v44 }
  0x46   :  { %475 = vmatprep.mubr.f32.mxu1 %v68_v45 }
  0x48   :  { %331 = vmatmul.mubr.f32.gmra.mxu0 %v65_v46 }
  0x49   :  { %476 = vmatmul.mubr.f32.gmra.mxu1 %v67_v47  ;;  %335 = vmatprep.mubr.f32.mxu0 %v71_v48 }
  0x4a   :  { %480 = vmatprep.mubr.f32.mxu1 %v73_v49 }
  0x4c   :  { %336 = vmatmul.mubr.f32.gmra.mxu0 %v70_v50 }
  0x4d   :  { %481 = vmatmul.mubr.f32.gmra.mxu1 %v72_v51  ;;  %340 = vmatprep.mubr.f32.mxu0 %v76_v52 }
  0x4e   :  { %485 = vmatprep.mubr.f32.mxu1 %v78_v53 }
  0x50   :  { %341 = vmatmul.mubr.f32.gmra.mxu0 %v75_v54 }
  0x51   :  { %486 = vmatmul.mubr.f32.gmra.mxu1 %v77_v55  ;;  %345 = vmatprep.mubr.f32.mxu0 %v81_v56 }
  0x52   :  { %490 = vmatprep.mubr.f32.mxu1 %v83_v57 }
  0x54   :  { %346 = vmatmul.mubr.f32.gmra.mxu0 %v80_v58 }
  0x55   :  { %491 = vmatmul.mubr.f32.gmra.mxu1 %v82_v59  ;;  %350 = vmatprep.mubr.f32.mxu0 %v86_v60 }
  0x56   :  { %495 = vmatprep.mubr.f32.mxu1 %v88_v61 }
  0x58   :  { %351 = vmatmul.mubr.f32.gmra.mxu0 %v85_v62 }
  0x59   :  { %496 = vmatmul.mubr.f32.gmra.mxu1 %v87_v63  ;;  %355 = vmatprep.mubr.f32.mxu0 %v91_v0 }
  0x5a   :  { %500 = vmatprep.mubr.f32.mxu1 %v93_v1 }
  0x5c   :  { %356 = vmatmul.mubr.f32.gmra.mxu0 %v90_v2 }
  0x5d   :  { %501 = vmatmul.mubr.f32.gmra.mxu1 %v92_v3  ;;  %360 = vmatprep.mubr.f32.mxu0 %v96_v4 }
  0x5e   :  { %505 = vmatprep.mubr.f32.mxu1 %v98_v5 }
  0x60   :  { %361 = vmatmul.mubr.f32.gmra.mxu0 %v95_v6 }
  0x61   :  { %506 = vmatmul.mubr.f32.gmra.mxu1 %v97_v7  ;;  %988 = vmatprep.mubr.msk.f32.mxu0 %vm172_vm0, %v24_v8 }
  0x62   :  { %1000 = vmatprep.mubr.msk.f32.mxu1 %vm172_vm0, %v64_v9 }
  0x64   :  { %989 = vmatmul.mubr.msk.f32.vlgmr.msra.gmra.mxu0 %vm172_vm0, %v29_v10 }
  0x65   :  { %1001 = vmatmul.mubr.msk.f32.vlgmr.msra.gmra.mxu1 %vm172_vm0, %v69_v11  ;;  %991 = vmatprep.mubr.msk.f32.mxu0 %vm172_vm0, %v34_v12 }
  0x66   :  { %1003 = vmatprep.mubr.msk.f32.mxu1 %vm172_vm0, %v74_v13 }
  0x68   :  { %992 = vmatmul.mubr.msk.f32.gmra.mxu0 %vm172_vm0, %v39_v14 }
  0x69   :  { %1004 = vmatmul.mubr.msk.f32.gmra.mxu1 %vm172_vm0, %v79_v15  ;;  %994 = vmatprep.mubr.msk.f32.mxu0 %vm172_vm0, %v44_v16 }
  0x6a   :  { %1006 = vmatprep.mubr.msk.f32.mxu1 %vm172_vm0, %v84_v17 }
  0x6c   :  { %995 = vmatmul.mubr.msk.f32.gmra.mxu0 %vm172_vm0, %v49_v18 }
  0x6d   :  { %1007 = vmatmul.mubr.msk.f32.gmra.mxu1 %vm172_vm0, %v89_v19  ;;  %997 = vmatprep.mubr.msk.f32.mxu0 %vm172_vm0, %v54_v20 }
  0x6e   :  { %1009 = vmatprep.mubr.msk.f32.mxu1 %vm172_vm0, %v94_v21 }
  0x70   :  { %998 = vmatmul.mubr.msk.f32.gmra.mxu0 %vm172_vm0, %v59_v22 }
  0x71   :  { %1010 = vmatmul.mubr.msk.f32.gmra.mxu1 %vm172_vm0, %v99_v23 }
  0xe4   :  { %v820_v24 = vpop.f32.mrf.mxu0 }
  0xe5   :  { %v900_v25 = vpop.f32.mrf.mxu1 }
  0xe6   :  { %v821_v26 = vpop.f32.mrf.mxu0 }
  0xe7   :  { %v901_v27 = vpop.f32.mrf.mxu1  ;;  %v822_v16 = vadd.f32 %v821_v26, %v820_v24 }
  0xe8   :  { %v823_v28 = vpop.f32.mrf.mxu0  ;;  %v902_v17 = vadd.f32 %v901_v27, %v900_v25 }
  0xe9   :  { %v903_v29 = vpop.f32.mrf.mxu1 }
  0xea   :  { %v824_v30 = vpop.f32.mrf.mxu0 }
  0xeb   :  { %v904_v31 = vpop.f32.mrf.mxu1  ;;  %v825_v18 = vadd.f32 %v824_v30, %v823_v28 }
  0xec   :  { %v826_v32 = vpop.f32.mrf.mxu0  ;;  %v905_v19 = vadd.f32 %v904_v31, %v903_v29 }
  0xed   :  { %v906_v33 = vpop.f32.mrf.mxu1 }
  0xee   :  { %v827_v34 = vpop.f32.mrf.mxu0 }
  0xef   :  { %v907_v35 = vpop.f32.mrf.mxu1  ;;  %v828_v20 = vadd.f32 %v827_v34, %v826_v32 }
  0xf0   :  { %v829_v36 = vpop.f32.mrf.mxu0  ;;  %v908_v21 = vadd.f32 %v907_v35, %v906_v33 }
  0xf1   :  { %v909_v37 = vpop.f32.mrf.mxu1 }
  0xf2   :  { %v830_v38 = vpop.f32.mrf.mxu0 }
  0xf3   :  { %v910_v39 = vpop.f32.mrf.mxu1  ;;  %v831_v22 = vadd.f32 %v830_v38, %v829_v36 }
  0xf4   :  { %v832_v40 = vpop.f32.mrf.mxu0  ;;  %v911_v23 = vadd.f32 %v910_v39, %v909_v37  ;;  %v438_v37 = vadd.f32 %v905_v19, %v825_v18  ;;  %v433_v39 = vadd.f32 %v902_v17, %v822_v16 }
  0xf5   :  { %v912_v41 = vpop.f32.mrf.mxu1 }
  0xf6   :  { %v833_v42 = vpop.f32.mrf.mxu0 }
  0xf7   :  { %v913_v43 = vpop.f32.mrf.mxu1  ;;  %v834_v25 = vadd.f32 %v833_v42, %v832_v40  ;;  %v448_v40 = vadd.f32 %v911_v23, %v831_v22  ;;  %v1530_v42 = vadd.f32 %v908_v21, %v828_v20 }
  0xf8   :  { %v835_v44 = vpop.f32.mrf.mxu0  ;;  %v914_v27 = vadd.f32 %v913_v43, %v912_v41 }
  0xf9   :  { %v915_v45 = vpop.f32.mrf.mxu1 }
  0xfa   :  { %v836_v46 = vpop.f32.mrf.mxu0 }
  0xfb   :  { %v916_v47 = vpop.f32.mrf.mxu1  ;;  %v837_v28 = vadd.f32 %v836_v46, %v835_v44 }
  0xfc   :  { %v838_v48 = vpop.f32.mrf.mxu0  ;;  %v917_v30 = vadd.f32 %v916_v47, %v915_v45 }
  0xfd   :  { %v918_v49 = vpop.f32.mrf.mxu1 }
  0xfe   :  { %v839_v50 = vpop.f32.mrf.mxu0 }
  0xff   :  { %v919_v51 = vpop.f32.mrf.mxu1  ;;  %v840_v29 = vadd.f32 %v839_v50, %v838_v48  ;;  %v1532_v50 = vadd.f32 %v917_v30, %v837_v28 }
 0x100   :  { %v841_v52 = vpop.f32.mrf.mxu0  ;;  %v920_v31 = vadd.f32 %v919_v51, %v918_v49  ;;  %v1534_v49 = vadd.f32 %v914_v27, %v834_v25  ;;  %v702_v25 = vld [vmem:[%s1709_s4] sm:$0xff] }
 0x101   :  { %v921_v53 = vpop.f32.mrf.mxu1  ;;  %v710_v27 = vld [vmem:[%s1709_s4 + $0x40] sm:$0xff] }
 0x102   :  { %v842_v54 = vpop.f32.mrf.mxu0  ;;  %v1536_v51 = vadd.f32 %v920_v31, %v840_v29 }
 0x103   :  { %v922_v55 = vpop.f32.mrf.mxu1  ;;  %v843_v41 = vadd.f32 %v842_v54, %v841_v52  ;;  %v1541_v54 = vld [vmem:[%s1707_s2] ss:$0 sm:$0xff] }
 0x104   :  { %v844_v56 = vpop.f32.mrf.mxu0  ;;  %v923_v43 = vadd.f32 %v922_v55, %v921_v53 }
 0x105   :  { %v924_v57 = vpop.f32.mrf.mxu1 }
 0x106   :  { %v845_v58 = vpop.f32.mrf.mxu0 }
 0x107   :  { %v925_v59 = vpop.f32.mrf.mxu1  ;;  %v846_v44 = vadd.f32 %v845_v58, %v844_v56 }
 0x108   :  { %v847_v60 = vpop.f32.mrf.mxu0  ;;  %v926_v46 = vadd.f32 %v925_v59, %v924_v57  ;;  %v1543_v59 = vadd.f32 %v923_v43, %v843_v41 }
 0x109   :  { %v927_v61 = vpop.f32.mrf.mxu1 }
 0x10a   :  { %v848_v62 = vpop.f32.mrf.mxu0  ;;  %v473_v58 = vadd.f32 %v926_v46, %v846_v44 }
 0x10b   :  { %v928_v63 = vpop.f32.mrf.mxu1  ;;  %v849_v32 = vadd.f32 %v848_v62, %v847_v60 }
 0x10c   :  { %v850_v0 = vpop.f32.mrf.mxu0  ;;  %v929_v34 = vadd.f32 %v928_v63, %v927_v61 }
 0x10d   :  { %v930_v1 = vpop.f32.mrf.mxu1 }
 0x10e   :  { %v851_v2 = vpop.f32.mrf.mxu0  ;;  %v478_v48 = vadd.f32 %v929_v34, %v849_v32 }
 0x10f   :  { %v931_v3 = vpop.f32.mrf.mxu1  ;;  %v852_v60 = vadd.f32 %v851_v2, %v850_v0 }
 0x110   :  { %v853_v4 = vpop.f32.mrf.mxu0  ;;  %v932_v61 = vadd.f32 %v931_v3, %v930_v1 }
 0x111   :  { %v933_v5 = vpop.f32.mrf.mxu1 }
 0x112   :  { %v854_v6 = vpop.f32.mrf.mxu0  ;;  %v483_v19 = vadd.f32 %v932_v61, %v852_v60  ;;  %v705_v60 = vld [vmem:[%s1709_s4 + $0x18] sm:$0xff] }
 0x113   :  { %v934_v7 = vpop.f32.mrf.mxu1  ;;  %v855_v62 = vadd.f32 %v854_v6, %v853_v4  ;;  %v1548_v4 = vld [vmem:[%s1708_s3] ss:$0 sm:$0xff]  ;;  %v713_v61 = vld [vmem:[%s1709_s4 + $0x58] sm:$0xff] }
 0x114   :  { %v856_v8 = vpop.f32.mrf.mxu0  ;;  %v935_v63 = vadd.f32 %v934_v7, %v933_v5 }
 0x115   :  { %v936_v9 = vpop.f32.mrf.mxu1 }
 0x116   :  { %v857_v10 = vpop.f32.mrf.mxu0 }
 0x117   :  { %v937_v11 = vpop.f32.mrf.mxu1  ;;  %v858_v16 = vadd.f32 %v857_v10, %v856_v8 }
 0x118   :  { %v859_v12 = vpop.f32.mrf.mxu0  ;;  %v938_v17 = vadd.f32 %v937_v11, %v936_v9  ;;  %v703_v11 = vld [vmem:[%s1709_s4 + $0x8] sm:$0xff] }
 0x119   :  { %v939_v13 = vpop.f32.mrf.mxu1 }
 0x11a   :  { %v860_v14 = vpop.f32.mrf.mxu0  ;;  %v493_v21 = vadd.f32 %v938_v17, %v858_v16 }
 0x11b   :  { %v940_v15 = vpop.f32.mrf.mxu1  ;;  %v861_v18 = vadd.f32 %v860_v14, %v859_v12  ;;  %v711_v12 = vld [vmem:[%s1709_s4 + $0x48] sm:$0xff]  ;;  %v488_v14 = vadd.f32 %v935_v63, %v855_v62 }
 0x11c   :  { %v862_v24 = vpop.f32.mrf.mxu0  ;;  %v941_v52 = vadd.f32 %v940_v15, %v939_v13 }
 0x11d   :  { %v942_v26 = vpop.f32.mrf.mxu1 }
 0x11e   :  { %v863_v33 = vpop.f32.mrf.mxu0  ;;  %v498_v20 = vadd.f32 %v941_v52, %v861_v18 }
 0x11f   :  { %v943_v35 = vpop.f32.mrf.mxu1  ;;  %v864_v0 = vadd.f32 %v863_v33, %v862_v24 }
 0x120   :  { %v865_v36 = vpop.f32.mrf.mxu0  ;;  %v944_v1 = vadd.f32 %v943_v35, %v942_v26 }
 0x121   :  { %v945_v38 = vpop.f32.mrf.mxu1 }
 0x122   :  { %v866_v45 = vpop.f32.mrf.mxu0  ;;  %v1570_v34 = vadd.f32 %v944_v1, %v864_v0 }
 0x123   :  { %v946_v47 = vpop.f32.mrf.mxu1  ;;  %v867_v2 = vadd.f32 %v866_v45, %v865_v36 }
 0x124   :  { %v990_v53 = vpop.f32.mrf.mxu0  ;;  %v947_v3 = vadd.f32 %v946_v47, %v945_v38 }
 0x125   :  { %v1002_v55 = vpop.f32.mrf.mxu1  ;;  %v583_v56 = vadd.f32 %v990_v53, %v438_v37 }
 0x126   :  { %v623_v57 = vadd.f32 %v1002_v55, %v478_v48  ;;  %v577_v5 = vpop.f32.mrf.mxu0  ;;  %v1568_v32 = vadd.f32 %v947_v3, %v867_v2  ;;  %v704_v55 = vld [vmem:[%s1709_s4 + $0x10] sm:$0xff] }
 0x127   :  { %v617_v6 = vpop.f32.mrf.mxu1  ;;  %v664_v7 = vmul.f32 %v1541_v54, %v583_v56  ;;  %v578_v9 = vadd.f32 %v577_v5, %v433_v39  ;;  %v712_v56 = vld [vmem:[%s1709_s4 + $0x50] sm:$0xff] }
 0x128   :  { %v672_v8 = vmul.f32 %v1541_v54, %v623_v57  ;;  %v618_v10 = vadd.f32 %v617_v6, %v473_v58  ;;  %v993_v13 = vpop.f32.mrf.mxu0 }
 0x129   :  { %v1005_v15 = vpop.f32.mrf.mxu1  ;;  %v687_v22 = vadd.f32 %v1548_v4, %v664_v7  ;;  %v663_v24 = vmul.f32 %v1541_v54, %v578_v9  ;;  %v593_v28 = vadd.f32 %v993_v13, %v448_v40 }
 0x12a   :  { %v695_v23 = vadd.f32 %v1548_v4, %v672_v8  ;;  %v671_v26 = vmul.f32 %v1541_v54, %v618_v10  ;;  %v633_v30 = vadd.f32 %v1005_v15, %v488_v14  ;;  %v587_v29 = vpop.f32.mrf.mxu0  ;;  %v707_v14 = vld [vmem:[%s1709_s4 + $0x28] sm:$0xff] }
 0x12b   :  { %v627_v31 = vpop.f32.mrf.mxu1  ;;  %v719_v33 = vadd.f32 %v703_v11, %v687_v22  ;;  %v686_v36 = vadd.f32 %v1548_v4, %v663_v24  ;;  %v666_v37 = vmul.f32 %v1541_v54, %v593_v28  ;;  %v588_v41 = vadd.f32 %v587_v29, %v1530_v42  ;;  %v715_v15 = vld [vmem:[%s1709_s4 + $0x68] sm:$0xff] }
 0x12c   :  { %v727_v35 = vadd.f32 %v711_v12, %v695_v23  ;;  %v694_v38 = vadd.f32 %v1548_v4, %v671_v26  ;;  %v674_v39 = vmul.f32 %v1541_v54, %v633_v30  ;;  %v628_v40 = vadd.f32 %v627_v31, %v483_v19  ;;  %v996_v43 = vpop.f32.mrf.mxu0 }
 0x12d   :  { %v1008_v44 = vpop.f32.mrf.mxu1  ;;  %v735_v46 = vmax.f32 %v719_v33, 0.0  ;;  %v718_v47 = vadd.f32 %v702_v25, %v686_v36  ;;  %v689_v62 = vadd.f32 %v1548_v4, %v666_v37  ;;  %v665_v42 = vmul.f32 %v1541_v54, %v588_v41  ;;  %v706_v25 = vld [vmem:[%s1709_s4 + $0x20] sm:$0xff] }
 0x12e   :  { %v743_v45 = vmax.f32 %v727_v35, 0.0  ;;  %v726_v48 = vadd.f32 %v710_v27, %v694_v38  ;;  %v697_v63 = vadd.f32 %v1548_v4, %v674_v39  ;;  %v673_v16 = vmul.f32 %v1541_v54, %v628_v40  ;;  %v597_v17 = vpop.f32.mrf.mxu0  ;;  %v714_v27 = vld [vmem:[%s1709_s4 + $0x60] sm:$0xff] }
 0x12f   :  { %v637_v18 = vpop.f32.mrf.mxu1  ;;  %751 = vst.msk [vmem:[%s1710_s5 + $0x8] sm:$0xff] %vm172_vm0, %v735_v46  ;;  %v734_v52 = vmax.f32 %v718_v47, 0.0  ;;  %v603_v57 = vadd.f32 %v996_v43, %v1532_v50  ;;  %v643_v58 = vadd.f32 %v1008_v44, %v498_v20  ;;  %v721_v0 = vadd.f32 %v705_v60, %v689_v62  ;;  %v709_v43 = vld [vmem:[%s1709_s4 + $0x38] sm:$0xff]  ;;  %v708_v60 = vld [vmem:[%s1709_s4 + $0x30] sm:$0xff] }
 0x130   :  { %759 = vst.msk [vmem:[%s1710_s5 + $0x48] sm:$0xff] %vm172_vm0, %v743_v45  ;;  %v742_v53 = vmax.f32 %v726_v48, 0.0  ;;  %v729_v1 = vadd.f32 %v713_v61, %v697_v63  ;;  %v688_v2 = vadd.f32 %v1548_v4, %v665_v42  ;;  %v696_v3 = vadd.f32 %v1548_v4, %v673_v16  ;;  %v999_v5 = vpop.f32.mrf.mxu0  ;;  %v717_v44 = vld [vmem:[%s1709_s4 + $0x78] sm:$0xff] }
 0x131   :  { %v1011_v6 = vpop.f32.mrf.mxu1  ;;  %750 = vst.msk [vmem:[%s1710_s5] sm:$0xff] %vm172_vm0, %v734_v52  ;;  %v668_v50 = vmul.f32 %v1541_v54, %v603_v57  ;;  %v676_v7 = vmul.f32 %v1541_v54, %v643_v58  ;;  %v598_v8 = vadd.f32 %v597_v17, %v1534_v49  ;;  %v638_v9 = vadd.f32 %v637_v18, %v493_v21 }
 0x132   :  { %758 = vst.msk [vmem:[%s1710_s5 + $0x40] sm:$0xff] %vm172_vm0, %v742_v53  ;;  %v737_v10 = vmax.f32 %v721_v0, 0.0  ;;  %v745_v11 = vmax.f32 %v729_v1, 0.0  ;;  %v720_v12 = vadd.f32 %v704_v55, %v688_v2  ;;  %v728_v13 = vadd.f32 %v712_v56, %v696_v3  ;;  %v607_v21 = vpop.f32.mrf.mxu0 }
 0x133   :  { %v691_v19 = vadd.f32 %v1548_v4, %v668_v50  ;;  %v699_v20 = vadd.f32 %v1548_v4, %v676_v7  ;;  %v667_v22 = vmul.f32 %v1541_v54, %v598_v8  ;;  %v675_v49 = vmul.f32 %v1541_v54, %v638_v9  ;;  %v647_v23 = vpop.f32.mrf.mxu1 }
 0x134   :  { %753 = vst.msk [vmem:[%s1710_s5 + $0x18] sm:$0xff] %vm172_vm0, %v737_v10  ;;  %761 = vst.msk [vmem:[%s1710_s5 + $0x58] sm:$0xff] %vm172_vm0, %v745_v11  ;;  %v736_v24 = vmax.f32 %v720_v12, 0.0  ;;  %v744_v26 = vmax.f32 %v728_v13, 0.0  ;;  %v613_v28 = vadd.f32 %v999_v5, %v1543_v59  ;;  %v653_v30 = vadd.f32 %v1011_v6, %v1568_v32 }
 0x135   :  { %v723_v29 = vadd.f32 %v707_v14, %v691_v19  ;;  %v731_v31 = vadd.f32 %v715_v15, %v699_v20  ;;  %v690_v33 = vadd.f32 %v1548_v4, %v667_v22  ;;  %v698_v35 = vadd.f32 %v1548_v4, %v675_v49 }
 0x136   :  { %752 = vst.msk [vmem:[%s1710_s5 + $0x10] sm:$0xff] %vm172_vm0, %v736_v24  ;;  %760 = vst.msk [vmem:[%s1710_s5 + $0x50] sm:$0xff] %vm172_vm0, %v744_v26  ;;  %v670_v59 = vmul.f32 %v1541_v54, %v613_v28  ;;  %v678_v32 = vmul.f32 %v1541_v54, %v653_v30  ;;  %v608_v36 = vadd.f32 %v607_v21, %v1536_v51 }
 0x137   :  { %v648_v38 = vadd.f32 %v647_v23, %v1570_v34  ;;  %v739_v37 = vmax.f32 %v723_v29, 0.0  ;;  %v747_v39 = vmax.f32 %v731_v31, 0.0  ;;  %v722_v41 = vadd.f32 %v706_v25, %v690_v33 }
 0x138   :  { %v730_v40 = vadd.f32 %v714_v27, %v698_v35  ;;  %v693_v46 = vadd.f32 %v1548_v4, %v670_v59  ;;  %v701_v45 = vadd.f32 %v1548_v4, %v678_v32  ;;  %v669_v51 = vmul.f32 %v1541_v54, %v608_v36 }
 0x139   :  { %v677_v34 = vmul.f32 %v1541_v54, %v648_v38  ;;  %755 = vst.msk [vmem:[%s1710_s5 + $0x28] sm:$0xff] %vm172_vm0, %v739_v37  ;;  %763 = vst.msk [vmem:[%s1710_s5 + $0x68] sm:$0xff] %vm172_vm0, %v747_v39  ;;  %v738_v47 = vmax.f32 %v722_v41, 0.0  ;;  %v716_v54 = vld [vmem:[%s1709_s4 + $0x70] sm:$0xff] }
 0x13a   :  { %v746_v48 = vmax.f32 %v730_v40, 0.0  ;;  %v725_v61 = vadd.f32 %v709_v43, %v693_v46  ;;  %v733_v62 = vadd.f32 %v717_v44, %v701_v45  ;;  %v692_v63 = vadd.f32 %v1548_v4, %v669_v51 }
 0x13b   :  { %v700_v42 = vadd.f32 %v1548_v4, %v677_v34  ;;  %754 = vst.msk [vmem:[%s1710_s5 + $0x20] sm:$0xff] %vm172_vm0, %v738_v47 }
 0x13c   :  { %762 = vst.msk [vmem:[%s1710_s5 + $0x60] sm:$0xff] %vm172_vm0, %v746_v48  ;;  %v741_v16 = vmax.f32 %v725_v61, 0.0  ;;  %v749_v17 = vmax.f32 %v733_v62, 0.0  ;;  %v724_v18 = vadd.f32 %v708_v60, %v692_v63 }
 0x13d   :  { %v732_v52 = vadd.f32 %v716_v54, %v700_v42 }
 0x13e   :  { %757 = vst.msk [vmem:[%s1710_s5 + $0x38] sm:$0xff] %vm172_vm0, %v741_v16  ;;  %765 = vst.msk [vmem:[%s1710_s5 + $0x78] sm:$0xff] %vm172_vm0, %v749_v17  ;;  %v740_v4 = vmax.f32 %v724_v18, 0.0 }
 0x13f   :  { %v748_v53 = vmax.f32 %v732_v52, 0.0 }
 0x140   :  { %756 = vst.msk [vmem:[%s1710_s5 + $0x30] sm:$0xff] %vm172_vm0, %v740_v4 }
 0x141   :  { %764 = vst.msk [vmem:[%s1710_s5 + $0x70] sm:$0xff] %vm172_vm0, %v748_v53 }

// kernel: feature_generator_resnet_forward.23
= control target key start
LH: loop header
LB: loop body
LE: loop exit
PB: predicated region body
PF: predicated region fallthrough
CT: control target
= control target key end

     0   :  { %vm109_vm0 = vcmask 523264   ;;  %s874_s1 = inlined_call_operand.vmem [shape: f32[576,128], index: 1, kind: input, shape index: {}]   ;;  %s875_s0 = inlined_call_operand.vmem [shape: f32[32,576], index: 0, kind: input, shape index: {}]   ;;  %s876_s2 = inlined_call_operand.vmem [shape: f32[1,128], index: 2, kind: input, shape index: {}]   ;;  %s877_s3 = inlined_call_operand.vmem [shape: f32[1,128], index: 3, kind: input, shape index: {}]   ;;  %s878_s4 = inlined_call_operand.vmem [shape: f32[32,128], index: 4, kind: output, shape index: {}]  }
   0x1   :  { %v68_v0 = vld [vmem:[%s874_s1 + $0xf8] sm:$0xff]  ;;  %v67_v4 = vld [vmem:[%s874_s1 + $0xf0] sm:$0xff]  ;;  %v66_v8 = vld [vmem:[%s874_s1 + $0xe8] sm:$0xff] }
   0x2   :  { %v100_v1 = vld [vmem:[%s874_s1 + $0x1f8] sm:$0xff]  ;;  %417 = vmatprep.subr.mxu0 %v68_v0  ;;  %v99_v5 = vld [vmem:[%s874_s1 + $0x1f0] sm:$0xff]  ;;  %v98_v9 = vld [vmem:[%s874_s1 + $0x1e8] sm:$0xff] }
   0x3   :  { %v52_v2 = vld [vmem:[%s874_s1 + $0x78] sm:$0xff]  ;;  %461 = vmatprep.subr.mxu1 %v100_v1  ;;  %v51_v6 = vld [vmem:[%s874_s1 + $0x70] sm:$0xff]  ;;  %v50_v10 = vld [vmem:[%s874_s1 + $0x68] sm:$0xff] }
   0x4   :  { %v84_v3 = vld [vmem:[%s874_s1 + $0x178] sm:$0xff]  ;;  %418 = vmatpush3.msra.mxu0 %v52_v2  ;;  %v83_v7 = vld [vmem:[%s874_s1 + $0x170] sm:$0xff]  ;;  %v82_v11 = vld [vmem:[%s874_s1 + $0x168] sm:$0xff] }
   0x5   :  { %462 = vmatpush3.msra.mxu1 %v84_v3  ;;  %419 = vmatprep.subr.mxu0 %v67_v4  ;;  %v65_v12 = vld [vmem:[%s874_s1 + $0xe0] sm:$0xff]  ;;  %v64_v16 = vld [vmem:[%s874_s1 + $0xd8] sm:$0xff]  ;;  %v63_v20 = vld [vmem:[%s874_s1 + $0xd0] sm:$0xff] }
   0x6   :  { %463 = vmatprep.subr.mxu1 %v99_v5  ;;  %420 = vmatpush3.msra.mxu0 %v51_v6  ;;  %v97_v13 = vld [vmem:[%s874_s1 + $0x1e0] sm:$0xff]  ;;  %v96_v17 = vld [vmem:[%s874_s1 + $0x1d8] sm:$0xff]  ;;  %v95_v21 = vld [vmem:[%s874_s1 + $0x1d0] sm:$0xff] }
   0x7   :  { %464 = vmatpush3.msra.mxu1 %v83_v7  ;;  %421 = vmatprep.subr.mxu0 %v66_v8  ;;  %v49_v14 = vld [vmem:[%s874_s1 + $0x60] sm:$0xff]  ;;  %v48_v18 = vld [vmem:[%s874_s1 + $0x58] sm:$0xff]  ;;  %v47_v22 = vld [vmem:[%s874_s1 + $0x50] sm:$0xff] }
   0x8   :  { %465 = vmatprep.subr.mxu1 %v98_v9  ;;  %v81_v15 = vld [vmem:[%s874_s1 + $0x160] sm:$0xff]  ;;  %422 = vmatpush3.msra.mxu0 %v50_v10  ;;  %v80_v19 = vld [vmem:[%s874_s1 + $0x158] sm:$0xff]  ;;  %v79_v23 = vld [vmem:[%s874_s1 + $0x150] sm:$0xff] }
   0x9   :  { %466 = vmatpush3.msra.mxu1 %v82_v11  ;;  %423 = vmatprep.subr.mxu0 %v65_v12  ;;  %v62_v24 = vld [vmem:[%s874_s1 + $0xc8] sm:$0xff]  ;;  %v61_v28 = vld [vmem:[%s874_s1 + $0xc0] sm:$0xff]  ;;  %v60_v32 = vld [vmem:[%s874_s1 + $0xb8] sm:$0xff] }
   0xa   :  { %467 = vmatprep.subr.mxu1 %v97_v13  ;;  %424 = vmatpush3.msra.mxu0 %v49_v14  ;;  %v94_v25 = vld [vmem:[%s874_s1 + $0x1c8] sm:$0xff]  ;;  %v93_v29 = vld [vmem:[%s874_s1 + $0x1c0] sm:$0xff]  ;;  %v92_v33 = vld [vmem:[%s874_s1 + $0x1b8] sm:$0xff] }
   0xb   :  { %468 = vmatpush3.msra.mxu1 %v81_v15  ;;  %425 = vmatprep.subr.mxu0 %v64_v16  ;;  %v46_v26 = vld [vmem:[%s874_s1 + $0x48] sm:$0xff]  ;;  %v45_v30 = vld [vmem:[%s874_s1 + $0x40] sm:$0xff]  ;;  %v44_v34 = vld [vmem:[%s874_s1 + $0x38] sm:$0xff] }
   0xc   :  { %469 = vmatprep.subr.mxu1 %v96_v17  ;;  %426 = vmatpush3.msra.mxu0 %v48_v18  ;;  %v78_v27 = vld [vmem:[%s874_s1 + $0x148] sm:$0xff]  ;;  %v77_v31 = vld [vmem:[%s874_s1 + $0x140] sm:$0xff]  ;;  %v76_v35 = vld [vmem:[%s874_s1 + $0x138] sm:$0xff] }
   0xd   :  { %470 = vmatpush3.msra.mxu1 %v80_v19  ;;  %427 = vmatprep.subr.mxu0 %v63_v20  ;;  %v59_v36 = vld [vmem:[%s874_s1 + $0xb0] sm:$0xff]  ;;  %v58_v40 = vld [vmem:[%s874_s1 + $0xa8] sm:$0xff]  ;;  %v57_v44 = vld [vmem:[%s874_s1 + $0xa0] sm:$0xff] }
   0xe   :  { %471 = vmatprep.subr.mxu1 %v95_v21  ;;  %428 = vmatpush3.msra.mxu0 %v47_v22  ;;  %v91_v37 = vld [vmem:[%s874_s1 + $0x1b0] sm:$0xff]  ;;  %v90_v41 = vld [vmem:[%s874_s1 + $0x1a8] sm:$0xff]  ;;  %v89_v45 = vld [vmem:[%s874_s1 + $0x1a0] sm:$0xff] }
   0xf   :  { %472 = vmatpush3.msra.mxu1 %v79_v23  ;;  %429 = vmatprep.subr.mxu0 %v62_v24  ;;  %v43_v38 = vld [vmem:[%s874_s1 + $0x30] sm:$0xff]  ;;  %v42_v42 = vld [vmem:[%s874_s1 + $0x28] sm:$0xff]  ;;  %v41_v46 = vld [vmem:[%s874_s1 + $0x20] sm:$0xff] }
  0x10   :  { %473 = vmatprep.subr.mxu1 %v94_v25  ;;  %430 = vmatpush3.msra.mxu0 %v46_v26  ;;  %v75_v39 = vld [vmem:[%s874_s1 + $0x130] sm:$0xff]  ;;  %v74_v43 = vld [vmem:[%s874_s1 + $0x128] sm:$0xff]  ;;  %v73_v47 = vld [vmem:[%s874_s1 + $0x120] sm:$0xff] }
  0x11   :  { %474 = vmatpush3.msra.mxu1 %v78_v27  ;;  %431 = vmatprep.subr.mxu0 %v61_v28  ;;  %v56_v48 = vld [vmem:[%s874_s1 + $0x98] sm:$0xff]  ;;  %v55_v52 = vld [vmem:[%s874_s1 + $0x90] sm:$0xff]  ;;  %v54_v56 = vld [vmem:[%s874_s1 + $0x88] sm:$0xff] }
  0x12   :  { %475 = vmatprep.subr.mxu1 %v93_v29  ;;  %432 = vmatpush3.msra.mxu0 %v45_v30  ;;  %v88_v49 = vld [vmem:[%s874_s1 + $0x198] sm:$0xff]  ;;  %v87_v53 = vld [vmem:[%s874_s1 + $0x190] sm:$0xff]  ;;  %v86_v57 = vld [vmem:[%s874_s1 + $0x188] sm:$0xff] }
  0x13   :  { %476 = vmatpush3.msra.mxu1 %v77_v31  ;;  %433 = vmatprep.subr.mxu0 %v60_v32  ;;  %v40_v50 = vld [vmem:[%s874_s1 + $0x18] sm:$0xff]  ;;  %v39_v54 = vld [vmem:[%s874_s1 + $0x10] sm:$0xff]  ;;  %v38_v58 = vld [vmem:[%s874_s1 + $0x8] sm:$0xff] }
  0x14   :  { %477 = vmatprep.subr.mxu1 %v92_v33  ;;  %434 = vmatpush3.msra.mxu0 %v44_v34  ;;  %v72_v51 = vld [vmem:[%s874_s1 + $0x118] sm:$0xff]  ;;  %v71_v55 = vld [vmem:[%s874_s1 + $0x110] sm:$0xff]  ;;  %v70_v59 = vld [vmem:[%s874_s1 + $0x108] sm:$0xff] }
  0x15   :  { %478 = vmatpush3.msra.mxu1 %v76_v35  ;;  %435 = vmatprep.subr.mxu0 %v59_v36  ;;  %v53_v60 = vld [vmem:[%s874_s1 + $0x80] sm:$0xff]  ;;  %v18_v63 = vld [vmem:[%s875_s0 + $0x8] sm:$0xff]  ;;  %v20_v1 = vld [vmem:[%s875_s0 + $0x18] sm:$0xff] }
  0x16   :  { %479 = vmatprep.subr.mxu1 %v91_v37  ;;  %436 = vmatpush3.msra.mxu0 %v43_v38  ;;  %v85_v61 = vld [vmem:[%s874_s1 + $0x180] sm:$0xff]  ;;  %v19_v3 = vld [vmem:[%s875_s0 + $0x10] sm:$0xff]  ;;  %v108_v4 = vld [vmem:[%s874_s1 + $0x238] sm:$0xff] }
  0x17   :  { %480 = vmatpush3.msra.mxu1 %v75_v39  ;;  %437 = vmatprep.subr.mxu0 %v58_v40  ;;  %v37_v62 = vld [vmem:[%s874_s1] sm:$0xff]  ;;  %v107_v5 = vld [vmem:[%s874_s1 + $0x230] sm:$0xff]  ;;  %v22_v8 = vld [vmem:[%s875_s0 + $0x28] sm:$0xff] }
  0x18   :  { %481 = vmatprep.subr.mxu1 %v90_v41  ;;  %438 = vmatpush3.msra.mxu0 %v42_v42  ;;  %v69_v0 = vld [vmem:[%s874_s1 + $0x100] sm:$0xff]  ;;  %v23_v6 = vld [vmem:[%s875_s0 + $0x30] sm:$0xff]  ;;  %v24_v9 = vld [vmem:[%s875_s0 + $0x38] sm:$0xff] }
  0x19   :  { %482 = vmatpush3.msra.mxu1 %v74_v43  ;;  %439 = vmatprep.subr.mxu0 %v57_v44  ;;  %v17_v2 = vld [vmem:[%s875_s0] sm:$0xff]  ;;  %v106_v10 = vld [vmem:[%s874_s1 + $0x228] sm:$0xff]  ;;  %v28_v12 = vld [vmem:[%s875_s0 + $0x58] sm:$0xff] }
  0x1a   :  { %483 = vmatprep.subr.mxu1 %v89_v45  ;;  %440 = vmatpush3.msra.mxu0 %v41_v46  ;;  %v25_v7 = vld [vmem:[%s875_s0 + $0x40] sm:$0xff]  ;;  %v30_v13 = vld [vmem:[%s875_s0 + $0x68] sm:$0xff]  ;;  %v27_v14 = vld [vmem:[%s875_s0 + $0x50] sm:$0xff] }
  0x1b   :  { %484 = vmatpush3.msra.mxu1 %v73_v47  ;;  %441 = vmatprep.subr.mxu0 %v56_v48  ;;  %v105_v11 = vld [vmem:[%s874_s1 + $0x220] sm:$0xff]  ;;  %v104_v16 = vld [vmem:[%s874_s1 + $0x218] sm:$0xff]  ;;  %v103_v17 = vld [vmem:[%s874_s1 + $0x210] sm:$0xff] }
  0x1c   :  { %485 = vmatprep.subr.mxu1 %v88_v49  ;;  %442 = vmatpush3.msra.mxu0 %v40_v50  ;;  %v29_v15 = vld [vmem:[%s875_s0 + $0x60] sm:$0xff]  ;;  %v35_v19 = vld [vmem:[%s875_s0 + $0x90] sm:$0xff]  ;;  %v32_v20 = vld [vmem:[%s875_s0 + $0x78] sm:$0xff] }
  0x1d   :  { %486 = vmatpush3.msra.mxu1 %v72_v51  ;;  %443 = vmatprep.subr.mxu0 %v55_v52  ;;  %v33_v18 = vld [vmem:[%s875_s0 + $0x80] sm:$0xff]  ;;  %v34_v21 = vld [vmem:[%s875_s0 + $0x88] sm:$0xff]  ;;  %v31_v25 = vld [vmem:[%s875_s0 + $0x70] sm:$0xff] }
  0x1e   :  { %487 = vmatprep.subr.mxu1 %v87_v53  ;;  %444 = vmatpush3.msra.mxu0 %v39_v54  ;;  %v102_v22 = vld [vmem:[%s874_s1 + $0x208] sm:$0xff]  ;;  %v101_v23 = vld [vmem:[%s874_s1 + $0x200] sm:$0xff]  ;;  %v36_v27 = vld [vmem:[%s875_s0 + $0x98] sm:$0xff] }
  0x1f   :  { %488 = vmatpush3.msra.mxu1 %v71_v55  ;;  %445 = vmatprep.subr.mxu0 %v54_v56  ;;  %v21_v24 = vld [vmem:[%s875_s0 + $0x20] sm:$0xff]  ;;  %v26_v26 = vld [vmem:[%s875_s0 + $0x48] sm:$0xff] }
  0x20   :  { %489 = vmatprep.subr.mxu1 %v86_v57  ;;  %446 = vmatpush3.msra.mxu0 %v38_v58  ;;  %v415_v55 = vld [vmem:[%s876_s2] ss:$0 sm:$0xff] }
  0x21   :  { %490 = vmatpush3.msra.mxu1 %v70_v59  ;;  %447 = vmatprep.subr.mxu0 %v53_v60 }
  0x22   :  { %491 = vmatprep.subr.mxu1 %v85_v61  ;;  %448 = vmatpush3.msra.mxu0 %v37_v62  ;;  %v416_v61 = vld [vmem:[%s877_s3] ss:$0 sm:$0xff] }
  0x23   :  { %186 = vmatprep.mubr.f32.mxu0 %v18_v63  ;;  %492 = vmatpush3.msra.mxu1 %v69_v0 }
  0x24   :  { %271 = vmatprep.mubr.f32.mxu1 %v20_v1  ;;  %187 = vmatmul.mubr.f32.vlgmr.msra.gmra.mxu0 %v17_v2 }
  0x25   :  { %272 = vmatmul.mubr.f32.vlgmr.msra.gmra.mxu1 %v19_v3  ;;  %517 = vmatprep.subr.mxu0 %v108_v4 }
  0x26   :  { %539 = vmatprep.subr.mxu1 %v108_v4  ;;  %518 = vmatpush3.msra.mxu0 %v108_v4 }
  0x27   :  { %547 = vmatpush3.msra.mxu1 %v108_v4  ;;  %519 = vmatprep.subr.mxu0 %v107_v5 }
  0x28   :  { %540 = vmatprep.subr.mxu1 %v107_v5  ;;  %191 = vmatprep.mubr.f32.mxu0 %v23_v6 }
  0x29   :  { %276 = vmatprep.mubr.f32.mxu1 %v25_v7  ;;  %520 = vmatpush3.msra.mxu0 %v107_v5 }
  0x2a   :  { %548 = vmatpush3.msra.mxu1 %v107_v5  ;;  %192 = vmatmul.mubr.f32.gmra.mxu0 %v22_v8 }
  0x2b   :  { %277 = vmatmul.mubr.f32.gmra.mxu1 %v24_v9  ;;  %521 = vmatprep.subr.mxu0 %v106_v10 }
  0x2c   :  { %541 = vmatprep.subr.mxu1 %v106_v10  ;;  %522 = vmatpush3.msra.mxu0 %v106_v10 }
  0x2d   :  { %549 = vmatpush3.msra.mxu1 %v106_v10  ;;  %523 = vmatprep.subr.mxu0 %v105_v11 }
  0x2e   :  { %542 = vmatprep.subr.mxu1 %v105_v11  ;;  %196 = vmatprep.mubr.f32.mxu0 %v28_v12 }
  0x2f   :  { %281 = vmatprep.mubr.f32.mxu1 %v30_v13  ;;  %524 = vmatpush3.msra.mxu0 %v105_v11 }
  0x30   :  { %550 = vmatpush3.msra.mxu1 %v105_v11  ;;  %197 = vmatmul.mubr.f32.gmra.mxu0 %v27_v14 }
  0x31   :  { %282 = vmatmul.mubr.f32.gmra.mxu1 %v29_v15  ;;  %525 = vmatprep.subr.mxu0 %v104_v16 }
  0x32   :  { %543 = vmatprep.subr.mxu1 %v104_v16  ;;  %526 = vmatpush3.msra.mxu0 %v104_v16 }
  0x33   :  { %551 = vmatpush3.msra.mxu1 %v104_v16  ;;  %527 = vmatprep.subr.mxu0 %v103_v17 }
  0x34   :  { %544 = vmatprep.subr.mxu1 %v103_v17  ;;  %201 = vmatprep.mubr.f32.mxu0 %v33_v18 }
  0x35   :  { %286 = vmatprep.mubr.f32.mxu1 %v35_v19  ;;  %528 = vmatpush3.msra.mxu0 %v103_v17 }
  0x36   :  { %552 = vmatpush3.msra.mxu1 %v103_v17  ;;  %202 = vmatmul.mubr.f32.gmra.mxu0 %v32_v20 }
  0x37   :  { %287 = vmatmul.mubr.f32.gmra.mxu1 %v34_v21  ;;  %529 = vmatprep.subr.mxu0 %v102_v22 }
  0x38   :  { %545 = vmatprep.subr.mxu1 %v102_v22  ;;  %530 = vmatpush3.msra.mxu0 %v102_v22 }
  0x39   :  { %553 = vmatpush3.msra.mxu1 %v102_v22  ;;  %531 = vmatprep.subr.mxu0 %v101_v23 }
  0x3a   :  { %546 = vmatprep.subr.mxu1 %v101_v23  ;;  %532 = vmatpush3.msra.mxu0 %v101_v23 }
  0x3b   :  { %554 = vmatpush3.msra.mxu1 %v101_v23  ;;  %533 = vmatprep.mubr.msk.f32.mxu0 %vm109_vm0, %v21_v24 }
  0x3c   :  { %536 = vmatprep.mubr.msk.f32.mxu1 %vm109_vm0, %v31_v25  ;;  %534 = vmatmul.mubr.msk.f32.vlgmr.msra.gmra.mxu0 %vm109_vm0, %v26_v26 }
  0x3d   :  { %537 = vmatmul.mubr.msk.f32.vlgmr.msra.gmra.mxu1 %vm109_vm0, %v36_v27 }
  0xe4   :  { %v449_v28 = vpop.f32.mrf.mxu0 }
  0xe5   :  { %v493_v29 = vpop.f32.mrf.mxu1 }
  0xe6   :  { %v450_v30 = vpop.f32.mrf.mxu0 }
  0xe7   :  { %v494_v31 = vpop.f32.mrf.mxu1  ;;  %v451_v44 = vadd.f32 %v450_v30, %v449_v28 }
  0xe8   :  { %v495_v45 = vadd.f32 %v494_v31, %v493_v29 }
  0xea   :  { %v452_v32 = vpop.f32.mrf.mxu0  ;;  %v274_v59 = vadd.f32 %v495_v45, %v451_v44 }
  0xeb   :  { %v496_v33 = vpop.f32.mrf.mxu1 }
  0xec   :  { %v453_v34 = vpop.f32.mrf.mxu0 }
  0xed   :  { %v497_v35 = vpop.f32.mrf.mxu1  ;;  %v454_v42 = vadd.f32 %v453_v34, %v452_v32 }
  0xee   :  { %v498_v43 = vadd.f32 %v497_v35, %v496_v33 }
  0xf0   :  { %v455_v36 = vpop.f32.mrf.mxu0  ;;  %v279_v52 = vadd.f32 %v498_v43, %v454_v42 }
  0xf1   :  { %v499_v37 = vpop.f32.mrf.mxu1 }
  0xf2   :  { %v456_v38 = vpop.f32.mrf.mxu0 }
  0xf3   :  { %v500_v39 = vpop.f32.mrf.mxu1  ;;  %v457_v48 = vadd.f32 %v456_v38, %v455_v36 }
  0xf4   :  { %v501_v49 = vadd.f32 %v500_v39, %v499_v37 }
  0xf6   :  { %v458_v40 = vpop.f32.mrf.mxu0  ;;  %v284_v60 = vadd.f32 %v501_v49, %v457_v48 }
  0xf7   :  { %v502_v41 = vpop.f32.mrf.mxu1 }
  0xf8   :  { %v459_v46 = vpop.f32.mrf.mxu0 }
  0xf9   :  { %v503_v47 = vpop.f32.mrf.mxu1  ;;  %v460_v50 = vadd.f32 %v459_v46, %v458_v40 }
  0xfa   :  { %v504_v51 = vadd.f32 %v503_v47, %v502_v41 }
  0xfc   :  { %v289_v53 = vadd.f32 %v504_v51, %v460_v50  ;;  %v535_v54 = vpop.f32.mrf.mxu0 }
  0xfd   :  { %v538_v56 = vpop.f32.mrf.mxu1  ;;  %v364_v57 = vadd.f32 %v535_v54, %v279_v52 }
  0xfe   :  { %v374_v58 = vadd.f32 %v538_v56, %v289_v53  ;;  %v358_v62 = vpop.f32.mrf.mxu0 }
  0xff   :  { %v368_v63 = vpop.f32.mrf.mxu1  ;;  %v385_v0 = vmul.f32 %v415_v55, %v364_v57  ;;  %v359_v2 = vadd.f32 %v358_v62, %v274_v59 }
 0x100   :  { %v387_v1 = vmul.f32 %v415_v55, %v374_v58  ;;  %v369_v3 = vadd.f32 %v368_v63, %v284_v60 }
 0x101   :  { %v396_v4 = vadd.f32 %v416_v61, %v385_v0  ;;  %v384_v6 = vmul.f32 %v415_v55, %v359_v2 }
 0x102   :  { %v398_v5 = vadd.f32 %v416_v61, %v387_v1  ;;  %v386_v7 = vmul.f32 %v415_v55, %v369_v3 }
 0x103   :  { %v400_v8 = vmax.f32 %v396_v4, 0.0  ;;  %v395_v10 = vadd.f32 %v416_v61, %v384_v6 }
 0x104   :  { %v402_v9 = vmax.f32 %v398_v5, 0.0  ;;  %v397_v11 = vadd.f32 %v416_v61, %v386_v7 }
 0x105   :  { %404 = vst [vmem:[%s878_s4 + $0x8] sm:$0xff] %v400_v8  ;;  %v399_v12 = vmax.f32 %v395_v10, 0.0 }
 0x106   :  { %406 = vst [vmem:[%s878_s4 + $0x18] sm:$0xff] %v402_v9  ;;  %v401_v13 = vmax.f32 %v397_v11, 0.0 }
 0x107   :  { %403 = vst [vmem:[%s878_s4] sm:$0xff] %v399_v12 }
 0x108   :  { %405 = vst [vmem:[%s878_s4 + $0x10] sm:$0xff] %v401_v13 }

// kernel: feature_generator_resnet_forward.22
= control target key start
LH: loop header
LB: loop body
LE: loop exit
PB: predicated region body
PF: predicated region fallthrough
CT: control target
= control target key end

     0   :  { %vm29_vm0 = vcmask 523264   ;;  %s292_s1 = inlined_call_operand.vmem [shape: f32[64,128], index: 1, kind: input, shape index: {}]   ;;  %s293_s0 = inlined_call_operand.vmem [shape: f32[32,64], index: 0, kind: input, shape index: {}]   ;;  %s294_s2 = inlined_call_operand.vmem [shape: f32[1,128], index: 2, kind: input, shape index: {}]   ;;  %s295_s3 = inlined_call_operand.vmem [shape: f32[1,128], index: 3, kind: input, shape index: {}]   ;;  %s296_s4 = inlined_call_operand.vmem [shape: f32[32,128], index: 4, kind: output, shape index: {}]  }
   0x1   :  { %v28_v0 = vld [vmem:[%s292_s1 + $0x38] sm:$0xff]  ;;  %v27_v1 = vld [vmem:[%s292_s1 + $0x30] sm:$0xff]  ;;  %v26_v2 = vld [vmem:[%s292_s1 + $0x28] sm:$0xff] }
   0x2   :  { %175 = vmatprep.subr.mxu0 %v28_v0  ;;  %197 = vmatprep.subr.mxu1 %v28_v0  ;;  %v25_v3 = vld [vmem:[%s292_s1 + $0x20] sm:$0xff]  ;;  %v24_v4 = vld [vmem:[%s292_s1 + $0x18] sm:$0xff]  ;;  %v23_v5 = vld [vmem:[%s292_s1 + $0x10] sm:$0xff] }
   0x3   :  { %176 = vmatpush3.msra.mxu0 %v28_v0  ;;  %205 = vmatpush3.msra.mxu1 %v28_v0  ;;  %v22_v6 = vld [vmem:[%s292_s1 + $0x8] sm:$0xff]  ;;  %v21_v7 = vld [vmem:[%s292_s1] sm:$0xff]  ;;  %v19_v9 = vld [vmem:[%s293_s0 + $0x10] sm:$0xff] }
   0x4   :  { %177 = vmatprep.subr.mxu0 %v27_v1  ;;  %198 = vmatprep.subr.mxu1 %v27_v1  ;;  %v17_v8 = vld [vmem:[%s293_s0] sm:$0xff]  ;;  %v18_v10 = vld [vmem:[%s293_s0 + $0x8] sm:$0xff]  ;;  %v20_v11 = vld [vmem:[%s293_s0 + $0x18] sm:$0xff] }
   0x5   :  { %178 = vmatpush3.msra.mxu0 %v27_v1  ;;  %206 = vmatpush3.msra.mxu1 %v27_v1  ;;  %v161_v12 = vld [vmem:[%s294_s2] ss:$0 sm:$0xff] }
   0x6   :  { %179 = vmatprep.subr.mxu0 %v26_v2  ;;  %199 = vmatprep.subr.mxu1 %v26_v2  ;;  %v162_v14 = vld [vmem:[%s295_s3] ss:$0 sm:$0xff] }
   0x7   :  { %180 = vmatpush3.msra.mxu0 %v26_v2  ;;  %207 = vmatpush3.msra.mxu1 %v26_v2 }
   0x8   :  { %181 = vmatprep.subr.mxu0 %v25_v3  ;;  %200 = vmatprep.subr.mxu1 %v25_v3 }
   0x9   :  { %182 = vmatpush3.msra.mxu0 %v25_v3  ;;  %208 = vmatpush3.msra.mxu1 %v25_v3 }
   0xa   :  { %183 = vmatprep.subr.mxu0 %v24_v4  ;;  %201 = vmatprep.subr.mxu1 %v24_v4 }
   0xb   :  { %184 = vmatpush3.msra.mxu0 %v24_v4  ;;  %209 = vmatpush3.msra.mxu1 %v24_v4 }
   0xc   :  { %185 = vmatprep.subr.mxu0 %v23_v5  ;;  %202 = vmatprep.subr.mxu1 %v23_v5 }
   0xd   :  { %186 = vmatpush3.msra.mxu0 %v23_v5  ;;  %210 = vmatpush3.msra.mxu1 %v23_v5 }
   0xe   :  { %187 = vmatprep.subr.mxu0 %v22_v6  ;;  %203 = vmatprep.subr.mxu1 %v22_v6 }
   0xf   :  { %188 = vmatpush3.msra.mxu0 %v22_v6  ;;  %211 = vmatpush3.msra.mxu1 %v22_v6 }
  0x10   :  { %189 = vmatprep.subr.mxu0 %v21_v7  ;;  %204 = vmatprep.subr.mxu1 %v21_v7 }
  0x11   :  { %190 = vmatpush3.msra.mxu0 %v21_v7  ;;  %212 = vmatpush3.msra.mxu1 %v21_v7 }
  0x12   :  { %191 = vmatprep.mubr.msk.f32.mxu0 %vm29_vm0, %v17_v8  ;;  %194 = vmatprep.mubr.msk.f32.mxu1 %vm29_vm0, %v19_v9 }
  0x13   :  { %192 = vmatmul.mubr.msk.f32.vlgmr.msra.gmra.mxu0 %vm29_vm0, %v18_v10  ;;  %195 = vmatmul.mubr.msk.f32.vlgmr.msra.gmra.mxu1 %vm29_vm0, %v20_v11 }
  0xd3   :  { %v193_v13 = vpop.f32.mrf.mxu0  ;;  %v196_v15 = vpop.f32.mrf.mxu1 }
  0xd4   :  { %v135_v16 = vmul.f32 %v193_v13, %v161_v12  ;;  %v137_v17 = vmul.f32 %v196_v15, %v161_v12 }
  0xd5   :  { %v108_v18 = vpop.f32.mrf.mxu0  ;;  %v118_v19 = vpop.f32.mrf.mxu1 }
  0xd6   :  { %v146_v20 = vadd.f32 %v162_v14, %v135_v16  ;;  %v148_v21 = vadd.f32 %v162_v14, %v137_v17  ;;  %v134_v22 = vmul.f32 %v161_v12, %v108_v18  ;;  %v136_v23 = vmul.f32 %v161_v12, %v118_v19 }
  0xd8   :  { %150 = vst [vmem:[%s296_s4 + $0x8] sm:$0xff] %v146_v20  ;;  %152 = vst [vmem:[%s296_s4 + $0x18] sm:$0xff] %v148_v21  ;;  %v145_v24 = vadd.f32 %v162_v14, %v134_v22  ;;  %v147_v25 = vadd.f32 %v162_v14, %v136_v23 }
  0xda   :  { %149 = vst [vmem:[%s296_s4] sm:$0xff] %v145_v24  ;;  %151 = vst [vmem:[%s296_s4 + $0x10] sm:$0xff] %v147_v25 }

// kernel: feature_generator_resnet_forward.24
= control target key start
LH: loop header
LB: loop body
LE: loop exit
PB: predicated region body
PF: predicated region fallthrough
CT: control target
= control target key end

     0   :  { %s1535_s1 = inlined_call_operand.vmem [shape: f32[1152,128], index: 1, kind: input, shape index: {}]   ;;  %s1536_s0 = inlined_call_operand.vmem [shape: f32[32,1152], index: 0, kind: input, shape index: {}]   ;;  %s1537_s2 = inlined_call_operand.vmem [shape: f32[1,128], index: 2, kind: input, shape index: {}]   ;;  %s1538_s3 = inlined_call_operand.vmem [shape: f32[1,128], index: 3, kind: input, shape index: {}]   ;;  %s1539_s4 = inlined_call_operand.vmem [shape: f32[32,128], index: 4, kind: input, shape index: {}]   ;;  %s1540_s5 = inlined_call_operand.vmem [shape: f32[32,128], index: 5, kind: output, shape index: {}]  }
   0x1   :  { %v87_v0 = vld [vmem:[%s1535_s1 + $0xf8] sm:$0xff]  ;;  %v86_v4 = vld [vmem:[%s1535_s1 + $0xf0] sm:$0xff]  ;;  %v85_v8 = vld [vmem:[%s1535_s1 + $0xe8] sm:$0xff] }
   0x2   :  { %v119_v1 = vld [vmem:[%s1535_s1 + $0x1f8] sm:$0xff]  ;;  %669 = vmatprep.subr.mxu0 %v87_v0  ;;  %v118_v5 = vld [vmem:[%s1535_s1 + $0x1f0] sm:$0xff]  ;;  %v117_v9 = vld [vmem:[%s1535_s1 + $0x1e8] sm:$0xff] }
   0x3   :  { %v71_v2 = vld [vmem:[%s1535_s1 + $0x78] sm:$0xff]  ;;  %713 = vmatprep.subr.mxu1 %v119_v1  ;;  %v70_v6 = vld [vmem:[%s1535_s1 + $0x70] sm:$0xff]  ;;  %v69_v10 = vld [vmem:[%s1535_s1 + $0x68] sm:$0xff] }
   0x4   :  { %v103_v3 = vld [vmem:[%s1535_s1 + $0x178] sm:$0xff]  ;;  %670 = vmatpush3.msra.mxu0 %v71_v2  ;;  %v102_v7 = vld [vmem:[%s1535_s1 + $0x170] sm:$0xff]  ;;  %v101_v11 = vld [vmem:[%s1535_s1 + $0x168] sm:$0xff] }
   0x5   :  { %714 = vmatpush3.msra.mxu1 %v103_v3  ;;  %671 = vmatprep.subr.mxu0 %v86_v4  ;;  %v84_v12 = vld [vmem:[%s1535_s1 + $0xe0] sm:$0xff]  ;;  %v83_v16 = vld [vmem:[%s1535_s1 + $0xd8] sm:$0xff]  ;;  %v82_v20 = vld [vmem:[%s1535_s1 + $0xd0] sm:$0xff] }
   0x6   :  { %715 = vmatprep.subr.mxu1 %v118_v5  ;;  %672 = vmatpush3.msra.mxu0 %v70_v6  ;;  %v116_v13 = vld [vmem:[%s1535_s1 + $0x1e0] sm:$0xff]  ;;  %v115_v17 = vld [vmem:[%s1535_s1 + $0x1d8] sm:$0xff]  ;;  %v114_v21 = vld [vmem:[%s1535_s1 + $0x1d0] sm:$0xff] }
   0x7   :  { %716 = vmatpush3.msra.mxu1 %v102_v7  ;;  %673 = vmatprep.subr.mxu0 %v85_v8  ;;  %v68_v14 = vld [vmem:[%s1535_s1 + $0x60] sm:$0xff]  ;;  %v67_v18 = vld [vmem:[%s1535_s1 + $0x58] sm:$0xff]  ;;  %v66_v22 = vld [vmem:[%s1535_s1 + $0x50] sm:$0xff] }
   0x8   :  { %717 = vmatprep.subr.mxu1 %v117_v9  ;;  %v100_v15 = vld [vmem:[%s1535_s1 + $0x160] sm:$0xff]  ;;  %674 = vmatpush3.msra.mxu0 %v69_v10  ;;  %v99_v19 = vld [vmem:[%s1535_s1 + $0x158] sm:$0xff]  ;;  %v98_v23 = vld [vmem:[%s1535_s1 + $0x150] sm:$0xff] }
   0x9   :  { %718 = vmatpush3.msra.mxu1 %v101_v11  ;;  %675 = vmatprep.subr.mxu0 %v84_v12  ;;  %v81_v24 = vld [vmem:[%s1535_s1 + $0xc8] sm:$0xff]  ;;  %v80_v28 = vld [vmem:[%s1535_s1 + $0xc0] sm:$0xff]  ;;  %v79_v32 = vld [vmem:[%s1535_s1 + $0xb8] sm:$0xff] }
   0xa   :  { %719 = vmatprep.subr.mxu1 %v116_v13  ;;  %676 = vmatpush3.msra.mxu0 %v68_v14  ;;  %v113_v25 = vld [vmem:[%s1535_s1 + $0x1c8] sm:$0xff]  ;;  %v112_v29 = vld [vmem:[%s1535_s1 + $0x1c0] sm:$0xff]  ;;  %v111_v33 = vld [vmem:[%s1535_s1 + $0x1b8] sm:$0xff] }
   0xb   :  { %720 = vmatpush3.msra.mxu1 %v100_v15  ;;  %677 = vmatprep.subr.mxu0 %v83_v16  ;;  %v65_v26 = vld [vmem:[%s1535_s1 + $0x48] sm:$0xff]  ;;  %v64_v30 = vld [vmem:[%s1535_s1 + $0x40] sm:$0xff]  ;;  %v63_v34 = vld [vmem:[%s1535_s1 + $0x38] sm:$0xff] }
   0xc   :  { %721 = vmatprep.subr.mxu1 %v115_v17  ;;  %678 = vmatpush3.msra.mxu0 %v67_v18  ;;  %v97_v27 = vld [vmem:[%s1535_s1 + $0x148] sm:$0xff]  ;;  %v96_v31 = vld [vmem:[%s1535_s1 + $0x140] sm:$0xff]  ;;  %v95_v35 = vld [vmem:[%s1535_s1 + $0x138] sm:$0xff] }
   0xd   :  { %722 = vmatpush3.msra.mxu1 %v99_v19  ;;  %679 = vmatprep.subr.mxu0 %v82_v20  ;;  %v78_v36 = vld [vmem:[%s1535_s1 + $0xb0] sm:$0xff]  ;;  %v77_v40 = vld [vmem:[%s1535_s1 + $0xa8] sm:$0xff]  ;;  %v76_v44 = vld [vmem:[%s1535_s1 + $0xa0] sm:$0xff] }
   0xe   :  { %723 = vmatprep.subr.mxu1 %v114_v21  ;;  %680 = vmatpush3.msra.mxu0 %v66_v22  ;;  %v110_v37 = vld [vmem:[%s1535_s1 + $0x1b0] sm:$0xff]  ;;  %v109_v41 = vld [vmem:[%s1535_s1 + $0x1a8] sm:$0xff]  ;;  %v108_v45 = vld [vmem:[%s1535_s1 + $0x1a0] sm:$0xff] }
   0xf   :  { %724 = vmatpush3.msra.mxu1 %v98_v23  ;;  %681 = vmatprep.subr.mxu0 %v81_v24  ;;  %v62_v38 = vld [vmem:[%s1535_s1 + $0x30] sm:$0xff]  ;;  %v61_v42 = vld [vmem:[%s1535_s1 + $0x28] sm:$0xff]  ;;  %v60_v46 = vld [vmem:[%s1535_s1 + $0x20] sm:$0xff] }
  0x10   :  { %725 = vmatprep.subr.mxu1 %v113_v25  ;;  %682 = vmatpush3.msra.mxu0 %v65_v26  ;;  %v94_v39 = vld [vmem:[%s1535_s1 + $0x130] sm:$0xff]  ;;  %v93_v43 = vld [vmem:[%s1535_s1 + $0x128] sm:$0xff]  ;;  %v92_v47 = vld [vmem:[%s1535_s1 + $0x120] sm:$0xff] }
  0x11   :  { %726 = vmatpush3.msra.mxu1 %v97_v27  ;;  %683 = vmatprep.subr.mxu0 %v80_v28  ;;  %v75_v48 = vld [vmem:[%s1535_s1 + $0x98] sm:$0xff]  ;;  %v74_v52 = vld [vmem:[%s1535_s1 + $0x90] sm:$0xff]  ;;  %v73_v56 = vld [vmem:[%s1535_s1 + $0x88] sm:$0xff] }
  0x12   :  { %727 = vmatprep.subr.mxu1 %v112_v29  ;;  %684 = vmatpush3.msra.mxu0 %v64_v30  ;;  %v107_v49 = vld [vmem:[%s1535_s1 + $0x198] sm:$0xff]  ;;  %v106_v53 = vld [vmem:[%s1535_s1 + $0x190] sm:$0xff]  ;;  %v105_v57 = vld [vmem:[%s1535_s1 + $0x188] sm:$0xff] }
  0x13   :  { %728 = vmatpush3.msra.mxu1 %v96_v31  ;;  %685 = vmatprep.subr.mxu0 %v79_v32  ;;  %v59_v50 = vld [vmem:[%s1535_s1 + $0x18] sm:$0xff]  ;;  %v58_v54 = vld [vmem:[%s1535_s1 + $0x10] sm:$0xff]  ;;  %v57_v58 = vld [vmem:[%s1535_s1 + $0x8] sm:$0xff] }
  0x14   :  { %729 = vmatprep.subr.mxu1 %v111_v33  ;;  %686 = vmatpush3.msra.mxu0 %v63_v34  ;;  %v91_v51 = vld [vmem:[%s1535_s1 + $0x118] sm:$0xff]  ;;  %v90_v55 = vld [vmem:[%s1535_s1 + $0x110] sm:$0xff]  ;;  %v89_v59 = vld [vmem:[%s1535_s1 + $0x108] sm:$0xff] }
  0x15   :  { %730 = vmatpush3.msra.mxu1 %v95_v35  ;;  %687 = vmatprep.subr.mxu0 %v78_v36  ;;  %v72_v60 = vld [vmem:[%s1535_s1 + $0x80] sm:$0xff]  ;;  %v21_v63 = vld [vmem:[%s1536_s0 + $0x8] sm:$0xff]  ;;  %v23_v1 = vld [vmem:[%s1536_s0 + $0x18] sm:$0xff] }
  0x16   :  { %731 = vmatprep.subr.mxu1 %v110_v37  ;;  %688 = vmatpush3.msra.mxu0 %v62_v38  ;;  %v104_v61 = vld [vmem:[%s1535_s1 + $0x180] sm:$0xff]  ;;  %v22_v3 = vld [vmem:[%s1536_s0 + $0x10] sm:$0xff]  ;;  %v151_v4 = vld [vmem:[%s1535_s1 + $0x2f8] sm:$0xff] }
  0x17   :  { %732 = vmatpush3.msra.mxu1 %v94_v39  ;;  %689 = vmatprep.subr.mxu0 %v77_v40  ;;  %v56_v62 = vld [vmem:[%s1535_s1] sm:$0xff]  ;;  %v183_v5 = vld [vmem:[%s1535_s1 + $0x3f8] sm:$0xff]  ;;  %v150_v8 = vld [vmem:[%s1535_s1 + $0x2f0] sm:$0xff] }
  0x18   :  { %733 = vmatprep.subr.mxu1 %v109_v41  ;;  %690 = vmatpush3.msra.mxu0 %v61_v42  ;;  %v88_v0 = vld [vmem:[%s1535_s1 + $0x100] sm:$0xff]  ;;  %v135_v6 = vld [vmem:[%s1535_s1 + $0x278] sm:$0xff]  ;;  %v182_v9 = vld [vmem:[%s1535_s1 + $0x3f0] sm:$0xff] }
  0x19   :  { %734 = vmatpush3.msra.mxu1 %v93_v43  ;;  %691 = vmatprep.subr.mxu0 %v76_v44  ;;  %v20_v2 = vld [vmem:[%s1536_s0] sm:$0xff]  ;;  %v167_v7 = vld [vmem:[%s1535_s1 + $0x378] sm:$0xff]  ;;  %v134_v10 = vld [vmem:[%s1535_s1 + $0x270] sm:$0xff] }
  0x1a   :  { %735 = vmatprep.subr.mxu1 %v108_v45  ;;  %692 = vmatpush3.msra.mxu0 %v60_v46  ;;  %v166_v11 = vld [vmem:[%s1535_s1 + $0x370] sm:$0xff]  ;;  %v149_v12 = vld [vmem:[%s1535_s1 + $0x2e8] sm:$0xff]  ;;  %v148_v16 = vld [vmem:[%s1535_s1 + $0x2e0] sm:$0xff] }
  0x1b   :  { %736 = vmatpush3.msra.mxu1 %v92_v47  ;;  %693 = vmatprep.subr.mxu0 %v75_v48  ;;  %v181_v13 = vld [vmem:[%s1535_s1 + $0x3e8] sm:$0xff]  ;;  %v180_v17 = vld [vmem:[%s1535_s1 + $0x3e0] sm:$0xff]  ;;  %v147_v20 = vld [vmem:[%s1535_s1 + $0x2d8] sm:$0xff] }
  0x1c   :  { %737 = vmatprep.subr.mxu1 %v107_v49  ;;  %694 = vmatpush3.msra.mxu0 %v59_v50  ;;  %v133_v14 = vld [vmem:[%s1535_s1 + $0x268] sm:$0xff]  ;;  %v132_v18 = vld [vmem:[%s1535_s1 + $0x260] sm:$0xff]  ;;  %v179_v21 = vld [vmem:[%s1535_s1 + $0x3d8] sm:$0xff] }
  0x1d   :  { %738 = vmatpush3.msra.mxu1 %v91_v51  ;;  %695 = vmatprep.subr.mxu0 %v74_v52  ;;  %v165_v15 = vld [vmem:[%s1535_s1 + $0x368] sm:$0xff]  ;;  %v164_v19 = vld [vmem:[%s1535_s1 + $0x360] sm:$0xff]  ;;  %v131_v22 = vld [vmem:[%s1535_s1 + $0x258] sm:$0xff] }
  0x1e   :  { %739 = vmatprep.subr.mxu1 %v106_v53  ;;  %696 = vmatpush3.msra.mxu0 %v58_v54  ;;  %v163_v23 = vld [vmem:[%s1535_s1 + $0x358] sm:$0xff]  ;;  %v146_v24 = vld [vmem:[%s1535_s1 + $0x2d0] sm:$0xff]  ;;  %v145_v28 = vld [vmem:[%s1535_s1 + $0x2c8] sm:$0xff] }
  0x1f   :  { %740 = vmatpush3.msra.mxu1 %v90_v55  ;;  %697 = vmatprep.subr.mxu0 %v73_v56  ;;  %v178_v25 = vld [vmem:[%s1535_s1 + $0x3d0] sm:$0xff]  ;;  %v177_v29 = vld [vmem:[%s1535_s1 + $0x3c8] sm:$0xff]  ;;  %v144_v32 = vld [vmem:[%s1535_s1 + $0x2c0] sm:$0xff] }
  0x20   :  { %741 = vmatprep.subr.mxu1 %v105_v57  ;;  %698 = vmatpush3.msra.mxu0 %v57_v58  ;;  %v130_v26 = vld [vmem:[%s1535_s1 + $0x250] sm:$0xff]  ;;  %v129_v30 = vld [vmem:[%s1535_s1 + $0x248] sm:$0xff]  ;;  %v176_v33 = vld [vmem:[%s1535_s1 + $0x3c0] sm:$0xff] }
  0x21   :  { %742 = vmatpush3.msra.mxu1 %v89_v59  ;;  %699 = vmatprep.subr.mxu0 %v72_v60  ;;  %v162_v27 = vld [vmem:[%s1535_s1 + $0x350] sm:$0xff]  ;;  %v161_v31 = vld [vmem:[%s1535_s1 + $0x348] sm:$0xff]  ;;  %v128_v34 = vld [vmem:[%s1535_s1 + $0x240] sm:$0xff] }
  0x22   :  { %743 = vmatprep.subr.mxu1 %v104_v61  ;;  %700 = vmatpush3.msra.mxu0 %v56_v62  ;;  %v160_v35 = vld [vmem:[%s1535_s1 + $0x340] sm:$0xff]  ;;  %v143_v36 = vld [vmem:[%s1535_s1 + $0x2b8] sm:$0xff]  ;;  %v30_v40 = vld [vmem:[%s1536_s0 + $0x50] sm:$0xff] }
  0x23   :  { %264 = vmatprep.mubr.f32.mxu0 %v21_v63  ;;  %744 = vmatpush3.msra.mxu1 %v88_v0  ;;  %v175_v37 = vld [vmem:[%s1535_s1 + $0x3b8] sm:$0xff]  ;;  %v32_v41 = vld [vmem:[%s1536_s0 + $0x60] sm:$0xff]  ;;  %v142_v42 = vld [vmem:[%s1535_s1 + $0x2b0] sm:$0xff] }
  0x24   :  { %349 = vmatprep.mubr.f32.mxu1 %v23_v1  ;;  %265 = vmatmul.mubr.f32.vlgmr.msra.gmra.mxu0 %v20_v2  ;;  %v127_v38 = vld [vmem:[%s1535_s1 + $0x238] sm:$0xff]  ;;  %v174_v43 = vld [vmem:[%s1535_s1 + $0x3b0] sm:$0xff]  ;;  %v29_v44 = vld [vmem:[%s1536_s0 + $0x48] sm:$0xff] }
  0x25   :  { %350 = vmatmul.mubr.f32.vlgmr.msra.gmra.mxu1 %v22_v3  ;;  %757 = vmatprep.subr.mxu0 %v151_v4  ;;  %v159_v39 = vld [vmem:[%s1535_s1 + $0x338] sm:$0xff]  ;;  %v126_v46 = vld [vmem:[%s1535_s1 + $0x230] sm:$0xff]  ;;  %v141_v48 = vld [vmem:[%s1535_s1 + $0x2a8] sm:$0xff] }
  0x26   :  { %801 = vmatprep.subr.mxu1 %v183_v5  ;;  %758 = vmatpush3.msra.mxu0 %v135_v6  ;;  %v31_v45 = vld [vmem:[%s1536_s0 + $0x58] sm:$0xff]  ;;  %v158_v47 = vld [vmem:[%s1535_s1 + $0x330] sm:$0xff]  ;;  %v173_v49 = vld [vmem:[%s1535_s1 + $0x3a8] sm:$0xff] }
  0x27   :  { %802 = vmatpush3.msra.mxu1 %v167_v7  ;;  %759 = vmatprep.subr.mxu0 %v150_v8  ;;  %v125_v50 = vld [vmem:[%s1535_s1 + $0x228] sm:$0xff]  ;;  %v39_v52 = vld [vmem:[%s1536_s0 + $0x98] sm:$0xff]  ;;  %v140_v54 = vld [vmem:[%s1535_s1 + $0x2a0] sm:$0xff] }
  0x28   :  { %803 = vmatprep.subr.mxu1 %v182_v9  ;;  %760 = vmatpush3.msra.mxu0 %v134_v10  ;;  %v157_v51 = vld [vmem:[%s1535_s1 + $0x328] sm:$0xff]  ;;  %v172_v55 = vld [vmem:[%s1535_s1 + $0x3a0] sm:$0xff]  ;;  %v38_v56 = vld [vmem:[%s1536_s0 + $0x90] sm:$0xff] }
  0x29   :  { %804 = vmatpush3.msra.mxu1 %v166_v11  ;;  %761 = vmatprep.subr.mxu0 %v149_v12  ;;  %v41_v53 = vld [vmem:[%s1536_s0 + $0xa8] sm:$0xff]  ;;  %v40_v57 = vld [vmem:[%s1536_s0 + $0xa0] sm:$0xff]  ;;  %v139_v60 = vld [vmem:[%s1535_s1 + $0x298] sm:$0xff] }
  0x2a   :  { %805 = vmatprep.subr.mxu1 %v181_v13  ;;  %762 = vmatpush3.msra.mxu0 %v133_v14  ;;  %v124_v58 = vld [vmem:[%s1535_s1 + $0x220] sm:$0xff]  ;;  %v171_v61 = vld [vmem:[%s1535_s1 + $0x398] sm:$0xff]  ;;  %v50_v1 = vld [vmem:[%s1536_s0 + $0xf0] sm:$0xff] }
  0x2b   :  { %806 = vmatpush3.msra.mxu1 %v165_v15  ;;  %763 = vmatprep.subr.mxu0 %v148_v16  ;;  %v156_v59 = vld [vmem:[%s1535_s1 + $0x320] sm:$0xff]  ;;  %v123_v62 = vld [vmem:[%s1535_s1 + $0x218] sm:$0xff]  ;;  %v138_v2 = vld [vmem:[%s1535_s1 + $0x290] sm:$0xff] }
  0x2c   :  { %807 = vmatprep.subr.mxu1 %v180_v17  ;;  %764 = vmatpush3.msra.mxu0 %v132_v18  ;;  %v155_v63 = vld [vmem:[%s1535_s1 + $0x318] sm:$0xff]  ;;  %v48_v0 = vld [vmem:[%s1536_s0 + $0xe0] sm:$0xff]  ;;  %v170_v3 = vld [vmem:[%s1535_s1 + $0x390] sm:$0xff] }
  0x2d   :  { %808 = vmatpush3.msra.mxu1 %v164_v19  ;;  %765 = vmatprep.subr.mxu0 %v147_v20  ;;  %v47_v4 = vld [vmem:[%s1536_s0 + $0xd8] sm:$0xff]  ;;  %v49_v5 = vld [vmem:[%s1536_s0 + $0xe8] sm:$0xff]  ;;  %v122_v6 = vld [vmem:[%s1535_s1 + $0x210] sm:$0xff] }
  0x2e   :  { %809 = vmatprep.subr.mxu1 %v179_v21  ;;  %766 = vmatpush3.msra.mxu0 %v131_v22  ;;  %v154_v7 = vld [vmem:[%s1535_s1 + $0x310] sm:$0xff]  ;;  %v137_v8 = vld [vmem:[%s1535_s1 + $0x288] sm:$0xff]  ;;  %v136_v12 = vld [vmem:[%s1535_s1 + $0x280] sm:$0xff] }
  0x2f   :  { %810 = vmatpush3.msra.mxu1 %v163_v23  ;;  %767 = vmatprep.subr.mxu0 %v146_v24  ;;  %v169_v9 = vld [vmem:[%s1535_s1 + $0x388] sm:$0xff]  ;;  %v168_v13 = vld [vmem:[%s1535_s1 + $0x380] sm:$0xff]  ;;  %v27_v17 = vld [vmem:[%s1536_s0 + $0x38] sm:$0xff] }
  0x30   :  { %811 = vmatprep.subr.mxu1 %v178_v25  ;;  %768 = vmatpush3.msra.mxu0 %v130_v26  ;;  %v121_v10 = vld [vmem:[%s1535_s1 + $0x208] sm:$0xff]  ;;  %v120_v14 = vld [vmem:[%s1535_s1 + $0x200] sm:$0xff]  ;;  %v26_v19 = vld [vmem:[%s1536_s0 + $0x30] sm:$0xff] }
  0x31   :  { %812 = vmatpush3.msra.mxu1 %v162_v27  ;;  %769 = vmatprep.subr.mxu0 %v145_v28  ;;  %v153_v11 = vld [vmem:[%s1535_s1 + $0x308] sm:$0xff]  ;;  %v152_v16 = vld [vmem:[%s1535_s1 + $0x300] sm:$0xff]  ;;  %v199_v20 = vld [vmem:[%s1535_s1 + $0x478] sm:$0xff] }
  0x32   :  { %813 = vmatprep.subr.mxu1 %v177_v29  ;;  %770 = vmatpush3.msra.mxu0 %v129_v30  ;;  %v25_v15 = vld [vmem:[%s1536_s0 + $0x28] sm:$0xff]  ;;  %v24_v18 = vld [vmem:[%s1536_s0 + $0x20] sm:$0xff]  ;;  %v198_v21 = vld [vmem:[%s1535_s1 + $0x470] sm:$0xff] }
  0x33   :  { %814 = vmatpush3.msra.mxu1 %v161_v31  ;;  %771 = vmatprep.subr.mxu0 %v144_v32  ;;  %v34_v22 = vld [vmem:[%s1536_s0 + $0x70] sm:$0xff]  ;;  %v33_v23 = vld [vmem:[%s1536_s0 + $0x68] sm:$0xff]  ;;  %v36_v25 = vld [vmem:[%s1536_s0 + $0x80] sm:$0xff] }
  0x34   :  { %815 = vmatprep.subr.mxu1 %v176_v33  ;;  %772 = vmatpush3.msra.mxu0 %v128_v34  ;;  %v197_v24 = vld [vmem:[%s1535_s1 + $0x468] sm:$0xff]  ;;  %v196_v26 = vld [vmem:[%s1535_s1 + $0x460] sm:$0xff]  ;;  %v35_v27 = vld [vmem:[%s1536_s0 + $0x78] sm:$0xff] }
  0x35   :  { %816 = vmatpush3.msra.mxu1 %v160_v35  ;;  %773 = vmatprep.subr.mxu0 %v143_v36  ;;  %v43_v28 = vld [vmem:[%s1536_s0 + $0xb8] sm:$0xff]  ;;  %v42_v29 = vld [vmem:[%s1536_s0 + $0xb0] sm:$0xff]  ;;  %v45_v31 = vld [vmem:[%s1536_s0 + $0xc8] sm:$0xff] }
  0x36   :  { %817 = vmatprep.subr.mxu1 %v175_v37  ;;  %774 = vmatpush3.msra.mxu0 %v127_v38  ;;  %v195_v30 = vld [vmem:[%s1535_s1 + $0x458] sm:$0xff]  ;;  %v194_v32 = vld [vmem:[%s1535_s1 + $0x450] sm:$0xff]  ;;  %v44_v33 = vld [vmem:[%s1536_s0 + $0xc0] sm:$0xff] }
  0x37   :  { %818 = vmatpush3.msra.mxu1 %v159_v39  ;;  %269 = vmatprep.mubr.f32.mxu0 %v30_v40  ;;  %v52_v34 = vld [vmem:[%s1536_s0 + $0x100] sm:$0xff]  ;;  %v51_v35 = vld [vmem:[%s1536_s0 + $0xf8] sm:$0xff]  ;;  %v193_v36 = vld [vmem:[%s1535_s1 + $0x448] sm:$0xff] }
  0x38   :  { %354 = vmatprep.mubr.f32.mxu1 %v32_v41  ;;  %775 = vmatprep.subr.mxu0 %v142_v42  ;;  %v54_v37 = vld [vmem:[%s1536_s0 + $0x110] sm:$0xff]  ;;  %v192_v38 = vld [vmem:[%s1535_s1 + $0x440] sm:$0xff]  ;;  %v53_v39 = vld [vmem:[%s1536_s0 + $0x108] sm:$0xff] }
  0x39   :  { %819 = vmatprep.subr.mxu1 %v174_v43  ;;  %270 = vmatmul.mubr.f32.gmra.mxu0 %v29_v44  ;;  %v191_v40 = vld [vmem:[%s1535_s1 + $0x438] sm:$0xff]  ;;  %v190_v41 = vld [vmem:[%s1535_s1 + $0x430] sm:$0xff]  ;;  %v189_v42 = vld [vmem:[%s1535_s1 + $0x428] sm:$0xff] }
  0x3a   :  { %355 = vmatmul.mubr.f32.gmra.mxu1 %v31_v45  ;;  %776 = vmatpush3.msra.mxu0 %v126_v46  ;;  %v188_v43 = vld [vmem:[%s1535_s1 + $0x420] sm:$0xff]  ;;  %v187_v44 = vld [vmem:[%s1535_s1 + $0x418] sm:$0xff]  ;;  %v186_v45 = vld [vmem:[%s1535_s1 + $0x410] sm:$0xff] }
  0x3b   :  { %820 = vmatpush3.msra.mxu1 %v158_v47  ;;  %777 = vmatprep.subr.mxu0 %v141_v48  ;;  %v185_v46 = vld [vmem:[%s1535_s1 + $0x408] sm:$0xff]  ;;  %v184_v47 = vld [vmem:[%s1535_s1 + $0x400] sm:$0xff] }
  0x3c   :  { %821 = vmatprep.subr.mxu1 %v173_v49  ;;  %778 = vmatpush3.msra.mxu0 %v125_v50  ;;  %v28_v48 = vld [vmem:[%s1536_s0 + $0x40] sm:$0xff]  ;;  %v46_v49 = vld [vmem:[%s1536_s0 + $0xd0] sm:$0xff]  ;;  %v37_v50 = vld [vmem:[%s1536_s0 + $0x88] sm:$0xff] }
  0x3d   :  { %822 = vmatpush3.msra.mxu1 %v157_v51  ;;  %274 = vmatprep.mubr.f32.mxu0 %v39_v52  ;;  %v55_v51 = vld [vmem:[%s1536_s0 + $0x118] sm:$0xff] }
  0x3e   :  { %359 = vmatprep.mubr.f32.mxu1 %v41_v53  ;;  %779 = vmatprep.subr.mxu0 %v140_v54 }
  0x3f   :  { %823 = vmatprep.subr.mxu1 %v172_v55  ;;  %275 = vmatmul.mubr.f32.gmra.mxu0 %v38_v56 }
  0x40   :  { %360 = vmatmul.mubr.f32.gmra.mxu1 %v40_v57  ;;  %780 = vmatpush3.msra.mxu0 %v124_v58 }
  0x41   :  { %824 = vmatpush3.msra.mxu1 %v156_v59  ;;  %781 = vmatprep.subr.mxu0 %v139_v60 }
  0x42   :  { %825 = vmatprep.subr.mxu1 %v171_v61  ;;  %782 = vmatpush3.msra.mxu0 %v123_v62 }
  0x43   :  { %826 = vmatpush3.msra.mxu1 %v155_v63  ;;  %279 = vmatprep.mubr.f32.mxu0 %v48_v0 }
  0x44   :  { %364 = vmatprep.mubr.f32.mxu1 %v50_v1  ;;  %783 = vmatprep.subr.mxu0 %v138_v2 }
  0x45   :  { %827 = vmatprep.subr.mxu1 %v170_v3  ;;  %280 = vmatmul.mubr.f32.gmra.mxu0 %v47_v4 }
  0x46   :  { %365 = vmatmul.mubr.f32.gmra.mxu1 %v49_v5  ;;  %784 = vmatpush3.msra.mxu0 %v122_v6 }
  0x47   :  { %828 = vmatpush3.msra.mxu1 %v154_v7  ;;  %785 = vmatprep.subr.mxu0 %v137_v8 }
  0x48   :  { %829 = vmatprep.subr.mxu1 %v169_v9  ;;  %786 = vmatpush3.msra.mxu0 %v121_v10 }
  0x49   :  { %830 = vmatpush3.msra.mxu1 %v153_v11  ;;  %787 = vmatprep.subr.mxu0 %v136_v12 }
  0x4a   :  { %831 = vmatprep.subr.mxu1 %v168_v13  ;;  %788 = vmatpush3.msra.mxu0 %v120_v14 }
  0x4b   :  { %434 = vmatprep.mubr.f32.mxu0 %v25_v15  ;;  %832 = vmatpush3.msra.mxu1 %v152_v16 }
  0x4c   :  { %519 = vmatprep.mubr.f32.mxu1 %v27_v17  ;;  %435 = vmatmul.mubr.f32.vlgmr.msra.gmra.mxu0 %v24_v18 }
  0x4d   :  { %520 = vmatmul.mubr.f32.vlgmr.msra.gmra.mxu1 %v26_v19  ;;  %865 = vmatprep.subr.mxu0 %v199_v20 }
  0x4e   :  { %903 = vmatprep.subr.mxu1 %v199_v20  ;;  %866 = vmatpush3.msra.mxu0 %v199_v20 }
  0x4f   :  { %919 = vmatpush3.msra.mxu1 %v199_v20  ;;  %867 = vmatprep.subr.mxu0 %v198_v21 }
  0x50   :  { %904 = vmatprep.subr.mxu1 %v198_v21  ;;  %439 = vmatprep.mubr.f32.mxu0 %v34_v22 }
  0x51   :  { %868 = vmatpush3.msra.mxu0 %v198_v21  ;;  %920 = vmatpush3.msra.mxu1 %v198_v21 }
  0x52   :  { %440 = vmatmul.mubr.f32.gmra.mxu0 %v33_v23  ;;  %869 = vmatprep.subr.mxu0 %v197_v24 }
  0x53   :  { %905 = vmatprep.subr.mxu1 %v197_v24  ;;  %524 = vmatprep.mubr.f32.mxu1 %v36_v25 }
  0x54   :  { %870 = vmatpush3.msra.mxu0 %v197_v24  ;;  %921 = vmatpush3.msra.mxu1 %v197_v24 }
  0x55   :  { %871 = vmatprep.subr.mxu0 %v196_v26  ;;  %525 = vmatmul.mubr.f32.gmra.mxu1 %v35_v27 }
  0x56   :  { %906 = vmatprep.subr.mxu1 %v196_v26  ;;  %444 = vmatprep.mubr.f32.mxu0 %v43_v28 }
  0x57   :  { %872 = vmatpush3.msra.mxu0 %v196_v26  ;;  %922 = vmatpush3.msra.mxu1 %v196_v26 }
  0x58   :  { %445 = vmatmul.mubr.f32.gmra.mxu0 %v42_v29  ;;  %873 = vmatprep.subr.mxu0 %v195_v30 }
  0x59   :  { %907 = vmatprep.subr.mxu1 %v195_v30  ;;  %529 = vmatprep.mubr.f32.mxu1 %v45_v31 }
  0x5a   :  { %874 = vmatpush3.msra.mxu0 %v195_v30  ;;  %923 = vmatpush3.msra.mxu1 %v195_v30 }
  0x5b   :  { %875 = vmatprep.subr.mxu0 %v194_v32  ;;  %530 = vmatmul.mubr.f32.gmra.mxu1 %v44_v33 }
  0x5c   :  { %908 = vmatprep.subr.mxu1 %v194_v32  ;;  %449 = vmatprep.mubr.f32.mxu0 %v52_v34 }
  0x5d   :  { %876 = vmatpush3.msra.mxu0 %v194_v32  ;;  %924 = vmatpush3.msra.mxu1 %v194_v32 }
  0x5e   :  { %450 = vmatmul.mubr.f32.gmra.mxu0 %v51_v35  ;;  %877 = vmatprep.subr.mxu0 %v193_v36 }
  0x5f   :  { %909 = vmatprep.subr.mxu1 %v193_v36  ;;  %534 = vmatprep.mubr.f32.mxu1 %v54_v37 }
  0x60   :  { %878 = vmatpush3.msra.mxu0 %v193_v36  ;;  %925 = vmatpush3.msra.mxu1 %v193_v36 }
  0x61   :  { %879 = vmatprep.subr.mxu0 %v192_v38  ;;  %535 = vmatmul.mubr.f32.gmra.mxu1 %v53_v39 }
  0x62   :  { %910 = vmatprep.subr.mxu1 %v192_v38  ;;  %880 = vmatpush3.msra.mxu0 %v192_v38 }
  0x63   :  { %926 = vmatpush3.msra.mxu1 %v192_v38  ;;  %881 = vmatprep.subr.mxu0 %v191_v40 }
  0x64   :  { %911 = vmatprep.subr.mxu1 %v191_v40  ;;  %882 = vmatpush3.msra.mxu0 %v191_v40 }
  0x65   :  { %927 = vmatpush3.msra.mxu1 %v191_v40  ;;  %883 = vmatprep.subr.mxu0 %v190_v41 }
  0x66   :  { %912 = vmatprep.subr.mxu1 %v190_v41  ;;  %884 = vmatpush3.msra.mxu0 %v190_v41 }
  0x67   :  { %928 = vmatpush3.msra.mxu1 %v190_v41  ;;  %885 = vmatprep.subr.mxu0 %v189_v42 }
  0x68   :  { %913 = vmatprep.subr.mxu1 %v189_v42  ;;  %886 = vmatpush3.msra.mxu0 %v189_v42 }
  0x69   :  { %929 = vmatpush3.msra.mxu1 %v189_v42  ;;  %887 = vmatprep.subr.mxu0 %v188_v43 }
  0x6a   :  { %914 = vmatprep.subr.mxu1 %v188_v43  ;;  %888 = vmatpush3.msra.mxu0 %v188_v43 }
  0x6b   :  { %930 = vmatpush3.msra.mxu1 %v188_v43  ;;  %889 = vmatprep.subr.mxu0 %v187_v44 }
  0x6c   :  { %915 = vmatprep.subr.mxu1 %v187_v44  ;;  %890 = vmatpush3.msra.mxu0 %v187_v44 }
  0x6d   :  { %931 = vmatpush3.msra.mxu1 %v187_v44  ;;  %891 = vmatprep.subr.mxu0 %v186_v45 }
  0x6e   :  { %916 = vmatprep.subr.mxu1 %v186_v45  ;;  %892 = vmatpush3.msra.mxu0 %v186_v45 }
  0x6f   :  { %932 = vmatpush3.msra.mxu1 %v186_v45  ;;  %893 = vmatprep.subr.mxu0 %v185_v46 }
  0x70   :  { %917 = vmatprep.subr.mxu1 %v185_v46  ;;  %894 = vmatpush3.msra.mxu0 %v185_v46 }
  0x71   :  { %933 = vmatpush3.msra.mxu1 %v185_v46  ;;  %895 = vmatprep.subr.mxu0 %v184_v47 }
  0x72   :  { %918 = vmatprep.subr.mxu1 %v184_v47  ;;  %896 = vmatpush3.msra.mxu0 %v184_v47 }
  0x73   :  { %934 = vmatpush3.msra.mxu1 %v184_v47  ;;  %897 = vmatprep.mubr.f32.mxu0 %v28_v48  ;;  %v667_v47 = vld [vmem:[%s1537_s2] ss:$0 sm:$0xff] }
  0x74   :  { %900 = vmatprep.mubr.f32.mxu1 %v46_v49  ;;  %898 = vmatmul.mubr.f32.vlgmr.msra.gmra.mxu0 %v37_v50 }
  0x75   :  { %901 = vmatmul.mubr.f32.vlgmr.msra.gmra.mxu1 %v55_v51 }
  0xe4   :  { %v701_v52 = vpop.f32.mrf.mxu0 }
  0xe5   :  { %v745_v53 = vpop.f32.mrf.mxu1 }
  0xe6   :  { %v702_v54 = vpop.f32.mrf.mxu0 }
  0xe7   :  { %v746_v55 = vpop.f32.mrf.mxu1  ;;  %v703_v23 = vadd.f32 %v702_v54, %v701_v52 }
  0xe8   :  { %v747_v24 = vadd.f32 %v746_v55, %v745_v53  ;;  %v668_v53 = vld [vmem:[%s1538_s3] ss:$0 sm:$0xff] }
  0xea   :  { %v352_v34 = vadd.f32 %v747_v24, %v703_v23 }
  0xf9   :  { %v704_v56 = vpop.f32.mrf.mxu0 }
  0xfa   :  { %v748_v57 = vpop.f32.mrf.mxu1 }
  0xfb   :  { %v705_v58 = vpop.f32.mrf.mxu0 }
  0xfc   :  { %v749_v59 = vpop.f32.mrf.mxu1  ;;  %v706_v19 = vadd.f32 %v705_v58, %v704_v56 }
  0xfd   :  { %v750_v20 = vadd.f32 %v749_v59, %v748_v57 }
  0xff   :  { %v707_v60 = vpop.f32.mrf.mxu0  ;;  %v357_v30 = vadd.f32 %v750_v20, %v706_v19 }
 0x100   :  { %v751_v62 = vpop.f32.mrf.mxu1 }
 0x101   :  { %v708_v61 = vpop.f32.mrf.mxu0 }
 0x102   :  { %v752_v0 = vpop.f32.mrf.mxu1  ;;  %v709_v25 = vadd.f32 %v708_v61, %v707_v60  ;;  %v648_v60 = vld [vmem:[%s1539_s4 + $0x8] sm:$0xff]  ;;  %v650_v61 = vld [vmem:[%s1539_s4 + $0x18] sm:$0xff] }
 0x103   :  { %v753_v26 = vadd.f32 %v752_v0, %v751_v62 }
 0x105   :  { %v710_v63 = vpop.f32.mrf.mxu0  ;;  %v362_v35 = vadd.f32 %v753_v26, %v709_v25 }
 0x106   :  { %v754_v2 = vpop.f32.mrf.mxu1 }
 0x107   :  { %v711_v1 = vpop.f32.mrf.mxu0 }
 0x108   :  { %v755_v4 = vpop.f32.mrf.mxu1  ;;  %v712_v21 = vadd.f32 %v711_v1, %v710_v63 }
 0x109   :  { %v756_v22 = vadd.f32 %v755_v4, %v754_v2  ;;  %v647_v2 = vld [vmem:[%s1539_s4] sm:$0xff] }
 0x10b   :  { %v367_v31 = vadd.f32 %v756_v22, %v712_v21 }
 0x10c   :  { %v789_v3 = vpop.f32.mrf.mxu0 }
 0x10d   :  { %v833_v6 = vpop.f32.mrf.mxu1 }
 0x10e   :  { %v790_v5 = vpop.f32.mrf.mxu0 }
 0x10f   :  { %v834_v8 = vpop.f32.mrf.mxu1  ;;  %v791_v32 = vadd.f32 %v790_v5, %v789_v3  ;;  %v649_v3 = vld [vmem:[%s1539_s4 + $0x10] sm:$0xff] }
 0x110   :  { %v835_v43 = vadd.f32 %v834_v8, %v833_v6 }
 0x111   :  { %v437_v40 = vadd.f32 %v791_v32, %v352_v34 }
 0x112   :  { %v792_v7 = vpop.f32.mrf.mxu0 }
 0x113   :  { %v522_v51 = vadd.f32 %v835_v43, %v437_v40 }
 0x114   :  { %v793_v9 = vpop.f32.mrf.mxu0 }
 0x115   :  { %v836_v10 = vpop.f32.mrf.mxu1  ;;  %v794_v27 = vadd.f32 %v793_v9, %v792_v7 }
 0x117   :  { %v837_v12 = vpop.f32.mrf.mxu1  ;;  %v442_v36 = vadd.f32 %v794_v27, %v357_v30 }
 0x118   :  { %v795_v11 = vpop.f32.mrf.mxu0  ;;  %v838_v37 = vadd.f32 %v837_v12, %v836_v10 }
 0x11a   :  { %v796_v13 = vpop.f32.mrf.mxu0  ;;  %v527_v44 = vadd.f32 %v838_v37, %v442_v36 }
 0x11b   :  { %v839_v14 = vpop.f32.mrf.mxu1  ;;  %v797_v33 = vadd.f32 %v796_v13, %v795_v11 }
 0x11d   :  { %v840_v16 = vpop.f32.mrf.mxu1  ;;  %v447_v41 = vadd.f32 %v797_v33, %v362_v35 }
 0x11e   :  { %v798_v15 = vpop.f32.mrf.mxu0  ;;  %v841_v42 = vadd.f32 %v840_v16, %v839_v14 }
 0x120   :  { %v799_v17 = vpop.f32.mrf.mxu0  ;;  %v532_v52 = vadd.f32 %v841_v42, %v447_v41 }
 0x121   :  { %v842_v18 = vpop.f32.mrf.mxu1  ;;  %v800_v28 = vadd.f32 %v799_v17, %v798_v15 }
 0x123   :  { %v843_v29 = vpop.f32.mrf.mxu1  ;;  %v452_v38 = vadd.f32 %v800_v28, %v367_v31 }
 0x124   :  { %v844_v39 = vadd.f32 %v843_v29, %v842_v18 }
 0x126   :  { %v537_v45 = vadd.f32 %v844_v39, %v452_v38 }
 0x134   :  { %v899_v46 = vpop.f32.mrf.mxu0 }
 0x135   :  { %v902_v48 = vpop.f32.mrf.mxu1  ;;  %v612_v49 = vadd.f32 %v899_v46, %v527_v44 }
 0x136   :  { %v622_v50 = vadd.f32 %v902_v48, %v537_v45  ;;  %v606_v54 = vpop.f32.mrf.mxu0 }
 0x137   :  { %v616_v55 = vpop.f32.mrf.mxu1  ;;  %v633_v56 = vmul.f32 %v667_v47, %v612_v49  ;;  %v607_v58 = vadd.f32 %v606_v54, %v522_v51 }
 0x138   :  { %v635_v57 = vmul.f32 %v667_v47, %v622_v50  ;;  %v617_v59 = vadd.f32 %v616_v55, %v532_v52 }
 0x139   :  { %v644_v62 = vadd.f32 %v668_v53, %v633_v56  ;;  %v632_v0 = vmul.f32 %v667_v47, %v607_v58 }
 0x13a   :  { %v646_v63 = vadd.f32 %v668_v53, %v635_v57  ;;  %v634_v1 = vmul.f32 %v667_v47, %v617_v59 }
 0x13b   :  { %v652_v4 = vadd.f32 %v648_v60, %v644_v62  ;;  %v643_v6 = vadd.f32 %v668_v53, %v632_v0 }
 0x13c   :  { %v654_v5 = vadd.f32 %v650_v61, %v646_v63  ;;  %v645_v7 = vadd.f32 %v668_v53, %v634_v1 }
 0x13d   :  { %v656_v8 = vmax.f32 %v652_v4, 0.0  ;;  %v651_v10 = vadd.f32 %v647_v2, %v643_v6 }
 0x13e   :  { %v658_v9 = vmax.f32 %v654_v5, 0.0  ;;  %v653_v11 = vadd.f32 %v649_v3, %v645_v7 }
 0x13f   :  { %660 = vst [vmem:[%s1540_s5 + $0x8] sm:$0xff] %v656_v8  ;;  %v655_v12 = vmax.f32 %v651_v10, 0.0 }
 0x140   :  { %662 = vst [vmem:[%s1540_s5 + $0x18] sm:$0xff] %v658_v9  ;;  %v657_v13 = vmax.f32 %v653_v11, 0.0 }
 0x141   :  { %659 = vst [vmem:[%s1540_s5] sm:$0xff] %v655_v12 }
 0x142   :  { %661 = vst [vmem:[%s1540_s5 + $0x10] sm:$0xff] %v657_v13 }

// kernel: feature_generator_resnet_forward.25
= control target key start
LH: loop header
LB: loop body
LE: loop exit
PB: predicated region body
PF: predicated region fallthrough
CT: control target
= control target key end

     0   :  { %s1507_s1 = inlined_call_operand.vmem [shape: f32[1152,128], index: 1, kind: input, shape index: {}]   ;;  %s1508_s0 = inlined_call_operand.vmem [shape: f32[32,1152], index: 0, kind: input, shape index: {}]   ;;  %s1509_s2 = inlined_call_operand.vmem [shape: f32[1,128], index: 2, kind: input, shape index: {}]   ;;  %s1510_s3 = inlined_call_operand.vmem [shape: f32[1,128], index: 3, kind: input, shape index: {}]   ;;  %s1511_s4 = inlined_call_operand.vmem [shape: f32[32,128], index: 4, kind: output, shape index: {}]  }
   0x1   :  { %v84_v0 = vld [vmem:[%s1507_s1 + $0xf8] sm:$0xff]  ;;  %v83_v4 = vld [vmem:[%s1507_s1 + $0xf0] sm:$0xff]  ;;  %v82_v8 = vld [vmem:[%s1507_s1 + $0xe8] sm:$0xff] }
   0x2   :  { %v116_v1 = vld [vmem:[%s1507_s1 + $0x1f8] sm:$0xff]  ;;  %658 = vmatprep.subr.mxu0 %v84_v0  ;;  %v115_v5 = vld [vmem:[%s1507_s1 + $0x1f0] sm:$0xff]  ;;  %v114_v9 = vld [vmem:[%s1507_s1 + $0x1e8] sm:$0xff] }
   0x3   :  { %v68_v2 = vld [vmem:[%s1507_s1 + $0x78] sm:$0xff]  ;;  %702 = vmatprep.subr.mxu1 %v116_v1  ;;  %v67_v6 = vld [vmem:[%s1507_s1 + $0x70] sm:$0xff]  ;;  %v66_v10 = vld [vmem:[%s1507_s1 + $0x68] sm:$0xff] }
   0x4   :  { %v100_v3 = vld [vmem:[%s1507_s1 + $0x178] sm:$0xff]  ;;  %659 = vmatpush3.msra.mxu0 %v68_v2  ;;  %v99_v7 = vld [vmem:[%s1507_s1 + $0x170] sm:$0xff]  ;;  %v98_v11 = vld [vmem:[%s1507_s1 + $0x168] sm:$0xff] }
   0x5   :  { %703 = vmatpush3.msra.mxu1 %v100_v3  ;;  %660 = vmatprep.subr.mxu0 %v83_v4  ;;  %v81_v12 = vld [vmem:[%s1507_s1 + $0xe0] sm:$0xff]  ;;  %v80_v16 = vld [vmem:[%s1507_s1 + $0xd8] sm:$0xff]  ;;  %v79_v20 = vld [vmem:[%s1507_s1 + $0xd0] sm:$0xff] }
   0x6   :  { %704 = vmatprep.subr.mxu1 %v115_v5  ;;  %661 = vmatpush3.msra.mxu0 %v67_v6  ;;  %v113_v13 = vld [vmem:[%s1507_s1 + $0x1e0] sm:$0xff]  ;;  %v112_v17 = vld [vmem:[%s1507_s1 + $0x1d8] sm:$0xff]  ;;  %v111_v21 = vld [vmem:[%s1507_s1 + $0x1d0] sm:$0xff] }
   0x7   :  { %705 = vmatpush3.msra.mxu1 %v99_v7  ;;  %662 = vmatprep.subr.mxu0 %v82_v8  ;;  %v65_v14 = vld [vmem:[%s1507_s1 + $0x60] sm:$0xff]  ;;  %v64_v18 = vld [vmem:[%s1507_s1 + $0x58] sm:$0xff]  ;;  %v63_v22 = vld [vmem:[%s1507_s1 + $0x50] sm:$0xff] }
   0x8   :  { %706 = vmatprep.subr.mxu1 %v114_v9  ;;  %v97_v15 = vld [vmem:[%s1507_s1 + $0x160] sm:$0xff]  ;;  %663 = vmatpush3.msra.mxu0 %v66_v10  ;;  %v96_v19 = vld [vmem:[%s1507_s1 + $0x158] sm:$0xff]  ;;  %v95_v23 = vld [vmem:[%s1507_s1 + $0x150] sm:$0xff] }
   0x9   :  { %707 = vmatpush3.msra.mxu1 %v98_v11  ;;  %664 = vmatprep.subr.mxu0 %v81_v12  ;;  %v78_v24 = vld [vmem:[%s1507_s1 + $0xc8] sm:$0xff]  ;;  %v77_v28 = vld [vmem:[%s1507_s1 + $0xc0] sm:$0xff]  ;;  %v76_v32 = vld [vmem:[%s1507_s1 + $0xb8] sm:$0xff] }
   0xa   :  { %708 = vmatprep.subr.mxu1 %v113_v13  ;;  %665 = vmatpush3.msra.mxu0 %v65_v14  ;;  %v110_v25 = vld [vmem:[%s1507_s1 + $0x1c8] sm:$0xff]  ;;  %v109_v29 = vld [vmem:[%s1507_s1 + $0x1c0] sm:$0xff]  ;;  %v108_v33 = vld [vmem:[%s1507_s1 + $0x1b8] sm:$0xff] }
   0xb   :  { %709 = vmatpush3.msra.mxu1 %v97_v15  ;;  %666 = vmatprep.subr.mxu0 %v80_v16  ;;  %v62_v26 = vld [vmem:[%s1507_s1 + $0x48] sm:$0xff]  ;;  %v61_v30 = vld [vmem:[%s1507_s1 + $0x40] sm:$0xff]  ;;  %v60_v34 = vld [vmem:[%s1507_s1 + $0x38] sm:$0xff] }
   0xc   :  { %710 = vmatprep.subr.mxu1 %v112_v17  ;;  %667 = vmatpush3.msra.mxu0 %v64_v18  ;;  %v94_v27 = vld [vmem:[%s1507_s1 + $0x148] sm:$0xff]  ;;  %v93_v31 = vld [vmem:[%s1507_s1 + $0x140] sm:$0xff]  ;;  %v92_v35 = vld [vmem:[%s1507_s1 + $0x138] sm:$0xff] }
   0xd   :  { %711 = vmatpush3.msra.mxu1 %v96_v19  ;;  %668 = vmatprep.subr.mxu0 %v79_v20  ;;  %v75_v36 = vld [vmem:[%s1507_s1 + $0xb0] sm:$0xff]  ;;  %v74_v40 = vld [vmem:[%s1507_s1 + $0xa8] sm:$0xff]  ;;  %v73_v44 = vld [vmem:[%s1507_s1 + $0xa0] sm:$0xff] }
   0xe   :  { %712 = vmatprep.subr.mxu1 %v111_v21  ;;  %669 = vmatpush3.msra.mxu0 %v63_v22  ;;  %v107_v37 = vld [vmem:[%s1507_s1 + $0x1b0] sm:$0xff]  ;;  %v106_v41 = vld [vmem:[%s1507_s1 + $0x1a8] sm:$0xff]  ;;  %v105_v45 = vld [vmem:[%s1507_s1 + $0x1a0] sm:$0xff] }
   0xf   :  { %713 = vmatpush3.msra.mxu1 %v95_v23  ;;  %670 = vmatprep.subr.mxu0 %v78_v24  ;;  %v59_v38 = vld [vmem:[%s1507_s1 + $0x30] sm:$0xff]  ;;  %v58_v42 = vld [vmem:[%s1507_s1 + $0x28] sm:$0xff]  ;;  %v57_v46 = vld [vmem:[%s1507_s1 + $0x20] sm:$0xff] }
  0x10   :  { %714 = vmatprep.subr.mxu1 %v110_v25  ;;  %671 = vmatpush3.msra.mxu0 %v62_v26  ;;  %v91_v39 = vld [vmem:[%s1507_s1 + $0x130] sm:$0xff]  ;;  %v90_v43 = vld [vmem:[%s1507_s1 + $0x128] sm:$0xff]  ;;  %v89_v47 = vld [vmem:[%s1507_s1 + $0x120] sm:$0xff] }
  0x11   :  { %715 = vmatpush3.msra.mxu1 %v94_v27  ;;  %672 = vmatprep.subr.mxu0 %v77_v28  ;;  %v72_v48 = vld [vmem:[%s1507_s1 + $0x98] sm:$0xff]  ;;  %v71_v52 = vld [vmem:[%s1507_s1 + $0x90] sm:$0xff]  ;;  %v70_v56 = vld [vmem:[%s1507_s1 + $0x88] sm:$0xff] }
  0x12   :  { %716 = vmatprep.subr.mxu1 %v109_v29  ;;  %673 = vmatpush3.msra.mxu0 %v61_v30  ;;  %v104_v49 = vld [vmem:[%s1507_s1 + $0x198] sm:$0xff]  ;;  %v103_v53 = vld [vmem:[%s1507_s1 + $0x190] sm:$0xff]  ;;  %v102_v57 = vld [vmem:[%s1507_s1 + $0x188] sm:$0xff] }
  0x13   :  { %717 = vmatpush3.msra.mxu1 %v93_v31  ;;  %674 = vmatprep.subr.mxu0 %v76_v32  ;;  %v56_v50 = vld [vmem:[%s1507_s1 + $0x18] sm:$0xff]  ;;  %v55_v54 = vld [vmem:[%s1507_s1 + $0x10] sm:$0xff]  ;;  %v54_v58 = vld [vmem:[%s1507_s1 + $0x8] sm:$0xff] }
  0x14   :  { %718 = vmatprep.subr.mxu1 %v108_v33  ;;  %675 = vmatpush3.msra.mxu0 %v60_v34  ;;  %v88_v51 = vld [vmem:[%s1507_s1 + $0x118] sm:$0xff]  ;;  %v87_v55 = vld [vmem:[%s1507_s1 + $0x110] sm:$0xff]  ;;  %v86_v59 = vld [vmem:[%s1507_s1 + $0x108] sm:$0xff] }
  0x15   :  { %719 = vmatpush3.msra.mxu1 %v92_v35  ;;  %676 = vmatprep.subr.mxu0 %v75_v36  ;;  %v69_v60 = vld [vmem:[%s1507_s1 + $0x80] sm:$0xff]  ;;  %v18_v63 = vld [vmem:[%s1508_s0 + $0x8] sm:$0xff]  ;;  %v20_v1 = vld [vmem:[%s1508_s0 + $0x18] sm:$0xff] }
  0x16   :  { %720 = vmatprep.subr.mxu1 %v107_v37  ;;  %677 = vmatpush3.msra.mxu0 %v59_v38  ;;  %v101_v61 = vld [vmem:[%s1507_s1 + $0x180] sm:$0xff]  ;;  %v19_v3 = vld [vmem:[%s1508_s0 + $0x10] sm:$0xff]  ;;  %v148_v4 = vld [vmem:[%s1507_s1 + $0x2f8] sm:$0xff] }
  0x17   :  { %721 = vmatpush3.msra.mxu1 %v91_v39  ;;  %678 = vmatprep.subr.mxu0 %v74_v40  ;;  %v53_v62 = vld [vmem:[%s1507_s1] sm:$0xff]  ;;  %v180_v5 = vld [vmem:[%s1507_s1 + $0x3f8] sm:$0xff]  ;;  %v147_v8 = vld [vmem:[%s1507_s1 + $0x2f0] sm:$0xff] }
  0x18   :  { %722 = vmatprep.subr.mxu1 %v106_v41  ;;  %679 = vmatpush3.msra.mxu0 %v58_v42  ;;  %v85_v0 = vld [vmem:[%s1507_s1 + $0x100] sm:$0xff]  ;;  %v132_v6 = vld [vmem:[%s1507_s1 + $0x278] sm:$0xff]  ;;  %v179_v9 = vld [vmem:[%s1507_s1 + $0x3f0] sm:$0xff] }
  0x19   :  { %723 = vmatpush3.msra.mxu1 %v90_v43  ;;  %680 = vmatprep.subr.mxu0 %v73_v44  ;;  %v17_v2 = vld [vmem:[%s1508_s0] sm:$0xff]  ;;  %v164_v7 = vld [vmem:[%s1507_s1 + $0x378] sm:$0xff]  ;;  %v131_v10 = vld [vmem:[%s1507_s1 + $0x270] sm:$0xff] }
  0x1a   :  { %724 = vmatprep.subr.mxu1 %v105_v45  ;;  %681 = vmatpush3.msra.mxu0 %v57_v46  ;;  %v163_v11 = vld [vmem:[%s1507_s1 + $0x370] sm:$0xff]  ;;  %v146_v12 = vld [vmem:[%s1507_s1 + $0x2e8] sm:$0xff]  ;;  %v145_v16 = vld [vmem:[%s1507_s1 + $0x2e0] sm:$0xff] }
  0x1b   :  { %725 = vmatpush3.msra.mxu1 %v89_v47  ;;  %682 = vmatprep.subr.mxu0 %v72_v48  ;;  %v178_v13 = vld [vmem:[%s1507_s1 + $0x3e8] sm:$0xff]  ;;  %v177_v17 = vld [vmem:[%s1507_s1 + $0x3e0] sm:$0xff]  ;;  %v144_v20 = vld [vmem:[%s1507_s1 + $0x2d8] sm:$0xff] }
  0x1c   :  { %726 = vmatprep.subr.mxu1 %v104_v49  ;;  %683 = vmatpush3.msra.mxu0 %v56_v50  ;;  %v130_v14 = vld [vmem:[%s1507_s1 + $0x268] sm:$0xff]  ;;  %v129_v18 = vld [vmem:[%s1507_s1 + $0x260] sm:$0xff]  ;;  %v176_v21 = vld [vmem:[%s1507_s1 + $0x3d8] sm:$0xff] }
  0x1d   :  { %727 = vmatpush3.msra.mxu1 %v88_v51  ;;  %684 = vmatprep.subr.mxu0 %v71_v52  ;;  %v162_v15 = vld [vmem:[%s1507_s1 + $0x368] sm:$0xff]  ;;  %v161_v19 = vld [vmem:[%s1507_s1 + $0x360] sm:$0xff]  ;;  %v128_v22 = vld [vmem:[%s1507_s1 + $0x258] sm:$0xff] }
  0x1e   :  { %728 = vmatprep.subr.mxu1 %v103_v53  ;;  %685 = vmatpush3.msra.mxu0 %v55_v54  ;;  %v160_v23 = vld [vmem:[%s1507_s1 + $0x358] sm:$0xff]  ;;  %v143_v24 = vld [vmem:[%s1507_s1 + $0x2d0] sm:$0xff]  ;;  %v142_v28 = vld [vmem:[%s1507_s1 + $0x2c8] sm:$0xff] }
  0x1f   :  { %729 = vmatpush3.msra.mxu1 %v87_v55  ;;  %686 = vmatprep.subr.mxu0 %v70_v56  ;;  %v175_v25 = vld [vmem:[%s1507_s1 + $0x3d0] sm:$0xff]  ;;  %v174_v29 = vld [vmem:[%s1507_s1 + $0x3c8] sm:$0xff]  ;;  %v141_v32 = vld [vmem:[%s1507_s1 + $0x2c0] sm:$0xff] }
  0x20   :  { %730 = vmatprep.subr.mxu1 %v102_v57  ;;  %687 = vmatpush3.msra.mxu0 %v54_v58  ;;  %v127_v26 = vld [vmem:[%s1507_s1 + $0x250] sm:$0xff]  ;;  %v126_v30 = vld [vmem:[%s1507_s1 + $0x248] sm:$0xff]  ;;  %v173_v33 = vld [vmem:[%s1507_s1 + $0x3c0] sm:$0xff] }
  0x21   :  { %731 = vmatpush3.msra.mxu1 %v86_v59  ;;  %688 = vmatprep.subr.mxu0 %v69_v60  ;;  %v159_v27 = vld [vmem:[%s1507_s1 + $0x350] sm:$0xff]  ;;  %v158_v31 = vld [vmem:[%s1507_s1 + $0x348] sm:$0xff]  ;;  %v125_v34 = vld [vmem:[%s1507_s1 + $0x240] sm:$0xff] }
  0x22   :  { %732 = vmatprep.subr.mxu1 %v101_v61  ;;  %689 = vmatpush3.msra.mxu0 %v53_v62  ;;  %v157_v35 = vld [vmem:[%s1507_s1 + $0x340] sm:$0xff]  ;;  %v140_v36 = vld [vmem:[%s1507_s1 + $0x2b8] sm:$0xff]  ;;  %v27_v40 = vld [vmem:[%s1508_s0 + $0x50] sm:$0xff] }
  0x23   :  { %261 = vmatprep.mubr.f32.mxu0 %v18_v63  ;;  %733 = vmatpush3.msra.mxu1 %v85_v0  ;;  %v172_v37 = vld [vmem:[%s1507_s1 + $0x3b8] sm:$0xff]  ;;  %v29_v41 = vld [vmem:[%s1508_s0 + $0x60] sm:$0xff]  ;;  %v139_v42 = vld [vmem:[%s1507_s1 + $0x2b0] sm:$0xff] }
  0x24   :  { %346 = vmatprep.mubr.f32.mxu1 %v20_v1  ;;  %262 = vmatmul.mubr.f32.vlgmr.msra.gmra.mxu0 %v17_v2  ;;  %v124_v38 = vld [vmem:[%s1507_s1 + $0x238] sm:$0xff]  ;;  %v171_v43 = vld [vmem:[%s1507_s1 + $0x3b0] sm:$0xff]  ;;  %v26_v44 = vld [vmem:[%s1508_s0 + $0x48] sm:$0xff] }
  0x25   :  { %347 = vmatmul.mubr.f32.vlgmr.msra.gmra.mxu1 %v19_v3  ;;  %746 = vmatprep.subr.mxu0 %v148_v4  ;;  %v156_v39 = vld [vmem:[%s1507_s1 + $0x338] sm:$0xff]  ;;  %v123_v46 = vld [vmem:[%s1507_s1 + $0x230] sm:$0xff]  ;;  %v138_v48 = vld [vmem:[%s1507_s1 + $0x2a8] sm:$0xff] }
  0x26   :  { %790 = vmatprep.subr.mxu1 %v180_v5  ;;  %747 = vmatpush3.msra.mxu0 %v132_v6  ;;  %v28_v45 = vld [vmem:[%s1508_s0 + $0x58] sm:$0xff]  ;;  %v155_v47 = vld [vmem:[%s1507_s1 + $0x330] sm:$0xff]  ;;  %v170_v49 = vld [vmem:[%s1507_s1 + $0x3a8] sm:$0xff] }
  0x27   :  { %791 = vmatpush3.msra.mxu1 %v164_v7  ;;  %748 = vmatprep.subr.mxu0 %v147_v8  ;;  %v122_v50 = vld [vmem:[%s1507_s1 + $0x228] sm:$0xff]  ;;  %v36_v52 = vld [vmem:[%s1508_s0 + $0x98] sm:$0xff]  ;;  %v137_v54 = vld [vmem:[%s1507_s1 + $0x2a0] sm:$0xff] }
  0x28   :  { %792 = vmatprep.subr.mxu1 %v179_v9  ;;  %749 = vmatpush3.msra.mxu0 %v131_v10  ;;  %v154_v51 = vld [vmem:[%s1507_s1 + $0x328] sm:$0xff]  ;;  %v169_v55 = vld [vmem:[%s1507_s1 + $0x3a0] sm:$0xff]  ;;  %v35_v56 = vld [vmem:[%s1508_s0 + $0x90] sm:$0xff] }
  0x29   :  { %793 = vmatpush3.msra.mxu1 %v163_v11  ;;  %750 = vmatprep.subr.mxu0 %v146_v12  ;;  %v38_v53 = vld [vmem:[%s1508_s0 + $0xa8] sm:$0xff]  ;;  %v37_v57 = vld [vmem:[%s1508_s0 + $0xa0] sm:$0xff]  ;;  %v136_v60 = vld [vmem:[%s1507_s1 + $0x298] sm:$0xff] }
  0x2a   :  { %794 = vmatprep.subr.mxu1 %v178_v13  ;;  %751 = vmatpush3.msra.mxu0 %v130_v14  ;;  %v121_v58 = vld [vmem:[%s1507_s1 + $0x220] sm:$0xff]  ;;  %v168_v61 = vld [vmem:[%s1507_s1 + $0x398] sm:$0xff]  ;;  %v47_v1 = vld [vmem:[%s1508_s0 + $0xf0] sm:$0xff] }
  0x2b   :  { %795 = vmatpush3.msra.mxu1 %v162_v15  ;;  %752 = vmatprep.subr.mxu0 %v145_v16  ;;  %v153_v59 = vld [vmem:[%s1507_s1 + $0x320] sm:$0xff]  ;;  %v120_v62 = vld [vmem:[%s1507_s1 + $0x218] sm:$0xff]  ;;  %v135_v2 = vld [vmem:[%s1507_s1 + $0x290] sm:$0xff] }
  0x2c   :  { %796 = vmatprep.subr.mxu1 %v177_v17  ;;  %753 = vmatpush3.msra.mxu0 %v129_v18  ;;  %v152_v63 = vld [vmem:[%s1507_s1 + $0x318] sm:$0xff]  ;;  %v45_v0 = vld [vmem:[%s1508_s0 + $0xe0] sm:$0xff]  ;;  %v167_v3 = vld [vmem:[%s1507_s1 + $0x390] sm:$0xff] }
  0x2d   :  { %797 = vmatpush3.msra.mxu1 %v161_v19  ;;  %754 = vmatprep.subr.mxu0 %v144_v20  ;;  %v44_v4 = vld [vmem:[%s1508_s0 + $0xd8] sm:$0xff]  ;;  %v46_v5 = vld [vmem:[%s1508_s0 + $0xe8] sm:$0xff]  ;;  %v119_v6 = vld [vmem:[%s1507_s1 + $0x210] sm:$0xff] }
  0x2e   :  { %798 = vmatprep.subr.mxu1 %v176_v21  ;;  %755 = vmatpush3.msra.mxu0 %v128_v22  ;;  %v151_v7 = vld [vmem:[%s1507_s1 + $0x310] sm:$0xff]  ;;  %v134_v8 = vld [vmem:[%s1507_s1 + $0x288] sm:$0xff]  ;;  %v133_v12 = vld [vmem:[%s1507_s1 + $0x280] sm:$0xff] }
  0x2f   :  { %799 = vmatpush3.msra.mxu1 %v160_v23  ;;  %756 = vmatprep.subr.mxu0 %v143_v24  ;;  %v166_v9 = vld [vmem:[%s1507_s1 + $0x388] sm:$0xff]  ;;  %v165_v13 = vld [vmem:[%s1507_s1 + $0x380] sm:$0xff]  ;;  %v24_v17 = vld [vmem:[%s1508_s0 + $0x38] sm:$0xff] }
  0x30   :  { %800 = vmatprep.subr.mxu1 %v175_v25  ;;  %757 = vmatpush3.msra.mxu0 %v127_v26  ;;  %v118_v10 = vld [vmem:[%s1507_s1 + $0x208] sm:$0xff]  ;;  %v117_v14 = vld [vmem:[%s1507_s1 + $0x200] sm:$0xff]  ;;  %v23_v19 = vld [vmem:[%s1508_s0 + $0x30] sm:$0xff] }
  0x31   :  { %801 = vmatpush3.msra.mxu1 %v159_v27  ;;  %758 = vmatprep.subr.mxu0 %v142_v28  ;;  %v150_v11 = vld [vmem:[%s1507_s1 + $0x308] sm:$0xff]  ;;  %v149_v16 = vld [vmem:[%s1507_s1 + $0x300] sm:$0xff]  ;;  %v196_v20 = vld [vmem:[%s1507_s1 + $0x478] sm:$0xff] }
  0x32   :  { %802 = vmatprep.subr.mxu1 %v174_v29  ;;  %759 = vmatpush3.msra.mxu0 %v126_v30  ;;  %v22_v15 = vld [vmem:[%s1508_s0 + $0x28] sm:$0xff]  ;;  %v21_v18 = vld [vmem:[%s1508_s0 + $0x20] sm:$0xff]  ;;  %v195_v21 = vld [vmem:[%s1507_s1 + $0x470] sm:$0xff] }
  0x33   :  { %803 = vmatpush3.msra.mxu1 %v158_v31  ;;  %760 = vmatprep.subr.mxu0 %v141_v32  ;;  %v31_v22 = vld [vmem:[%s1508_s0 + $0x70] sm:$0xff]  ;;  %v30_v23 = vld [vmem:[%s1508_s0 + $0x68] sm:$0xff]  ;;  %v33_v25 = vld [vmem:[%s1508_s0 + $0x80] sm:$0xff] }
  0x34   :  { %804 = vmatprep.subr.mxu1 %v173_v33  ;;  %761 = vmatpush3.msra.mxu0 %v125_v34  ;;  %v194_v24 = vld [vmem:[%s1507_s1 + $0x468] sm:$0xff]  ;;  %v193_v26 = vld [vmem:[%s1507_s1 + $0x460] sm:$0xff]  ;;  %v32_v27 = vld [vmem:[%s1508_s0 + $0x78] sm:$0xff] }
  0x35   :  { %805 = vmatpush3.msra.mxu1 %v157_v35  ;;  %762 = vmatprep.subr.mxu0 %v140_v36  ;;  %v40_v28 = vld [vmem:[%s1508_s0 + $0xb8] sm:$0xff]  ;;  %v39_v29 = vld [vmem:[%s1508_s0 + $0xb0] sm:$0xff]  ;;  %v42_v31 = vld [vmem:[%s1508_s0 + $0xc8] sm:$0xff] }
  0x36   :  { %806 = vmatprep.subr.mxu1 %v172_v37  ;;  %763 = vmatpush3.msra.mxu0 %v124_v38  ;;  %v192_v30 = vld [vmem:[%s1507_s1 + $0x458] sm:$0xff]  ;;  %v191_v32 = vld [vmem:[%s1507_s1 + $0x450] sm:$0xff]  ;;  %v41_v33 = vld [vmem:[%s1508_s0 + $0xc0] sm:$0xff] }
  0x37   :  { %807 = vmatpush3.msra.mxu1 %v156_v39  ;;  %266 = vmatprep.mubr.f32.mxu0 %v27_v40  ;;  %v49_v34 = vld [vmem:[%s1508_s0 + $0x100] sm:$0xff]  ;;  %v48_v35 = vld [vmem:[%s1508_s0 + $0xf8] sm:$0xff]  ;;  %v190_v36 = vld [vmem:[%s1507_s1 + $0x448] sm:$0xff] }
  0x38   :  { %351 = vmatprep.mubr.f32.mxu1 %v29_v41  ;;  %764 = vmatprep.subr.mxu0 %v139_v42  ;;  %v51_v37 = vld [vmem:[%s1508_s0 + $0x110] sm:$0xff]  ;;  %v189_v38 = vld [vmem:[%s1507_s1 + $0x440] sm:$0xff]  ;;  %v50_v39 = vld [vmem:[%s1508_s0 + $0x108] sm:$0xff] }
  0x39   :  { %808 = vmatprep.subr.mxu1 %v171_v43  ;;  %267 = vmatmul.mubr.f32.gmra.mxu0 %v26_v44  ;;  %v188_v40 = vld [vmem:[%s1507_s1 + $0x438] sm:$0xff]  ;;  %v187_v41 = vld [vmem:[%s1507_s1 + $0x430] sm:$0xff]  ;;  %v186_v42 = vld [vmem:[%s1507_s1 + $0x428] sm:$0xff] }
  0x3a   :  { %352 = vmatmul.mubr.f32.gmra.mxu1 %v28_v45  ;;  %765 = vmatpush3.msra.mxu0 %v123_v46  ;;  %v185_v43 = vld [vmem:[%s1507_s1 + $0x420] sm:$0xff]  ;;  %v184_v44 = vld [vmem:[%s1507_s1 + $0x418] sm:$0xff]  ;;  %v183_v45 = vld [vmem:[%s1507_s1 + $0x410] sm:$0xff] }
  0x3b   :  { %809 = vmatpush3.msra.mxu1 %v155_v47  ;;  %766 = vmatprep.subr.mxu0 %v138_v48  ;;  %v182_v46 = vld [vmem:[%s1507_s1 + $0x408] sm:$0xff]  ;;  %v181_v47 = vld [vmem:[%s1507_s1 + $0x400] sm:$0xff] }
  0x3c   :  { %810 = vmatprep.subr.mxu1 %v170_v49  ;;  %767 = vmatpush3.msra.mxu0 %v122_v50  ;;  %v25_v48 = vld [vmem:[%s1508_s0 + $0x40] sm:$0xff]  ;;  %v43_v49 = vld [vmem:[%s1508_s0 + $0xd0] sm:$0xff]  ;;  %v34_v50 = vld [vmem:[%s1508_s0 + $0x88] sm:$0xff] }
  0x3d   :  { %811 = vmatpush3.msra.mxu1 %v154_v51  ;;  %271 = vmatprep.mubr.f32.mxu0 %v36_v52  ;;  %v52_v51 = vld [vmem:[%s1508_s0 + $0x118] sm:$0xff] }
  0x3e   :  { %356 = vmatprep.mubr.f32.mxu1 %v38_v53  ;;  %768 = vmatprep.subr.mxu0 %v137_v54 }
  0x3f   :  { %812 = vmatprep.subr.mxu1 %v169_v55  ;;  %272 = vmatmul.mubr.f32.gmra.mxu0 %v35_v56 }
  0x40   :  { %357 = vmatmul.mubr.f32.gmra.mxu1 %v37_v57  ;;  %769 = vmatpush3.msra.mxu0 %v121_v58 }
  0x41   :  { %813 = vmatpush3.msra.mxu1 %v153_v59  ;;  %770 = vmatprep.subr.mxu0 %v136_v60 }
  0x42   :  { %814 = vmatprep.subr.mxu1 %v168_v61  ;;  %771 = vmatpush3.msra.mxu0 %v120_v62 }
  0x43   :  { %815 = vmatpush3.msra.mxu1 %v152_v63  ;;  %276 = vmatprep.mubr.f32.mxu0 %v45_v0 }
  0x44   :  { %361 = vmatprep.mubr.f32.mxu1 %v47_v1  ;;  %772 = vmatprep.subr.mxu0 %v135_v2 }
  0x45   :  { %816 = vmatprep.subr.mxu1 %v167_v3  ;;  %277 = vmatmul.mubr.f32.gmra.mxu0 %v44_v4 }
  0x46   :  { %362 = vmatmul.mubr.f32.gmra.mxu1 %v46_v5  ;;  %773 = vmatpush3.msra.mxu0 %v119_v6 }
  0x47   :  { %817 = vmatpush3.msra.mxu1 %v151_v7  ;;  %774 = vmatprep.subr.mxu0 %v134_v8 }
  0x48   :  { %818 = vmatprep.subr.mxu1 %v166_v9  ;;  %775 = vmatpush3.msra.mxu0 %v118_v10 }
  0x49   :  { %819 = vmatpush3.msra.mxu1 %v150_v11  ;;  %776 = vmatprep.subr.mxu0 %v133_v12 }
  0x4a   :  { %820 = vmatprep.subr.mxu1 %v165_v13  ;;  %777 = vmatpush3.msra.mxu0 %v117_v14 }
  0x4b   :  { %431 = vmatprep.mubr.f32.mxu0 %v22_v15  ;;  %821 = vmatpush3.msra.mxu1 %v149_v16 }
  0x4c   :  { %516 = vmatprep.mubr.f32.mxu1 %v24_v17  ;;  %432 = vmatmul.mubr.f32.vlgmr.msra.gmra.mxu0 %v21_v18 }
  0x4d   :  { %517 = vmatmul.mubr.f32.vlgmr.msra.gmra.mxu1 %v23_v19  ;;  %854 = vmatprep.subr.mxu0 %v196_v20 }
  0x4e   :  { %892 = vmatprep.subr.mxu1 %v196_v20  ;;  %855 = vmatpush3.msra.mxu0 %v196_v20 }
  0x4f   :  { %908 = vmatpush3.msra.mxu1 %v196_v20  ;;  %856 = vmatprep.subr.mxu0 %v195_v21 }
  0x50   :  { %893 = vmatprep.subr.mxu1 %v195_v21  ;;  %436 = vmatprep.mubr.f32.mxu0 %v31_v22 }
  0x51   :  { %857 = vmatpush3.msra.mxu0 %v195_v21  ;;  %909 = vmatpush3.msra.mxu1 %v195_v21 }
  0x52   :  { %437 = vmatmul.mubr.f32.gmra.mxu0 %v30_v23  ;;  %858 = vmatprep.subr.mxu0 %v194_v24 }
  0x53   :  { %894 = vmatprep.subr.mxu1 %v194_v24  ;;  %521 = vmatprep.mubr.f32.mxu1 %v33_v25 }
  0x54   :  { %859 = vmatpush3.msra.mxu0 %v194_v24  ;;  %910 = vmatpush3.msra.mxu1 %v194_v24 }
  0x55   :  { %860 = vmatprep.subr.mxu0 %v193_v26  ;;  %522 = vmatmul.mubr.f32.gmra.mxu1 %v32_v27 }
  0x56   :  { %895 = vmatprep.subr.mxu1 %v193_v26  ;;  %441 = vmatprep.mubr.f32.mxu0 %v40_v28 }
  0x57   :  { %861 = vmatpush3.msra.mxu0 %v193_v26  ;;  %911 = vmatpush3.msra.mxu1 %v193_v26 }
  0x58   :  { %442 = vmatmul.mubr.f32.gmra.mxu0 %v39_v29  ;;  %862 = vmatprep.subr.mxu0 %v192_v30 }
  0x59   :  { %896 = vmatprep.subr.mxu1 %v192_v30  ;;  %526 = vmatprep.mubr.f32.mxu1 %v42_v31 }
  0x5a   :  { %863 = vmatpush3.msra.mxu0 %v192_v30  ;;  %912 = vmatpush3.msra.mxu1 %v192_v30 }
  0x5b   :  { %864 = vmatprep.subr.mxu0 %v191_v32  ;;  %527 = vmatmul.mubr.f32.gmra.mxu1 %v41_v33 }
  0x5c   :  { %897 = vmatprep.subr.mxu1 %v191_v32  ;;  %446 = vmatprep.mubr.f32.mxu0 %v49_v34 }
  0x5d   :  { %865 = vmatpush3.msra.mxu0 %v191_v32  ;;  %913 = vmatpush3.msra.mxu1 %v191_v32 }
  0x5e   :  { %447 = vmatmul.mubr.f32.gmra.mxu0 %v48_v35  ;;  %866 = vmatprep.subr.mxu0 %v190_v36 }
  0x5f   :  { %898 = vmatprep.subr.mxu1 %v190_v36  ;;  %531 = vmatprep.mubr.f32.mxu1 %v51_v37 }
  0x60   :  { %867 = vmatpush3.msra.mxu0 %v190_v36  ;;  %914 = vmatpush3.msra.mxu1 %v190_v36 }
  0x61   :  { %868 = vmatprep.subr.mxu0 %v189_v38  ;;  %532 = vmatmul.mubr.f32.gmra.mxu1 %v50_v39 }
  0x62   :  { %899 = vmatprep.subr.mxu1 %v189_v38  ;;  %869 = vmatpush3.msra.mxu0 %v189_v38 }
  0x63   :  { %915 = vmatpush3.msra.mxu1 %v189_v38  ;;  %870 = vmatprep.subr.mxu0 %v188_v40 }
  0x64   :  { %900 = vmatprep.subr.mxu1 %v188_v40  ;;  %871 = vmatpush3.msra.mxu0 %v188_v40 }
  0x65   :  { %916 = vmatpush3.msra.mxu1 %v188_v40  ;;  %872 = vmatprep.subr.mxu0 %v187_v41 }
  0x66   :  { %901 = vmatprep.subr.mxu1 %v187_v41  ;;  %873 = vmatpush3.msra.mxu0 %v187_v41 }
  0x67   :  { %917 = vmatpush3.msra.mxu1 %v187_v41  ;;  %874 = vmatprep.subr.mxu0 %v186_v42 }
  0x68   :  { %902 = vmatprep.subr.mxu1 %v186_v42  ;;  %875 = vmatpush3.msra.mxu0 %v186_v42 }
  0x69   :  { %918 = vmatpush3.msra.mxu1 %v186_v42  ;;  %876 = vmatprep.subr.mxu0 %v185_v43 }
  0x6a   :  { %903 = vmatprep.subr.mxu1 %v185_v43  ;;  %877 = vmatpush3.msra.mxu0 %v185_v43 }
  0x6b   :  { %919 = vmatpush3.msra.mxu1 %v185_v43  ;;  %878 = vmatprep.subr.mxu0 %v184_v44 }
  0x6c   :  { %904 = vmatprep.subr.mxu1 %v184_v44  ;;  %879 = vmatpush3.msra.mxu0 %v184_v44 }
  0x6d   :  { %920 = vmatpush3.msra.mxu1 %v184_v44  ;;  %880 = vmatprep.subr.mxu0 %v183_v45 }
  0x6e   :  { %905 = vmatprep.subr.mxu1 %v183_v45  ;;  %881 = vmatpush3.msra.mxu0 %v183_v45 }
  0x6f   :  { %921 = vmatpush3.msra.mxu1 %v183_v45  ;;  %882 = vmatprep.subr.mxu0 %v182_v46 }
  0x70   :  { %906 = vmatprep.subr.mxu1 %v182_v46  ;;  %883 = vmatpush3.msra.mxu0 %v182_v46 }
  0x71   :  { %922 = vmatpush3.msra.mxu1 %v182_v46  ;;  %884 = vmatprep.subr.mxu0 %v181_v47 }
  0x72   :  { %907 = vmatprep.subr.mxu1 %v181_v47  ;;  %885 = vmatpush3.msra.mxu0 %v181_v47 }
  0x73   :  { %923 = vmatpush3.msra.mxu1 %v181_v47  ;;  %886 = vmatprep.mubr.f32.mxu0 %v25_v48  ;;  %v656_v47 = vld [vmem:[%s1509_s2] ss:$0 sm:$0xff] }
  0x74   :  { %889 = vmatprep.mubr.f32.mxu1 %v43_v49  ;;  %887 = vmatmul.mubr.f32.vlgmr.msra.gmra.mxu0 %v34_v50 }
  0x75   :  { %890 = vmatmul.mubr.f32.vlgmr.msra.gmra.mxu1 %v52_v51 }
  0xe4   :  { %v690_v52 = vpop.f32.mrf.mxu0 }
  0xe5   :  { %v734_v53 = vpop.f32.mrf.mxu1 }
  0xe6   :  { %v691_v54 = vpop.f32.mrf.mxu0 }
  0xe7   :  { %v735_v55 = vpop.f32.mrf.mxu1  ;;  %v692_v23 = vadd.f32 %v691_v54, %v690_v52 }
  0xe8   :  { %v736_v24 = vadd.f32 %v735_v55, %v734_v53  ;;  %v657_v53 = vld [vmem:[%s1510_s3] ss:$0 sm:$0xff] }
  0xea   :  { %v349_v34 = vadd.f32 %v736_v24, %v692_v23 }
  0xf9   :  { %v693_v56 = vpop.f32.mrf.mxu0 }
  0xfa   :  { %v737_v57 = vpop.f32.mrf.mxu1 }
  0xfb   :  { %v694_v58 = vpop.f32.mrf.mxu0 }
  0xfc   :  { %v738_v59 = vpop.f32.mrf.mxu1  ;;  %v695_v19 = vadd.f32 %v694_v58, %v693_v56 }
  0xfd   :  { %v739_v20 = vadd.f32 %v738_v59, %v737_v57 }
  0xff   :  { %v696_v60 = vpop.f32.mrf.mxu0  ;;  %v354_v30 = vadd.f32 %v739_v20, %v695_v19 }
 0x100   :  { %v740_v62 = vpop.f32.mrf.mxu1 }
 0x101   :  { %v697_v61 = vpop.f32.mrf.mxu0 }
 0x102   :  { %v741_v0 = vpop.f32.mrf.mxu1  ;;  %v698_v25 = vadd.f32 %v697_v61, %v696_v60 }
 0x103   :  { %v742_v26 = vadd.f32 %v741_v0, %v740_v62 }
 0x105   :  { %v699_v63 = vpop.f32.mrf.mxu0  ;;  %v359_v35 = vadd.f32 %v742_v26, %v698_v25 }
 0x106   :  { %v743_v2 = vpop.f32.mrf.mxu1 }
 0x107   :  { %v700_v1 = vpop.f32.mrf.mxu0 }
 0x108   :  { %v744_v4 = vpop.f32.mrf.mxu1  ;;  %v701_v21 = vadd.f32 %v700_v1, %v699_v63 }
 0x109   :  { %v745_v22 = vadd.f32 %v744_v4, %v743_v2 }
 0x10b   :  { %v364_v31 = vadd.f32 %v745_v22, %v701_v21 }
 0x10c   :  { %v778_v3 = vpop.f32.mrf.mxu0 }
 0x10d   :  { %v822_v6 = vpop.f32.mrf.mxu1 }
 0x10e   :  { %v779_v5 = vpop.f32.mrf.mxu0 }
 0x10f   :  { %v823_v8 = vpop.f32.mrf.mxu1  ;;  %v780_v32 = vadd.f32 %v779_v5, %v778_v3 }
 0x110   :  { %v824_v43 = vadd.f32 %v823_v8, %v822_v6 }
 0x111   :  { %v434_v40 = vadd.f32 %v780_v32, %v349_v34 }
 0x112   :  { %v781_v7 = vpop.f32.mrf.mxu0 }
 0x113   :  { %v519_v51 = vadd.f32 %v824_v43, %v434_v40 }
 0x114   :  { %v782_v9 = vpop.f32.mrf.mxu0 }
 0x115   :  { %v825_v10 = vpop.f32.mrf.mxu1  ;;  %v783_v27 = vadd.f32 %v782_v9, %v781_v7 }
 0x117   :  { %v826_v12 = vpop.f32.mrf.mxu1  ;;  %v439_v36 = vadd.f32 %v783_v27, %v354_v30 }
 0x118   :  { %v784_v11 = vpop.f32.mrf.mxu0  ;;  %v827_v37 = vadd.f32 %v826_v12, %v825_v10 }
 0x11a   :  { %v785_v13 = vpop.f32.mrf.mxu0  ;;  %v524_v44 = vadd.f32 %v827_v37, %v439_v36 }
 0x11b   :  { %v828_v14 = vpop.f32.mrf.mxu1  ;;  %v786_v33 = vadd.f32 %v785_v13, %v784_v11 }
 0x11d   :  { %v829_v16 = vpop.f32.mrf.mxu1  ;;  %v444_v41 = vadd.f32 %v786_v33, %v359_v35 }
 0x11e   :  { %v787_v15 = vpop.f32.mrf.mxu0  ;;  %v830_v42 = vadd.f32 %v829_v16, %v828_v14 }
 0x120   :  { %v788_v17 = vpop.f32.mrf.mxu0  ;;  %v529_v52 = vadd.f32 %v830_v42, %v444_v41 }
 0x121   :  { %v831_v18 = vpop.f32.mrf.mxu1  ;;  %v789_v28 = vadd.f32 %v788_v17, %v787_v15 }
 0x123   :  { %v832_v29 = vpop.f32.mrf.mxu1  ;;  %v449_v38 = vadd.f32 %v789_v28, %v364_v31 }
 0x124   :  { %v833_v39 = vadd.f32 %v832_v29, %v831_v18 }
 0x126   :  { %v534_v45 = vadd.f32 %v833_v39, %v449_v38 }
 0x134   :  { %v888_v46 = vpop.f32.mrf.mxu0 }
 0x135   :  { %v891_v48 = vpop.f32.mrf.mxu1  ;;  %v609_v49 = vadd.f32 %v888_v46, %v524_v44 }
 0x136   :  { %v619_v50 = vadd.f32 %v891_v48, %v534_v45  ;;  %v603_v54 = vpop.f32.mrf.mxu0 }
 0x137   :  { %v613_v55 = vpop.f32.mrf.mxu1  ;;  %v630_v56 = vmul.f32 %v656_v47, %v609_v49  ;;  %v604_v58 = vadd.f32 %v603_v54, %v519_v51 }
 0x138   :  { %v632_v57 = vmul.f32 %v656_v47, %v619_v50  ;;  %v614_v59 = vadd.f32 %v613_v55, %v529_v52 }
 0x139   :  { %v641_v60 = vadd.f32 %v657_v53, %v630_v56  ;;  %v629_v62 = vmul.f32 %v656_v47, %v604_v58 }
 0x13a   :  { %v643_v61 = vadd.f32 %v657_v53, %v632_v57  ;;  %v631_v63 = vmul.f32 %v656_v47, %v614_v59 }
 0x13b   :  { %v645_v0 = vmax.f32 %v641_v60, 0.0  ;;  %v640_v2 = vadd.f32 %v657_v53, %v629_v62 }
 0x13c   :  { %v647_v1 = vmax.f32 %v643_v61, 0.0  ;;  %v642_v3 = vadd.f32 %v657_v53, %v631_v63 }
 0x13d   :  { %649 = vst [vmem:[%s1511_s4 + $0x8] sm:$0xff] %v645_v0  ;;  %v644_v4 = vmax.f32 %v640_v2, 0.0 }
 0x13e   :  { %651 = vst [vmem:[%s1511_s4 + $0x18] sm:$0xff] %v647_v1  ;;  %v646_v5 = vmax.f32 %v642_v3, 0.0 }
 0x13f   :  { %648 = vst [vmem:[%s1511_s4] sm:$0xff] %v644_v4 }
 0x140   :  { %650 = vst [vmem:[%s1511_s4 + $0x10] sm:$0xff] %v646_v5 }

// kernel: feature_generator_resnet_forward.28
= control target key start
LH: loop header
LB: loop body
LE: loop exit
PB: predicated region body
PF: predicated region fallthrough
CT: control target
= control target key end

     0   :  { %s1635_s1 = inlined_call_operand.vmem [shape: f32[1152,256], index: 1, kind: input, shape index: {}]   ;;  %s1636_s0 = inlined_call_operand.vmem [shape: f32[8,1152], index: 0, kind: input, shape index: {}]   ;;  %s1637_s2 = inlined_call_operand.vmem [shape: f32[1,256], index: 2, kind: input, shape index: {}]   ;;  %s1638_s3 = inlined_call_operand.vmem [shape: f32[1,256], index: 3, kind: input, shape index: {}]   ;;  %s1639_s4 = inlined_call_operand.vmem [shape: f32[8,256], index: 4, kind: output, shape index: {}]  }
   0x1   :  { %v57_v0 = vld [vmem:[%s1635_s1 + $0xf8] sm:$0xff]  ;;  %v56_v2 = vld [vmem:[%s1635_s1 + $0xf0] sm:$0xff]  ;;  %v55_v4 = vld [vmem:[%s1635_s1 + $0xe8] sm:$0xff] }
   0x2   :  { %v121_v1 = vld [vmem:[%s1635_s1 + $0x2f8] sm:$0xff]  ;;  %314 = vmatprep.subr.mxu0 %v57_v0  ;;  %v120_v3 = vld [vmem:[%s1635_s1 + $0x2f0] sm:$0xff]  ;;  %v119_v5 = vld [vmem:[%s1635_s1 + $0x2e8] sm:$0xff] }
   0x3   :  { %385 = vmatprep.subr.mxu1 %v121_v1  ;;  %315 = vmatpush1.msra.mxu0 %v56_v2  ;;  %v54_v6 = vld [vmem:[%s1635_s1 + $0xe0] sm:$0xff]  ;;  %v53_v8 = vld [vmem:[%s1635_s1 + $0xd8] sm:$0xff]  ;;  %v52_v10 = vld [vmem:[%s1635_s1 + $0xd0] sm:$0xff] }
   0x4   :  { %386 = vmatpush1.msra.mxu1 %v120_v3  ;;  %v118_v7 = vld [vmem:[%s1635_s1 + $0x2e0] sm:$0xff]  ;;  %316 = vmatprep.subr.mxu0 %v55_v4  ;;  %v117_v9 = vld [vmem:[%s1635_s1 + $0x2d8] sm:$0xff]  ;;  %v116_v11 = vld [vmem:[%s1635_s1 + $0x2d0] sm:$0xff] }
   0x5   :  { %387 = vmatprep.subr.mxu1 %v119_v5  ;;  %317 = vmatpush1.msra.mxu0 %v54_v6  ;;  %v51_v12 = vld [vmem:[%s1635_s1 + $0xc8] sm:$0xff]  ;;  %v50_v14 = vld [vmem:[%s1635_s1 + $0xc0] sm:$0xff]  ;;  %v49_v16 = vld [vmem:[%s1635_s1 + $0xb8] sm:$0xff] }
   0x6   :  { %388 = vmatpush1.msra.mxu1 %v118_v7  ;;  %v115_v13 = vld [vmem:[%s1635_s1 + $0x2c8] sm:$0xff]  ;;  %318 = vmatprep.subr.mxu0 %v53_v8  ;;  %v114_v15 = vld [vmem:[%s1635_s1 + $0x2c0] sm:$0xff]  ;;  %v113_v17 = vld [vmem:[%s1635_s1 + $0x2b8] sm:$0xff] }
   0x7   :  { %389 = vmatprep.subr.mxu1 %v117_v9  ;;  %319 = vmatpush1.msra.mxu0 %v52_v10  ;;  %v48_v18 = vld [vmem:[%s1635_s1 + $0xb0] sm:$0xff]  ;;  %v47_v20 = vld [vmem:[%s1635_s1 + $0xa8] sm:$0xff]  ;;  %v46_v22 = vld [vmem:[%s1635_s1 + $0xa0] sm:$0xff] }
   0x8   :  { %390 = vmatpush1.msra.mxu1 %v116_v11  ;;  %320 = vmatprep.subr.mxu0 %v51_v12  ;;  %v112_v19 = vld [vmem:[%s1635_s1 + $0x2b0] sm:$0xff]  ;;  %v111_v21 = vld [vmem:[%s1635_s1 + $0x2a8] sm:$0xff]  ;;  %v110_v23 = vld [vmem:[%s1635_s1 + $0x2a0] sm:$0xff] }
   0x9   :  { %391 = vmatprep.subr.mxu1 %v115_v13  ;;  %321 = vmatpush1.msra.mxu0 %v50_v14  ;;  %v45_v24 = vld [vmem:[%s1635_s1 + $0x98] sm:$0xff]  ;;  %v44_v26 = vld [vmem:[%s1635_s1 + $0x90] sm:$0xff]  ;;  %v43_v28 = vld [vmem:[%s1635_s1 + $0x88] sm:$0xff] }
   0xa   :  { %392 = vmatpush1.msra.mxu1 %v114_v15  ;;  %322 = vmatprep.subr.mxu0 %v49_v16  ;;  %v109_v25 = vld [vmem:[%s1635_s1 + $0x298] sm:$0xff]  ;;  %v108_v27 = vld [vmem:[%s1635_s1 + $0x290] sm:$0xff]  ;;  %v107_v29 = vld [vmem:[%s1635_s1 + $0x288] sm:$0xff] }
   0xb   :  { %393 = vmatprep.subr.mxu1 %v113_v17  ;;  %323 = vmatpush1.msra.mxu0 %v48_v18  ;;  %v42_v30 = vld [vmem:[%s1635_s1 + $0x80] sm:$0xff]  ;;  %v41_v32 = vld [vmem:[%s1635_s1 + $0x78] sm:$0xff]  ;;  %v40_v34 = vld [vmem:[%s1635_s1 + $0x70] sm:$0xff] }
   0xc   :  { %394 = vmatpush1.msra.mxu1 %v112_v19  ;;  %324 = vmatprep.subr.mxu0 %v47_v20  ;;  %v106_v31 = vld [vmem:[%s1635_s1 + $0x280] sm:$0xff]  ;;  %v105_v33 = vld [vmem:[%s1635_s1 + $0x278] sm:$0xff]  ;;  %v104_v35 = vld [vmem:[%s1635_s1 + $0x270] sm:$0xff] }
   0xd   :  { %395 = vmatprep.subr.mxu1 %v111_v21  ;;  %325 = vmatpush1.msra.mxu0 %v46_v22  ;;  %v39_v36 = vld [vmem:[%s1635_s1 + $0x68] sm:$0xff]  ;;  %v38_v38 = vld [vmem:[%s1635_s1 + $0x60] sm:$0xff]  ;;  %v37_v40 = vld [vmem:[%s1635_s1 + $0x58] sm:$0xff] }
   0xe   :  { %396 = vmatpush1.msra.mxu1 %v110_v23  ;;  %326 = vmatprep.subr.mxu0 %v45_v24  ;;  %v103_v37 = vld [vmem:[%s1635_s1 + $0x268] sm:$0xff]  ;;  %v102_v39 = vld [vmem:[%s1635_s1 + $0x260] sm:$0xff]  ;;  %v101_v41 = vld [vmem:[%s1635_s1 + $0x258] sm:$0xff] }
   0xf   :  { %397 = vmatprep.subr.mxu1 %v109_v25  ;;  %327 = vmatpush1.msra.mxu0 %v44_v26  ;;  %v36_v42 = vld [vmem:[%s1635_s1 + $0x50] sm:$0xff]  ;;  %v35_v44 = vld [vmem:[%s1635_s1 + $0x48] sm:$0xff]  ;;  %v34_v46 = vld [vmem:[%s1635_s1 + $0x40] sm:$0xff] }
  0x10   :  { %398 = vmatpush1.msra.mxu1 %v108_v27  ;;  %328 = vmatprep.subr.mxu0 %v43_v28  ;;  %v100_v43 = vld [vmem:[%s1635_s1 + $0x250] sm:$0xff]  ;;  %v99_v45 = vld [vmem:[%s1635_s1 + $0x248] sm:$0xff]  ;;  %v98_v47 = vld [vmem:[%s1635_s1 + $0x240] sm:$0xff] }
  0x11   :  { %399 = vmatprep.subr.mxu1 %v107_v29  ;;  %329 = vmatpush1.msra.mxu0 %v42_v30  ;;  %v33_v48 = vld [vmem:[%s1635_s1 + $0x38] sm:$0xff]  ;;  %v32_v50 = vld [vmem:[%s1635_s1 + $0x30] sm:$0xff]  ;;  %v31_v52 = vld [vmem:[%s1635_s1 + $0x28] sm:$0xff] }
  0x12   :  { %400 = vmatpush1.msra.mxu1 %v106_v31  ;;  %330 = vmatprep.subr.mxu0 %v41_v32  ;;  %v97_v49 = vld [vmem:[%s1635_s1 + $0x238] sm:$0xff]  ;;  %v96_v51 = vld [vmem:[%s1635_s1 + $0x230] sm:$0xff]  ;;  %v95_v53 = vld [vmem:[%s1635_s1 + $0x228] sm:$0xff] }
  0x13   :  { %401 = vmatprep.subr.mxu1 %v105_v33  ;;  %331 = vmatpush1.msra.mxu0 %v40_v34  ;;  %v30_v54 = vld [vmem:[%s1635_s1 + $0x20] sm:$0xff]  ;;  %v29_v56 = vld [vmem:[%s1635_s1 + $0x18] sm:$0xff]  ;;  %v28_v58 = vld [vmem:[%s1635_s1 + $0x10] sm:$0xff] }
  0x14   :  { %402 = vmatpush1.msra.mxu1 %v104_v35  ;;  %332 = vmatprep.subr.mxu0 %v39_v36  ;;  %v94_v55 = vld [vmem:[%s1635_s1 + $0x220] sm:$0xff]  ;;  %v93_v57 = vld [vmem:[%s1635_s1 + $0x218] sm:$0xff]  ;;  %v92_v59 = vld [vmem:[%s1635_s1 + $0x210] sm:$0xff] }
  0x15   :  { %403 = vmatprep.subr.mxu1 %v103_v37  ;;  %333 = vmatpush1.msra.mxu0 %v38_v38  ;;  %v27_v60 = vld [vmem:[%s1635_s1 + $0x8] sm:$0xff]  ;;  %v26_v62 = vld [vmem:[%s1635_s1] sm:$0xff]  ;;  %v89_v0 = vld [vmem:[%s1635_s1 + $0x1f8] sm:$0xff] }
  0x16   :  { %404 = vmatpush1.msra.mxu1 %v102_v39  ;;  %334 = vmatprep.subr.mxu0 %v37_v40  ;;  %v91_v61 = vld [vmem:[%s1635_s1 + $0x208] sm:$0xff]  ;;  %v90_v63 = vld [vmem:[%s1635_s1 + $0x200] sm:$0xff]  ;;  %v153_v1 = vld [vmem:[%s1635_s1 + $0x3f8] sm:$0xff] }
  0x17   :  { %405 = vmatprep.subr.mxu1 %v101_v41  ;;  %335 = vmatpush1.msra.mxu0 %v36_v42  ;;  %v88_v2 = vld [vmem:[%s1635_s1 + $0x1f0] sm:$0xff]  ;;  %v87_v4 = vld [vmem:[%s1635_s1 + $0x1e8] sm:$0xff]  ;;  %v86_v6 = vld [vmem:[%s1635_s1 + $0x1e0] sm:$0xff] }
  0x18   :  { %406 = vmatpush1.msra.mxu1 %v100_v43  ;;  %336 = vmatprep.subr.mxu0 %v35_v44  ;;  %v152_v3 = vld [vmem:[%s1635_s1 + $0x3f0] sm:$0xff]  ;;  %v151_v5 = vld [vmem:[%s1635_s1 + $0x3e8] sm:$0xff]  ;;  %v150_v7 = vld [vmem:[%s1635_s1 + $0x3e0] sm:$0xff] }
  0x19   :  { %407 = vmatprep.subr.mxu1 %v99_v45  ;;  %337 = vmatpush1.msra.mxu0 %v34_v46  ;;  %v85_v8 = vld [vmem:[%s1635_s1 + $0x1d8] sm:$0xff]  ;;  %v84_v10 = vld [vmem:[%s1635_s1 + $0x1d0] sm:$0xff]  ;;  %v83_v12 = vld [vmem:[%s1635_s1 + $0x1c8] sm:$0xff] }
  0x1a   :  { %408 = vmatpush1.msra.mxu1 %v98_v47  ;;  %338 = vmatprep.subr.mxu0 %v33_v48  ;;  %v149_v9 = vld [vmem:[%s1635_s1 + $0x3d8] sm:$0xff]  ;;  %v148_v11 = vld [vmem:[%s1635_s1 + $0x3d0] sm:$0xff]  ;;  %v147_v13 = vld [vmem:[%s1635_s1 + $0x3c8] sm:$0xff] }
  0x1b   :  { %409 = vmatprep.subr.mxu1 %v97_v49  ;;  %339 = vmatpush1.msra.mxu0 %v32_v50  ;;  %v82_v14 = vld [vmem:[%s1635_s1 + $0x1c0] sm:$0xff]  ;;  %v81_v16 = vld [vmem:[%s1635_s1 + $0x1b8] sm:$0xff]  ;;  %v80_v18 = vld [vmem:[%s1635_s1 + $0x1b0] sm:$0xff] }
  0x1c   :  { %410 = vmatpush1.msra.mxu1 %v96_v51  ;;  %340 = vmatprep.subr.mxu0 %v31_v52  ;;  %v146_v15 = vld [vmem:[%s1635_s1 + $0x3c0] sm:$0xff]  ;;  %v145_v17 = vld [vmem:[%s1635_s1 + $0x3b8] sm:$0xff]  ;;  %v144_v19 = vld [vmem:[%s1635_s1 + $0x3b0] sm:$0xff] }
  0x1d   :  { %411 = vmatprep.subr.mxu1 %v95_v53  ;;  %341 = vmatpush1.msra.mxu0 %v30_v54  ;;  %v79_v20 = vld [vmem:[%s1635_s1 + $0x1a8] sm:$0xff]  ;;  %v78_v22 = vld [vmem:[%s1635_s1 + $0x1a0] sm:$0xff]  ;;  %v77_v24 = vld [vmem:[%s1635_s1 + $0x198] sm:$0xff] }
  0x1e   :  { %412 = vmatpush1.msra.mxu1 %v94_v55  ;;  %342 = vmatprep.subr.mxu0 %v29_v56  ;;  %v143_v21 = vld [vmem:[%s1635_s1 + $0x3a8] sm:$0xff]  ;;  %v142_v23 = vld [vmem:[%s1635_s1 + $0x3a0] sm:$0xff]  ;;  %v141_v25 = vld [vmem:[%s1635_s1 + $0x398] sm:$0xff] }
  0x1f   :  { %413 = vmatprep.subr.mxu1 %v93_v57  ;;  %343 = vmatpush1.msra.mxu0 %v28_v58  ;;  %v76_v26 = vld [vmem:[%s1635_s1 + $0x190] sm:$0xff]  ;;  %v75_v28 = vld [vmem:[%s1635_s1 + $0x188] sm:$0xff]  ;;  %v74_v30 = vld [vmem:[%s1635_s1 + $0x180] sm:$0xff] }
  0x20   :  { %414 = vmatpush1.msra.mxu1 %v92_v59  ;;  %344 = vmatprep.subr.mxu0 %v27_v60  ;;  %v140_v27 = vld [vmem:[%s1635_s1 + $0x390] sm:$0xff]  ;;  %v139_v29 = vld [vmem:[%s1635_s1 + $0x388] sm:$0xff]  ;;  %v138_v31 = vld [vmem:[%s1635_s1 + $0x380] sm:$0xff] }
  0x21   :  { %415 = vmatprep.subr.mxu1 %v91_v61  ;;  %345 = vmatpush1.msra.mxu0 %v26_v62  ;;  %v73_v32 = vld [vmem:[%s1635_s1 + $0x178] sm:$0xff]  ;;  %v72_v34 = vld [vmem:[%s1635_s1 + $0x170] sm:$0xff]  ;;  %v71_v36 = vld [vmem:[%s1635_s1 + $0x168] sm:$0xff] }
  0x22   :  { %416 = vmatpush1.msra.mxu1 %v90_v63  ;;  %346 = vmatprep.subr.mxu0 %v89_v0  ;;  %v137_v33 = vld [vmem:[%s1635_s1 + $0x378] sm:$0xff]  ;;  %v136_v35 = vld [vmem:[%s1635_s1 + $0x370] sm:$0xff]  ;;  %v135_v37 = vld [vmem:[%s1635_s1 + $0x368] sm:$0xff] }
  0x23   :  { %417 = vmatprep.subr.mxu1 %v153_v1  ;;  %347 = vmatpush2.msra.mxu0 %v88_v2  ;;  %v70_v38 = vld [vmem:[%s1635_s1 + $0x160] sm:$0xff]  ;;  %v69_v40 = vld [vmem:[%s1635_s1 + $0x158] sm:$0xff]  ;;  %v68_v42 = vld [vmem:[%s1635_s1 + $0x150] sm:$0xff] }
  0x24   :  { %418 = vmatpush2.msra.mxu1 %v152_v3  ;;  %348 = vmatprep.subr.mxu0 %v87_v4  ;;  %v134_v39 = vld [vmem:[%s1635_s1 + $0x360] sm:$0xff]  ;;  %v133_v41 = vld [vmem:[%s1635_s1 + $0x358] sm:$0xff]  ;;  %v132_v43 = vld [vmem:[%s1635_s1 + $0x350] sm:$0xff] }
  0x25   :  { %419 = vmatprep.subr.mxu1 %v151_v5  ;;  %349 = vmatpush2.msra.mxu0 %v86_v6  ;;  %v67_v44 = vld [vmem:[%s1635_s1 + $0x148] sm:$0xff]  ;;  %v66_v46 = vld [vmem:[%s1635_s1 + $0x140] sm:$0xff]  ;;  %v65_v48 = vld [vmem:[%s1635_s1 + $0x138] sm:$0xff] }
  0x26   :  { %420 = vmatpush2.msra.mxu1 %v150_v7  ;;  %350 = vmatprep.subr.mxu0 %v85_v8  ;;  %v131_v45 = vld [vmem:[%s1635_s1 + $0x348] sm:$0xff]  ;;  %v130_v47 = vld [vmem:[%s1635_s1 + $0x340] sm:$0xff]  ;;  %v129_v49 = vld [vmem:[%s1635_s1 + $0x338] sm:$0xff] }
  0x27   :  { %421 = vmatprep.subr.mxu1 %v149_v9  ;;  %351 = vmatpush2.msra.mxu0 %v84_v10  ;;  %v64_v50 = vld [vmem:[%s1635_s1 + $0x130] sm:$0xff]  ;;  %v63_v52 = vld [vmem:[%s1635_s1 + $0x128] sm:$0xff]  ;;  %v62_v54 = vld [vmem:[%s1635_s1 + $0x120] sm:$0xff] }
  0x28   :  { %422 = vmatpush2.msra.mxu1 %v148_v11  ;;  %352 = vmatprep.subr.mxu0 %v83_v12  ;;  %v128_v51 = vld [vmem:[%s1635_s1 + $0x330] sm:$0xff]  ;;  %v127_v53 = vld [vmem:[%s1635_s1 + $0x328] sm:$0xff]  ;;  %v126_v55 = vld [vmem:[%s1635_s1 + $0x320] sm:$0xff] }
  0x29   :  { %423 = vmatprep.subr.mxu1 %v147_v13  ;;  %353 = vmatpush2.msra.mxu0 %v82_v14  ;;  %v61_v56 = vld [vmem:[%s1635_s1 + $0x118] sm:$0xff]  ;;  %v60_v58 = vld [vmem:[%s1635_s1 + $0x110] sm:$0xff]  ;;  %v59_v60 = vld [vmem:[%s1635_s1 + $0x108] sm:$0xff] }
  0x2a   :  { %424 = vmatpush2.msra.mxu1 %v146_v15  ;;  %354 = vmatprep.subr.mxu0 %v81_v16  ;;  %v125_v57 = vld [vmem:[%s1635_s1 + $0x318] sm:$0xff]  ;;  %v124_v59 = vld [vmem:[%s1635_s1 + $0x310] sm:$0xff]  ;;  %v123_v61 = vld [vmem:[%s1635_s1 + $0x308] sm:$0xff] }
  0x2b   :  { %425 = vmatprep.subr.mxu1 %v145_v17  ;;  %355 = vmatpush2.msra.mxu0 %v80_v18  ;;  %v58_v62 = vld [vmem:[%s1635_s1 + $0x100] sm:$0xff]  ;;  %v18_v63 = vld [vmem:[%s1636_s0 + $0x8] sm:$0xff]  ;;  %v20_v1 = vld [vmem:[%s1636_s0 + $0x18] sm:$0xff] }
  0x2c   :  { %426 = vmatpush2.msra.mxu1 %v144_v19  ;;  %356 = vmatprep.subr.mxu0 %v79_v20  ;;  %v122_v0 = vld [vmem:[%s1635_s1 + $0x300] sm:$0xff]  ;;  %v19_v3 = vld [vmem:[%s1636_s0 + $0x10] sm:$0xff]  ;;  %v185_v4 = vld [vmem:[%s1635_s1 + $0x4f8] sm:$0xff] }
  0x2d   :  { %427 = vmatprep.subr.mxu1 %v143_v21  ;;  %357 = vmatpush2.msra.mxu0 %v78_v22  ;;  %v17_v2 = vld [vmem:[%s1636_s0] sm:$0xff]  ;;  %v249_v5 = vld [vmem:[%s1635_s1 + $0x6f8] sm:$0xff]  ;;  %v184_v6 = vld [vmem:[%s1635_s1 + $0x4f0] sm:$0xff] }
  0x2e   :  { %428 = vmatpush2.msra.mxu1 %v142_v23  ;;  %358 = vmatprep.subr.mxu0 %v77_v24  ;;  %v248_v7 = vld [vmem:[%s1635_s1 + $0x6f0] sm:$0xff]  ;;  %v183_v8 = vld [vmem:[%s1635_s1 + $0x4e8] sm:$0xff]  ;;  %v182_v10 = vld [vmem:[%s1635_s1 + $0x4e0] sm:$0xff] }
  0x2f   :  { %429 = vmatprep.subr.mxu1 %v141_v25  ;;  %359 = vmatpush2.msra.mxu0 %v76_v26  ;;  %v247_v9 = vld [vmem:[%s1635_s1 + $0x6e8] sm:$0xff]  ;;  %v246_v11 = vld [vmem:[%s1635_s1 + $0x6e0] sm:$0xff]  ;;  %v181_v12 = vld [vmem:[%s1635_s1 + $0x4d8] sm:$0xff] }
  0x30   :  { %430 = vmatpush2.msra.mxu1 %v140_v27  ;;  %360 = vmatprep.subr.mxu0 %v75_v28  ;;  %v245_v13 = vld [vmem:[%s1635_s1 + $0x6d8] sm:$0xff]  ;;  %v180_v14 = vld [vmem:[%s1635_s1 + $0x4d0] sm:$0xff]  ;;  %v179_v16 = vld [vmem:[%s1635_s1 + $0x4c8] sm:$0xff] }
  0x31   :  { %431 = vmatprep.subr.mxu1 %v139_v29  ;;  %361 = vmatpush2.msra.mxu0 %v74_v30  ;;  %v244_v15 = vld [vmem:[%s1635_s1 + $0x6d0] sm:$0xff]  ;;  %v243_v17 = vld [vmem:[%s1635_s1 + $0x6c8] sm:$0xff]  ;;  %v178_v18 = vld [vmem:[%s1635_s1 + $0x4c0] sm:$0xff] }
  0x32   :  { %432 = vmatpush2.msra.mxu1 %v138_v31  ;;  %362 = vmatprep.subr.mxu0 %v73_v32  ;;  %v242_v19 = vld [vmem:[%s1635_s1 + $0x6c0] sm:$0xff]  ;;  %v177_v20 = vld [vmem:[%s1635_s1 + $0x4b8] sm:$0xff]  ;;  %v176_v22 = vld [vmem:[%s1635_s1 + $0x4b0] sm:$0xff] }
  0x33   :  { %433 = vmatprep.subr.mxu1 %v137_v33  ;;  %363 = vmatpush2.msra.mxu0 %v72_v34  ;;  %v241_v21 = vld [vmem:[%s1635_s1 + $0x6b8] sm:$0xff]  ;;  %v240_v23 = vld [vmem:[%s1635_s1 + $0x6b0] sm:$0xff]  ;;  %v175_v24 = vld [vmem:[%s1635_s1 + $0x4a8] sm:$0xff] }
  0x34   :  { %434 = vmatpush2.msra.mxu1 %v136_v35  ;;  %364 = vmatprep.subr.mxu0 %v71_v36  ;;  %v239_v25 = vld [vmem:[%s1635_s1 + $0x6a8] sm:$0xff]  ;;  %v174_v26 = vld [vmem:[%s1635_s1 + $0x4a0] sm:$0xff]  ;;  %v173_v28 = vld [vmem:[%s1635_s1 + $0x498] sm:$0xff] }
  0x35   :  { %435 = vmatprep.subr.mxu1 %v135_v37  ;;  %365 = vmatpush2.msra.mxu0 %v70_v38  ;;  %v238_v27 = vld [vmem:[%s1635_s1 + $0x6a0] sm:$0xff]  ;;  %v237_v29 = vld [vmem:[%s1635_s1 + $0x698] sm:$0xff]  ;;  %v172_v30 = vld [vmem:[%s1635_s1 + $0x490] sm:$0xff] }
  0x36   :  { %436 = vmatpush2.msra.mxu1 %v134_v39  ;;  %366 = vmatprep.subr.mxu0 %v69_v40  ;;  %v236_v31 = vld [vmem:[%s1635_s1 + $0x690] sm:$0xff]  ;;  %v171_v32 = vld [vmem:[%s1635_s1 + $0x488] sm:$0xff]  ;;  %v170_v34 = vld [vmem:[%s1635_s1 + $0x480] sm:$0xff] }
  0x37   :  { %437 = vmatprep.subr.mxu1 %v133_v41  ;;  %367 = vmatpush2.msra.mxu0 %v68_v42  ;;  %v235_v33 = vld [vmem:[%s1635_s1 + $0x688] sm:$0xff]  ;;  %v234_v35 = vld [vmem:[%s1635_s1 + $0x680] sm:$0xff]  ;;  %v169_v36 = vld [vmem:[%s1635_s1 + $0x478] sm:$0xff] }
  0x38   :  { %438 = vmatpush2.msra.mxu1 %v132_v43  ;;  %368 = vmatprep.subr.mxu0 %v67_v44  ;;  %v233_v37 = vld [vmem:[%s1635_s1 + $0x678] sm:$0xff]  ;;  %v168_v38 = vld [vmem:[%s1635_s1 + $0x470] sm:$0xff]  ;;  %v167_v40 = vld [vmem:[%s1635_s1 + $0x468] sm:$0xff] }
  0x39   :  { %439 = vmatprep.subr.mxu1 %v131_v45  ;;  %369 = vmatpush2.msra.mxu0 %v66_v46  ;;  %v232_v39 = vld [vmem:[%s1635_s1 + $0x670] sm:$0xff]  ;;  %v231_v41 = vld [vmem:[%s1635_s1 + $0x668] sm:$0xff]  ;;  %v166_v42 = vld [vmem:[%s1635_s1 + $0x460] sm:$0xff] }
  0x3a   :  { %440 = vmatpush2.msra.mxu1 %v130_v47  ;;  %370 = vmatprep.subr.mxu0 %v65_v48  ;;  %v230_v43 = vld [vmem:[%s1635_s1 + $0x660] sm:$0xff]  ;;  %v165_v44 = vld [vmem:[%s1635_s1 + $0x458] sm:$0xff]  ;;  %v164_v46 = vld [vmem:[%s1635_s1 + $0x450] sm:$0xff] }
  0x3b   :  { %441 = vmatprep.subr.mxu1 %v129_v49  ;;  %371 = vmatpush2.msra.mxu0 %v64_v50  ;;  %v229_v45 = vld [vmem:[%s1635_s1 + $0x658] sm:$0xff]  ;;  %v228_v47 = vld [vmem:[%s1635_s1 + $0x650] sm:$0xff]  ;;  %v163_v48 = vld [vmem:[%s1635_s1 + $0x448] sm:$0xff] }
  0x3c   :  { %442 = vmatpush2.msra.mxu1 %v128_v51  ;;  %372 = vmatprep.subr.mxu0 %v63_v52  ;;  %v227_v49 = vld [vmem:[%s1635_s1 + $0x648] sm:$0xff]  ;;  %v162_v50 = vld [vmem:[%s1635_s1 + $0x440] sm:$0xff]  ;;  %v161_v52 = vld [vmem:[%s1635_s1 + $0x438] sm:$0xff] }
  0x3d   :  { %443 = vmatprep.subr.mxu1 %v127_v53  ;;  %373 = vmatpush2.msra.mxu0 %v62_v54  ;;  %v226_v51 = vld [vmem:[%s1635_s1 + $0x640] sm:$0xff]  ;;  %v225_v53 = vld [vmem:[%s1635_s1 + $0x638] sm:$0xff]  ;;  %v160_v54 = vld [vmem:[%s1635_s1 + $0x430] sm:$0xff] }
  0x3e   :  { %444 = vmatpush2.msra.mxu1 %v126_v55  ;;  %374 = vmatprep.subr.mxu0 %v61_v56  ;;  %v224_v55 = vld [vmem:[%s1635_s1 + $0x630] sm:$0xff]  ;;  %v159_v56 = vld [vmem:[%s1635_s1 + $0x428] sm:$0xff] }
  0x3f   :  { %445 = vmatprep.subr.mxu1 %v125_v57  ;;  %375 = vmatpush2.msra.mxu0 %v60_v58  ;;  %v223_v57 = vld [vmem:[%s1635_s1 + $0x628] sm:$0xff]  ;;  %v158_v58 = vld [vmem:[%s1635_s1 + $0x420] sm:$0xff] }
  0x40   :  { %446 = vmatpush2.msra.mxu1 %v124_v59  ;;  %376 = vmatprep.subr.mxu0 %v59_v60  ;;  %v222_v59 = vld [vmem:[%s1635_s1 + $0x620] sm:$0xff]  ;;  %v157_v60 = vld [vmem:[%s1635_s1 + $0x418] sm:$0xff] }
  0x41   :  { %447 = vmatprep.subr.mxu1 %v123_v61  ;;  %377 = vmatpush2.msra.mxu0 %v58_v62  ;;  %v221_v61 = vld [vmem:[%s1635_s1 + $0x618] sm:$0xff]  ;;  %v156_v62 = vld [vmem:[%s1635_s1 + $0x410] sm:$0xff] }
  0x42   :  { %378 = vmatprep.mubr.f32.mxu0 %v18_v63  ;;  %448 = vmatpush2.msra.mxu1 %v122_v0  ;;  %v220_v63 = vld [vmem:[%s1635_s1 + $0x610] sm:$0xff]  ;;  %v155_v0 = vld [vmem:[%s1635_s1 + $0x408] sm:$0xff] }
  0x43   :  { %449 = vmatprep.mubr.f32.mxu1 %v20_v1  ;;  %379 = vmatmul.mubr.f32.vlgmr.msra.gmra.mxu0 %v17_v2  ;;  %v219_v1 = vld [vmem:[%s1635_s1 + $0x608] sm:$0xff]  ;;  %v154_v2 = vld [vmem:[%s1635_s1 + $0x400] sm:$0xff] }
  0x44   :  { %450 = vmatmul.mubr.f32.vlgmr.msra.gmra.mxu1 %v19_v3  ;;  %456 = vmatprep.subr.mxu0 %v185_v4  ;;  %v218_v3 = vld [vmem:[%s1635_s1 + $0x600] sm:$0xff]  ;;  %v217_v4 = vld [vmem:[%s1635_s1 + $0x5f8] sm:$0xff] }
  0x45   :  { %527 = vmatprep.subr.mxu1 %v249_v5  ;;  %457 = vmatpush1.msra.mxu0 %v184_v6  ;;  %v281_v5 = vld [vmem:[%s1635_s1 + $0x7f8] sm:$0xff]  ;;  %v216_v6 = vld [vmem:[%s1635_s1 + $0x5f0] sm:$0xff] }
  0x46   :  { %528 = vmatpush1.msra.mxu1 %v248_v7  ;;  %458 = vmatprep.subr.mxu0 %v183_v8  ;;  %v280_v7 = vld [vmem:[%s1635_s1 + $0x7f0] sm:$0xff]  ;;  %v215_v8 = vld [vmem:[%s1635_s1 + $0x5e8] sm:$0xff] }
  0x47   :  { %529 = vmatprep.subr.mxu1 %v247_v9  ;;  %459 = vmatpush1.msra.mxu0 %v182_v10  ;;  %v279_v9 = vld [vmem:[%s1635_s1 + $0x7e8] sm:$0xff]  ;;  %v214_v10 = vld [vmem:[%s1635_s1 + $0x5e0] sm:$0xff] }
  0x48   :  { %530 = vmatpush1.msra.mxu1 %v246_v11  ;;  %460 = vmatprep.subr.mxu0 %v181_v12  ;;  %v278_v11 = vld [vmem:[%s1635_s1 + $0x7e0] sm:$0xff]  ;;  %v213_v12 = vld [vmem:[%s1635_s1 + $0x5d8] sm:$0xff] }
  0x49   :  { %531 = vmatprep.subr.mxu1 %v245_v13  ;;  %461 = vmatpush1.msra.mxu0 %v180_v14  ;;  %v277_v13 = vld [vmem:[%s1635_s1 + $0x7d8] sm:$0xff]  ;;  %v212_v14 = vld [vmem:[%s1635_s1 + $0x5d0] sm:$0xff] }
  0x4a   :  { %532 = vmatpush1.msra.mxu1 %v244_v15  ;;  %462 = vmatprep.subr.mxu0 %v179_v16  ;;  %v276_v15 = vld [vmem:[%s1635_s1 + $0x7d0] sm:$0xff]  ;;  %v211_v16 = vld [vmem:[%s1635_s1 + $0x5c8] sm:$0xff] }
  0x4b   :  { %533 = vmatprep.subr.mxu1 %v243_v17  ;;  %463 = vmatpush1.msra.mxu0 %v178_v18  ;;  %v275_v17 = vld [vmem:[%s1635_s1 + $0x7c8] sm:$0xff]  ;;  %v210_v18 = vld [vmem:[%s1635_s1 + $0x5c0] sm:$0xff] }
  0x4c   :  { %534 = vmatpush1.msra.mxu1 %v242_v19  ;;  %464 = vmatprep.subr.mxu0 %v177_v20  ;;  %v274_v19 = vld [vmem:[%s1635_s1 + $0x7c0] sm:$0xff]  ;;  %v209_v20 = vld [vmem:[%s1635_s1 + $0x5b8] sm:$0xff] }
  0x4d   :  { %535 = vmatprep.subr.mxu1 %v241_v21  ;;  %465 = vmatpush1.msra.mxu0 %v176_v22  ;;  %v273_v21 = vld [vmem:[%s1635_s1 + $0x7b8] sm:$0xff]  ;;  %v208_v22 = vld [vmem:[%s1635_s1 + $0x5b0] sm:$0xff] }
  0x4e   :  { %536 = vmatpush1.msra.mxu1 %v240_v23  ;;  %466 = vmatprep.subr.mxu0 %v175_v24  ;;  %v272_v23 = vld [vmem:[%s1635_s1 + $0x7b0] sm:$0xff]  ;;  %v207_v24 = vld [vmem:[%s1635_s1 + $0x5a8] sm:$0xff] }
  0x4f   :  { %537 = vmatprep.subr.mxu1 %v239_v25  ;;  %467 = vmatpush1.msra.mxu0 %v174_v26  ;;  %v271_v25 = vld [vmem:[%s1635_s1 + $0x7a8] sm:$0xff]  ;;  %v206_v26 = vld [vmem:[%s1635_s1 + $0x5a0] sm:$0xff] }
  0x50   :  { %538 = vmatpush1.msra.mxu1 %v238_v27  ;;  %468 = vmatprep.subr.mxu0 %v173_v28  ;;  %v270_v27 = vld [vmem:[%s1635_s1 + $0x7a0] sm:$0xff]  ;;  %v205_v28 = vld [vmem:[%s1635_s1 + $0x598] sm:$0xff] }
  0x51   :  { %539 = vmatprep.subr.mxu1 %v237_v29  ;;  %469 = vmatpush1.msra.mxu0 %v172_v30  ;;  %v269_v29 = vld [vmem:[%s1635_s1 + $0x798] sm:$0xff]  ;;  %v204_v30 = vld [vmem:[%s1635_s1 + $0x590] sm:$0xff] }
  0x52   :  { %540 = vmatpush1.msra.mxu1 %v236_v31  ;;  %470 = vmatprep.subr.mxu0 %v171_v32  ;;  %v268_v31 = vld [vmem:[%s1635_s1 + $0x790] sm:$0xff]  ;;  %v203_v32 = vld [vmem:[%s1635_s1 + $0x588] sm:$0xff] }
  0x53   :  { %541 = vmatprep.subr.mxu1 %v235_v33  ;;  %471 = vmatpush1.msra.mxu0 %v170_v34  ;;  %v267_v33 = vld [vmem:[%s1635_s1 + $0x788] sm:$0xff]  ;;  %v202_v34 = vld [vmem:[%s1635_s1 + $0x580] sm:$0xff] }
  0x54   :  { %542 = vmatpush1.msra.mxu1 %v234_v35  ;;  %472 = vmatprep.subr.mxu0 %v169_v36  ;;  %v266_v35 = vld [vmem:[%s1635_s1 + $0x780] sm:$0xff]  ;;  %v201_v36 = vld [vmem:[%s1635_s1 + $0x578] sm:$0xff] }
  0x55   :  { %543 = vmatprep.subr.mxu1 %v233_v37  ;;  %473 = vmatpush1.msra.mxu0 %v168_v38  ;;  %v265_v37 = vld [vmem:[%s1635_s1 + $0x778] sm:$0xff]  ;;  %v200_v38 = vld [vmem:[%s1635_s1 + $0x570] sm:$0xff] }
  0x56   :  { %544 = vmatpush1.msra.mxu1 %v232_v39  ;;  %474 = vmatprep.subr.mxu0 %v167_v40  ;;  %v264_v39 = vld [vmem:[%s1635_s1 + $0x770] sm:$0xff]  ;;  %v199_v40 = vld [vmem:[%s1635_s1 + $0x568] sm:$0xff] }
  0x57   :  { %545 = vmatprep.subr.mxu1 %v231_v41  ;;  %475 = vmatpush1.msra.mxu0 %v166_v42  ;;  %v263_v41 = vld [vmem:[%s1635_s1 + $0x768] sm:$0xff]  ;;  %v198_v42 = vld [vmem:[%s1635_s1 + $0x560] sm:$0xff] }
  0x58   :  { %546 = vmatpush1.msra.mxu1 %v230_v43  ;;  %476 = vmatprep.subr.mxu0 %v165_v44  ;;  %v262_v43 = vld [vmem:[%s1635_s1 + $0x760] sm:$0xff]  ;;  %v197_v44 = vld [vmem:[%s1635_s1 + $0x558] sm:$0xff] }
  0x59   :  { %547 = vmatprep.subr.mxu1 %v229_v45  ;;  %477 = vmatpush1.msra.mxu0 %v164_v46  ;;  %v261_v45 = vld [vmem:[%s1635_s1 + $0x758] sm:$0xff]  ;;  %v196_v46 = vld [vmem:[%s1635_s1 + $0x550] sm:$0xff] }
  0x5a   :  { %548 = vmatpush1.msra.mxu1 %v228_v47  ;;  %478 = vmatprep.subr.mxu0 %v163_v48  ;;  %v260_v47 = vld [vmem:[%s1635_s1 + $0x750] sm:$0xff]  ;;  %v195_v48 = vld [vmem:[%s1635_s1 + $0x548] sm:$0xff] }
  0x5b   :  { %549 = vmatprep.subr.mxu1 %v227_v49  ;;  %479 = vmatpush1.msra.mxu0 %v162_v50  ;;  %v259_v49 = vld [vmem:[%s1635_s1 + $0x748] sm:$0xff]  ;;  %v194_v50 = vld [vmem:[%s1635_s1 + $0x540] sm:$0xff] }
  0x5c   :  { %550 = vmatpush1.msra.mxu1 %v226_v51  ;;  %480 = vmatprep.subr.mxu0 %v161_v52  ;;  %v258_v51 = vld [vmem:[%s1635_s1 + $0x740] sm:$0xff]  ;;  %v193_v52 = vld [vmem:[%s1635_s1 + $0x538] sm:$0xff] }
  0x5d   :  { %551 = vmatprep.subr.mxu1 %v225_v53  ;;  %481 = vmatpush1.msra.mxu0 %v160_v54  ;;  %v257_v53 = vld [vmem:[%s1635_s1 + $0x738] sm:$0xff]  ;;  %v192_v54 = vld [vmem:[%s1635_s1 + $0x530] sm:$0xff] }
  0x5e   :  { %552 = vmatpush1.msra.mxu1 %v224_v55  ;;  %482 = vmatprep.subr.mxu0 %v159_v56  ;;  %v256_v55 = vld [vmem:[%s1635_s1 + $0x730] sm:$0xff]  ;;  %v191_v56 = vld [vmem:[%s1635_s1 + $0x528] sm:$0xff] }
  0x5f   :  { %553 = vmatprep.subr.mxu1 %v223_v57  ;;  %483 = vmatpush1.msra.mxu0 %v158_v58  ;;  %v255_v57 = vld [vmem:[%s1635_s1 + $0x728] sm:$0xff]  ;;  %v190_v58 = vld [vmem:[%s1635_s1 + $0x520] sm:$0xff] }
  0x60   :  { %554 = vmatpush1.msra.mxu1 %v222_v59  ;;  %484 = vmatprep.subr.mxu0 %v157_v60  ;;  %v254_v59 = vld [vmem:[%s1635_s1 + $0x720] sm:$0xff]  ;;  %v189_v60 = vld [vmem:[%s1635_s1 + $0x518] sm:$0xff] }
  0x61   :  { %555 = vmatprep.subr.mxu1 %v221_v61  ;;  %485 = vmatpush1.msra.mxu0 %v156_v62  ;;  %v253_v61 = vld [vmem:[%s1635_s1 + $0x718] sm:$0xff]  ;;  %v188_v62 = vld [vmem:[%s1635_s1 + $0x510] sm:$0xff] }
  0x62   :  { %556 = vmatpush1.msra.mxu1 %v220_v63  ;;  %486 = vmatprep.subr.mxu0 %v155_v0  ;;  %v22_v63 = vld [vmem:[%s1636_s0 + $0x28] sm:$0xff] }
  0x63   :  { %557 = vmatprep.subr.mxu1 %v219_v1  ;;  %487 = vmatpush1.msra.mxu0 %v154_v2  ;;  %v187_v0 = vld [vmem:[%s1635_s1 + $0x508] sm:$0xff]  ;;  %v252_v1 = vld [vmem:[%s1635_s1 + $0x710] sm:$0xff]  ;;  %v186_v2 = vld [vmem:[%s1635_s1 + $0x500] sm:$0xff] }
  0x64   :  { %558 = vmatpush1.msra.mxu1 %v218_v3  ;;  %488 = vmatprep.subr.mxu0 %v217_v4  ;;  %v251_v3 = vld [vmem:[%s1635_s1 + $0x708] sm:$0xff]  ;;  %v21_v4 = vld [vmem:[%s1636_s0 + $0x20] sm:$0xff] }
  0x65   :  { %559 = vmatprep.subr.mxu1 %v281_v5  ;;  %489 = vmatpush2.msra.mxu0 %v216_v6  ;;  %v313_v5 = vld [vmem:[%s1635_s1 + $0x8f8] sm:$0xff]  ;;  %v250_v6 = vld [vmem:[%s1635_s1 + $0x700] sm:$0xff] }
  0x66   :  { %560 = vmatpush2.msra.mxu1 %v280_v7  ;;  %490 = vmatprep.subr.mxu0 %v215_v8  ;;  %v24_v7 = vld [vmem:[%s1636_s0 + $0x38] sm:$0xff]  ;;  %v312_v8 = vld [vmem:[%s1635_s1 + $0x8f0] sm:$0xff] }
  0x67   :  { %561 = vmatprep.subr.mxu1 %v279_v9  ;;  %491 = vmatpush2.msra.mxu0 %v214_v10  ;;  %v23_v9 = vld [vmem:[%s1636_s0 + $0x30] sm:$0xff]  ;;  %v311_v10 = vld [vmem:[%s1635_s1 + $0x8e8] sm:$0xff] }
  0x68   :  { %562 = vmatpush2.msra.mxu1 %v278_v11  ;;  %492 = vmatprep.subr.mxu0 %v213_v12  ;;  %v310_v11 = vld [vmem:[%s1635_s1 + $0x8e0] sm:$0xff]  ;;  %v309_v12 = vld [vmem:[%s1635_s1 + $0x8d8] sm:$0xff] }
  0x69   :  { %563 = vmatprep.subr.mxu1 %v277_v13  ;;  %493 = vmatpush2.msra.mxu0 %v212_v14  ;;  %v308_v13 = vld [vmem:[%s1635_s1 + $0x8d0] sm:$0xff]  ;;  %v706_v14 = vmov 0.0  }
  0x6a   :  { %564 = vmatpush2.msra.mxu1 %v276_v15  ;;  %494 = vmatprep.subr.mxu0 %v211_v16  ;;  %v307_v15 = vld [vmem:[%s1635_s1 + $0x8c8] sm:$0xff]  ;;  %v306_v16 = vld [vmem:[%s1635_s1 + $0x8c0] sm:$0xff] }
  0x6b   :  { %565 = vmatprep.subr.mxu1 %v275_v17  ;;  %495 = vmatpush2.msra.mxu0 %v210_v18  ;;  %v305_v17 = vld [vmem:[%s1635_s1 + $0x8b8] sm:$0xff]  ;;  %v304_v18 = vld [vmem:[%s1635_s1 + $0x8b0] sm:$0xff] }
  0x6c   :  { %566 = vmatpush2.msra.mxu1 %v274_v19  ;;  %496 = vmatprep.subr.mxu0 %v209_v20  ;;  %v303_v19 = vld [vmem:[%s1635_s1 + $0x8a8] sm:$0xff]  ;;  %v302_v20 = vld [vmem:[%s1635_s1 + $0x8a0] sm:$0xff] }
  0x6d   :  { %567 = vmatprep.subr.mxu1 %v273_v21  ;;  %497 = vmatpush2.msra.mxu0 %v208_v22  ;;  %v301_v21 = vld [vmem:[%s1635_s1 + $0x898] sm:$0xff]  ;;  %v300_v22 = vld [vmem:[%s1635_s1 + $0x890] sm:$0xff] }
  0x6e   :  { %568 = vmatpush2.msra.mxu1 %v272_v23  ;;  %498 = vmatprep.subr.mxu0 %v207_v24  ;;  %v299_v23 = vld [vmem:[%s1635_s1 + $0x888] sm:$0xff]  ;;  %v298_v24 = vld [vmem:[%s1635_s1 + $0x880] sm:$0xff] }
  0x6f   :  { %569 = vmatprep.subr.mxu1 %v271_v25  ;;  %499 = vmatpush2.msra.mxu0 %v206_v26  ;;  %v297_v25 = vld [vmem:[%s1635_s1 + $0x878] sm:$0xff]  ;;  %v296_v26 = vld [vmem:[%s1635_s1 + $0x870] sm:$0xff] }
  0x70   :  { %570 = vmatpush2.msra.mxu1 %v270_v27  ;;  %500 = vmatprep.subr.mxu0 %v205_v28  ;;  %v295_v27 = vld [vmem:[%s1635_s1 + $0x868] sm:$0xff]  ;;  %v294_v28 = vld [vmem:[%s1635_s1 + $0x860] sm:$0xff] }
  0x71   :  { %571 = vmatprep.subr.mxu1 %v269_v29  ;;  %501 = vmatpush2.msra.mxu0 %v204_v30  ;;  %v293_v29 = vld [vmem:[%s1635_s1 + $0x858] sm:$0xff]  ;;  %v292_v30 = vld [vmem:[%s1635_s1 + $0x850] sm:$0xff] }
  0x72   :  { %572 = vmatpush2.msra.mxu1 %v268_v31  ;;  %502 = vmatprep.subr.mxu0 %v203_v32  ;;  %v291_v31 = vld [vmem:[%s1635_s1 + $0x848] sm:$0xff]  ;;  %v290_v32 = vld [vmem:[%s1635_s1 + $0x840] sm:$0xff] }
  0x73   :  { %573 = vmatprep.subr.mxu1 %v267_v33  ;;  %503 = vmatpush2.msra.mxu0 %v202_v34  ;;  %v289_v33 = vld [vmem:[%s1635_s1 + $0x838] sm:$0xff]  ;;  %v288_v34 = vld [vmem:[%s1635_s1 + $0x830] sm:$0xff] }
  0x74   :  { %574 = vmatpush2.msra.mxu1 %v266_v35  ;;  %504 = vmatprep.subr.mxu0 %v201_v36  ;;  %v287_v35 = vld [vmem:[%s1635_s1 + $0x828] sm:$0xff]  ;;  %v286_v36 = vld [vmem:[%s1635_s1 + $0x820] sm:$0xff] }
  0x75   :  { %575 = vmatprep.subr.mxu1 %v265_v37  ;;  %505 = vmatpush2.msra.mxu0 %v200_v38  ;;  %v285_v37 = vld [vmem:[%s1635_s1 + $0x818] sm:$0xff]  ;;  %v284_v38 = vld [vmem:[%s1635_s1 + $0x810] sm:$0xff] }
  0x76   :  { %576 = vmatpush2.msra.mxu1 %v264_v39  ;;  %506 = vmatprep.subr.mxu0 %v199_v40  ;;  %v283_v39 = vld [vmem:[%s1635_s1 + $0x808] sm:$0xff]  ;;  %v282_v40 = vld [vmem:[%s1635_s1 + $0x800] sm:$0xff] }
  0x77   :  { %577 = vmatprep.subr.mxu1 %v263_v41  ;;  %507 = vmatpush2.msra.mxu0 %v198_v42  ;;  %v25_v41 = vld [vmem:[%s1636_s0 + $0x40] sm:$0xff] }
  0x78   :  { %578 = vmatpush2.msra.mxu1 %v262_v43  ;;  %508 = vmatprep.subr.mxu0 %v197_v44  ;;  %v671_v43 = vlaneseq }
  0x79   :  { %579 = vmatprep.subr.mxu1 %v261_v45  ;;  %509 = vmatpush2.msra.mxu0 %v196_v46 }
  0x7a   :  { %580 = vmatpush2.msra.mxu1 %v260_v47  ;;  %510 = vmatprep.subr.mxu0 %v195_v48  ;;  %v672_v47 = vshrl.u32 %v671_v43, 7 }
  0x7b   :  { %581 = vmatprep.subr.mxu1 %v259_v49  ;;  %511 = vmatpush2.msra.mxu0 %v194_v50 }
  0x7c   :  { %582 = vmatpush2.msra.mxu1 %v258_v51  ;;  %512 = vmatprep.subr.mxu0 %v193_v52 }
  0x7d   :  { %583 = vmatprep.subr.mxu1 %v257_v53  ;;  %513 = vmatpush2.msra.mxu0 %v192_v54  ;;  %v673_v54 = vsub.s32 0, %v672_v47 }
  0x7e   :  { %584 = vmatpush2.msra.mxu1 %v256_v55  ;;  %514 = vmatprep.subr.mxu0 %v191_v56  ;;  %v669_v55 = vld [vmem:[%s1637_s2] sm:$0x3] }
  0x7f   :  { %585 = vmatprep.subr.mxu1 %v255_v57  ;;  %515 = vmatpush2.msra.mxu0 %v190_v58  ;;  %v677_v57 = vsub.s32 1, %v672_v47 }
  0x80   :  { %586 = vmatpush2.msra.mxu1 %v254_v59  ;;  %516 = vmatprep.subr.mxu0 %v189_v60  ;;  %v683_v59 = vld [vmem:[%s1638_s3] sm:$0x3] }
  0x81   :  { %587 = vmatprep.subr.mxu1 %v253_v61  ;;  %517 = vmatpush2.msra.mxu0 %v188_v62  ;;  %v674_v61 = vrot.slane %v669_v55, %v673_v54 }
  0x82   :  { %520 = vmatprep.mubr.f32.mxu0 %v22_v63  ;;  %518 = vmatprep.subr.mxu0 %v187_v0 }
  0x83   :  { %588 = vmatpush2.msra.mxu1 %v252_v1  ;;  %519 = vmatpush2.msra.mxu0 %v186_v2  ;;  %v688_v1 = vrot.slane %v683_v59, %v673_v54  ;;  %v678_v2 = vrot.slane %v669_v55, %v677_v57 }
  0x84   :  { %589 = vmatprep.subr.mxu1 %v251_v3  ;;  %521 = vmatmul.mubr.f32.vlgmr.msra.gmra.mxu0 %v21_v4 }
  0x85   :  { %598 = vmatprep.subr.mxu0 %v313_v5  ;;  %590 = vmatpush2.msra.mxu1 %v250_v6  ;;  %v692_v6 = vrot.slane %v683_v59, %v677_v57 }
  0x86   :  { %591 = vmatprep.mubr.f32.mxu1 %v24_v7  ;;  %599 = vmatpush1.msra.mxu0 %v312_v8 }
  0x87   :  { %592 = vmatmul.mubr.f32.vlgmr.msra.gmra.mxu1 %v23_v9  ;;  %600 = vmatprep.subr.mxu0 %v311_v10 }
  0x88   :  { %662 = vmatprep.mubr.f32.mxu0 %v706_v14  ;;  %601 = vmatpush1.msra.mxu0 %v310_v11 }
  0x89   :  { %602 = vmatprep.subr.mxu0 %v309_v12 }
  0x8a   :  { %603 = vmatpush1.msra.mxu0 %v308_v13 }
  0x8b   :  { %604 = vmatprep.subr.mxu0 %v307_v15 }
  0x8c   :  { %605 = vmatpush1.msra.mxu0 %v306_v16 }
  0x8d   :  { %606 = vmatprep.subr.mxu0 %v305_v17 }
  0x8e   :  { %607 = vmatpush1.msra.mxu0 %v304_v18 }
  0x8f   :  { %608 = vmatprep.subr.mxu0 %v303_v19 }
  0x90   :  { %609 = vmatpush1.msra.mxu0 %v302_v20 }
  0x91   :  { %610 = vmatprep.subr.mxu0 %v301_v21 }
  0x92   :  { %611 = vmatpush1.msra.mxu0 %v300_v22 }
  0x93   :  { %612 = vmatprep.subr.mxu0 %v299_v23 }
  0x94   :  { %613 = vmatpush1.msra.mxu0 %v298_v24 }
  0x95   :  { %614 = vmatprep.subr.mxu0 %v297_v25 }
  0x96   :  { %615 = vmatpush1.msra.mxu0 %v296_v26 }
  0x97   :  { %616 = vmatprep.subr.mxu0 %v295_v27 }
  0x98   :  { %617 = vmatpush1.msra.mxu0 %v294_v28 }
  0x99   :  { %618 = vmatprep.subr.mxu0 %v293_v29 }
  0x9a   :  { %619 = vmatpush1.msra.mxu0 %v292_v30 }
  0x9b   :  { %620 = vmatprep.subr.mxu0 %v291_v31 }
  0x9c   :  { %621 = vmatpush1.msra.mxu0 %v290_v32 }
  0x9d   :  { %622 = vmatprep.subr.mxu0 %v289_v33 }
  0x9e   :  { %623 = vmatpush1.msra.mxu0 %v288_v34 }
  0x9f   :  { %624 = vmatprep.subr.mxu0 %v287_v35 }
  0xa0   :  { %625 = vmatpush1.msra.mxu0 %v286_v36 }
  0xa1   :  { %626 = vmatprep.subr.mxu0 %v285_v37 }
  0xa2   :  { %627 = vmatpush1.msra.mxu0 %v284_v38 }
  0xa3   :  { %628 = vmatprep.subr.mxu0 %v283_v39 }
  0xa4   :  { %629 = vmatpush1.msra.mxu0 %v282_v40 }
  0xa5   :  { %663 = vmatmul.mubr.f32.vlgmr.msra.gmra.mxu0 %v25_v41 }
 0x103   :  { %v380_v42 = vpop.f32.mrf.mxu0 }
 0x104   :  { %v451_v44 = vpop.f32.mrf.mxu1 }
 0x105   :  { %v382_v45 = vpop.f32.mrf.mxu0  ;;  %v452_v49 = vadd.f32 %v451_v44, %v380_v42 }
 0x106   :  { %v453_v48 = vpop.f32.mrf.mxu1 }
 0x107   :  { %v454_v52 = vadd.f32 %v453_v48, %v382_v45 }
 0x144   :  { %v522_v46 = vpop.f32.mrf.mxu0 }
 0x145   :  { %v523_v53 = vadd.f32 %v522_v46, %v452_v49 }
 0x146   :  { %v524_v50 = vpop.f32.mrf.mxu0 }
 0x147   :  { %v593_v51 = vpop.f32.mrf.mxu1  ;;  %v525_v56 = vadd.f32 %v524_v50, %v454_v52 }
 0x148   :  { %v594_v60 = vadd.f32 %v593_v51, %v523_v53 }
 0x149   :  { %v595_v58 = vpop.f32.mrf.mxu1 }
 0x14a   :  { %v596_v63 = vadd.f32 %v595_v58, %v525_v56 }
 0x165   :  { %v664_v62 = vpop.f32.mrf.mxu0 }
 0x166   :  { %v665_v0 = vadd.f32 %v664_v62, %v594_v60 }
 0x167   :  { %v666_v3 = vpop.f32.mrf.mxu0 }
 0x168   :  { %v681_v4 = vmul.f32 %v674_v61, %v665_v0  ;;  %v667_v5 = vadd.f32 %v666_v3, %v596_v63 }
 0x16a   :  { %v695_v7 = vadd.f32 %v688_v1, %v681_v4  ;;  %v682_v8 = vmul.f32 %v678_v2, %v667_v5 }
 0x16c   :  { %v697_v9 = vmax.f32 %v695_v7, 0.0  ;;  %v696_v10 = vadd.f32 %v692_v6, %v682_v8 }
 0x16e   :  { %699 = vst [vmem:[%s1639_s4] sm:$0xff] %v697_v9  ;;  %v698_v11 = vmax.f32 %v696_v10, 0.0 }
 0x170   :  { %700 = vst [vmem:[%s1639_s4 + $0x8] sm:$0xff] %v698_v11 }

// kernel: feature_generator_resnet_forward.27
= control target key start
LH: loop header
LB: loop body
LE: loop exit
PB: predicated region body
PF: predicated region fallthrough
CT: control target
= control target key end

     0   :  { %v156_v3 = vmov 0.0   ;;  %v123_v34 = vlaneseq  ;;  %s293_s1 = inlined_call_operand.vmem [shape: f32[128,256], index: 1, kind: input, shape index: {}]   ;;  %s294_s0 = inlined_call_operand.vmem [shape: f32[8,128], index: 0, kind: input, shape index: {}]   ;;  %s295_s2 = inlined_call_operand.vmem [shape: f32[1,256], index: 2, kind: input, shape index: {}]   ;;  %s296_s3 = inlined_call_operand.vmem [shape: f32[1,256], index: 3, kind: input, shape index: {}]   ;;  %s297_s4 = inlined_call_operand.vmem [shape: f32[8,256], index: 4, kind: output, shape index: {}]  }
   0x1   :  { %v49_v0 = vld [vmem:[%s293_s1 + $0xf8] sm:$0xff]  ;;  %v48_v1 = vld [vmem:[%s293_s1 + $0xf0] sm:$0xff]  ;;  %v47_v2 = vld [vmem:[%s293_s1 + $0xe8] sm:$0xff]  ;;  %114 = vmatprep.mubr.f32.mxu0 %v156_v3 }
   0x2   :  { %50 = vmatprep.subr.mxu0 %v49_v0  ;;  %v46_v4 = vld [vmem:[%s293_s1 + $0xe0] sm:$0xff]  ;;  %v45_v5 = vld [vmem:[%s293_s1 + $0xd8] sm:$0xff]  ;;  %v44_v6 = vld [vmem:[%s293_s1 + $0xd0] sm:$0xff]  ;;  %v124_v35 = vshrl.u32 %v123_v34, 7 }
   0x3   :  { %51 = vmatpush1.msra.mxu0 %v48_v1  ;;  %v43_v7 = vld [vmem:[%s293_s1 + $0xc8] sm:$0xff]  ;;  %v42_v8 = vld [vmem:[%s293_s1 + $0xc0] sm:$0xff]  ;;  %v41_v9 = vld [vmem:[%s293_s1 + $0xb8] sm:$0xff] }
   0x4   :  { %52 = vmatprep.subr.mxu0 %v47_v2  ;;  %v40_v10 = vld [vmem:[%s293_s1 + $0xb0] sm:$0xff]  ;;  %v39_v11 = vld [vmem:[%s293_s1 + $0xa8] sm:$0xff]  ;;  %v38_v12 = vld [vmem:[%s293_s1 + $0xa0] sm:$0xff]  ;;  %v125_v36 = vsub.s32 0, %v124_v35  ;;  %v129_v38 = vsub.s32 1, %v124_v35 }
   0x5   :  { %53 = vmatpush1.msra.mxu0 %v46_v4  ;;  %v37_v13 = vld [vmem:[%s293_s1 + $0x98] sm:$0xff]  ;;  %v36_v14 = vld [vmem:[%s293_s1 + $0x90] sm:$0xff]  ;;  %v35_v15 = vld [vmem:[%s293_s1 + $0x88] sm:$0xff] }
   0x6   :  { %54 = vmatprep.subr.mxu0 %v45_v5  ;;  %v34_v16 = vld [vmem:[%s293_s1 + $0x80] sm:$0xff]  ;;  %v33_v17 = vld [vmem:[%s293_s1 + $0x78] sm:$0xff]  ;;  %v32_v18 = vld [vmem:[%s293_s1 + $0x70] sm:$0xff] }
   0x7   :  { %55 = vmatpush1.msra.mxu0 %v44_v6  ;;  %v31_v19 = vld [vmem:[%s293_s1 + $0x68] sm:$0xff]  ;;  %v30_v20 = vld [vmem:[%s293_s1 + $0x60] sm:$0xff]  ;;  %v29_v21 = vld [vmem:[%s293_s1 + $0x58] sm:$0xff] }
   0x8   :  { %56 = vmatprep.subr.mxu0 %v43_v7  ;;  %v28_v22 = vld [vmem:[%s293_s1 + $0x50] sm:$0xff]  ;;  %v27_v23 = vld [vmem:[%s293_s1 + $0x48] sm:$0xff]  ;;  %v26_v24 = vld [vmem:[%s293_s1 + $0x40] sm:$0xff] }
   0x9   :  { %57 = vmatpush1.msra.mxu0 %v42_v8  ;;  %v25_v25 = vld [vmem:[%s293_s1 + $0x38] sm:$0xff]  ;;  %v24_v26 = vld [vmem:[%s293_s1 + $0x30] sm:$0xff]  ;;  %v23_v27 = vld [vmem:[%s293_s1 + $0x28] sm:$0xff] }
   0xa   :  { %58 = vmatprep.subr.mxu0 %v41_v9  ;;  %v22_v28 = vld [vmem:[%s293_s1 + $0x20] sm:$0xff]  ;;  %v21_v29 = vld [vmem:[%s293_s1 + $0x18] sm:$0xff]  ;;  %v20_v30 = vld [vmem:[%s293_s1 + $0x10] sm:$0xff] }
   0xb   :  { %59 = vmatpush1.msra.mxu0 %v40_v10  ;;  %v19_v31 = vld [vmem:[%s293_s1 + $0x8] sm:$0xff]  ;;  %v18_v32 = vld [vmem:[%s293_s1] sm:$0xff] }
   0xc   :  { %60 = vmatprep.subr.mxu0 %v39_v11  ;;  %v17_v33 = vld [vmem:[%s294_s0] sm:$0xff] }
   0xd   :  { %61 = vmatpush1.msra.mxu0 %v38_v12  ;;  %v121_v37 = vld [vmem:[%s295_s2] sm:$0x3] }
   0xe   :  { %62 = vmatprep.subr.mxu0 %v37_v13  ;;  %v135_v39 = vld [vmem:[%s296_s3] sm:$0x3]  ;;  %v126_v40 = vrot.slane %v121_v37, %v125_v36  ;;  %v130_v42 = vrot.slane %v121_v37, %v129_v38 }
   0xf   :  { %63 = vmatpush1.msra.mxu0 %v36_v14  ;;  %v140_v41 = vrot.slane %v135_v39, %v125_v36  ;;  %v144_v45 = vrot.slane %v135_v39, %v129_v38 }
  0x10   :  { %64 = vmatprep.subr.mxu0 %v35_v15 }
  0x11   :  { %65 = vmatpush1.msra.mxu0 %v34_v16 }
  0x12   :  { %66 = vmatprep.subr.mxu0 %v33_v17 }
  0x13   :  { %67 = vmatpush1.msra.mxu0 %v32_v18 }
  0x14   :  { %68 = vmatprep.subr.mxu0 %v31_v19 }
  0x15   :  { %69 = vmatpush1.msra.mxu0 %v30_v20 }
  0x16   :  { %70 = vmatprep.subr.mxu0 %v29_v21 }
  0x17   :  { %71 = vmatpush1.msra.mxu0 %v28_v22 }
  0x18   :  { %72 = vmatprep.subr.mxu0 %v27_v23 }
  0x19   :  { %73 = vmatpush1.msra.mxu0 %v26_v24 }
  0x1a   :  { %74 = vmatprep.subr.mxu0 %v25_v25 }
  0x1b   :  { %75 = vmatpush1.msra.mxu0 %v24_v26 }
  0x1c   :  { %76 = vmatprep.subr.mxu0 %v23_v27 }
  0x1d   :  { %77 = vmatpush1.msra.mxu0 %v22_v28 }
  0x1e   :  { %78 = vmatprep.subr.mxu0 %v21_v29 }
  0x1f   :  { %79 = vmatpush1.msra.mxu0 %v20_v30 }
  0x20   :  { %80 = vmatprep.subr.mxu0 %v19_v31 }
  0x21   :  { %81 = vmatpush1.msra.mxu0 %v18_v32 }
  0x22   :  { %115 = vmatmul.mubr.f32.vlgmr.msra.gmra.mxu0 %v17_v33 }
  0xe2   :  { %v116_v43 = vpop.f32.mrf.mxu0 }
  0xe3   :  { %v133_v44 = vmul.f32 %v126_v40, %v116_v43 }
  0xe4   :  { %v118_v46 = vpop.f32.mrf.mxu0 }
  0xe5   :  { %v147_v47 = vadd.f32 %v140_v41, %v133_v44  ;;  %v134_v48 = vmul.f32 %v130_v42, %v118_v46 }
  0xe7   :  { %149 = vst [vmem:[%s297_s4] sm:$0xff] %v147_v47  ;;  %v148_v49 = vadd.f32 %v144_v45, %v134_v48 }
  0xe9   :  { %150 = vst [vmem:[%s297_s4 + $0x8] sm:$0xff] %v148_v49 }

// kernel: feature_generator_resnet_forward.29
= control target key start
LH: loop header
LB: loop body
LE: loop exit
PB: predicated region body
PF: predicated region fallthrough
CT: control target
= control target key end

     0   :  { %s3123_s1 = inlined_call_operand.vmem [shape: f32[2304,256], index: 1, kind: input, shape index: {}]   ;;  %s3124_s0 = inlined_call_operand.vmem [shape: f32[8,2304], index: 0, kind: input, shape index: {}]   ;;  %s3125_s2 = inlined_call_operand.vmem [shape: f32[1,256], index: 2, kind: input, shape index: {}]   ;;  %s3126_s3 = inlined_call_operand.vmem [shape: f32[1,256], index: 3, kind: input, shape index: {}]   ;;  %s3127_s4 = inlined_call_operand.vmem [shape: f32[8,256], index: 4, kind: input, shape index: {}]   ;;  %s3128_s5 = inlined_call_operand.vmem [shape: f32[8,256], index: 5, kind: output, shape index: {}]  }
   0x1   :  { %v69_v0 = vld [vmem:[%s3123_s1 + $0xf8] sm:$0xff]  ;;  %v68_v2 = vld [vmem:[%s3123_s1 + $0xf0] sm:$0xff]  ;;  %v67_v4 = vld [vmem:[%s3123_s1 + $0xe8] sm:$0xff] }
   0x2   :  { %v133_v1 = vld [vmem:[%s3123_s1 + $0x2f8] sm:$0xff]  ;;  %614 = vmatprep.subr.mxu0 %v69_v0  ;;  %v132_v3 = vld [vmem:[%s3123_s1 + $0x2f0] sm:$0xff]  ;;  %v131_v5 = vld [vmem:[%s3123_s1 + $0x2e8] sm:$0xff] }
   0x3   :  { %685 = vmatprep.subr.mxu1 %v133_v1  ;;  %615 = vmatpush1.msra.mxu0 %v68_v2  ;;  %v66_v6 = vld [vmem:[%s3123_s1 + $0xe0] sm:$0xff]  ;;  %v65_v8 = vld [vmem:[%s3123_s1 + $0xd8] sm:$0xff]  ;;  %v64_v10 = vld [vmem:[%s3123_s1 + $0xd0] sm:$0xff] }
   0x4   :  { %686 = vmatpush1.msra.mxu1 %v132_v3  ;;  %v130_v7 = vld [vmem:[%s3123_s1 + $0x2e0] sm:$0xff]  ;;  %616 = vmatprep.subr.mxu0 %v67_v4  ;;  %v129_v9 = vld [vmem:[%s3123_s1 + $0x2d8] sm:$0xff]  ;;  %v128_v11 = vld [vmem:[%s3123_s1 + $0x2d0] sm:$0xff] }
   0x5   :  { %687 = vmatprep.subr.mxu1 %v131_v5  ;;  %617 = vmatpush1.msra.mxu0 %v66_v6  ;;  %v63_v12 = vld [vmem:[%s3123_s1 + $0xc8] sm:$0xff]  ;;  %v62_v14 = vld [vmem:[%s3123_s1 + $0xc0] sm:$0xff]  ;;  %v61_v16 = vld [vmem:[%s3123_s1 + $0xb8] sm:$0xff] }
   0x6   :  { %688 = vmatpush1.msra.mxu1 %v130_v7  ;;  %v127_v13 = vld [vmem:[%s3123_s1 + $0x2c8] sm:$0xff]  ;;  %618 = vmatprep.subr.mxu0 %v65_v8  ;;  %v126_v15 = vld [vmem:[%s3123_s1 + $0x2c0] sm:$0xff]  ;;  %v125_v17 = vld [vmem:[%s3123_s1 + $0x2b8] sm:$0xff] }
   0x7   :  { %689 = vmatprep.subr.mxu1 %v129_v9  ;;  %619 = vmatpush1.msra.mxu0 %v64_v10  ;;  %v60_v18 = vld [vmem:[%s3123_s1 + $0xb0] sm:$0xff]  ;;  %v59_v20 = vld [vmem:[%s3123_s1 + $0xa8] sm:$0xff]  ;;  %v58_v22 = vld [vmem:[%s3123_s1 + $0xa0] sm:$0xff] }
   0x8   :  { %690 = vmatpush1.msra.mxu1 %v128_v11  ;;  %620 = vmatprep.subr.mxu0 %v63_v12  ;;  %v124_v19 = vld [vmem:[%s3123_s1 + $0x2b0] sm:$0xff]  ;;  %v123_v21 = vld [vmem:[%s3123_s1 + $0x2a8] sm:$0xff]  ;;  %v122_v23 = vld [vmem:[%s3123_s1 + $0x2a0] sm:$0xff] }
   0x9   :  { %691 = vmatprep.subr.mxu1 %v127_v13  ;;  %621 = vmatpush1.msra.mxu0 %v62_v14  ;;  %v57_v24 = vld [vmem:[%s3123_s1 + $0x98] sm:$0xff]  ;;  %v56_v26 = vld [vmem:[%s3123_s1 + $0x90] sm:$0xff]  ;;  %v55_v28 = vld [vmem:[%s3123_s1 + $0x88] sm:$0xff] }
   0xa   :  { %692 = vmatpush1.msra.mxu1 %v126_v15  ;;  %622 = vmatprep.subr.mxu0 %v61_v16  ;;  %v121_v25 = vld [vmem:[%s3123_s1 + $0x298] sm:$0xff]  ;;  %v120_v27 = vld [vmem:[%s3123_s1 + $0x290] sm:$0xff]  ;;  %v119_v29 = vld [vmem:[%s3123_s1 + $0x288] sm:$0xff] }
   0xb   :  { %693 = vmatprep.subr.mxu1 %v125_v17  ;;  %623 = vmatpush1.msra.mxu0 %v60_v18  ;;  %v54_v30 = vld [vmem:[%s3123_s1 + $0x80] sm:$0xff]  ;;  %v53_v32 = vld [vmem:[%s3123_s1 + $0x78] sm:$0xff]  ;;  %v52_v34 = vld [vmem:[%s3123_s1 + $0x70] sm:$0xff] }
   0xc   :  { %694 = vmatpush1.msra.mxu1 %v124_v19  ;;  %624 = vmatprep.subr.mxu0 %v59_v20  ;;  %v118_v31 = vld [vmem:[%s3123_s1 + $0x280] sm:$0xff]  ;;  %v117_v33 = vld [vmem:[%s3123_s1 + $0x278] sm:$0xff]  ;;  %v116_v35 = vld [vmem:[%s3123_s1 + $0x270] sm:$0xff] }
   0xd   :  { %695 = vmatprep.subr.mxu1 %v123_v21  ;;  %625 = vmatpush1.msra.mxu0 %v58_v22  ;;  %v51_v36 = vld [vmem:[%s3123_s1 + $0x68] sm:$0xff]  ;;  %v50_v38 = vld [vmem:[%s3123_s1 + $0x60] sm:$0xff]  ;;  %v49_v40 = vld [vmem:[%s3123_s1 + $0x58] sm:$0xff] }
   0xe   :  { %696 = vmatpush1.msra.mxu1 %v122_v23  ;;  %626 = vmatprep.subr.mxu0 %v57_v24  ;;  %v115_v37 = vld [vmem:[%s3123_s1 + $0x268] sm:$0xff]  ;;  %v114_v39 = vld [vmem:[%s3123_s1 + $0x260] sm:$0xff]  ;;  %v113_v41 = vld [vmem:[%s3123_s1 + $0x258] sm:$0xff] }
   0xf   :  { %697 = vmatprep.subr.mxu1 %v121_v25  ;;  %627 = vmatpush1.msra.mxu0 %v56_v26  ;;  %v48_v42 = vld [vmem:[%s3123_s1 + $0x50] sm:$0xff]  ;;  %v47_v44 = vld [vmem:[%s3123_s1 + $0x48] sm:$0xff]  ;;  %v46_v46 = vld [vmem:[%s3123_s1 + $0x40] sm:$0xff] }
  0x10   :  { %698 = vmatpush1.msra.mxu1 %v120_v27  ;;  %628 = vmatprep.subr.mxu0 %v55_v28  ;;  %v112_v43 = vld [vmem:[%s3123_s1 + $0x250] sm:$0xff]  ;;  %v111_v45 = vld [vmem:[%s3123_s1 + $0x248] sm:$0xff]  ;;  %v110_v47 = vld [vmem:[%s3123_s1 + $0x240] sm:$0xff] }
  0x11   :  { %699 = vmatprep.subr.mxu1 %v119_v29  ;;  %629 = vmatpush1.msra.mxu0 %v54_v30  ;;  %v45_v48 = vld [vmem:[%s3123_s1 + $0x38] sm:$0xff]  ;;  %v44_v50 = vld [vmem:[%s3123_s1 + $0x30] sm:$0xff]  ;;  %v43_v52 = vld [vmem:[%s3123_s1 + $0x28] sm:$0xff] }
  0x12   :  { %700 = vmatpush1.msra.mxu1 %v118_v31  ;;  %630 = vmatprep.subr.mxu0 %v53_v32  ;;  %v109_v49 = vld [vmem:[%s3123_s1 + $0x238] sm:$0xff]  ;;  %v108_v51 = vld [vmem:[%s3123_s1 + $0x230] sm:$0xff]  ;;  %v107_v53 = vld [vmem:[%s3123_s1 + $0x228] sm:$0xff] }
  0x13   :  { %701 = vmatprep.subr.mxu1 %v117_v33  ;;  %631 = vmatpush1.msra.mxu0 %v52_v34  ;;  %v42_v54 = vld [vmem:[%s3123_s1 + $0x20] sm:$0xff]  ;;  %v41_v56 = vld [vmem:[%s3123_s1 + $0x18] sm:$0xff]  ;;  %v40_v58 = vld [vmem:[%s3123_s1 + $0x10] sm:$0xff] }
  0x14   :  { %702 = vmatpush1.msra.mxu1 %v116_v35  ;;  %632 = vmatprep.subr.mxu0 %v51_v36  ;;  %v106_v55 = vld [vmem:[%s3123_s1 + $0x220] sm:$0xff]  ;;  %v105_v57 = vld [vmem:[%s3123_s1 + $0x218] sm:$0xff]  ;;  %v104_v59 = vld [vmem:[%s3123_s1 + $0x210] sm:$0xff] }
  0x15   :  { %703 = vmatprep.subr.mxu1 %v115_v37  ;;  %633 = vmatpush1.msra.mxu0 %v50_v38  ;;  %v39_v60 = vld [vmem:[%s3123_s1 + $0x8] sm:$0xff]  ;;  %v38_v62 = vld [vmem:[%s3123_s1] sm:$0xff]  ;;  %v101_v0 = vld [vmem:[%s3123_s1 + $0x1f8] sm:$0xff] }
  0x16   :  { %704 = vmatpush1.msra.mxu1 %v114_v39  ;;  %634 = vmatprep.subr.mxu0 %v49_v40  ;;  %v103_v61 = vld [vmem:[%s3123_s1 + $0x208] sm:$0xff]  ;;  %v102_v63 = vld [vmem:[%s3123_s1 + $0x200] sm:$0xff]  ;;  %v165_v1 = vld [vmem:[%s3123_s1 + $0x3f8] sm:$0xff] }
  0x17   :  { %705 = vmatprep.subr.mxu1 %v113_v41  ;;  %635 = vmatpush1.msra.mxu0 %v48_v42  ;;  %v100_v2 = vld [vmem:[%s3123_s1 + $0x1f0] sm:$0xff]  ;;  %v99_v4 = vld [vmem:[%s3123_s1 + $0x1e8] sm:$0xff]  ;;  %v98_v6 = vld [vmem:[%s3123_s1 + $0x1e0] sm:$0xff] }
  0x18   :  { %706 = vmatpush1.msra.mxu1 %v112_v43  ;;  %636 = vmatprep.subr.mxu0 %v47_v44  ;;  %v164_v3 = vld [vmem:[%s3123_s1 + $0x3f0] sm:$0xff]  ;;  %v163_v5 = vld [vmem:[%s3123_s1 + $0x3e8] sm:$0xff]  ;;  %v162_v7 = vld [vmem:[%s3123_s1 + $0x3e0] sm:$0xff] }
  0x19   :  { %707 = vmatprep.subr.mxu1 %v111_v45  ;;  %637 = vmatpush1.msra.mxu0 %v46_v46  ;;  %v97_v8 = vld [vmem:[%s3123_s1 + $0x1d8] sm:$0xff]  ;;  %v96_v10 = vld [vmem:[%s3123_s1 + $0x1d0] sm:$0xff]  ;;  %v95_v12 = vld [vmem:[%s3123_s1 + $0x1c8] sm:$0xff] }
  0x1a   :  { %708 = vmatpush1.msra.mxu1 %v110_v47  ;;  %638 = vmatprep.subr.mxu0 %v45_v48  ;;  %v161_v9 = vld [vmem:[%s3123_s1 + $0x3d8] sm:$0xff]  ;;  %v160_v11 = vld [vmem:[%s3123_s1 + $0x3d0] sm:$0xff]  ;;  %v159_v13 = vld [vmem:[%s3123_s1 + $0x3c8] sm:$0xff] }
  0x1b   :  { %709 = vmatprep.subr.mxu1 %v109_v49  ;;  %639 = vmatpush1.msra.mxu0 %v44_v50  ;;  %v94_v14 = vld [vmem:[%s3123_s1 + $0x1c0] sm:$0xff]  ;;  %v93_v16 = vld [vmem:[%s3123_s1 + $0x1b8] sm:$0xff]  ;;  %v92_v18 = vld [vmem:[%s3123_s1 + $0x1b0] sm:$0xff] }
  0x1c   :  { %710 = vmatpush1.msra.mxu1 %v108_v51  ;;  %640 = vmatprep.subr.mxu0 %v43_v52  ;;  %v158_v15 = vld [vmem:[%s3123_s1 + $0x3c0] sm:$0xff]  ;;  %v157_v17 = vld [vmem:[%s3123_s1 + $0x3b8] sm:$0xff]  ;;  %v156_v19 = vld [vmem:[%s3123_s1 + $0x3b0] sm:$0xff] }
  0x1d   :  { %711 = vmatprep.subr.mxu1 %v107_v53  ;;  %641 = vmatpush1.msra.mxu0 %v42_v54  ;;  %v91_v20 = vld [vmem:[%s3123_s1 + $0x1a8] sm:$0xff]  ;;  %v90_v22 = vld [vmem:[%s3123_s1 + $0x1a0] sm:$0xff]  ;;  %v89_v24 = vld [vmem:[%s3123_s1 + $0x198] sm:$0xff] }
  0x1e   :  { %712 = vmatpush1.msra.mxu1 %v106_v55  ;;  %642 = vmatprep.subr.mxu0 %v41_v56  ;;  %v155_v21 = vld [vmem:[%s3123_s1 + $0x3a8] sm:$0xff]  ;;  %v154_v23 = vld [vmem:[%s3123_s1 + $0x3a0] sm:$0xff]  ;;  %v153_v25 = vld [vmem:[%s3123_s1 + $0x398] sm:$0xff] }
  0x1f   :  { %713 = vmatprep.subr.mxu1 %v105_v57  ;;  %643 = vmatpush1.msra.mxu0 %v40_v58  ;;  %v88_v26 = vld [vmem:[%s3123_s1 + $0x190] sm:$0xff]  ;;  %v87_v28 = vld [vmem:[%s3123_s1 + $0x188] sm:$0xff]  ;;  %v86_v30 = vld [vmem:[%s3123_s1 + $0x180] sm:$0xff] }
  0x20   :  { %714 = vmatpush1.msra.mxu1 %v104_v59  ;;  %644 = vmatprep.subr.mxu0 %v39_v60  ;;  %v152_v27 = vld [vmem:[%s3123_s1 + $0x390] sm:$0xff]  ;;  %v151_v29 = vld [vmem:[%s3123_s1 + $0x388] sm:$0xff]  ;;  %v150_v31 = vld [vmem:[%s3123_s1 + $0x380] sm:$0xff] }
  0x21   :  { %715 = vmatprep.subr.mxu1 %v103_v61  ;;  %645 = vmatpush1.msra.mxu0 %v38_v62  ;;  %v85_v32 = vld [vmem:[%s3123_s1 + $0x178] sm:$0xff]  ;;  %v84_v34 = vld [vmem:[%s3123_s1 + $0x170] sm:$0xff]  ;;  %v83_v36 = vld [vmem:[%s3123_s1 + $0x168] sm:$0xff] }
  0x22   :  { %716 = vmatpush1.msra.mxu1 %v102_v63  ;;  %646 = vmatprep.subr.mxu0 %v101_v0  ;;  %v149_v33 = vld [vmem:[%s3123_s1 + $0x378] sm:$0xff]  ;;  %v148_v35 = vld [vmem:[%s3123_s1 + $0x370] sm:$0xff]  ;;  %v147_v37 = vld [vmem:[%s3123_s1 + $0x368] sm:$0xff] }
  0x23   :  { %717 = vmatprep.subr.mxu1 %v165_v1  ;;  %647 = vmatpush2.msra.mxu0 %v100_v2  ;;  %v82_v38 = vld [vmem:[%s3123_s1 + $0x160] sm:$0xff]  ;;  %v81_v40 = vld [vmem:[%s3123_s1 + $0x158] sm:$0xff]  ;;  %v80_v42 = vld [vmem:[%s3123_s1 + $0x150] sm:$0xff] }
  0x24   :  { %718 = vmatpush2.msra.mxu1 %v164_v3  ;;  %648 = vmatprep.subr.mxu0 %v99_v4  ;;  %v146_v39 = vld [vmem:[%s3123_s1 + $0x360] sm:$0xff]  ;;  %v145_v41 = vld [vmem:[%s3123_s1 + $0x358] sm:$0xff]  ;;  %v144_v43 = vld [vmem:[%s3123_s1 + $0x350] sm:$0xff] }
  0x25   :  { %719 = vmatprep.subr.mxu1 %v163_v5  ;;  %649 = vmatpush2.msra.mxu0 %v98_v6  ;;  %v79_v44 = vld [vmem:[%s3123_s1 + $0x148] sm:$0xff]  ;;  %v78_v46 = vld [vmem:[%s3123_s1 + $0x140] sm:$0xff]  ;;  %v77_v48 = vld [vmem:[%s3123_s1 + $0x138] sm:$0xff] }
  0x26   :  { %720 = vmatpush2.msra.mxu1 %v162_v7  ;;  %650 = vmatprep.subr.mxu0 %v97_v8  ;;  %v143_v45 = vld [vmem:[%s3123_s1 + $0x348] sm:$0xff]  ;;  %v142_v47 = vld [vmem:[%s3123_s1 + $0x340] sm:$0xff]  ;;  %v141_v49 = vld [vmem:[%s3123_s1 + $0x338] sm:$0xff] }
  0x27   :  { %721 = vmatprep.subr.mxu1 %v161_v9  ;;  %651 = vmatpush2.msra.mxu0 %v96_v10  ;;  %v76_v50 = vld [vmem:[%s3123_s1 + $0x130] sm:$0xff]  ;;  %v75_v52 = vld [vmem:[%s3123_s1 + $0x128] sm:$0xff]  ;;  %v74_v54 = vld [vmem:[%s3123_s1 + $0x120] sm:$0xff] }
  0x28   :  { %722 = vmatpush2.msra.mxu1 %v160_v11  ;;  %652 = vmatprep.subr.mxu0 %v95_v12  ;;  %v140_v51 = vld [vmem:[%s3123_s1 + $0x330] sm:$0xff]  ;;  %v139_v53 = vld [vmem:[%s3123_s1 + $0x328] sm:$0xff]  ;;  %v138_v55 = vld [vmem:[%s3123_s1 + $0x320] sm:$0xff] }
  0x29   :  { %723 = vmatprep.subr.mxu1 %v159_v13  ;;  %653 = vmatpush2.msra.mxu0 %v94_v14  ;;  %v73_v56 = vld [vmem:[%s3123_s1 + $0x118] sm:$0xff]  ;;  %v72_v58 = vld [vmem:[%s3123_s1 + $0x110] sm:$0xff]  ;;  %v71_v60 = vld [vmem:[%s3123_s1 + $0x108] sm:$0xff] }
  0x2a   :  { %724 = vmatpush2.msra.mxu1 %v158_v15  ;;  %654 = vmatprep.subr.mxu0 %v93_v16  ;;  %v137_v57 = vld [vmem:[%s3123_s1 + $0x318] sm:$0xff]  ;;  %v136_v59 = vld [vmem:[%s3123_s1 + $0x310] sm:$0xff]  ;;  %v135_v61 = vld [vmem:[%s3123_s1 + $0x308] sm:$0xff] }
  0x2b   :  { %725 = vmatprep.subr.mxu1 %v157_v17  ;;  %655 = vmatpush2.msra.mxu0 %v92_v18  ;;  %v70_v62 = vld [vmem:[%s3123_s1 + $0x100] sm:$0xff]  ;;  %v21_v63 = vld [vmem:[%s3124_s0 + $0x8] sm:$0xff]  ;;  %v23_v1 = vld [vmem:[%s3124_s0 + $0x18] sm:$0xff] }
  0x2c   :  { %726 = vmatpush2.msra.mxu1 %v156_v19  ;;  %656 = vmatprep.subr.mxu0 %v91_v20  ;;  %v134_v0 = vld [vmem:[%s3123_s1 + $0x300] sm:$0xff]  ;;  %v22_v3 = vld [vmem:[%s3124_s0 + $0x10] sm:$0xff]  ;;  %v197_v4 = vld [vmem:[%s3123_s1 + $0x4f8] sm:$0xff] }
  0x2d   :  { %727 = vmatprep.subr.mxu1 %v155_v21  ;;  %657 = vmatpush2.msra.mxu0 %v90_v22  ;;  %v20_v2 = vld [vmem:[%s3124_s0] sm:$0xff]  ;;  %v261_v5 = vld [vmem:[%s3123_s1 + $0x6f8] sm:$0xff]  ;;  %v196_v6 = vld [vmem:[%s3123_s1 + $0x4f0] sm:$0xff] }
  0x2e   :  { %728 = vmatpush2.msra.mxu1 %v154_v23  ;;  %658 = vmatprep.subr.mxu0 %v89_v24  ;;  %v260_v7 = vld [vmem:[%s3123_s1 + $0x6f0] sm:$0xff]  ;;  %v195_v8 = vld [vmem:[%s3123_s1 + $0x4e8] sm:$0xff]  ;;  %v194_v10 = vld [vmem:[%s3123_s1 + $0x4e0] sm:$0xff] }
  0x2f   :  { %729 = vmatprep.subr.mxu1 %v153_v25  ;;  %659 = vmatpush2.msra.mxu0 %v88_v26  ;;  %v259_v9 = vld [vmem:[%s3123_s1 + $0x6e8] sm:$0xff]  ;;  %v258_v11 = vld [vmem:[%s3123_s1 + $0x6e0] sm:$0xff]  ;;  %v193_v12 = vld [vmem:[%s3123_s1 + $0x4d8] sm:$0xff] }
  0x30   :  { %730 = vmatpush2.msra.mxu1 %v152_v27  ;;  %660 = vmatprep.subr.mxu0 %v87_v28  ;;  %v257_v13 = vld [vmem:[%s3123_s1 + $0x6d8] sm:$0xff]  ;;  %v192_v14 = vld [vmem:[%s3123_s1 + $0x4d0] sm:$0xff]  ;;  %v191_v16 = vld [vmem:[%s3123_s1 + $0x4c8] sm:$0xff] }
  0x31   :  { %731 = vmatprep.subr.mxu1 %v151_v29  ;;  %661 = vmatpush2.msra.mxu0 %v86_v30  ;;  %v256_v15 = vld [vmem:[%s3123_s1 + $0x6d0] sm:$0xff]  ;;  %v255_v17 = vld [vmem:[%s3123_s1 + $0x6c8] sm:$0xff]  ;;  %v190_v18 = vld [vmem:[%s3123_s1 + $0x4c0] sm:$0xff] }
  0x32   :  { %732 = vmatpush2.msra.mxu1 %v150_v31  ;;  %662 = vmatprep.subr.mxu0 %v85_v32  ;;  %v254_v19 = vld [vmem:[%s3123_s1 + $0x6c0] sm:$0xff]  ;;  %v189_v20 = vld [vmem:[%s3123_s1 + $0x4b8] sm:$0xff]  ;;  %v188_v22 = vld [vmem:[%s3123_s1 + $0x4b0] sm:$0xff] }
  0x33   :  { %733 = vmatprep.subr.mxu1 %v149_v33  ;;  %663 = vmatpush2.msra.mxu0 %v84_v34  ;;  %v253_v21 = vld [vmem:[%s3123_s1 + $0x6b8] sm:$0xff]  ;;  %v252_v23 = vld [vmem:[%s3123_s1 + $0x6b0] sm:$0xff]  ;;  %v187_v24 = vld [vmem:[%s3123_s1 + $0x4a8] sm:$0xff] }
  0x34   :  { %734 = vmatpush2.msra.mxu1 %v148_v35  ;;  %664 = vmatprep.subr.mxu0 %v83_v36  ;;  %v251_v25 = vld [vmem:[%s3123_s1 + $0x6a8] sm:$0xff]  ;;  %v186_v26 = vld [vmem:[%s3123_s1 + $0x4a0] sm:$0xff]  ;;  %v185_v28 = vld [vmem:[%s3123_s1 + $0x498] sm:$0xff] }
  0x35   :  { %735 = vmatprep.subr.mxu1 %v147_v37  ;;  %665 = vmatpush2.msra.mxu0 %v82_v38  ;;  %v250_v27 = vld [vmem:[%s3123_s1 + $0x6a0] sm:$0xff]  ;;  %v249_v29 = vld [vmem:[%s3123_s1 + $0x698] sm:$0xff]  ;;  %v184_v30 = vld [vmem:[%s3123_s1 + $0x490] sm:$0xff] }
  0x36   :  { %736 = vmatpush2.msra.mxu1 %v146_v39  ;;  %666 = vmatprep.subr.mxu0 %v81_v40  ;;  %v248_v31 = vld [vmem:[%s3123_s1 + $0x690] sm:$0xff]  ;;  %v183_v32 = vld [vmem:[%s3123_s1 + $0x488] sm:$0xff]  ;;  %v182_v34 = vld [vmem:[%s3123_s1 + $0x480] sm:$0xff] }
  0x37   :  { %737 = vmatprep.subr.mxu1 %v145_v41  ;;  %667 = vmatpush2.msra.mxu0 %v80_v42  ;;  %v247_v33 = vld [vmem:[%s3123_s1 + $0x688] sm:$0xff]  ;;  %v246_v35 = vld [vmem:[%s3123_s1 + $0x680] sm:$0xff]  ;;  %v181_v36 = vld [vmem:[%s3123_s1 + $0x478] sm:$0xff] }
  0x38   :  { %738 = vmatpush2.msra.mxu1 %v144_v43  ;;  %668 = vmatprep.subr.mxu0 %v79_v44  ;;  %v245_v37 = vld [vmem:[%s3123_s1 + $0x678] sm:$0xff]  ;;  %v180_v38 = vld [vmem:[%s3123_s1 + $0x470] sm:$0xff]  ;;  %v179_v40 = vld [vmem:[%s3123_s1 + $0x468] sm:$0xff] }
  0x39   :  { %739 = vmatprep.subr.mxu1 %v143_v45  ;;  %669 = vmatpush2.msra.mxu0 %v78_v46  ;;  %v244_v39 = vld [vmem:[%s3123_s1 + $0x670] sm:$0xff]  ;;  %v243_v41 = vld [vmem:[%s3123_s1 + $0x668] sm:$0xff]  ;;  %v178_v42 = vld [vmem:[%s3123_s1 + $0x460] sm:$0xff] }
  0x3a   :  { %740 = vmatpush2.msra.mxu1 %v142_v47  ;;  %670 = vmatprep.subr.mxu0 %v77_v48  ;;  %v242_v43 = vld [vmem:[%s3123_s1 + $0x660] sm:$0xff]  ;;  %v177_v44 = vld [vmem:[%s3123_s1 + $0x458] sm:$0xff]  ;;  %v176_v46 = vld [vmem:[%s3123_s1 + $0x450] sm:$0xff] }
  0x3b   :  { %741 = vmatprep.subr.mxu1 %v141_v49  ;;  %671 = vmatpush2.msra.mxu0 %v76_v50  ;;  %v241_v45 = vld [vmem:[%s3123_s1 + $0x658] sm:$0xff]  ;;  %v240_v47 = vld [vmem:[%s3123_s1 + $0x650] sm:$0xff]  ;;  %v175_v48 = vld [vmem:[%s3123_s1 + $0x448] sm:$0xff] }
  0x3c   :  { %742 = vmatpush2.msra.mxu1 %v140_v51  ;;  %672 = vmatprep.subr.mxu0 %v75_v52  ;;  %v239_v49 = vld [vmem:[%s3123_s1 + $0x648] sm:$0xff]  ;;  %v174_v50 = vld [vmem:[%s3123_s1 + $0x440] sm:$0xff]  ;;  %v173_v52 = vld [vmem:[%s3123_s1 + $0x438] sm:$0xff] }
  0x3d   :  { %743 = vmatprep.subr.mxu1 %v139_v53  ;;  %673 = vmatpush2.msra.mxu0 %v74_v54  ;;  %v238_v51 = vld [vmem:[%s3123_s1 + $0x640] sm:$0xff]  ;;  %v237_v53 = vld [vmem:[%s3123_s1 + $0x638] sm:$0xff]  ;;  %v172_v54 = vld [vmem:[%s3123_s1 + $0x430] sm:$0xff] }
  0x3e   :  { %744 = vmatpush2.msra.mxu1 %v138_v55  ;;  %674 = vmatprep.subr.mxu0 %v73_v56  ;;  %v236_v55 = vld [vmem:[%s3123_s1 + $0x630] sm:$0xff]  ;;  %v171_v56 = vld [vmem:[%s3123_s1 + $0x428] sm:$0xff] }
  0x3f   :  { %745 = vmatprep.subr.mxu1 %v137_v57  ;;  %675 = vmatpush2.msra.mxu0 %v72_v58  ;;  %v235_v57 = vld [vmem:[%s3123_s1 + $0x628] sm:$0xff]  ;;  %v170_v58 = vld [vmem:[%s3123_s1 + $0x420] sm:$0xff] }
  0x40   :  { %746 = vmatpush2.msra.mxu1 %v136_v59  ;;  %676 = vmatprep.subr.mxu0 %v71_v60  ;;  %v234_v59 = vld [vmem:[%s3123_s1 + $0x620] sm:$0xff]  ;;  %v169_v60 = vld [vmem:[%s3123_s1 + $0x418] sm:$0xff] }
  0x41   :  { %747 = vmatprep.subr.mxu1 %v135_v61  ;;  %677 = vmatpush2.msra.mxu0 %v70_v62  ;;  %v233_v61 = vld [vmem:[%s3123_s1 + $0x618] sm:$0xff]  ;;  %v168_v62 = vld [vmem:[%s3123_s1 + $0x410] sm:$0xff] }
  0x42   :  { %678 = vmatprep.mubr.f32.mxu0 %v21_v63  ;;  %748 = vmatpush2.msra.mxu1 %v134_v0  ;;  %v232_v63 = vld [vmem:[%s3123_s1 + $0x610] sm:$0xff]  ;;  %v167_v0 = vld [vmem:[%s3123_s1 + $0x408] sm:$0xff] }
  0x43   :  { %749 = vmatprep.mubr.f32.mxu1 %v23_v1  ;;  %679 = vmatmul.mubr.f32.vlgmr.msra.gmra.mxu0 %v20_v2  ;;  %v231_v1 = vld [vmem:[%s3123_s1 + $0x608] sm:$0xff]  ;;  %v166_v2 = vld [vmem:[%s3123_s1 + $0x400] sm:$0xff] }
  0x44   :  { %750 = vmatmul.mubr.f32.vlgmr.msra.gmra.mxu1 %v22_v3  ;;  %756 = vmatprep.subr.mxu0 %v197_v4  ;;  %v230_v3 = vld [vmem:[%s3123_s1 + $0x600] sm:$0xff]  ;;  %v229_v4 = vld [vmem:[%s3123_s1 + $0x5f8] sm:$0xff] }
  0x45   :  { %827 = vmatprep.subr.mxu1 %v261_v5  ;;  %757 = vmatpush1.msra.mxu0 %v196_v6  ;;  %v293_v5 = vld [vmem:[%s3123_s1 + $0x7f8] sm:$0xff]  ;;  %v228_v6 = vld [vmem:[%s3123_s1 + $0x5f0] sm:$0xff] }
  0x46   :  { %828 = vmatpush1.msra.mxu1 %v260_v7  ;;  %758 = vmatprep.subr.mxu0 %v195_v8  ;;  %v292_v7 = vld [vmem:[%s3123_s1 + $0x7f0] sm:$0xff]  ;;  %v227_v8 = vld [vmem:[%s3123_s1 + $0x5e8] sm:$0xff] }
  0x47   :  { %829 = vmatprep.subr.mxu1 %v259_v9  ;;  %759 = vmatpush1.msra.mxu0 %v194_v10  ;;  %v291_v9 = vld [vmem:[%s3123_s1 + $0x7e8] sm:$0xff]  ;;  %v226_v10 = vld [vmem:[%s3123_s1 + $0x5e0] sm:$0xff] }
  0x48   :  { %830 = vmatpush1.msra.mxu1 %v258_v11  ;;  %760 = vmatprep.subr.mxu0 %v193_v12  ;;  %v290_v11 = vld [vmem:[%s3123_s1 + $0x7e0] sm:$0xff]  ;;  %v225_v12 = vld [vmem:[%s3123_s1 + $0x5d8] sm:$0xff] }
  0x49   :  { %831 = vmatprep.subr.mxu1 %v257_v13  ;;  %761 = vmatpush1.msra.mxu0 %v192_v14  ;;  %v289_v13 = vld [vmem:[%s3123_s1 + $0x7d8] sm:$0xff]  ;;  %v224_v14 = vld [vmem:[%s3123_s1 + $0x5d0] sm:$0xff] }
  0x4a   :  { %832 = vmatpush1.msra.mxu1 %v256_v15  ;;  %762 = vmatprep.subr.mxu0 %v191_v16  ;;  %v288_v15 = vld [vmem:[%s3123_s1 + $0x7d0] sm:$0xff]  ;;  %v223_v16 = vld [vmem:[%s3123_s1 + $0x5c8] sm:$0xff] }
  0x4b   :  { %833 = vmatprep.subr.mxu1 %v255_v17  ;;  %763 = vmatpush1.msra.mxu0 %v190_v18  ;;  %v287_v17 = vld [vmem:[%s3123_s1 + $0x7c8] sm:$0xff]  ;;  %v222_v18 = vld [vmem:[%s3123_s1 + $0x5c0] sm:$0xff] }
  0x4c   :  { %834 = vmatpush1.msra.mxu1 %v254_v19  ;;  %764 = vmatprep.subr.mxu0 %v189_v20  ;;  %v286_v19 = vld [vmem:[%s3123_s1 + $0x7c0] sm:$0xff]  ;;  %v221_v20 = vld [vmem:[%s3123_s1 + $0x5b8] sm:$0xff] }
  0x4d   :  { %835 = vmatprep.subr.mxu1 %v253_v21  ;;  %765 = vmatpush1.msra.mxu0 %v188_v22  ;;  %v285_v21 = vld [vmem:[%s3123_s1 + $0x7b8] sm:$0xff]  ;;  %v220_v22 = vld [vmem:[%s3123_s1 + $0x5b0] sm:$0xff] }
  0x4e   :  { %836 = vmatpush1.msra.mxu1 %v252_v23  ;;  %766 = vmatprep.subr.mxu0 %v187_v24  ;;  %v284_v23 = vld [vmem:[%s3123_s1 + $0x7b0] sm:$0xff]  ;;  %v219_v24 = vld [vmem:[%s3123_s1 + $0x5a8] sm:$0xff] }
  0x4f   :  { %837 = vmatprep.subr.mxu1 %v251_v25  ;;  %767 = vmatpush1.msra.mxu0 %v186_v26  ;;  %v283_v25 = vld [vmem:[%s3123_s1 + $0x7a8] sm:$0xff]  ;;  %v218_v26 = vld [vmem:[%s3123_s1 + $0x5a0] sm:$0xff] }
  0x50   :  { %838 = vmatpush1.msra.mxu1 %v250_v27  ;;  %768 = vmatprep.subr.mxu0 %v185_v28  ;;  %v282_v27 = vld [vmem:[%s3123_s1 + $0x7a0] sm:$0xff]  ;;  %v217_v28 = vld [vmem:[%s3123_s1 + $0x598] sm:$0xff] }
  0x51   :  { %839 = vmatprep.subr.mxu1 %v249_v29  ;;  %769 = vmatpush1.msra.mxu0 %v184_v30  ;;  %v281_v29 = vld [vmem:[%s3123_s1 + $0x798] sm:$0xff]  ;;  %v216_v30 = vld [vmem:[%s3123_s1 + $0x590] sm:$0xff] }
  0x52   :  { %840 = vmatpush1.msra.mxu1 %v248_v31  ;;  %770 = vmatprep.subr.mxu0 %v183_v32  ;;  %v280_v31 = vld [vmem:[%s3123_s1 + $0x790] sm:$0xff]  ;;  %v215_v32 = vld [vmem:[%s3123_s1 + $0x588] sm:$0xff] }
  0x53   :  { %841 = vmatprep.subr.mxu1 %v247_v33  ;;  %771 = vmatpush1.msra.mxu0 %v182_v34  ;;  %v279_v33 = vld [vmem:[%s3123_s1 + $0x788] sm:$0xff]  ;;  %v214_v34 = vld [vmem:[%s3123_s1 + $0x580] sm:$0xff] }
  0x54   :  { %842 = vmatpush1.msra.mxu1 %v246_v35  ;;  %772 = vmatprep.subr.mxu0 %v181_v36  ;;  %v278_v35 = vld [vmem:[%s3123_s1 + $0x780] sm:$0xff]  ;;  %v213_v36 = vld [vmem:[%s3123_s1 + $0x578] sm:$0xff] }
  0x55   :  { %843 = vmatprep.subr.mxu1 %v245_v37  ;;  %773 = vmatpush1.msra.mxu0 %v180_v38  ;;  %v277_v37 = vld [vmem:[%s3123_s1 + $0x778] sm:$0xff]  ;;  %v212_v38 = vld [vmem:[%s3123_s1 + $0x570] sm:$0xff] }
  0x56   :  { %844 = vmatpush1.msra.mxu1 %v244_v39  ;;  %774 = vmatprep.subr.mxu0 %v179_v40  ;;  %v276_v39 = vld [vmem:[%s3123_s1 + $0x770] sm:$0xff]  ;;  %v211_v40 = vld [vmem:[%s3123_s1 + $0x568] sm:$0xff] }
  0x57   :  { %845 = vmatprep.subr.mxu1 %v243_v41  ;;  %775 = vmatpush1.msra.mxu0 %v178_v42  ;;  %v275_v41 = vld [vmem:[%s3123_s1 + $0x768] sm:$0xff]  ;;  %v210_v42 = vld [vmem:[%s3123_s1 + $0x560] sm:$0xff] }
  0x58   :  { %846 = vmatpush1.msra.mxu1 %v242_v43  ;;  %776 = vmatprep.subr.mxu0 %v177_v44  ;;  %v274_v43 = vld [vmem:[%s3123_s1 + $0x760] sm:$0xff]  ;;  %v209_v44 = vld [vmem:[%s3123_s1 + $0x558] sm:$0xff] }
  0x59   :  { %847 = vmatprep.subr.mxu1 %v241_v45  ;;  %777 = vmatpush1.msra.mxu0 %v176_v46  ;;  %v273_v45 = vld [vmem:[%s3123_s1 + $0x758] sm:$0xff]  ;;  %v208_v46 = vld [vmem:[%s3123_s1 + $0x550] sm:$0xff] }
  0x5a   :  { %848 = vmatpush1.msra.mxu1 %v240_v47  ;;  %778 = vmatprep.subr.mxu0 %v175_v48  ;;  %v272_v47 = vld [vmem:[%s3123_s1 + $0x750] sm:$0xff]  ;;  %v207_v48 = vld [vmem:[%s3123_s1 + $0x548] sm:$0xff] }
  0x5b   :  { %849 = vmatprep.subr.mxu1 %v239_v49  ;;  %779 = vmatpush1.msra.mxu0 %v174_v50  ;;  %v271_v49 = vld [vmem:[%s3123_s1 + $0x748] sm:$0xff]  ;;  %v206_v50 = vld [vmem:[%s3123_s1 + $0x540] sm:$0xff] }
  0x5c   :  { %850 = vmatpush1.msra.mxu1 %v238_v51  ;;  %780 = vmatprep.subr.mxu0 %v173_v52  ;;  %v270_v51 = vld [vmem:[%s3123_s1 + $0x740] sm:$0xff]  ;;  %v205_v52 = vld [vmem:[%s3123_s1 + $0x538] sm:$0xff] }
  0x5d   :  { %851 = vmatprep.subr.mxu1 %v237_v53  ;;  %781 = vmatpush1.msra.mxu0 %v172_v54  ;;  %v269_v53 = vld [vmem:[%s3123_s1 + $0x738] sm:$0xff]  ;;  %v204_v54 = vld [vmem:[%s3123_s1 + $0x530] sm:$0xff] }
  0x5e   :  { %852 = vmatpush1.msra.mxu1 %v236_v55  ;;  %782 = vmatprep.subr.mxu0 %v171_v56  ;;  %v268_v55 = vld [vmem:[%s3123_s1 + $0x730] sm:$0xff]  ;;  %v203_v56 = vld [vmem:[%s3123_s1 + $0x528] sm:$0xff] }
  0x5f   :  { %853 = vmatprep.subr.mxu1 %v235_v57  ;;  %783 = vmatpush1.msra.mxu0 %v170_v58  ;;  %v267_v57 = vld [vmem:[%s3123_s1 + $0x728] sm:$0xff]  ;;  %v202_v58 = vld [vmem:[%s3123_s1 + $0x520] sm:$0xff] }
  0x60   :  { %854 = vmatpush1.msra.mxu1 %v234_v59  ;;  %784 = vmatprep.subr.mxu0 %v169_v60  ;;  %v266_v59 = vld [vmem:[%s3123_s1 + $0x720] sm:$0xff]  ;;  %v201_v60 = vld [vmem:[%s3123_s1 + $0x518] sm:$0xff] }
  0x61   :  { %855 = vmatprep.subr.mxu1 %v233_v61  ;;  %785 = vmatpush1.msra.mxu0 %v168_v62  ;;  %v265_v61 = vld [vmem:[%s3123_s1 + $0x718] sm:$0xff]  ;;  %v200_v62 = vld [vmem:[%s3123_s1 + $0x510] sm:$0xff] }
  0x62   :  { %856 = vmatpush1.msra.mxu1 %v232_v63  ;;  %786 = vmatprep.subr.mxu0 %v167_v0  ;;  %v25_v63 = vld [vmem:[%s3124_s0 + $0x28] sm:$0xff] }
  0x63   :  { %857 = vmatprep.subr.mxu1 %v231_v1  ;;  %787 = vmatpush1.msra.mxu0 %v166_v2  ;;  %v199_v0 = vld [vmem:[%s3123_s1 + $0x508] sm:$0xff]  ;;  %v264_v1 = vld [vmem:[%s3123_s1 + $0x710] sm:$0xff]  ;;  %v198_v2 = vld [vmem:[%s3123_s1 + $0x500] sm:$0xff] }
  0x64   :  { %858 = vmatpush1.msra.mxu1 %v230_v3  ;;  %788 = vmatprep.subr.mxu0 %v229_v4  ;;  %v263_v3 = vld [vmem:[%s3123_s1 + $0x708] sm:$0xff]  ;;  %v24_v4 = vld [vmem:[%s3124_s0 + $0x20] sm:$0xff] }
  0x65   :  { %859 = vmatprep.subr.mxu1 %v293_v5  ;;  %789 = vmatpush2.msra.mxu0 %v228_v6  ;;  %v325_v5 = vld [vmem:[%s3123_s1 + $0x8f8] sm:$0xff]  ;;  %v262_v6 = vld [vmem:[%s3123_s1 + $0x700] sm:$0xff] }
  0x66   :  { %860 = vmatpush2.msra.mxu1 %v292_v7  ;;  %790 = vmatprep.subr.mxu0 %v227_v8  ;;  %v27_v7 = vld [vmem:[%s3124_s0 + $0x38] sm:$0xff]  ;;  %v324_v8 = vld [vmem:[%s3123_s1 + $0x8f0] sm:$0xff] }
  0x67   :  { %861 = vmatprep.subr.mxu1 %v291_v9  ;;  %791 = vmatpush2.msra.mxu0 %v226_v10  ;;  %v26_v9 = vld [vmem:[%s3124_s0 + $0x30] sm:$0xff]  ;;  %v323_v10 = vld [vmem:[%s3123_s1 + $0x8e8] sm:$0xff] }
  0x68   :  { %862 = vmatpush2.msra.mxu1 %v290_v11  ;;  %792 = vmatprep.subr.mxu0 %v225_v12  ;;  %v389_v11 = vld [vmem:[%s3123_s1 + $0xaf8] sm:$0xff]  ;;  %v322_v12 = vld [vmem:[%s3123_s1 + $0x8e0] sm:$0xff] }
  0x69   :  { %863 = vmatprep.subr.mxu1 %v289_v13  ;;  %793 = vmatpush2.msra.mxu0 %v224_v14  ;;  %v388_v13 = vld [vmem:[%s3123_s1 + $0xaf0] sm:$0xff]  ;;  %v321_v14 = vld [vmem:[%s3123_s1 + $0x8d8] sm:$0xff] }
  0x6a   :  { %864 = vmatpush2.msra.mxu1 %v288_v15  ;;  %794 = vmatprep.subr.mxu0 %v223_v16  ;;  %v387_v15 = vld [vmem:[%s3123_s1 + $0xae8] sm:$0xff]  ;;  %v320_v16 = vld [vmem:[%s3123_s1 + $0x8d0] sm:$0xff] }
  0x6b   :  { %865 = vmatprep.subr.mxu1 %v287_v17  ;;  %795 = vmatpush2.msra.mxu0 %v222_v18  ;;  %v386_v17 = vld [vmem:[%s3123_s1 + $0xae0] sm:$0xff]  ;;  %v319_v18 = vld [vmem:[%s3123_s1 + $0x8c8] sm:$0xff] }
  0x6c   :  { %866 = vmatpush2.msra.mxu1 %v286_v19  ;;  %796 = vmatprep.subr.mxu0 %v221_v20  ;;  %v385_v19 = vld [vmem:[%s3123_s1 + $0xad8] sm:$0xff]  ;;  %v318_v20 = vld [vmem:[%s3123_s1 + $0x8c0] sm:$0xff] }
  0x6d   :  { %867 = vmatprep.subr.mxu1 %v285_v21  ;;  %797 = vmatpush2.msra.mxu0 %v220_v22  ;;  %v384_v21 = vld [vmem:[%s3123_s1 + $0xad0] sm:$0xff]  ;;  %v317_v22 = vld [vmem:[%s3123_s1 + $0x8b8] sm:$0xff] }
  0x6e   :  { %868 = vmatpush2.msra.mxu1 %v284_v23  ;;  %798 = vmatprep.subr.mxu0 %v219_v24  ;;  %v383_v23 = vld [vmem:[%s3123_s1 + $0xac8] sm:$0xff]  ;;  %v316_v24 = vld [vmem:[%s3123_s1 + $0x8b0] sm:$0xff] }
  0x6f   :  { %869 = vmatprep.subr.mxu1 %v283_v25  ;;  %799 = vmatpush2.msra.mxu0 %v218_v26  ;;  %v382_v25 = vld [vmem:[%s3123_s1 + $0xac0] sm:$0xff]  ;;  %v315_v26 = vld [vmem:[%s3123_s1 + $0x8a8] sm:$0xff] }
  0x70   :  { %870 = vmatpush2.msra.mxu1 %v282_v27  ;;  %800 = vmatprep.subr.mxu0 %v217_v28  ;;  %v381_v27 = vld [vmem:[%s3123_s1 + $0xab8] sm:$0xff]  ;;  %v314_v28 = vld [vmem:[%s3123_s1 + $0x8a0] sm:$0xff] }
  0x71   :  { %871 = vmatprep.subr.mxu1 %v281_v29  ;;  %801 = vmatpush2.msra.mxu0 %v216_v30  ;;  %v380_v29 = vld [vmem:[%s3123_s1 + $0xab0] sm:$0xff]  ;;  %v313_v30 = vld [vmem:[%s3123_s1 + $0x898] sm:$0xff] }
  0x72   :  { %872 = vmatpush2.msra.mxu1 %v280_v31  ;;  %802 = vmatprep.subr.mxu0 %v215_v32  ;;  %v379_v31 = vld [vmem:[%s3123_s1 + $0xaa8] sm:$0xff]  ;;  %v312_v32 = vld [vmem:[%s3123_s1 + $0x890] sm:$0xff] }
  0x73   :  { %873 = vmatprep.subr.mxu1 %v279_v33  ;;  %803 = vmatpush2.msra.mxu0 %v214_v34  ;;  %v378_v33 = vld [vmem:[%s3123_s1 + $0xaa0] sm:$0xff]  ;;  %v311_v34 = vld [vmem:[%s3123_s1 + $0x888] sm:$0xff] }
  0x74   :  { %874 = vmatpush2.msra.mxu1 %v278_v35  ;;  %804 = vmatprep.subr.mxu0 %v213_v36  ;;  %v377_v35 = vld [vmem:[%s3123_s1 + $0xa98] sm:$0xff]  ;;  %v310_v36 = vld [vmem:[%s3123_s1 + $0x880] sm:$0xff] }
  0x75   :  { %875 = vmatprep.subr.mxu1 %v277_v37  ;;  %805 = vmatpush2.msra.mxu0 %v212_v38  ;;  %v376_v37 = vld [vmem:[%s3123_s1 + $0xa90] sm:$0xff]  ;;  %v309_v38 = vld [vmem:[%s3123_s1 + $0x878] sm:$0xff] }
  0x76   :  { %876 = vmatpush2.msra.mxu1 %v276_v39  ;;  %806 = vmatprep.subr.mxu0 %v211_v40  ;;  %v375_v39 = vld [vmem:[%s3123_s1 + $0xa88] sm:$0xff]  ;;  %v308_v40 = vld [vmem:[%s3123_s1 + $0x870] sm:$0xff] }
  0x77   :  { %877 = vmatprep.subr.mxu1 %v275_v41  ;;  %807 = vmatpush2.msra.mxu0 %v210_v42  ;;  %v374_v41 = vld [vmem:[%s3123_s1 + $0xa80] sm:$0xff]  ;;  %v307_v42 = vld [vmem:[%s3123_s1 + $0x868] sm:$0xff] }
  0x78   :  { %878 = vmatpush2.msra.mxu1 %v274_v43  ;;  %808 = vmatprep.subr.mxu0 %v209_v44  ;;  %v373_v43 = vld [vmem:[%s3123_s1 + $0xa78] sm:$0xff]  ;;  %v306_v44 = vld [vmem:[%s3123_s1 + $0x860] sm:$0xff] }
  0x79   :  { %879 = vmatprep.subr.mxu1 %v273_v45  ;;  %809 = vmatpush2.msra.mxu0 %v208_v46  ;;  %v372_v45 = vld [vmem:[%s3123_s1 + $0xa70] sm:$0xff]  ;;  %v305_v46 = vld [vmem:[%s3123_s1 + $0x858] sm:$0xff] }
  0x7a   :  { %880 = vmatpush2.msra.mxu1 %v272_v47  ;;  %810 = vmatprep.subr.mxu0 %v207_v48  ;;  %v371_v47 = vld [vmem:[%s3123_s1 + $0xa68] sm:$0xff]  ;;  %v304_v48 = vld [vmem:[%s3123_s1 + $0x850] sm:$0xff] }
  0x7b   :  { %881 = vmatprep.subr.mxu1 %v271_v49  ;;  %811 = vmatpush2.msra.mxu0 %v206_v50  ;;  %v370_v49 = vld [vmem:[%s3123_s1 + $0xa60] sm:$0xff]  ;;  %v303_v50 = vld [vmem:[%s3123_s1 + $0x848] sm:$0xff] }
  0x7c   :  { %882 = vmatpush2.msra.mxu1 %v270_v51  ;;  %812 = vmatprep.subr.mxu0 %v205_v52  ;;  %v369_v51 = vld [vmem:[%s3123_s1 + $0xa58] sm:$0xff]  ;;  %v302_v52 = vld [vmem:[%s3123_s1 + $0x840] sm:$0xff] }
  0x7d   :  { %883 = vmatprep.subr.mxu1 %v269_v53  ;;  %813 = vmatpush2.msra.mxu0 %v204_v54  ;;  %v368_v53 = vld [vmem:[%s3123_s1 + $0xa50] sm:$0xff]  ;;  %v301_v54 = vld [vmem:[%s3123_s1 + $0x838] sm:$0xff] }
  0x7e   :  { %884 = vmatpush2.msra.mxu1 %v268_v55  ;;  %814 = vmatprep.subr.mxu0 %v203_v56  ;;  %v367_v55 = vld [vmem:[%s3123_s1 + $0xa48] sm:$0xff]  ;;  %v300_v56 = vld [vmem:[%s3123_s1 + $0x830] sm:$0xff] }
  0x7f   :  { %885 = vmatprep.subr.mxu1 %v267_v57  ;;  %815 = vmatpush2.msra.mxu0 %v202_v58  ;;  %v366_v57 = vld [vmem:[%s3123_s1 + $0xa40] sm:$0xff]  ;;  %v299_v58 = vld [vmem:[%s3123_s1 + $0x828] sm:$0xff] }
  0x80   :  { %886 = vmatpush2.msra.mxu1 %v266_v59  ;;  %816 = vmatprep.subr.mxu0 %v201_v60  ;;  %v365_v59 = vld [vmem:[%s3123_s1 + $0xa38] sm:$0xff]  ;;  %v298_v60 = vld [vmem:[%s3123_s1 + $0x820] sm:$0xff] }
  0x81   :  { %887 = vmatprep.subr.mxu1 %v265_v61  ;;  %817 = vmatpush2.msra.mxu0 %v200_v62  ;;  %v364_v61 = vld [vmem:[%s3123_s1 + $0xa30] sm:$0xff]  ;;  %v297_v62 = vld [vmem:[%s3123_s1 + $0x818] sm:$0xff] }
  0x82   :  { %820 = vmatprep.mubr.f32.mxu0 %v25_v63  ;;  %818 = vmatprep.subr.mxu0 %v199_v0  ;;  %v363_v63 = vld [vmem:[%s3123_s1 + $0xa28] sm:$0xff]  ;;  %v296_v0 = vld [vmem:[%s3123_s1 + $0x810] sm:$0xff] }
  0x83   :  { %888 = vmatpush2.msra.mxu1 %v264_v1  ;;  %819 = vmatpush2.msra.mxu0 %v198_v2  ;;  %v362_v1 = vld [vmem:[%s3123_s1 + $0xa20] sm:$0xff]  ;;  %v295_v2 = vld [vmem:[%s3123_s1 + $0x808] sm:$0xff] }
  0x84   :  { %889 = vmatprep.subr.mxu1 %v263_v3  ;;  %821 = vmatmul.mubr.f32.vlgmr.msra.gmra.mxu0 %v24_v4  ;;  %v361_v3 = vld [vmem:[%s3123_s1 + $0xa18] sm:$0xff]  ;;  %v294_v4 = vld [vmem:[%s3123_s1 + $0x800] sm:$0xff] }
  0x85   :  { %898 = vmatprep.subr.mxu0 %v325_v5  ;;  %890 = vmatpush2.msra.mxu1 %v262_v6  ;;  %v360_v5 = vld [vmem:[%s3123_s1 + $0xa10] sm:$0xff]  ;;  %v357_v6 = vld [vmem:[%s3123_s1 + $0x9f8] sm:$0xff] }
  0x86   :  { %891 = vmatprep.mubr.f32.mxu1 %v27_v7  ;;  %899 = vmatpush1.msra.mxu0 %v324_v8  ;;  %v359_v7 = vld [vmem:[%s3123_s1 + $0xa08] sm:$0xff]  ;;  %v356_v8 = vld [vmem:[%s3123_s1 + $0x9f0] sm:$0xff] }
  0x87   :  { %892 = vmatmul.mubr.f32.vlgmr.msra.gmra.mxu1 %v26_v9  ;;  %900 = vmatprep.subr.mxu0 %v323_v10  ;;  %v358_v9 = vld [vmem:[%s3123_s1 + $0xa00] sm:$0xff]  ;;  %v355_v10 = vld [vmem:[%s3123_s1 + $0x9e8] sm:$0xff] }
  0x88   :  { %969 = vmatprep.subr.mxu1 %v389_v11  ;;  %901 = vmatpush1.msra.mxu0 %v322_v12  ;;  %v421_v11 = vld [vmem:[%s3123_s1 + $0xbf8] sm:$0xff]  ;;  %v354_v12 = vld [vmem:[%s3123_s1 + $0x9e0] sm:$0xff] }
  0x89   :  { %970 = vmatpush1.msra.mxu1 %v388_v13  ;;  %902 = vmatprep.subr.mxu0 %v321_v14  ;;  %v420_v13 = vld [vmem:[%s3123_s1 + $0xbf0] sm:$0xff]  ;;  %v353_v14 = vld [vmem:[%s3123_s1 + $0x9d8] sm:$0xff] }
  0x8a   :  { %971 = vmatprep.subr.mxu1 %v387_v15  ;;  %903 = vmatpush1.msra.mxu0 %v320_v16  ;;  %v419_v15 = vld [vmem:[%s3123_s1 + $0xbe8] sm:$0xff]  ;;  %v352_v16 = vld [vmem:[%s3123_s1 + $0x9d0] sm:$0xff] }
  0x8b   :  { %972 = vmatpush1.msra.mxu1 %v386_v17  ;;  %904 = vmatprep.subr.mxu0 %v319_v18  ;;  %v418_v17 = vld [vmem:[%s3123_s1 + $0xbe0] sm:$0xff]  ;;  %v351_v18 = vld [vmem:[%s3123_s1 + $0x9c8] sm:$0xff] }
  0x8c   :  { %973 = vmatprep.subr.mxu1 %v385_v19  ;;  %905 = vmatpush1.msra.mxu0 %v318_v20  ;;  %v417_v19 = vld [vmem:[%s3123_s1 + $0xbd8] sm:$0xff]  ;;  %v350_v20 = vld [vmem:[%s3123_s1 + $0x9c0] sm:$0xff] }
  0x8d   :  { %974 = vmatpush1.msra.mxu1 %v384_v21  ;;  %906 = vmatprep.subr.mxu0 %v317_v22  ;;  %v416_v21 = vld [vmem:[%s3123_s1 + $0xbd0] sm:$0xff]  ;;  %v349_v22 = vld [vmem:[%s3123_s1 + $0x9b8] sm:$0xff] }
  0x8e   :  { %975 = vmatprep.subr.mxu1 %v383_v23  ;;  %907 = vmatpush1.msra.mxu0 %v316_v24  ;;  %v415_v23 = vld [vmem:[%s3123_s1 + $0xbc8] sm:$0xff]  ;;  %v348_v24 = vld [vmem:[%s3123_s1 + $0x9b0] sm:$0xff] }
  0x8f   :  { %976 = vmatpush1.msra.mxu1 %v382_v25  ;;  %908 = vmatprep.subr.mxu0 %v315_v26  ;;  %v414_v25 = vld [vmem:[%s3123_s1 + $0xbc0] sm:$0xff]  ;;  %v347_v26 = vld [vmem:[%s3123_s1 + $0x9a8] sm:$0xff] }
  0x90   :  { %977 = vmatprep.subr.mxu1 %v381_v27  ;;  %909 = vmatpush1.msra.mxu0 %v314_v28  ;;  %v413_v27 = vld [vmem:[%s3123_s1 + $0xbb8] sm:$0xff]  ;;  %v346_v28 = vld [vmem:[%s3123_s1 + $0x9a0] sm:$0xff] }
  0x91   :  { %978 = vmatpush1.msra.mxu1 %v380_v29  ;;  %910 = vmatprep.subr.mxu0 %v313_v30  ;;  %v412_v29 = vld [vmem:[%s3123_s1 + $0xbb0] sm:$0xff]  ;;  %v345_v30 = vld [vmem:[%s3123_s1 + $0x998] sm:$0xff] }
  0x92   :  { %979 = vmatprep.subr.mxu1 %v379_v31  ;;  %911 = vmatpush1.msra.mxu0 %v312_v32  ;;  %v411_v31 = vld [vmem:[%s3123_s1 + $0xba8] sm:$0xff]  ;;  %v344_v32 = vld [vmem:[%s3123_s1 + $0x990] sm:$0xff] }
  0x93   :  { %980 = vmatpush1.msra.mxu1 %v378_v33  ;;  %912 = vmatprep.subr.mxu0 %v311_v34  ;;  %v410_v33 = vld [vmem:[%s3123_s1 + $0xba0] sm:$0xff]  ;;  %v343_v34 = vld [vmem:[%s3123_s1 + $0x988] sm:$0xff] }
  0x94   :  { %981 = vmatprep.subr.mxu1 %v377_v35  ;;  %913 = vmatpush1.msra.mxu0 %v310_v36  ;;  %v409_v35 = vld [vmem:[%s3123_s1 + $0xb98] sm:$0xff]  ;;  %v342_v36 = vld [vmem:[%s3123_s1 + $0x980] sm:$0xff] }
  0x95   :  { %982 = vmatpush1.msra.mxu1 %v376_v37  ;;  %914 = vmatprep.subr.mxu0 %v309_v38  ;;  %v408_v37 = vld [vmem:[%s3123_s1 + $0xb90] sm:$0xff]  ;;  %v341_v38 = vld [vmem:[%s3123_s1 + $0x978] sm:$0xff] }
  0x96   :  { %983 = vmatprep.subr.mxu1 %v375_v39  ;;  %915 = vmatpush1.msra.mxu0 %v308_v40  ;;  %v407_v39 = vld [vmem:[%s3123_s1 + $0xb88] sm:$0xff]  ;;  %v340_v40 = vld [vmem:[%s3123_s1 + $0x970] sm:$0xff] }
  0x97   :  { %984 = vmatpush1.msra.mxu1 %v374_v41  ;;  %916 = vmatprep.subr.mxu0 %v307_v42  ;;  %v406_v41 = vld [vmem:[%s3123_s1 + $0xb80] sm:$0xff]  ;;  %v339_v42 = vld [vmem:[%s3123_s1 + $0x968] sm:$0xff] }
  0x98   :  { %985 = vmatprep.subr.mxu1 %v373_v43  ;;  %917 = vmatpush1.msra.mxu0 %v306_v44  ;;  %v405_v43 = vld [vmem:[%s3123_s1 + $0xb78] sm:$0xff]  ;;  %v338_v44 = vld [vmem:[%s3123_s1 + $0x960] sm:$0xff] }
  0x99   :  { %986 = vmatpush1.msra.mxu1 %v372_v45  ;;  %918 = vmatprep.subr.mxu0 %v305_v46  ;;  %v404_v45 = vld [vmem:[%s3123_s1 + $0xb70] sm:$0xff]  ;;  %v337_v46 = vld [vmem:[%s3123_s1 + $0x958] sm:$0xff] }
  0x9a   :  { %987 = vmatprep.subr.mxu1 %v371_v47  ;;  %919 = vmatpush1.msra.mxu0 %v304_v48  ;;  %v403_v47 = vld [vmem:[%s3123_s1 + $0xb68] sm:$0xff]  ;;  %v336_v48 = vld [vmem:[%s3123_s1 + $0x950] sm:$0xff] }
  0x9b   :  { %988 = vmatpush1.msra.mxu1 %v370_v49  ;;  %920 = vmatprep.subr.mxu0 %v303_v50  ;;  %v402_v49 = vld [vmem:[%s3123_s1 + $0xb60] sm:$0xff]  ;;  %v335_v50 = vld [vmem:[%s3123_s1 + $0x948] sm:$0xff] }
  0x9c   :  { %989 = vmatprep.subr.mxu1 %v369_v51  ;;  %921 = vmatpush1.msra.mxu0 %v302_v52  ;;  %v401_v51 = vld [vmem:[%s3123_s1 + $0xb58] sm:$0xff]  ;;  %v334_v52 = vld [vmem:[%s3123_s1 + $0x940] sm:$0xff] }
  0x9d   :  { %990 = vmatpush1.msra.mxu1 %v368_v53  ;;  %922 = vmatprep.subr.mxu0 %v301_v54  ;;  %v400_v53 = vld [vmem:[%s3123_s1 + $0xb50] sm:$0xff]  ;;  %v333_v54 = vld [vmem:[%s3123_s1 + $0x938] sm:$0xff] }
  0x9e   :  { %991 = vmatprep.subr.mxu1 %v367_v55  ;;  %923 = vmatpush1.msra.mxu0 %v300_v56  ;;  %v399_v55 = vld [vmem:[%s3123_s1 + $0xb48] sm:$0xff]  ;;  %v332_v56 = vld [vmem:[%s3123_s1 + $0x930] sm:$0xff] }
  0x9f   :  { %992 = vmatpush1.msra.mxu1 %v366_v57  ;;  %924 = vmatprep.subr.mxu0 %v299_v58  ;;  %v398_v57 = vld [vmem:[%s3123_s1 + $0xb40] sm:$0xff]  ;;  %v331_v58 = vld [vmem:[%s3123_s1 + $0x928] sm:$0xff] }
  0xa0   :  { %993 = vmatprep.subr.mxu1 %v365_v59  ;;  %925 = vmatpush1.msra.mxu0 %v298_v60  ;;  %v397_v59 = vld [vmem:[%s3123_s1 + $0xb38] sm:$0xff]  ;;  %v330_v60 = vld [vmem:[%s3123_s1 + $0x920] sm:$0xff] }
  0xa1   :  { %994 = vmatpush1.msra.mxu1 %v364_v61  ;;  %926 = vmatprep.subr.mxu0 %v297_v62  ;;  %v396_v61 = vld [vmem:[%s3123_s1 + $0xb30] sm:$0xff]  ;;  %v329_v62 = vld [vmem:[%s3123_s1 + $0x918] sm:$0xff] }
  0xa2   :  { %995 = vmatprep.subr.mxu1 %v363_v63  ;;  %927 = vmatpush1.msra.mxu0 %v296_v0  ;;  %v395_v63 = vld [vmem:[%s3123_s1 + $0xb28] sm:$0xff]  ;;  %v328_v0 = vld [vmem:[%s3123_s1 + $0x910] sm:$0xff] }
  0xa3   :  { %996 = vmatpush1.msra.mxu1 %v362_v1  ;;  %928 = vmatprep.subr.mxu0 %v295_v2  ;;  %v394_v1 = vld [vmem:[%s3123_s1 + $0xb20] sm:$0xff]  ;;  %v327_v2 = vld [vmem:[%s3123_s1 + $0x908] sm:$0xff] }
  0xa4   :  { %997 = vmatprep.subr.mxu1 %v361_v3  ;;  %929 = vmatpush1.msra.mxu0 %v294_v4  ;;  %v393_v3 = vld [vmem:[%s3123_s1 + $0xb18] sm:$0xff]  ;;  %v326_v4 = vld [vmem:[%s3123_s1 + $0x900] sm:$0xff] }
  0xa5   :  { %998 = vmatpush1.msra.mxu1 %v360_v5  ;;  %930 = vmatprep.subr.mxu0 %v357_v6  ;;  %v29_v5 = vld [vmem:[%s3124_s0 + $0x48] sm:$0xff]  ;;  %v392_v6 = vld [vmem:[%s3123_s1 + $0xb10] sm:$0xff] }
  0xa6   :  { %999 = vmatprep.subr.mxu1 %v359_v7  ;;  %931 = vmatpush2.msra.mxu0 %v356_v8  ;;  %v28_v7 = vld [vmem:[%s3124_s0 + $0x40] sm:$0xff]  ;;  %v391_v8 = vld [vmem:[%s3123_s1 + $0xb08] sm:$0xff] }
  0xa7   :  { %1000 = vmatpush1.msra.mxu1 %v358_v9  ;;  %932 = vmatprep.subr.mxu0 %v355_v10  ;;  %v453_v9 = vld [vmem:[%s3123_s1 + $0xcf8] sm:$0xff]  ;;  %v390_v10 = vld [vmem:[%s3123_s1 + $0xb00] sm:$0xff] }
  0xa8   :  { %1001 = vmatprep.subr.mxu1 %v421_v11  ;;  %933 = vmatpush2.msra.mxu0 %v354_v12  ;;  %v31_v11 = vld [vmem:[%s3124_s0 + $0x58] sm:$0xff]  ;;  %v452_v12 = vld [vmem:[%s3123_s1 + $0xcf0] sm:$0xff] }
  0xa9   :  { %1002 = vmatpush2.msra.mxu1 %v420_v13  ;;  %934 = vmatprep.subr.mxu0 %v353_v14  ;;  %v30_v13 = vld [vmem:[%s3124_s0 + $0x50] sm:$0xff]  ;;  %v451_v14 = vld [vmem:[%s3123_s1 + $0xce8] sm:$0xff] }
  0xaa   :  { %1003 = vmatprep.subr.mxu1 %v419_v15  ;;  %935 = vmatpush2.msra.mxu0 %v352_v16  ;;  %v517_v15 = vld [vmem:[%s3123_s1 + $0xef8] sm:$0xff]  ;;  %v450_v16 = vld [vmem:[%s3123_s1 + $0xce0] sm:$0xff] }
  0xab   :  { %1004 = vmatpush2.msra.mxu1 %v418_v17  ;;  %936 = vmatprep.subr.mxu0 %v351_v18  ;;  %v516_v17 = vld [vmem:[%s3123_s1 + $0xef0] sm:$0xff]  ;;  %v449_v18 = vld [vmem:[%s3123_s1 + $0xcd8] sm:$0xff] }
  0xac   :  { %1005 = vmatprep.subr.mxu1 %v417_v19  ;;  %937 = vmatpush2.msra.mxu0 %v350_v20  ;;  %v515_v19 = vld [vmem:[%s3123_s1 + $0xee8] sm:$0xff]  ;;  %v448_v20 = vld [vmem:[%s3123_s1 + $0xcd0] sm:$0xff] }
  0xad   :  { %1006 = vmatpush2.msra.mxu1 %v416_v21  ;;  %938 = vmatprep.subr.mxu0 %v349_v22  ;;  %v514_v21 = vld [vmem:[%s3123_s1 + $0xee0] sm:$0xff]  ;;  %v447_v22 = vld [vmem:[%s3123_s1 + $0xcc8] sm:$0xff] }
  0xae   :  { %1007 = vmatprep.subr.mxu1 %v415_v23  ;;  %939 = vmatpush2.msra.mxu0 %v348_v24  ;;  %v513_v23 = vld [vmem:[%s3123_s1 + $0xed8] sm:$0xff]  ;;  %v446_v24 = vld [vmem:[%s3123_s1 + $0xcc0] sm:$0xff] }
  0xaf   :  { %1008 = vmatpush2.msra.mxu1 %v414_v25  ;;  %940 = vmatprep.subr.mxu0 %v347_v26  ;;  %v512_v25 = vld [vmem:[%s3123_s1 + $0xed0] sm:$0xff]  ;;  %v445_v26 = vld [vmem:[%s3123_s1 + $0xcb8] sm:$0xff] }
  0xb0   :  { %1009 = vmatprep.subr.mxu1 %v413_v27  ;;  %941 = vmatpush2.msra.mxu0 %v346_v28  ;;  %v511_v27 = vld [vmem:[%s3123_s1 + $0xec8] sm:$0xff]  ;;  %v444_v28 = vld [vmem:[%s3123_s1 + $0xcb0] sm:$0xff] }
  0xb1   :  { %1010 = vmatpush2.msra.mxu1 %v412_v29  ;;  %942 = vmatprep.subr.mxu0 %v345_v30  ;;  %v510_v29 = vld [vmem:[%s3123_s1 + $0xec0] sm:$0xff]  ;;  %v443_v30 = vld [vmem:[%s3123_s1 + $0xca8] sm:$0xff] }
  0xb2   :  { %1011 = vmatprep.subr.mxu1 %v411_v31  ;;  %943 = vmatpush2.msra.mxu0 %v344_v32  ;;  %v509_v31 = vld [vmem:[%s3123_s1 + $0xeb8] sm:$0xff]  ;;  %v442_v32 = vld [vmem:[%s3123_s1 + $0xca0] sm:$0xff] }
  0xb3   :  { %1012 = vmatpush2.msra.mxu1 %v410_v33  ;;  %944 = vmatprep.subr.mxu0 %v343_v34  ;;  %v508_v33 = vld [vmem:[%s3123_s1 + $0xeb0] sm:$0xff]  ;;  %v441_v34 = vld [vmem:[%s3123_s1 + $0xc98] sm:$0xff] }
  0xb4   :  { %1013 = vmatprep.subr.mxu1 %v409_v35  ;;  %945 = vmatpush2.msra.mxu0 %v342_v36  ;;  %v507_v35 = vld [vmem:[%s3123_s1 + $0xea8] sm:$0xff]  ;;  %v440_v36 = vld [vmem:[%s3123_s1 + $0xc90] sm:$0xff] }
  0xb5   :  { %1014 = vmatpush2.msra.mxu1 %v408_v37  ;;  %946 = vmatprep.subr.mxu0 %v341_v38  ;;  %v506_v37 = vld [vmem:[%s3123_s1 + $0xea0] sm:$0xff]  ;;  %v439_v38 = vld [vmem:[%s3123_s1 + $0xc88] sm:$0xff] }
  0xb6   :  { %1015 = vmatprep.subr.mxu1 %v407_v39  ;;  %947 = vmatpush2.msra.mxu0 %v340_v40  ;;  %v505_v39 = vld [vmem:[%s3123_s1 + $0xe98] sm:$0xff]  ;;  %v438_v40 = vld [vmem:[%s3123_s1 + $0xc80] sm:$0xff] }
  0xb7   :  { %1016 = vmatpush2.msra.mxu1 %v406_v41  ;;  %948 = vmatprep.subr.mxu0 %v339_v42  ;;  %v504_v41 = vld [vmem:[%s3123_s1 + $0xe90] sm:$0xff]  ;;  %v437_v42 = vld [vmem:[%s3123_s1 + $0xc78] sm:$0xff] }
  0xb8   :  { %1017 = vmatprep.subr.mxu1 %v405_v43  ;;  %949 = vmatpush2.msra.mxu0 %v338_v44  ;;  %v503_v43 = vld [vmem:[%s3123_s1 + $0xe88] sm:$0xff]  ;;  %v436_v44 = vld [vmem:[%s3123_s1 + $0xc70] sm:$0xff] }
  0xb9   :  { %1018 = vmatpush2.msra.mxu1 %v404_v45  ;;  %950 = vmatprep.subr.mxu0 %v337_v46  ;;  %v502_v45 = vld [vmem:[%s3123_s1 + $0xe80] sm:$0xff]  ;;  %v435_v46 = vld [vmem:[%s3123_s1 + $0xc68] sm:$0xff] }
  0xba   :  { %1019 = vmatprep.subr.mxu1 %v403_v47  ;;  %951 = vmatpush2.msra.mxu0 %v336_v48  ;;  %v501_v47 = vld [vmem:[%s3123_s1 + $0xe78] sm:$0xff]  ;;  %v434_v48 = vld [vmem:[%s3123_s1 + $0xc60] sm:$0xff] }
  0xbb   :  { %1020 = vmatpush2.msra.mxu1 %v402_v49  ;;  %952 = vmatprep.subr.mxu0 %v335_v50  ;;  %v500_v49 = vld [vmem:[%s3123_s1 + $0xe70] sm:$0xff]  ;;  %v433_v50 = vld [vmem:[%s3123_s1 + $0xc58] sm:$0xff] }
  0xbc   :  { %1021 = vmatprep.subr.mxu1 %v401_v51  ;;  %953 = vmatpush2.msra.mxu0 %v334_v52  ;;  %v499_v51 = vld [vmem:[%s3123_s1 + $0xe68] sm:$0xff]  ;;  %v432_v52 = vld [vmem:[%s3123_s1 + $0xc50] sm:$0xff] }
  0xbd   :  { %1022 = vmatpush2.msra.mxu1 %v400_v53  ;;  %954 = vmatprep.subr.mxu0 %v333_v54  ;;  %v498_v53 = vld [vmem:[%s3123_s1 + $0xe60] sm:$0xff]  ;;  %v431_v54 = vld [vmem:[%s3123_s1 + $0xc48] sm:$0xff] }
  0xbe   :  { %1023 = vmatprep.subr.mxu1 %v399_v55  ;;  %955 = vmatpush2.msra.mxu0 %v332_v56  ;;  %v497_v55 = vld [vmem:[%s3123_s1 + $0xe58] sm:$0xff]  ;;  %v430_v56 = vld [vmem:[%s3123_s1 + $0xc40] sm:$0xff] }
  0xbf   :  { %1024 = vmatpush2.msra.mxu1 %v398_v57  ;;  %956 = vmatprep.subr.mxu0 %v331_v58  ;;  %v496_v57 = vld [vmem:[%s3123_s1 + $0xe50] sm:$0xff]  ;;  %v429_v58 = vld [vmem:[%s3123_s1 + $0xc38] sm:$0xff] }
  0xc0   :  { %1025 = vmatprep.subr.mxu1 %v397_v59  ;;  %957 = vmatpush2.msra.mxu0 %v330_v60  ;;  %v495_v59 = vld [vmem:[%s3123_s1 + $0xe48] sm:$0xff]  ;;  %v428_v60 = vld [vmem:[%s3123_s1 + $0xc30] sm:$0xff] }
  0xc1   :  { %1026 = vmatpush2.msra.mxu1 %v396_v61  ;;  %958 = vmatprep.subr.mxu0 %v329_v62  ;;  %v494_v61 = vld [vmem:[%s3123_s1 + $0xe40] sm:$0xff]  ;;  %v427_v62 = vld [vmem:[%s3123_s1 + $0xc28] sm:$0xff] }
  0xc2   :  { %1027 = vmatprep.subr.mxu1 %v395_v63  ;;  %959 = vmatpush2.msra.mxu0 %v328_v0  ;;  %v493_v63 = vld [vmem:[%s3123_s1 + $0xe38] sm:$0xff]  ;;  %v426_v0 = vld [vmem:[%s3123_s1 + $0xc20] sm:$0xff] }
  0xc3   :  { %1028 = vmatpush2.msra.mxu1 %v394_v1  ;;  %960 = vmatprep.subr.mxu0 %v327_v2  ;;  %v492_v1 = vld [vmem:[%s3123_s1 + $0xe30] sm:$0xff]  ;;  %v425_v2 = vld [vmem:[%s3123_s1 + $0xc18] sm:$0xff] }
  0xc4   :  { %1029 = vmatprep.subr.mxu1 %v393_v3  ;;  %961 = vmatpush2.msra.mxu0 %v326_v4  ;;  %v491_v3 = vld [vmem:[%s3123_s1 + $0xe28] sm:$0xff]  ;;  %v424_v4 = vld [vmem:[%s3123_s1 + $0xc10] sm:$0xff] }
  0xc5   :  { %962 = vmatprep.mubr.f32.mxu0 %v29_v5  ;;  %1030 = vmatpush2.msra.mxu1 %v392_v6  ;;  %v490_v5 = vld [vmem:[%s3123_s1 + $0xe20] sm:$0xff]  ;;  %v423_v6 = vld [vmem:[%s3123_s1 + $0xc08] sm:$0xff] }
  0xc6   :  { %963 = vmatmul.mubr.f32.vlgmr.msra.gmra.mxu0 %v28_v7  ;;  %1031 = vmatprep.subr.mxu1 %v391_v8  ;;  %v489_v7 = vld [vmem:[%s3123_s1 + $0xe18] sm:$0xff]  ;;  %v422_v8 = vld [vmem:[%s3123_s1 + $0xc00] sm:$0xff] }
  0xc7   :  { %1040 = vmatprep.subr.mxu0 %v453_v9  ;;  %1032 = vmatpush2.msra.mxu1 %v390_v10  ;;  %v488_v9 = vld [vmem:[%s3123_s1 + $0xe10] sm:$0xff]  ;;  %v485_v10 = vld [vmem:[%s3123_s1 + $0xdf8] sm:$0xff] }
  0xc8   :  { %1033 = vmatprep.mubr.f32.mxu1 %v31_v11  ;;  %1041 = vmatpush1.msra.mxu0 %v452_v12  ;;  %v487_v11 = vld [vmem:[%s3123_s1 + $0xe08] sm:$0xff]  ;;  %v484_v12 = vld [vmem:[%s3123_s1 + $0xdf0] sm:$0xff] }
  0xc9   :  { %1034 = vmatmul.mubr.f32.vlgmr.msra.gmra.mxu1 %v30_v13  ;;  %1042 = vmatprep.subr.mxu0 %v451_v14  ;;  %v486_v13 = vld [vmem:[%s3123_s1 + $0xe00] sm:$0xff]  ;;  %v483_v14 = vld [vmem:[%s3123_s1 + $0xde8] sm:$0xff] }
  0xca   :  { %1111 = vmatprep.subr.mxu1 %v517_v15  ;;  %1043 = vmatpush1.msra.mxu0 %v450_v16  ;;  %v549_v15 = vld [vmem:[%s3123_s1 + $0xff8] sm:$0xff]  ;;  %v482_v16 = vld [vmem:[%s3123_s1 + $0xde0] sm:$0xff] }
  0xcb   :  { %1112 = vmatpush1.msra.mxu1 %v516_v17  ;;  %1044 = vmatprep.subr.mxu0 %v449_v18  ;;  %v548_v17 = vld [vmem:[%s3123_s1 + $0xff0] sm:$0xff]  ;;  %v481_v18 = vld [vmem:[%s3123_s1 + $0xdd8] sm:$0xff] }
  0xcc   :  { %1113 = vmatprep.subr.mxu1 %v515_v19  ;;  %1045 = vmatpush1.msra.mxu0 %v448_v20  ;;  %v547_v19 = vld [vmem:[%s3123_s1 + $0xfe8] sm:$0xff]  ;;  %v480_v20 = vld [vmem:[%s3123_s1 + $0xdd0] sm:$0xff] }
  0xcd   :  { %1114 = vmatpush1.msra.mxu1 %v514_v21  ;;  %1046 = vmatprep.subr.mxu0 %v447_v22  ;;  %v546_v21 = vld [vmem:[%s3123_s1 + $0xfe0] sm:$0xff]  ;;  %v479_v22 = vld [vmem:[%s3123_s1 + $0xdc8] sm:$0xff] }
  0xce   :  { %1115 = vmatprep.subr.mxu1 %v513_v23  ;;  %1047 = vmatpush1.msra.mxu0 %v446_v24  ;;  %v545_v23 = vld [vmem:[%s3123_s1 + $0xfd8] sm:$0xff]  ;;  %v478_v24 = vld [vmem:[%s3123_s1 + $0xdc0] sm:$0xff] }
  0xcf   :  { %1116 = vmatpush1.msra.mxu1 %v512_v25  ;;  %1048 = vmatprep.subr.mxu0 %v445_v26  ;;  %v544_v25 = vld [vmem:[%s3123_s1 + $0xfd0] sm:$0xff]  ;;  %v477_v26 = vld [vmem:[%s3123_s1 + $0xdb8] sm:$0xff] }
  0xd0   :  { %1117 = vmatprep.subr.mxu1 %v511_v27  ;;  %1049 = vmatpush1.msra.mxu0 %v444_v28  ;;  %v543_v27 = vld [vmem:[%s3123_s1 + $0xfc8] sm:$0xff]  ;;  %v476_v28 = vld [vmem:[%s3123_s1 + $0xdb0] sm:$0xff] }
  0xd1   :  { %1118 = vmatpush1.msra.mxu1 %v510_v29  ;;  %1050 = vmatprep.subr.mxu0 %v443_v30  ;;  %v542_v29 = vld [vmem:[%s3123_s1 + $0xfc0] sm:$0xff]  ;;  %v475_v30 = vld [vmem:[%s3123_s1 + $0xda8] sm:$0xff] }
  0xd2   :  { %1119 = vmatprep.subr.mxu1 %v509_v31  ;;  %1051 = vmatpush1.msra.mxu0 %v442_v32  ;;  %v541_v31 = vld [vmem:[%s3123_s1 + $0xfb8] sm:$0xff]  ;;  %v474_v32 = vld [vmem:[%s3123_s1 + $0xda0] sm:$0xff] }
  0xd3   :  { %1120 = vmatpush1.msra.mxu1 %v508_v33  ;;  %1052 = vmatprep.subr.mxu0 %v441_v34  ;;  %v540_v33 = vld [vmem:[%s3123_s1 + $0xfb0] sm:$0xff]  ;;  %v473_v34 = vld [vmem:[%s3123_s1 + $0xd98] sm:$0xff] }
  0xd4   :  { %1121 = vmatprep.subr.mxu1 %v507_v35  ;;  %1053 = vmatpush1.msra.mxu0 %v440_v36  ;;  %v539_v35 = vld [vmem:[%s3123_s1 + $0xfa8] sm:$0xff]  ;;  %v472_v36 = vld [vmem:[%s3123_s1 + $0xd90] sm:$0xff] }
  0xd5   :  { %1122 = vmatpush1.msra.mxu1 %v506_v37  ;;  %1054 = vmatprep.subr.mxu0 %v439_v38  ;;  %v538_v37 = vld [vmem:[%s3123_s1 + $0xfa0] sm:$0xff]  ;;  %v471_v38 = vld [vmem:[%s3123_s1 + $0xd88] sm:$0xff] }
  0xd6   :  { %1123 = vmatprep.subr.mxu1 %v505_v39  ;;  %1055 = vmatpush1.msra.mxu0 %v438_v40  ;;  %v537_v39 = vld [vmem:[%s3123_s1 + $0xf98] sm:$0xff]  ;;  %v470_v40 = vld [vmem:[%s3123_s1 + $0xd80] sm:$0xff] }
  0xd7   :  { %1124 = vmatpush1.msra.mxu1 %v504_v41  ;;  %1056 = vmatprep.subr.mxu0 %v437_v42  ;;  %v536_v41 = vld [vmem:[%s3123_s1 + $0xf90] sm:$0xff]  ;;  %v469_v42 = vld [vmem:[%s3123_s1 + $0xd78] sm:$0xff] }
  0xd8   :  { %1125 = vmatprep.subr.mxu1 %v503_v43  ;;  %1057 = vmatpush1.msra.mxu0 %v436_v44  ;;  %v535_v43 = vld [vmem:[%s3123_s1 + $0xf88] sm:$0xff]  ;;  %v468_v44 = vld [vmem:[%s3123_s1 + $0xd70] sm:$0xff] }
  0xd9   :  { %1126 = vmatpush1.msra.mxu1 %v502_v45  ;;  %1058 = vmatprep.subr.mxu0 %v435_v46  ;;  %v534_v45 = vld [vmem:[%s3123_s1 + $0xf80] sm:$0xff]  ;;  %v467_v46 = vld [vmem:[%s3123_s1 + $0xd68] sm:$0xff] }
  0xda   :  { %1127 = vmatprep.subr.mxu1 %v501_v47  ;;  %1059 = vmatpush1.msra.mxu0 %v434_v48  ;;  %v533_v47 = vld [vmem:[%s3123_s1 + $0xf78] sm:$0xff]  ;;  %v466_v48 = vld [vmem:[%s3123_s1 + $0xd60] sm:$0xff] }
  0xdb   :  { %1128 = vmatpush1.msra.mxu1 %v500_v49  ;;  %1060 = vmatprep.subr.mxu0 %v433_v50  ;;  %v532_v49 = vld [vmem:[%s3123_s1 + $0xf70] sm:$0xff]  ;;  %v465_v50 = vld [vmem:[%s3123_s1 + $0xd58] sm:$0xff] }
  0xdc   :  { %1129 = vmatprep.subr.mxu1 %v499_v51  ;;  %1061 = vmatpush1.msra.mxu0 %v432_v52  ;;  %v531_v51 = vld [vmem:[%s3123_s1 + $0xf68] sm:$0xff]  ;;  %v464_v52 = vld [vmem:[%s3123_s1 + $0xd50] sm:$0xff] }
  0xdd   :  { %1130 = vmatpush1.msra.mxu1 %v498_v53  ;;  %1062 = vmatprep.subr.mxu0 %v431_v54  ;;  %v530_v53 = vld [vmem:[%s3123_s1 + $0xf60] sm:$0xff]  ;;  %v463_v54 = vld [vmem:[%s3123_s1 + $0xd48] sm:$0xff] }
  0xde   :  { %1131 = vmatprep.subr.mxu1 %v497_v55  ;;  %1063 = vmatpush1.msra.mxu0 %v430_v56  ;;  %v529_v55 = vld [vmem:[%s3123_s1 + $0xf58] sm:$0xff]  ;;  %v462_v56 = vld [vmem:[%s3123_s1 + $0xd40] sm:$0xff] }
  0xdf   :  { %1132 = vmatpush1.msra.mxu1 %v496_v57  ;;  %1064 = vmatprep.subr.mxu0 %v429_v58  ;;  %v528_v57 = vld [vmem:[%s3123_s1 + $0xf50] sm:$0xff]  ;;  %v461_v58 = vld [vmem:[%s3123_s1 + $0xd38] sm:$0xff] }
  0xe0   :  { %1133 = vmatprep.subr.mxu1 %v495_v59  ;;  %1065 = vmatpush1.msra.mxu0 %v428_v60  ;;  %v527_v59 = vld [vmem:[%s3123_s1 + $0xf48] sm:$0xff]  ;;  %v460_v60 = vld [vmem:[%s3123_s1 + $0xd30] sm:$0xff] }
  0xe1   :  { %1134 = vmatpush1.msra.mxu1 %v494_v61  ;;  %1066 = vmatprep.subr.mxu0 %v427_v62  ;;  %v526_v61 = vld [vmem:[%s3123_s1 + $0xf40] sm:$0xff]  ;;  %v459_v62 = vld [vmem:[%s3123_s1 + $0xd28] sm:$0xff] }
  0xe2   :  { %1135 = vmatprep.subr.mxu1 %v493_v63  ;;  %1067 = vmatpush1.msra.mxu0 %v426_v0  ;;  %v525_v63 = vld [vmem:[%s3123_s1 + $0xf38] sm:$0xff]  ;;  %v458_v0 = vld [vmem:[%s3123_s1 + $0xd20] sm:$0xff] }
  0xe3   :  { %1136 = vmatpush1.msra.mxu1 %v492_v1  ;;  %1068 = vmatprep.subr.mxu0 %v425_v2  ;;  %v524_v1 = vld [vmem:[%s3123_s1 + $0xf30] sm:$0xff]  ;;  %v457_v2 = vld [vmem:[%s3123_s1 + $0xd18] sm:$0xff] }
  0xe4   :  { %1137 = vmatprep.subr.mxu1 %v491_v3  ;;  %1069 = vmatpush1.msra.mxu0 %v424_v4  ;;  %v523_v3 = vld [vmem:[%s3123_s1 + $0xf28] sm:$0xff]  ;;  %v456_v4 = vld [vmem:[%s3123_s1 + $0xd10] sm:$0xff] }
  0xe5   :  { %1138 = vmatpush1.msra.mxu1 %v490_v5  ;;  %1070 = vmatprep.subr.mxu0 %v423_v6  ;;  %v522_v5 = vld [vmem:[%s3123_s1 + $0xf20] sm:$0xff]  ;;  %v455_v6 = vld [vmem:[%s3123_s1 + $0xd08] sm:$0xff] }
  0xe6   :  { %1139 = vmatprep.subr.mxu1 %v489_v7  ;;  %1071 = vmatpush1.msra.mxu0 %v422_v8  ;;  %v521_v7 = vld [vmem:[%s3123_s1 + $0xf18] sm:$0xff]  ;;  %v454_v8 = vld [vmem:[%s3123_s1 + $0xd00] sm:$0xff] }
  0xe7   :  { %1140 = vmatpush1.msra.mxu1 %v488_v9  ;;  %1072 = vmatprep.subr.mxu0 %v485_v10  ;;  %v33_v9 = vld [vmem:[%s3124_s0 + $0x68] sm:$0xff]  ;;  %v520_v10 = vld [vmem:[%s3123_s1 + $0xf10] sm:$0xff] }
  0xe8   :  { %1141 = vmatprep.subr.mxu1 %v487_v11  ;;  %1073 = vmatpush2.msra.mxu0 %v484_v12  ;;  %v32_v11 = vld [vmem:[%s3124_s0 + $0x60] sm:$0xff]  ;;  %v519_v12 = vld [vmem:[%s3123_s1 + $0xf08] sm:$0xff] }
  0xe9   :  { %1142 = vmatpush1.msra.mxu1 %v486_v13  ;;  %1074 = vmatprep.subr.mxu0 %v483_v14  ;;  %v581_v13 = vld [vmem:[%s3123_s1 + $0x10f8] sm:$0xff]  ;;  %v518_v14 = vld [vmem:[%s3123_s1 + $0xf00] sm:$0xff] }
  0xea   :  { %1143 = vmatprep.subr.mxu1 %v549_v15  ;;  %1075 = vmatpush2.msra.mxu0 %v482_v16  ;;  %v35_v15 = vld [vmem:[%s3124_s0 + $0x78] sm:$0xff]  ;;  %v580_v16 = vld [vmem:[%s3123_s1 + $0x10f0] sm:$0xff] }
  0xeb   :  { %1144 = vmatpush2.msra.mxu1 %v548_v17  ;;  %1076 = vmatprep.subr.mxu0 %v481_v18  ;;  %v34_v17 = vld [vmem:[%s3124_s0 + $0x70] sm:$0xff]  ;;  %v579_v18 = vld [vmem:[%s3123_s1 + $0x10e8] sm:$0xff] }
  0xec   :  { %1145 = vmatprep.subr.mxu1 %v547_v19  ;;  %1077 = vmatpush2.msra.mxu0 %v480_v20  ;;  %v37_v19 = vld [vmem:[%s3124_s0 + $0x88] sm:$0xff]  ;;  %v578_v20 = vld [vmem:[%s3123_s1 + $0x10e0] sm:$0xff] }
  0xed   :  { %1146 = vmatpush2.msra.mxu1 %v546_v21  ;;  %1078 = vmatprep.subr.mxu0 %v479_v22  ;;  %v577_v21 = vld [vmem:[%s3123_s1 + $0x10d8] sm:$0xff]  ;;  %v576_v22 = vld [vmem:[%s3123_s1 + $0x10d0] sm:$0xff] }
  0xee   :  { %1147 = vmatprep.subr.mxu1 %v545_v23  ;;  %1079 = vmatpush2.msra.mxu0 %v478_v24  ;;  %v575_v23 = vld [vmem:[%s3123_s1 + $0x10c8] sm:$0xff]  ;;  %v574_v24 = vld [vmem:[%s3123_s1 + $0x10c0] sm:$0xff] }
  0xef   :  { %1148 = vmatpush2.msra.mxu1 %v544_v25  ;;  %1080 = vmatprep.subr.mxu0 %v477_v26  ;;  %v573_v25 = vld [vmem:[%s3123_s1 + $0x10b8] sm:$0xff]  ;;  %v572_v26 = vld [vmem:[%s3123_s1 + $0x10b0] sm:$0xff] }
  0xf0   :  { %1149 = vmatprep.subr.mxu1 %v543_v27  ;;  %1081 = vmatpush2.msra.mxu0 %v476_v28  ;;  %v571_v27 = vld [vmem:[%s3123_s1 + $0x10a8] sm:$0xff]  ;;  %v570_v28 = vld [vmem:[%s3123_s1 + $0x10a0] sm:$0xff] }
  0xf1   :  { %1150 = vmatpush2.msra.mxu1 %v542_v29  ;;  %1082 = vmatprep.subr.mxu0 %v475_v30  ;;  %v569_v29 = vld [vmem:[%s3123_s1 + $0x1098] sm:$0xff]  ;;  %v568_v30 = vld [vmem:[%s3123_s1 + $0x1090] sm:$0xff] }
  0xf2   :  { %1151 = vmatprep.subr.mxu1 %v541_v31  ;;  %1083 = vmatpush2.msra.mxu0 %v474_v32  ;;  %v567_v31 = vld [vmem:[%s3123_s1 + $0x1088] sm:$0xff]  ;;  %v566_v32 = vld [vmem:[%s3123_s1 + $0x1080] sm:$0xff] }
  0xf3   :  { %1152 = vmatpush2.msra.mxu1 %v540_v33  ;;  %1084 = vmatprep.subr.mxu0 %v473_v34  ;;  %v565_v33 = vld [vmem:[%s3123_s1 + $0x1078] sm:$0xff]  ;;  %v564_v34 = vld [vmem:[%s3123_s1 + $0x1070] sm:$0xff] }
  0xf4   :  { %1153 = vmatprep.subr.mxu1 %v539_v35  ;;  %1085 = vmatpush2.msra.mxu0 %v472_v36  ;;  %v563_v35 = vld [vmem:[%s3123_s1 + $0x1068] sm:$0xff]  ;;  %v562_v36 = vld [vmem:[%s3123_s1 + $0x1060] sm:$0xff] }
  0xf5   :  { %1154 = vmatpush2.msra.mxu1 %v538_v37  ;;  %1086 = vmatprep.subr.mxu0 %v471_v38  ;;  %v561_v37 = vld [vmem:[%s3123_s1 + $0x1058] sm:$0xff]  ;;  %v560_v38 = vld [vmem:[%s3123_s1 + $0x1050] sm:$0xff] }
  0xf6   :  { %1155 = vmatprep.subr.mxu1 %v537_v39  ;;  %1087 = vmatpush2.msra.mxu0 %v470_v40  ;;  %v559_v39 = vld [vmem:[%s3123_s1 + $0x1048] sm:$0xff]  ;;  %v558_v40 = vld [vmem:[%s3123_s1 + $0x1040] sm:$0xff] }
  0xf7   :  { %1156 = vmatpush2.msra.mxu1 %v536_v41  ;;  %1088 = vmatprep.subr.mxu0 %v469_v42  ;;  %v557_v41 = vld [vmem:[%s3123_s1 + $0x1038] sm:$0xff]  ;;  %v556_v42 = vld [vmem:[%s3123_s1 + $0x1030] sm:$0xff] }
  0xf8   :  { %1157 = vmatprep.subr.mxu1 %v535_v43  ;;  %1089 = vmatpush2.msra.mxu0 %v468_v44  ;;  %v555_v43 = vld [vmem:[%s3123_s1 + $0x1028] sm:$0xff]  ;;  %v554_v44 = vld [vmem:[%s3123_s1 + $0x1020] sm:$0xff] }
  0xf9   :  { %1158 = vmatpush2.msra.mxu1 %v534_v45  ;;  %1090 = vmatprep.subr.mxu0 %v467_v46  ;;  %v553_v45 = vld [vmem:[%s3123_s1 + $0x1018] sm:$0xff]  ;;  %v552_v46 = vld [vmem:[%s3123_s1 + $0x1010] sm:$0xff] }
  0xfa   :  { %1159 = vmatprep.subr.mxu1 %v533_v47  ;;  %1091 = vmatpush2.msra.mxu0 %v466_v48  ;;  %v551_v47 = vld [vmem:[%s3123_s1 + $0x1008] sm:$0xff]  ;;  %v550_v48 = vld [vmem:[%s3123_s1 + $0x1000] sm:$0xff] }
  0xfb   :  { %1160 = vmatpush2.msra.mxu1 %v532_v49  ;;  %1092 = vmatprep.subr.mxu0 %v465_v50  ;;  %v613_v49 = vld [vmem:[%s3123_s1 + $0x11f8] sm:$0xff]  ;;  %v612_v50 = vld [vmem:[%s3123_s1 + $0x11f0] sm:$0xff] }
  0xfc   :  { %1161 = vmatprep.subr.mxu1 %v531_v51  ;;  %1093 = vmatpush2.msra.mxu0 %v464_v52  ;;  %v611_v51 = vld [vmem:[%s3123_s1 + $0x11e8] sm:$0xff]  ;;  %v610_v52 = vld [vmem:[%s3123_s1 + $0x11e0] sm:$0xff] }
  0xfd   :  { %1162 = vmatpush2.msra.mxu1 %v530_v53  ;;  %1094 = vmatprep.subr.mxu0 %v463_v54  ;;  %v609_v53 = vld [vmem:[%s3123_s1 + $0x11d8] sm:$0xff]  ;;  %v608_v54 = vld [vmem:[%s3123_s1 + $0x11d0] sm:$0xff] }
  0xfe   :  { %1163 = vmatprep.subr.mxu1 %v529_v55  ;;  %1095 = vmatpush2.msra.mxu0 %v462_v56  ;;  %v607_v55 = vld [vmem:[%s3123_s1 + $0x11c8] sm:$0xff]  ;;  %v606_v56 = vld [vmem:[%s3123_s1 + $0x11c0] sm:$0xff] }
  0xff   :  { %1164 = vmatpush2.msra.mxu1 %v528_v57  ;;  %1096 = vmatprep.subr.mxu0 %v461_v58  ;;  %v605_v57 = vld [vmem:[%s3123_s1 + $0x11b8] sm:$0xff]  ;;  %v604_v58 = vld [vmem:[%s3123_s1 + $0x11b0] sm:$0xff] }
 0x100   :  { %1165 = vmatprep.subr.mxu1 %v527_v59  ;;  %1097 = vmatpush2.msra.mxu0 %v460_v60  ;;  %v603_v59 = vld [vmem:[%s3123_s1 + $0x11a8] sm:$0xff]  ;;  %v602_v60 = vld [vmem:[%s3123_s1 + $0x11a0] sm:$0xff] }
 0x101   :  { %1166 = vmatpush2.msra.mxu1 %v526_v61  ;;  %1098 = vmatprep.subr.mxu0 %v459_v62  ;;  %v601_v61 = vld [vmem:[%s3123_s1 + $0x1198] sm:$0xff]  ;;  %v600_v62 = vld [vmem:[%s3123_s1 + $0x1190] sm:$0xff] }
 0x102   :  { %1167 = vmatprep.subr.mxu1 %v525_v63  ;;  %1099 = vmatpush2.msra.mxu0 %v458_v0  ;;  %v599_v63 = vld [vmem:[%s3123_s1 + $0x1188] sm:$0xff]  ;;  %v598_v0 = vld [vmem:[%s3123_s1 + $0x1180] sm:$0xff] }
 0x103   :  { %1168 = vmatpush2.msra.mxu1 %v524_v1  ;;  %1100 = vmatprep.subr.mxu0 %v457_v2  ;;  %v597_v1 = vld [vmem:[%s3123_s1 + $0x1178] sm:$0xff]  ;;  %v596_v2 = vld [vmem:[%s3123_s1 + $0x1170] sm:$0xff] }
 0x104   :  { %1169 = vmatprep.subr.mxu1 %v523_v3  ;;  %1101 = vmatpush2.msra.mxu0 %v456_v4  ;;  %v595_v3 = vld [vmem:[%s3123_s1 + $0x1168] sm:$0xff]  ;;  %v594_v4 = vld [vmem:[%s3123_s1 + $0x1160] sm:$0xff] }
 0x105   :  { %1170 = vmatpush2.msra.mxu1 %v522_v5  ;;  %1102 = vmatprep.subr.mxu0 %v455_v6  ;;  %v593_v5 = vld [vmem:[%s3123_s1 + $0x1158] sm:$0xff]  ;;  %v592_v6 = vld [vmem:[%s3123_s1 + $0x1150] sm:$0xff] }
 0x106   :  { %1171 = vmatprep.subr.mxu1 %v521_v7  ;;  %1103 = vmatpush2.msra.mxu0 %v454_v8  ;;  %v591_v7 = vld [vmem:[%s3123_s1 + $0x1148] sm:$0xff]  ;;  %v590_v8 = vld [vmem:[%s3123_s1 + $0x1140] sm:$0xff] }
 0x107   :  { %1104 = vmatprep.mubr.f32.mxu0 %v33_v9  ;;  %1172 = vmatpush2.msra.mxu1 %v520_v10  ;;  %v589_v9 = vld [vmem:[%s3123_s1 + $0x1138] sm:$0xff]  ;;  %v588_v10 = vld [vmem:[%s3123_s1 + $0x1130] sm:$0xff] }
 0x108   :  { %1105 = vmatmul.mubr.f32.vlgmr.msra.gmra.mxu0 %v32_v11  ;;  %1173 = vmatprep.subr.mxu1 %v519_v12  ;;  %v587_v11 = vld [vmem:[%s3123_s1 + $0x1128] sm:$0xff]  ;;  %v586_v12 = vld [vmem:[%s3123_s1 + $0x1120] sm:$0xff] }
 0x109   :  { %1182 = vmatprep.subr.mxu0 %v581_v13  ;;  %1174 = vmatpush2.msra.mxu1 %v518_v14  ;;  %v585_v13 = vld [vmem:[%s3123_s1 + $0x1118] sm:$0xff]  ;;  %v584_v14 = vld [vmem:[%s3123_s1 + $0x1110] sm:$0xff] }
 0x10a   :  { %1175 = vmatprep.mubr.f32.mxu1 %v35_v15  ;;  %1183 = vmatpush1.msra.mxu0 %v580_v16  ;;  %v583_v15 = vld [vmem:[%s3123_s1 + $0x1108] sm:$0xff]  ;;  %v582_v16 = vld [vmem:[%s3123_s1 + $0x1100] sm:$0xff] }
 0x10b   :  { %1176 = vmatmul.mubr.f32.vlgmr.msra.gmra.mxu1 %v34_v17  ;;  %1184 = vmatprep.subr.mxu0 %v579_v18  ;;  %v36_v17 = vld [vmem:[%s3124_s0 + $0x80] sm:$0xff]  ;;  %v680_v18 = vpop.f32.mrf.mxu0 }
 0x10c   :  { %1246 = vmatprep.mubr.f32.mxu0 %v37_v19  ;;  %1185 = vmatpush1.msra.mxu0 %v578_v20  ;;  %v751_v19 = vpop.f32.mrf.mxu1 }
 0x10d   :  { %1186 = vmatprep.subr.mxu0 %v577_v21  ;;  %v682_v20 = vpop.f32.mrf.mxu0 }
 0x10e   :  { %1187 = vmatpush1.msra.mxu0 %v576_v22  ;;  %v753_v22 = vpop.f32.mrf.mxu1 }
 0x10f   :  { %1188 = vmatprep.subr.mxu0 %v575_v23  ;;  %v752_v23 = vadd.f32 %v751_v19, %v680_v18 }
 0x110   :  { %1189 = vmatpush1.msra.mxu0 %v574_v24 }
 0x111   :  { %1190 = vmatprep.subr.mxu0 %v573_v25 }
 0x112   :  { %1191 = vmatpush1.msra.mxu0 %v572_v26  ;;  %v754_v26 = vadd.f32 %v753_v22, %v682_v20 }
 0x113   :  { %1192 = vmatprep.subr.mxu0 %v571_v27 }
 0x114   :  { %1193 = vmatpush1.msra.mxu0 %v570_v28 }
 0x115   :  { %1194 = vmatprep.subr.mxu0 %v569_v29 }
 0x116   :  { %1195 = vmatpush1.msra.mxu0 %v568_v30 }
 0x117   :  { %1196 = vmatprep.subr.mxu0 %v567_v31 }
 0x118   :  { %1197 = vmatpush1.msra.mxu0 %v566_v32  ;;  %v1255_v32 = vlaneseq }
 0x119   :  { %1198 = vmatprep.subr.mxu0 %v565_v33 }
 0x11a   :  { %1199 = vmatpush1.msra.mxu0 %v564_v34 }
 0x11b   :  { %1200 = vmatprep.subr.mxu0 %v563_v35 }
 0x11c   :  { %1201 = vmatpush1.msra.mxu0 %v562_v36 }
 0x11d   :  { %1202 = vmatprep.subr.mxu0 %v561_v37 }
 0x11e   :  { %1203 = vmatpush1.msra.mxu0 %v560_v38 }
 0x11f   :  { %1204 = vmatprep.subr.mxu0 %v559_v39  ;;  %v1256_v39 = vshrl.u32 %v1255_v32, 7 }
 0x120   :  { %1205 = vmatpush1.msra.mxu0 %v558_v40 }
 0x121   :  { %1206 = vmatprep.subr.mxu0 %v557_v41 }
 0x122   :  { %1207 = vmatpush1.msra.mxu0 %v556_v42 }
 0x123   :  { %1208 = vmatprep.subr.mxu0 %v555_v43 }
 0x124   :  { %1209 = vmatpush1.msra.mxu0 %v554_v44 }
 0x125   :  { %1210 = vmatprep.subr.mxu0 %v553_v45 }
 0x126   :  { %1211 = vmatpush1.msra.mxu0 %v552_v46  ;;  %v1257_v46 = vsub.s32 0, %v1256_v39 }
 0x127   :  { %1212 = vmatprep.subr.mxu0 %v551_v47  ;;  %v1253_v47 = vld [vmem:[%s3125_s2] sm:$0x3] }
 0x128   :  { %1213 = vmatpush1.msra.mxu0 %v550_v48 }
 0x129   :  { %1214 = vmatprep.subr.mxu0 %v613_v49  ;;  %v1261_v49 = vsub.s32 1, %v1256_v39 }
 0x12a   :  { %1215 = vmatpush2.msra.mxu0 %v612_v50 }
 0x12b   :  { %1216 = vmatprep.subr.mxu0 %v611_v51  ;;  %v1267_v51 = vld [vmem:[%s3126_s3] sm:$0x3] }
 0x12c   :  { %1217 = vmatpush2.msra.mxu0 %v610_v52 }
 0x12d   :  { %1218 = vmatprep.subr.mxu0 %v609_v53  ;;  %v1258_v53 = vrot.slane %v1253_v47, %v1257_v46 }
 0x12e   :  { %1219 = vmatpush2.msra.mxu0 %v608_v54 }
 0x12f   :  { %1220 = vmatprep.subr.mxu0 %v607_v55 }
 0x130   :  { %1221 = vmatpush2.msra.mxu0 %v606_v56 }
 0x131   :  { %1222 = vmatprep.subr.mxu0 %v605_v57  ;;  %v1272_v57 = vrot.slane %v1267_v51, %v1257_v46 }
 0x132   :  { %1223 = vmatpush2.msra.mxu0 %v604_v58  ;;  %v1262_v58 = vrot.slane %v1253_v47, %v1261_v49 }
 0x133   :  { %1224 = vmatprep.subr.mxu0 %v603_v59 }
 0x134   :  { %1225 = vmatpush2.msra.mxu0 %v602_v60 }
 0x135   :  { %1226 = vmatprep.subr.mxu0 %v601_v61 }
 0x136   :  { %1227 = vmatpush2.msra.mxu0 %v600_v62  ;;  %v1276_v62 = vrot.slane %v1267_v51, %v1261_v49 }
 0x137   :  { %1228 = vmatprep.subr.mxu0 %v599_v63  ;;  %v1281_v63 = vld [vmem:[%s3127_s4] sm:$0xff] }
 0x138   :  { %1229 = vmatpush2.msra.mxu0 %v598_v0 }
 0x139   :  { %1230 = vmatprep.subr.mxu0 %v597_v1 }
 0x13a   :  { %1231 = vmatpush2.msra.mxu0 %v596_v2  ;;  %v1282_v2 = vld [vmem:[%s3127_s4 + $0x8] sm:$0xff] }
 0x13b   :  { %1232 = vmatprep.subr.mxu0 %v595_v3 }
 0x13c   :  { %1233 = vmatpush2.msra.mxu0 %v594_v4 }
 0x13d   :  { %1234 = vmatprep.subr.mxu0 %v593_v5 }
 0x13e   :  { %1235 = vmatpush2.msra.mxu0 %v592_v6 }
 0x13f   :  { %1236 = vmatprep.subr.mxu0 %v591_v7 }
 0x140   :  { %1237 = vmatpush2.msra.mxu0 %v590_v8 }
 0x141   :  { %1238 = vmatprep.subr.mxu0 %v589_v9 }
 0x142   :  { %1239 = vmatpush2.msra.mxu0 %v588_v10 }
 0x143   :  { %1240 = vmatprep.subr.mxu0 %v587_v11 }
 0x144   :  { %1241 = vmatpush2.msra.mxu0 %v586_v12  ;;  %v822_v21 = vpop.f32.mrf.mxu0 }
 0x145   :  { %1242 = vmatprep.subr.mxu0 %v585_v13  ;;  %v823_v27 = vadd.f32 %v822_v21, %v752_v23 }
 0x146   :  { %1243 = vmatpush2.msra.mxu0 %v584_v14  ;;  %v824_v24 = vpop.f32.mrf.mxu0 }
 0x147   :  { %1244 = vmatprep.subr.mxu0 %v583_v15  ;;  %v893_v25 = vpop.f32.mrf.mxu1  ;;  %v825_v29 = vadd.f32 %v824_v24, %v754_v26 }
 0x148   :  { %1245 = vmatpush2.msra.mxu0 %v582_v16  ;;  %v894_v31 = vadd.f32 %v893_v25, %v823_v27 }
 0x149   :  { %1247 = vmatmul.mubr.f32.vlgmr.msra.gmra.mxu0 %v36_v17  ;;  %v895_v30 = vpop.f32.mrf.mxu1 }
 0x14a   :  { %v896_v35 = vadd.f32 %v895_v30, %v825_v29 }
 0x186   :  { %v964_v28 = vpop.f32.mrf.mxu0 }
 0x187   :  { %v965_v36 = vadd.f32 %v964_v28, %v894_v31 }
 0x188   :  { %v966_v33 = vpop.f32.mrf.mxu0 }
 0x189   :  { %v1035_v34 = vpop.f32.mrf.mxu1  ;;  %v967_v38 = vadd.f32 %v966_v33, %v896_v35 }
 0x18a   :  { %v1036_v41 = vadd.f32 %v1035_v34, %v965_v36 }
 0x18b   :  { %v1037_v40 = vpop.f32.mrf.mxu1 }
 0x18c   :  { %v1038_v44 = vadd.f32 %v1037_v40, %v967_v38 }
 0x1c8   :  { %v1106_v37 = vpop.f32.mrf.mxu0 }
 0x1c9   :  { %v1107_v45 = vadd.f32 %v1106_v37, %v1036_v41 }
 0x1ca   :  { %v1108_v42 = vpop.f32.mrf.mxu0 }
 0x1cb   :  { %v1177_v43 = vpop.f32.mrf.mxu1  ;;  %v1109_v48 = vadd.f32 %v1108_v42, %v1038_v44 }
 0x1cc   :  { %v1178_v52 = vadd.f32 %v1177_v43, %v1107_v45 }
 0x1cd   :  { %v1179_v50 = vpop.f32.mrf.mxu1 }
 0x1ce   :  { %v1180_v55 = vadd.f32 %v1179_v50, %v1109_v48 }
 0x209   :  { %v1248_v54 = vpop.f32.mrf.mxu0 }
 0x20a   :  { %v1249_v56 = vadd.f32 %v1248_v54, %v1178_v52 }
 0x20b   :  { %v1250_v59 = vpop.f32.mrf.mxu0 }
 0x20c   :  { %v1265_v60 = vmul.f32 %v1258_v53, %v1249_v56  ;;  %v1251_v61 = vadd.f32 %v1250_v59, %v1180_v55 }
 0x20e   :  { %v1279_v0 = vadd.f32 %v1272_v57, %v1265_v60  ;;  %v1266_v1 = vmul.f32 %v1262_v58, %v1251_v61 }
 0x210   :  { %v1283_v3 = vadd.f32 %v1281_v63, %v1279_v0  ;;  %v1280_v4 = vadd.f32 %v1276_v62, %v1266_v1 }
 0x212   :  { %v1285_v5 = vmax.f32 %v1283_v3, 0.0  ;;  %v1284_v6 = vadd.f32 %v1282_v2, %v1280_v4 }
 0x214   :  { %1287 = vst [vmem:[%s3128_s5] sm:$0xff] %v1285_v5  ;;  %v1286_v7 = vmax.f32 %v1284_v6, 0.0 }
 0x216   :  { %1288 = vst [vmem:[%s3128_s5 + $0x8] sm:$0xff] %v1286_v7 }

// kernel: feature_generator_resnet_forward.30
= control target key start
LH: loop header
LB: loop body
LE: loop exit
PB: predicated region body
PF: predicated region fallthrough
CT: control target
= control target key end

     0   :  { %s3105_s1 = inlined_call_operand.vmem [shape: f32[2304,256], index: 1, kind: input, shape index: {}]   ;;  %s3106_s0 = inlined_call_operand.vmem [shape: f32[8,2304], index: 0, kind: input, shape index: {}]   ;;  %s3107_s2 = inlined_call_operand.vmem [shape: f32[1,256], index: 2, kind: input, shape index: {}]   ;;  %s3108_s3 = inlined_call_operand.vmem [shape: f32[1,256], index: 3, kind: input, shape index: {}]   ;;  %s3109_s4 = inlined_call_operand.vmem [shape: f32[8,256], index: 4, kind: output, shape index: {}]  }
   0x1   :  { %v66_v0 = vld [vmem:[%s3105_s1 + $0xf8] sm:$0xff]  ;;  %v65_v2 = vld [vmem:[%s3105_s1 + $0xf0] sm:$0xff]  ;;  %v64_v4 = vld [vmem:[%s3105_s1 + $0xe8] sm:$0xff] }
   0x2   :  { %v130_v1 = vld [vmem:[%s3105_s1 + $0x2f8] sm:$0xff]  ;;  %611 = vmatprep.subr.mxu0 %v66_v0  ;;  %v129_v3 = vld [vmem:[%s3105_s1 + $0x2f0] sm:$0xff]  ;;  %v128_v5 = vld [vmem:[%s3105_s1 + $0x2e8] sm:$0xff] }
   0x3   :  { %682 = vmatprep.subr.mxu1 %v130_v1  ;;  %612 = vmatpush1.msra.mxu0 %v65_v2  ;;  %v63_v6 = vld [vmem:[%s3105_s1 + $0xe0] sm:$0xff]  ;;  %v62_v8 = vld [vmem:[%s3105_s1 + $0xd8] sm:$0xff]  ;;  %v61_v10 = vld [vmem:[%s3105_s1 + $0xd0] sm:$0xff] }
   0x4   :  { %683 = vmatpush1.msra.mxu1 %v129_v3  ;;  %v127_v7 = vld [vmem:[%s3105_s1 + $0x2e0] sm:$0xff]  ;;  %613 = vmatprep.subr.mxu0 %v64_v4  ;;  %v126_v9 = vld [vmem:[%s3105_s1 + $0x2d8] sm:$0xff]  ;;  %v125_v11 = vld [vmem:[%s3105_s1 + $0x2d0] sm:$0xff] }
   0x5   :  { %684 = vmatprep.subr.mxu1 %v128_v5  ;;  %614 = vmatpush1.msra.mxu0 %v63_v6  ;;  %v60_v12 = vld [vmem:[%s3105_s1 + $0xc8] sm:$0xff]  ;;  %v59_v14 = vld [vmem:[%s3105_s1 + $0xc0] sm:$0xff]  ;;  %v58_v16 = vld [vmem:[%s3105_s1 + $0xb8] sm:$0xff] }
   0x6   :  { %685 = vmatpush1.msra.mxu1 %v127_v7  ;;  %v124_v13 = vld [vmem:[%s3105_s1 + $0x2c8] sm:$0xff]  ;;  %615 = vmatprep.subr.mxu0 %v62_v8  ;;  %v123_v15 = vld [vmem:[%s3105_s1 + $0x2c0] sm:$0xff]  ;;  %v122_v17 = vld [vmem:[%s3105_s1 + $0x2b8] sm:$0xff] }
   0x7   :  { %686 = vmatprep.subr.mxu1 %v126_v9  ;;  %616 = vmatpush1.msra.mxu0 %v61_v10  ;;  %v57_v18 = vld [vmem:[%s3105_s1 + $0xb0] sm:$0xff]  ;;  %v56_v20 = vld [vmem:[%s3105_s1 + $0xa8] sm:$0xff]  ;;  %v55_v22 = vld [vmem:[%s3105_s1 + $0xa0] sm:$0xff] }
   0x8   :  { %687 = vmatpush1.msra.mxu1 %v125_v11  ;;  %617 = vmatprep.subr.mxu0 %v60_v12  ;;  %v121_v19 = vld [vmem:[%s3105_s1 + $0x2b0] sm:$0xff]  ;;  %v120_v21 = vld [vmem:[%s3105_s1 + $0x2a8] sm:$0xff]  ;;  %v119_v23 = vld [vmem:[%s3105_s1 + $0x2a0] sm:$0xff] }
   0x9   :  { %688 = vmatprep.subr.mxu1 %v124_v13  ;;  %618 = vmatpush1.msra.mxu0 %v59_v14  ;;  %v54_v24 = vld [vmem:[%s3105_s1 + $0x98] sm:$0xff]  ;;  %v53_v26 = vld [vmem:[%s3105_s1 + $0x90] sm:$0xff]  ;;  %v52_v28 = vld [vmem:[%s3105_s1 + $0x88] sm:$0xff] }
   0xa   :  { %689 = vmatpush1.msra.mxu1 %v123_v15  ;;  %619 = vmatprep.subr.mxu0 %v58_v16  ;;  %v118_v25 = vld [vmem:[%s3105_s1 + $0x298] sm:$0xff]  ;;  %v117_v27 = vld [vmem:[%s3105_s1 + $0x290] sm:$0xff]  ;;  %v116_v29 = vld [vmem:[%s3105_s1 + $0x288] sm:$0xff] }
   0xb   :  { %690 = vmatprep.subr.mxu1 %v122_v17  ;;  %620 = vmatpush1.msra.mxu0 %v57_v18  ;;  %v51_v30 = vld [vmem:[%s3105_s1 + $0x80] sm:$0xff]  ;;  %v50_v32 = vld [vmem:[%s3105_s1 + $0x78] sm:$0xff]  ;;  %v49_v34 = vld [vmem:[%s3105_s1 + $0x70] sm:$0xff] }
   0xc   :  { %691 = vmatpush1.msra.mxu1 %v121_v19  ;;  %621 = vmatprep.subr.mxu0 %v56_v20  ;;  %v115_v31 = vld [vmem:[%s3105_s1 + $0x280] sm:$0xff]  ;;  %v114_v33 = vld [vmem:[%s3105_s1 + $0x278] sm:$0xff]  ;;  %v113_v35 = vld [vmem:[%s3105_s1 + $0x270] sm:$0xff] }
   0xd   :  { %692 = vmatprep.subr.mxu1 %v120_v21  ;;  %622 = vmatpush1.msra.mxu0 %v55_v22  ;;  %v48_v36 = vld [vmem:[%s3105_s1 + $0x68] sm:$0xff]  ;;  %v47_v38 = vld [vmem:[%s3105_s1 + $0x60] sm:$0xff]  ;;  %v46_v40 = vld [vmem:[%s3105_s1 + $0x58] sm:$0xff] }
   0xe   :  { %693 = vmatpush1.msra.mxu1 %v119_v23  ;;  %623 = vmatprep.subr.mxu0 %v54_v24  ;;  %v112_v37 = vld [vmem:[%s3105_s1 + $0x268] sm:$0xff]  ;;  %v111_v39 = vld [vmem:[%s3105_s1 + $0x260] sm:$0xff]  ;;  %v110_v41 = vld [vmem:[%s3105_s1 + $0x258] sm:$0xff] }
   0xf   :  { %694 = vmatprep.subr.mxu1 %v118_v25  ;;  %624 = vmatpush1.msra.mxu0 %v53_v26  ;;  %v45_v42 = vld [vmem:[%s3105_s1 + $0x50] sm:$0xff]  ;;  %v44_v44 = vld [vmem:[%s3105_s1 + $0x48] sm:$0xff]  ;;  %v43_v46 = vld [vmem:[%s3105_s1 + $0x40] sm:$0xff] }
  0x10   :  { %695 = vmatpush1.msra.mxu1 %v117_v27  ;;  %625 = vmatprep.subr.mxu0 %v52_v28  ;;  %v109_v43 = vld [vmem:[%s3105_s1 + $0x250] sm:$0xff]  ;;  %v108_v45 = vld [vmem:[%s3105_s1 + $0x248] sm:$0xff]  ;;  %v107_v47 = vld [vmem:[%s3105_s1 + $0x240] sm:$0xff] }
  0x11   :  { %696 = vmatprep.subr.mxu1 %v116_v29  ;;  %626 = vmatpush1.msra.mxu0 %v51_v30  ;;  %v42_v48 = vld [vmem:[%s3105_s1 + $0x38] sm:$0xff]  ;;  %v41_v50 = vld [vmem:[%s3105_s1 + $0x30] sm:$0xff]  ;;  %v40_v52 = vld [vmem:[%s3105_s1 + $0x28] sm:$0xff] }
  0x12   :  { %697 = vmatpush1.msra.mxu1 %v115_v31  ;;  %627 = vmatprep.subr.mxu0 %v50_v32  ;;  %v106_v49 = vld [vmem:[%s3105_s1 + $0x238] sm:$0xff]  ;;  %v105_v51 = vld [vmem:[%s3105_s1 + $0x230] sm:$0xff]  ;;  %v104_v53 = vld [vmem:[%s3105_s1 + $0x228] sm:$0xff] }
  0x13   :  { %698 = vmatprep.subr.mxu1 %v114_v33  ;;  %628 = vmatpush1.msra.mxu0 %v49_v34  ;;  %v39_v54 = vld [vmem:[%s3105_s1 + $0x20] sm:$0xff]  ;;  %v38_v56 = vld [vmem:[%s3105_s1 + $0x18] sm:$0xff]  ;;  %v37_v58 = vld [vmem:[%s3105_s1 + $0x10] sm:$0xff] }
  0x14   :  { %699 = vmatpush1.msra.mxu1 %v113_v35  ;;  %629 = vmatprep.subr.mxu0 %v48_v36  ;;  %v103_v55 = vld [vmem:[%s3105_s1 + $0x220] sm:$0xff]  ;;  %v102_v57 = vld [vmem:[%s3105_s1 + $0x218] sm:$0xff]  ;;  %v101_v59 = vld [vmem:[%s3105_s1 + $0x210] sm:$0xff] }
  0x15   :  { %700 = vmatprep.subr.mxu1 %v112_v37  ;;  %630 = vmatpush1.msra.mxu0 %v47_v38  ;;  %v36_v60 = vld [vmem:[%s3105_s1 + $0x8] sm:$0xff]  ;;  %v35_v62 = vld [vmem:[%s3105_s1] sm:$0xff]  ;;  %v98_v0 = vld [vmem:[%s3105_s1 + $0x1f8] sm:$0xff] }
  0x16   :  { %701 = vmatpush1.msra.mxu1 %v111_v39  ;;  %631 = vmatprep.subr.mxu0 %v46_v40  ;;  %v100_v61 = vld [vmem:[%s3105_s1 + $0x208] sm:$0xff]  ;;  %v99_v63 = vld [vmem:[%s3105_s1 + $0x200] sm:$0xff]  ;;  %v162_v1 = vld [vmem:[%s3105_s1 + $0x3f8] sm:$0xff] }
  0x17   :  { %702 = vmatprep.subr.mxu1 %v110_v41  ;;  %632 = vmatpush1.msra.mxu0 %v45_v42  ;;  %v97_v2 = vld [vmem:[%s3105_s1 + $0x1f0] sm:$0xff]  ;;  %v96_v4 = vld [vmem:[%s3105_s1 + $0x1e8] sm:$0xff]  ;;  %v95_v6 = vld [vmem:[%s3105_s1 + $0x1e0] sm:$0xff] }
  0x18   :  { %703 = vmatpush1.msra.mxu1 %v109_v43  ;;  %633 = vmatprep.subr.mxu0 %v44_v44  ;;  %v161_v3 = vld [vmem:[%s3105_s1 + $0x3f0] sm:$0xff]  ;;  %v160_v5 = vld [vmem:[%s3105_s1 + $0x3e8] sm:$0xff]  ;;  %v159_v7 = vld [vmem:[%s3105_s1 + $0x3e0] sm:$0xff] }
  0x19   :  { %704 = vmatprep.subr.mxu1 %v108_v45  ;;  %634 = vmatpush1.msra.mxu0 %v43_v46  ;;  %v94_v8 = vld [vmem:[%s3105_s1 + $0x1d8] sm:$0xff]  ;;  %v93_v10 = vld [vmem:[%s3105_s1 + $0x1d0] sm:$0xff]  ;;  %v92_v12 = vld [vmem:[%s3105_s1 + $0x1c8] sm:$0xff] }
  0x1a   :  { %705 = vmatpush1.msra.mxu1 %v107_v47  ;;  %635 = vmatprep.subr.mxu0 %v42_v48  ;;  %v158_v9 = vld [vmem:[%s3105_s1 + $0x3d8] sm:$0xff]  ;;  %v157_v11 = vld [vmem:[%s3105_s1 + $0x3d0] sm:$0xff]  ;;  %v156_v13 = vld [vmem:[%s3105_s1 + $0x3c8] sm:$0xff] }
  0x1b   :  { %706 = vmatprep.subr.mxu1 %v106_v49  ;;  %636 = vmatpush1.msra.mxu0 %v41_v50  ;;  %v91_v14 = vld [vmem:[%s3105_s1 + $0x1c0] sm:$0xff]  ;;  %v90_v16 = vld [vmem:[%s3105_s1 + $0x1b8] sm:$0xff]  ;;  %v89_v18 = vld [vmem:[%s3105_s1 + $0x1b0] sm:$0xff] }
  0x1c   :  { %707 = vmatpush1.msra.mxu1 %v105_v51  ;;  %637 = vmatprep.subr.mxu0 %v40_v52  ;;  %v155_v15 = vld [vmem:[%s3105_s1 + $0x3c0] sm:$0xff]  ;;  %v154_v17 = vld [vmem:[%s3105_s1 + $0x3b8] sm:$0xff]  ;;  %v153_v19 = vld [vmem:[%s3105_s1 + $0x3b0] sm:$0xff] }
  0x1d   :  { %708 = vmatprep.subr.mxu1 %v104_v53  ;;  %638 = vmatpush1.msra.mxu0 %v39_v54  ;;  %v88_v20 = vld [vmem:[%s3105_s1 + $0x1a8] sm:$0xff]  ;;  %v87_v22 = vld [vmem:[%s3105_s1 + $0x1a0] sm:$0xff]  ;;  %v86_v24 = vld [vmem:[%s3105_s1 + $0x198] sm:$0xff] }
  0x1e   :  { %709 = vmatpush1.msra.mxu1 %v103_v55  ;;  %639 = vmatprep.subr.mxu0 %v38_v56  ;;  %v152_v21 = vld [vmem:[%s3105_s1 + $0x3a8] sm:$0xff]  ;;  %v151_v23 = vld [vmem:[%s3105_s1 + $0x3a0] sm:$0xff]  ;;  %v150_v25 = vld [vmem:[%s3105_s1 + $0x398] sm:$0xff] }
  0x1f   :  { %710 = vmatprep.subr.mxu1 %v102_v57  ;;  %640 = vmatpush1.msra.mxu0 %v37_v58  ;;  %v85_v26 = vld [vmem:[%s3105_s1 + $0x190] sm:$0xff]  ;;  %v84_v28 = vld [vmem:[%s3105_s1 + $0x188] sm:$0xff]  ;;  %v83_v30 = vld [vmem:[%s3105_s1 + $0x180] sm:$0xff] }
  0x20   :  { %711 = vmatpush1.msra.mxu1 %v101_v59  ;;  %641 = vmatprep.subr.mxu0 %v36_v60  ;;  %v149_v27 = vld [vmem:[%s3105_s1 + $0x390] sm:$0xff]  ;;  %v148_v29 = vld [vmem:[%s3105_s1 + $0x388] sm:$0xff]  ;;  %v147_v31 = vld [vmem:[%s3105_s1 + $0x380] sm:$0xff] }
  0x21   :  { %712 = vmatprep.subr.mxu1 %v100_v61  ;;  %642 = vmatpush1.msra.mxu0 %v35_v62  ;;  %v82_v32 = vld [vmem:[%s3105_s1 + $0x178] sm:$0xff]  ;;  %v81_v34 = vld [vmem:[%s3105_s1 + $0x170] sm:$0xff]  ;;  %v80_v36 = vld [vmem:[%s3105_s1 + $0x168] sm:$0xff] }
  0x22   :  { %713 = vmatpush1.msra.mxu1 %v99_v63  ;;  %643 = vmatprep.subr.mxu0 %v98_v0  ;;  %v146_v33 = vld [vmem:[%s3105_s1 + $0x378] sm:$0xff]  ;;  %v145_v35 = vld [vmem:[%s3105_s1 + $0x370] sm:$0xff]  ;;  %v144_v37 = vld [vmem:[%s3105_s1 + $0x368] sm:$0xff] }
  0x23   :  { %714 = vmatprep.subr.mxu1 %v162_v1  ;;  %644 = vmatpush2.msra.mxu0 %v97_v2  ;;  %v79_v38 = vld [vmem:[%s3105_s1 + $0x160] sm:$0xff]  ;;  %v78_v40 = vld [vmem:[%s3105_s1 + $0x158] sm:$0xff]  ;;  %v77_v42 = vld [vmem:[%s3105_s1 + $0x150] sm:$0xff] }
  0x24   :  { %715 = vmatpush2.msra.mxu1 %v161_v3  ;;  %645 = vmatprep.subr.mxu0 %v96_v4  ;;  %v143_v39 = vld [vmem:[%s3105_s1 + $0x360] sm:$0xff]  ;;  %v142_v41 = vld [vmem:[%s3105_s1 + $0x358] sm:$0xff]  ;;  %v141_v43 = vld [vmem:[%s3105_s1 + $0x350] sm:$0xff] }
  0x25   :  { %716 = vmatprep.subr.mxu1 %v160_v5  ;;  %646 = vmatpush2.msra.mxu0 %v95_v6  ;;  %v76_v44 = vld [vmem:[%s3105_s1 + $0x148] sm:$0xff]  ;;  %v75_v46 = vld [vmem:[%s3105_s1 + $0x140] sm:$0xff]  ;;  %v74_v48 = vld [vmem:[%s3105_s1 + $0x138] sm:$0xff] }
  0x26   :  { %717 = vmatpush2.msra.mxu1 %v159_v7  ;;  %647 = vmatprep.subr.mxu0 %v94_v8  ;;  %v140_v45 = vld [vmem:[%s3105_s1 + $0x348] sm:$0xff]  ;;  %v139_v47 = vld [vmem:[%s3105_s1 + $0x340] sm:$0xff]  ;;  %v138_v49 = vld [vmem:[%s3105_s1 + $0x338] sm:$0xff] }
  0x27   :  { %718 = vmatprep.subr.mxu1 %v158_v9  ;;  %648 = vmatpush2.msra.mxu0 %v93_v10  ;;  %v73_v50 = vld [vmem:[%s3105_s1 + $0x130] sm:$0xff]  ;;  %v72_v52 = vld [vmem:[%s3105_s1 + $0x128] sm:$0xff]  ;;  %v71_v54 = vld [vmem:[%s3105_s1 + $0x120] sm:$0xff] }
  0x28   :  { %719 = vmatpush2.msra.mxu1 %v157_v11  ;;  %649 = vmatprep.subr.mxu0 %v92_v12  ;;  %v137_v51 = vld [vmem:[%s3105_s1 + $0x330] sm:$0xff]  ;;  %v136_v53 = vld [vmem:[%s3105_s1 + $0x328] sm:$0xff]  ;;  %v135_v55 = vld [vmem:[%s3105_s1 + $0x320] sm:$0xff] }
  0x29   :  { %720 = vmatprep.subr.mxu1 %v156_v13  ;;  %650 = vmatpush2.msra.mxu0 %v91_v14  ;;  %v70_v56 = vld [vmem:[%s3105_s1 + $0x118] sm:$0xff]  ;;  %v69_v58 = vld [vmem:[%s3105_s1 + $0x110] sm:$0xff]  ;;  %v68_v60 = vld [vmem:[%s3105_s1 + $0x108] sm:$0xff] }
  0x2a   :  { %721 = vmatpush2.msra.mxu1 %v155_v15  ;;  %651 = vmatprep.subr.mxu0 %v90_v16  ;;  %v134_v57 = vld [vmem:[%s3105_s1 + $0x318] sm:$0xff]  ;;  %v133_v59 = vld [vmem:[%s3105_s1 + $0x310] sm:$0xff]  ;;  %v132_v61 = vld [vmem:[%s3105_s1 + $0x308] sm:$0xff] }
  0x2b   :  { %722 = vmatprep.subr.mxu1 %v154_v17  ;;  %652 = vmatpush2.msra.mxu0 %v89_v18  ;;  %v67_v62 = vld [vmem:[%s3105_s1 + $0x100] sm:$0xff]  ;;  %v18_v63 = vld [vmem:[%s3106_s0 + $0x8] sm:$0xff]  ;;  %v20_v1 = vld [vmem:[%s3106_s0 + $0x18] sm:$0xff] }
  0x2c   :  { %723 = vmatpush2.msra.mxu1 %v153_v19  ;;  %653 = vmatprep.subr.mxu0 %v88_v20  ;;  %v131_v0 = vld [vmem:[%s3105_s1 + $0x300] sm:$0xff]  ;;  %v19_v3 = vld [vmem:[%s3106_s0 + $0x10] sm:$0xff]  ;;  %v194_v4 = vld [vmem:[%s3105_s1 + $0x4f8] sm:$0xff] }
  0x2d   :  { %724 = vmatprep.subr.mxu1 %v152_v21  ;;  %654 = vmatpush2.msra.mxu0 %v87_v22  ;;  %v17_v2 = vld [vmem:[%s3106_s0] sm:$0xff]  ;;  %v258_v5 = vld [vmem:[%s3105_s1 + $0x6f8] sm:$0xff]  ;;  %v193_v6 = vld [vmem:[%s3105_s1 + $0x4f0] sm:$0xff] }
  0x2e   :  { %725 = vmatpush2.msra.mxu1 %v151_v23  ;;  %655 = vmatprep.subr.mxu0 %v86_v24  ;;  %v257_v7 = vld [vmem:[%s3105_s1 + $0x6f0] sm:$0xff]  ;;  %v192_v8 = vld [vmem:[%s3105_s1 + $0x4e8] sm:$0xff]  ;;  %v191_v10 = vld [vmem:[%s3105_s1 + $0x4e0] sm:$0xff] }
  0x2f   :  { %726 = vmatprep.subr.mxu1 %v150_v25  ;;  %656 = vmatpush2.msra.mxu0 %v85_v26  ;;  %v256_v9 = vld [vmem:[%s3105_s1 + $0x6e8] sm:$0xff]  ;;  %v255_v11 = vld [vmem:[%s3105_s1 + $0x6e0] sm:$0xff]  ;;  %v190_v12 = vld [vmem:[%s3105_s1 + $0x4d8] sm:$0xff] }
  0x30   :  { %727 = vmatpush2.msra.mxu1 %v149_v27  ;;  %657 = vmatprep.subr.mxu0 %v84_v28  ;;  %v254_v13 = vld [vmem:[%s3105_s1 + $0x6d8] sm:$0xff]  ;;  %v189_v14 = vld [vmem:[%s3105_s1 + $0x4d0] sm:$0xff]  ;;  %v188_v16 = vld [vmem:[%s3105_s1 + $0x4c8] sm:$0xff] }
  0x31   :  { %728 = vmatprep.subr.mxu1 %v148_v29  ;;  %658 = vmatpush2.msra.mxu0 %v83_v30  ;;  %v253_v15 = vld [vmem:[%s3105_s1 + $0x6d0] sm:$0xff]  ;;  %v252_v17 = vld [vmem:[%s3105_s1 + $0x6c8] sm:$0xff]  ;;  %v187_v18 = vld [vmem:[%s3105_s1 + $0x4c0] sm:$0xff] }
  0x32   :  { %729 = vmatpush2.msra.mxu1 %v147_v31  ;;  %659 = vmatprep.subr.mxu0 %v82_v32  ;;  %v251_v19 = vld [vmem:[%s3105_s1 + $0x6c0] sm:$0xff]  ;;  %v186_v20 = vld [vmem:[%s3105_s1 + $0x4b8] sm:$0xff]  ;;  %v185_v22 = vld [vmem:[%s3105_s1 + $0x4b0] sm:$0xff] }
  0x33   :  { %730 = vmatprep.subr.mxu1 %v146_v33  ;;  %660 = vmatpush2.msra.mxu0 %v81_v34  ;;  %v250_v21 = vld [vmem:[%s3105_s1 + $0x6b8] sm:$0xff]  ;;  %v249_v23 = vld [vmem:[%s3105_s1 + $0x6b0] sm:$0xff]  ;;  %v184_v24 = vld [vmem:[%s3105_s1 + $0x4a8] sm:$0xff] }
  0x34   :  { %731 = vmatpush2.msra.mxu1 %v145_v35  ;;  %661 = vmatprep.subr.mxu0 %v80_v36  ;;  %v248_v25 = vld [vmem:[%s3105_s1 + $0x6a8] sm:$0xff]  ;;  %v183_v26 = vld [vmem:[%s3105_s1 + $0x4a0] sm:$0xff]  ;;  %v182_v28 = vld [vmem:[%s3105_s1 + $0x498] sm:$0xff] }
  0x35   :  { %732 = vmatprep.subr.mxu1 %v144_v37  ;;  %662 = vmatpush2.msra.mxu0 %v79_v38  ;;  %v247_v27 = vld [vmem:[%s3105_s1 + $0x6a0] sm:$0xff]  ;;  %v246_v29 = vld [vmem:[%s3105_s1 + $0x698] sm:$0xff]  ;;  %v181_v30 = vld [vmem:[%s3105_s1 + $0x490] sm:$0xff] }
  0x36   :  { %733 = vmatpush2.msra.mxu1 %v143_v39  ;;  %663 = vmatprep.subr.mxu0 %v78_v40  ;;  %v245_v31 = vld [vmem:[%s3105_s1 + $0x690] sm:$0xff]  ;;  %v180_v32 = vld [vmem:[%s3105_s1 + $0x488] sm:$0xff]  ;;  %v179_v34 = vld [vmem:[%s3105_s1 + $0x480] sm:$0xff] }
  0x37   :  { %734 = vmatprep.subr.mxu1 %v142_v41  ;;  %664 = vmatpush2.msra.mxu0 %v77_v42  ;;  %v244_v33 = vld [vmem:[%s3105_s1 + $0x688] sm:$0xff]  ;;  %v243_v35 = vld [vmem:[%s3105_s1 + $0x680] sm:$0xff]  ;;  %v178_v36 = vld [vmem:[%s3105_s1 + $0x478] sm:$0xff] }
  0x38   :  { %735 = vmatpush2.msra.mxu1 %v141_v43  ;;  %665 = vmatprep.subr.mxu0 %v76_v44  ;;  %v242_v37 = vld [vmem:[%s3105_s1 + $0x678] sm:$0xff]  ;;  %v177_v38 = vld [vmem:[%s3105_s1 + $0x470] sm:$0xff]  ;;  %v176_v40 = vld [vmem:[%s3105_s1 + $0x468] sm:$0xff] }
  0x39   :  { %736 = vmatprep.subr.mxu1 %v140_v45  ;;  %666 = vmatpush2.msra.mxu0 %v75_v46  ;;  %v241_v39 = vld [vmem:[%s3105_s1 + $0x670] sm:$0xff]  ;;  %v240_v41 = vld [vmem:[%s3105_s1 + $0x668] sm:$0xff]  ;;  %v175_v42 = vld [vmem:[%s3105_s1 + $0x460] sm:$0xff] }
  0x3a   :  { %737 = vmatpush2.msra.mxu1 %v139_v47  ;;  %667 = vmatprep.subr.mxu0 %v74_v48  ;;  %v239_v43 = vld [vmem:[%s3105_s1 + $0x660] sm:$0xff]  ;;  %v174_v44 = vld [vmem:[%s3105_s1 + $0x458] sm:$0xff]  ;;  %v173_v46 = vld [vmem:[%s3105_s1 + $0x450] sm:$0xff] }
  0x3b   :  { %738 = vmatprep.subr.mxu1 %v138_v49  ;;  %668 = vmatpush2.msra.mxu0 %v73_v50  ;;  %v238_v45 = vld [vmem:[%s3105_s1 + $0x658] sm:$0xff]  ;;  %v237_v47 = vld [vmem:[%s3105_s1 + $0x650] sm:$0xff]  ;;  %v172_v48 = vld [vmem:[%s3105_s1 + $0x448] sm:$0xff] }
  0x3c   :  { %739 = vmatpush2.msra.mxu1 %v137_v51  ;;  %669 = vmatprep.subr.mxu0 %v72_v52  ;;  %v236_v49 = vld [vmem:[%s3105_s1 + $0x648] sm:$0xff]  ;;  %v171_v50 = vld [vmem:[%s3105_s1 + $0x440] sm:$0xff]  ;;  %v170_v52 = vld [vmem:[%s3105_s1 + $0x438] sm:$0xff] }
  0x3d   :  { %740 = vmatprep.subr.mxu1 %v136_v53  ;;  %670 = vmatpush2.msra.mxu0 %v71_v54  ;;  %v235_v51 = vld [vmem:[%s3105_s1 + $0x640] sm:$0xff]  ;;  %v234_v53 = vld [vmem:[%s3105_s1 + $0x638] sm:$0xff]  ;;  %v169_v54 = vld [vmem:[%s3105_s1 + $0x430] sm:$0xff] }
  0x3e   :  { %741 = vmatpush2.msra.mxu1 %v135_v55  ;;  %671 = vmatprep.subr.mxu0 %v70_v56  ;;  %v233_v55 = vld [vmem:[%s3105_s1 + $0x630] sm:$0xff]  ;;  %v168_v56 = vld [vmem:[%s3105_s1 + $0x428] sm:$0xff] }
  0x3f   :  { %742 = vmatprep.subr.mxu1 %v134_v57  ;;  %672 = vmatpush2.msra.mxu0 %v69_v58  ;;  %v232_v57 = vld [vmem:[%s3105_s1 + $0x628] sm:$0xff]  ;;  %v167_v58 = vld [vmem:[%s3105_s1 + $0x420] sm:$0xff] }
  0x40   :  { %743 = vmatpush2.msra.mxu1 %v133_v59  ;;  %673 = vmatprep.subr.mxu0 %v68_v60  ;;  %v231_v59 = vld [vmem:[%s3105_s1 + $0x620] sm:$0xff]  ;;  %v166_v60 = vld [vmem:[%s3105_s1 + $0x418] sm:$0xff] }
  0x41   :  { %744 = vmatprep.subr.mxu1 %v132_v61  ;;  %674 = vmatpush2.msra.mxu0 %v67_v62  ;;  %v230_v61 = vld [vmem:[%s3105_s1 + $0x618] sm:$0xff]  ;;  %v165_v62 = vld [vmem:[%s3105_s1 + $0x410] sm:$0xff] }
  0x42   :  { %675 = vmatprep.mubr.f32.mxu0 %v18_v63  ;;  %745 = vmatpush2.msra.mxu1 %v131_v0  ;;  %v229_v63 = vld [vmem:[%s3105_s1 + $0x610] sm:$0xff]  ;;  %v164_v0 = vld [vmem:[%s3105_s1 + $0x408] sm:$0xff] }
  0x43   :  { %746 = vmatprep.mubr.f32.mxu1 %v20_v1  ;;  %676 = vmatmul.mubr.f32.vlgmr.msra.gmra.mxu0 %v17_v2  ;;  %v228_v1 = vld [vmem:[%s3105_s1 + $0x608] sm:$0xff]  ;;  %v163_v2 = vld [vmem:[%s3105_s1 + $0x400] sm:$0xff] }
  0x44   :  { %747 = vmatmul.mubr.f32.vlgmr.msra.gmra.mxu1 %v19_v3  ;;  %753 = vmatprep.subr.mxu0 %v194_v4  ;;  %v227_v3 = vld [vmem:[%s3105_s1 + $0x600] sm:$0xff]  ;;  %v226_v4 = vld [vmem:[%s3105_s1 + $0x5f8] sm:$0xff] }
  0x45   :  { %824 = vmatprep.subr.mxu1 %v258_v5  ;;  %754 = vmatpush1.msra.mxu0 %v193_v6  ;;  %v290_v5 = vld [vmem:[%s3105_s1 + $0x7f8] sm:$0xff]  ;;  %v225_v6 = vld [vmem:[%s3105_s1 + $0x5f0] sm:$0xff] }
  0x46   :  { %825 = vmatpush1.msra.mxu1 %v257_v7  ;;  %755 = vmatprep.subr.mxu0 %v192_v8  ;;  %v289_v7 = vld [vmem:[%s3105_s1 + $0x7f0] sm:$0xff]  ;;  %v224_v8 = vld [vmem:[%s3105_s1 + $0x5e8] sm:$0xff] }
  0x47   :  { %826 = vmatprep.subr.mxu1 %v256_v9  ;;  %756 = vmatpush1.msra.mxu0 %v191_v10  ;;  %v288_v9 = vld [vmem:[%s3105_s1 + $0x7e8] sm:$0xff]  ;;  %v223_v10 = vld [vmem:[%s3105_s1 + $0x5e0] sm:$0xff] }
  0x48   :  { %827 = vmatpush1.msra.mxu1 %v255_v11  ;;  %757 = vmatprep.subr.mxu0 %v190_v12  ;;  %v287_v11 = vld [vmem:[%s3105_s1 + $0x7e0] sm:$0xff]  ;;  %v222_v12 = vld [vmem:[%s3105_s1 + $0x5d8] sm:$0xff] }
  0x49   :  { %828 = vmatprep.subr.mxu1 %v254_v13  ;;  %758 = vmatpush1.msra.mxu0 %v189_v14  ;;  %v286_v13 = vld [vmem:[%s3105_s1 + $0x7d8] sm:$0xff]  ;;  %v221_v14 = vld [vmem:[%s3105_s1 + $0x5d0] sm:$0xff] }
  0x4a   :  { %829 = vmatpush1.msra.mxu1 %v253_v15  ;;  %759 = vmatprep.subr.mxu0 %v188_v16  ;;  %v285_v15 = vld [vmem:[%s3105_s1 + $0x7d0] sm:$0xff]  ;;  %v220_v16 = vld [vmem:[%s3105_s1 + $0x5c8] sm:$0xff] }
  0x4b   :  { %830 = vmatprep.subr.mxu1 %v252_v17  ;;  %760 = vmatpush1.msra.mxu0 %v187_v18  ;;  %v284_v17 = vld [vmem:[%s3105_s1 + $0x7c8] sm:$0xff]  ;;  %v219_v18 = vld [vmem:[%s3105_s1 + $0x5c0] sm:$0xff] }
  0x4c   :  { %831 = vmatpush1.msra.mxu1 %v251_v19  ;;  %761 = vmatprep.subr.mxu0 %v186_v20  ;;  %v283_v19 = vld [vmem:[%s3105_s1 + $0x7c0] sm:$0xff]  ;;  %v218_v20 = vld [vmem:[%s3105_s1 + $0x5b8] sm:$0xff] }
  0x4d   :  { %832 = vmatprep.subr.mxu1 %v250_v21  ;;  %762 = vmatpush1.msra.mxu0 %v185_v22  ;;  %v282_v21 = vld [vmem:[%s3105_s1 + $0x7b8] sm:$0xff]  ;;  %v217_v22 = vld [vmem:[%s3105_s1 + $0x5b0] sm:$0xff] }
  0x4e   :  { %833 = vmatpush1.msra.mxu1 %v249_v23  ;;  %763 = vmatprep.subr.mxu0 %v184_v24  ;;  %v281_v23 = vld [vmem:[%s3105_s1 + $0x7b0] sm:$0xff]  ;;  %v216_v24 = vld [vmem:[%s3105_s1 + $0x5a8] sm:$0xff] }
  0x4f   :  { %834 = vmatprep.subr.mxu1 %v248_v25  ;;  %764 = vmatpush1.msra.mxu0 %v183_v26  ;;  %v280_v25 = vld [vmem:[%s3105_s1 + $0x7a8] sm:$0xff]  ;;  %v215_v26 = vld [vmem:[%s3105_s1 + $0x5a0] sm:$0xff] }
  0x50   :  { %835 = vmatpush1.msra.mxu1 %v247_v27  ;;  %765 = vmatprep.subr.mxu0 %v182_v28  ;;  %v279_v27 = vld [vmem:[%s3105_s1 + $0x7a0] sm:$0xff]  ;;  %v214_v28 = vld [vmem:[%s3105_s1 + $0x598] sm:$0xff] }
  0x51   :  { %836 = vmatprep.subr.mxu1 %v246_v29  ;;  %766 = vmatpush1.msra.mxu0 %v181_v30  ;;  %v278_v29 = vld [vmem:[%s3105_s1 + $0x798] sm:$0xff]  ;;  %v213_v30 = vld [vmem:[%s3105_s1 + $0x590] sm:$0xff] }
  0x52   :  { %837 = vmatpush1.msra.mxu1 %v245_v31  ;;  %767 = vmatprep.subr.mxu0 %v180_v32  ;;  %v277_v31 = vld [vmem:[%s3105_s1 + $0x790] sm:$0xff]  ;;  %v212_v32 = vld [vmem:[%s3105_s1 + $0x588] sm:$0xff] }
  0x53   :  { %838 = vmatprep.subr.mxu1 %v244_v33  ;;  %768 = vmatpush1.msra.mxu0 %v179_v34  ;;  %v276_v33 = vld [vmem:[%s3105_s1 + $0x788] sm:$0xff]  ;;  %v211_v34 = vld [vmem:[%s3105_s1 + $0x580] sm:$0xff] }
  0x54   :  { %839 = vmatpush1.msra.mxu1 %v243_v35  ;;  %769 = vmatprep.subr.mxu0 %v178_v36  ;;  %v275_v35 = vld [vmem:[%s3105_s1 + $0x780] sm:$0xff]  ;;  %v210_v36 = vld [vmem:[%s3105_s1 + $0x578] sm:$0xff] }
  0x55   :  { %840 = vmatprep.subr.mxu1 %v242_v37  ;;  %770 = vmatpush1.msra.mxu0 %v177_v38  ;;  %v274_v37 = vld [vmem:[%s3105_s1 + $0x778] sm:$0xff]  ;;  %v209_v38 = vld [vmem:[%s3105_s1 + $0x570] sm:$0xff] }
  0x56   :  { %841 = vmatpush1.msra.mxu1 %v241_v39  ;;  %771 = vmatprep.subr.mxu0 %v176_v40  ;;  %v273_v39 = vld [vmem:[%s3105_s1 + $0x770] sm:$0xff]  ;;  %v208_v40 = vld [vmem:[%s3105_s1 + $0x568] sm:$0xff] }
  0x57   :  { %842 = vmatprep.subr.mxu1 %v240_v41  ;;  %772 = vmatpush1.msra.mxu0 %v175_v42  ;;  %v272_v41 = vld [vmem:[%s3105_s1 + $0x768] sm:$0xff]  ;;  %v207_v42 = vld [vmem:[%s3105_s1 + $0x560] sm:$0xff] }
  0x58   :  { %843 = vmatpush1.msra.mxu1 %v239_v43  ;;  %773 = vmatprep.subr.mxu0 %v174_v44  ;;  %v271_v43 = vld [vmem:[%s3105_s1 + $0x760] sm:$0xff]  ;;  %v206_v44 = vld [vmem:[%s3105_s1 + $0x558] sm:$0xff] }
  0x59   :  { %844 = vmatprep.subr.mxu1 %v238_v45  ;;  %774 = vmatpush1.msra.mxu0 %v173_v46  ;;  %v270_v45 = vld [vmem:[%s3105_s1 + $0x758] sm:$0xff]  ;;  %v205_v46 = vld [vmem:[%s3105_s1 + $0x550] sm:$0xff] }
  0x5a   :  { %845 = vmatpush1.msra.mxu1 %v237_v47  ;;  %775 = vmatprep.subr.mxu0 %v172_v48  ;;  %v269_v47 = vld [vmem:[%s3105_s1 + $0x750] sm:$0xff]  ;;  %v204_v48 = vld [vmem:[%s3105_s1 + $0x548] sm:$0xff] }
  0x5b   :  { %846 = vmatprep.subr.mxu1 %v236_v49  ;;  %776 = vmatpush1.msra.mxu0 %v171_v50  ;;  %v268_v49 = vld [vmem:[%s3105_s1 + $0x748] sm:$0xff]  ;;  %v203_v50 = vld [vmem:[%s3105_s1 + $0x540] sm:$0xff] }
  0x5c   :  { %847 = vmatpush1.msra.mxu1 %v235_v51  ;;  %777 = vmatprep.subr.mxu0 %v170_v52  ;;  %v267_v51 = vld [vmem:[%s3105_s1 + $0x740] sm:$0xff]  ;;  %v202_v52 = vld [vmem:[%s3105_s1 + $0x538] sm:$0xff] }
  0x5d   :  { %848 = vmatprep.subr.mxu1 %v234_v53  ;;  %778 = vmatpush1.msra.mxu0 %v169_v54  ;;  %v266_v53 = vld [vmem:[%s3105_s1 + $0x738] sm:$0xff]  ;;  %v201_v54 = vld [vmem:[%s3105_s1 + $0x530] sm:$0xff] }
  0x5e   :  { %849 = vmatpush1.msra.mxu1 %v233_v55  ;;  %779 = vmatprep.subr.mxu0 %v168_v56  ;;  %v265_v55 = vld [vmem:[%s3105_s1 + $0x730] sm:$0xff]  ;;  %v200_v56 = vld [vmem:[%s3105_s1 + $0x528] sm:$0xff] }
  0x5f   :  { %850 = vmatprep.subr.mxu1 %v232_v57  ;;  %780 = vmatpush1.msra.mxu0 %v167_v58  ;;  %v264_v57 = vld [vmem:[%s3105_s1 + $0x728] sm:$0xff]  ;;  %v199_v58 = vld [vmem:[%s3105_s1 + $0x520] sm:$0xff] }
  0x60   :  { %851 = vmatpush1.msra.mxu1 %v231_v59  ;;  %781 = vmatprep.subr.mxu0 %v166_v60  ;;  %v263_v59 = vld [vmem:[%s3105_s1 + $0x720] sm:$0xff]  ;;  %v198_v60 = vld [vmem:[%s3105_s1 + $0x518] sm:$0xff] }
  0x61   :  { %852 = vmatprep.subr.mxu1 %v230_v61  ;;  %782 = vmatpush1.msra.mxu0 %v165_v62  ;;  %v262_v61 = vld [vmem:[%s3105_s1 + $0x718] sm:$0xff]  ;;  %v197_v62 = vld [vmem:[%s3105_s1 + $0x510] sm:$0xff] }
  0x62   :  { %853 = vmatpush1.msra.mxu1 %v229_v63  ;;  %783 = vmatprep.subr.mxu0 %v164_v0  ;;  %v22_v63 = vld [vmem:[%s3106_s0 + $0x28] sm:$0xff] }
  0x63   :  { %854 = vmatprep.subr.mxu1 %v228_v1  ;;  %784 = vmatpush1.msra.mxu0 %v163_v2  ;;  %v196_v0 = vld [vmem:[%s3105_s1 + $0x508] sm:$0xff]  ;;  %v261_v1 = vld [vmem:[%s3105_s1 + $0x710] sm:$0xff]  ;;  %v195_v2 = vld [vmem:[%s3105_s1 + $0x500] sm:$0xff] }
  0x64   :  { %855 = vmatpush1.msra.mxu1 %v227_v3  ;;  %785 = vmatprep.subr.mxu0 %v226_v4  ;;  %v260_v3 = vld [vmem:[%s3105_s1 + $0x708] sm:$0xff]  ;;  %v21_v4 = vld [vmem:[%s3106_s0 + $0x20] sm:$0xff] }
  0x65   :  { %856 = vmatprep.subr.mxu1 %v290_v5  ;;  %786 = vmatpush2.msra.mxu0 %v225_v6  ;;  %v322_v5 = vld [vmem:[%s3105_s1 + $0x8f8] sm:$0xff]  ;;  %v259_v6 = vld [vmem:[%s3105_s1 + $0x700] sm:$0xff] }
  0x66   :  { %857 = vmatpush2.msra.mxu1 %v289_v7  ;;  %787 = vmatprep.subr.mxu0 %v224_v8  ;;  %v24_v7 = vld [vmem:[%s3106_s0 + $0x38] sm:$0xff]  ;;  %v321_v8 = vld [vmem:[%s3105_s1 + $0x8f0] sm:$0xff] }
  0x67   :  { %858 = vmatprep.subr.mxu1 %v288_v9  ;;  %788 = vmatpush2.msra.mxu0 %v223_v10  ;;  %v23_v9 = vld [vmem:[%s3106_s0 + $0x30] sm:$0xff]  ;;  %v320_v10 = vld [vmem:[%s3105_s1 + $0x8e8] sm:$0xff] }
  0x68   :  { %859 = vmatpush2.msra.mxu1 %v287_v11  ;;  %789 = vmatprep.subr.mxu0 %v222_v12  ;;  %v386_v11 = vld [vmem:[%s3105_s1 + $0xaf8] sm:$0xff]  ;;  %v319_v12 = vld [vmem:[%s3105_s1 + $0x8e0] sm:$0xff] }
  0x69   :  { %860 = vmatprep.subr.mxu1 %v286_v13  ;;  %790 = vmatpush2.msra.mxu0 %v221_v14  ;;  %v385_v13 = vld [vmem:[%s3105_s1 + $0xaf0] sm:$0xff]  ;;  %v318_v14 = vld [vmem:[%s3105_s1 + $0x8d8] sm:$0xff] }
  0x6a   :  { %861 = vmatpush2.msra.mxu1 %v285_v15  ;;  %791 = vmatprep.subr.mxu0 %v220_v16  ;;  %v384_v15 = vld [vmem:[%s3105_s1 + $0xae8] sm:$0xff]  ;;  %v317_v16 = vld [vmem:[%s3105_s1 + $0x8d0] sm:$0xff] }
  0x6b   :  { %862 = vmatprep.subr.mxu1 %v284_v17  ;;  %792 = vmatpush2.msra.mxu0 %v219_v18  ;;  %v383_v17 = vld [vmem:[%s3105_s1 + $0xae0] sm:$0xff]  ;;  %v316_v18 = vld [vmem:[%s3105_s1 + $0x8c8] sm:$0xff] }
  0x6c   :  { %863 = vmatpush2.msra.mxu1 %v283_v19  ;;  %793 = vmatprep.subr.mxu0 %v218_v20  ;;  %v382_v19 = vld [vmem:[%s3105_s1 + $0xad8] sm:$0xff]  ;;  %v315_v20 = vld [vmem:[%s3105_s1 + $0x8c0] sm:$0xff] }
  0x6d   :  { %864 = vmatprep.subr.mxu1 %v282_v21  ;;  %794 = vmatpush2.msra.mxu0 %v217_v22  ;;  %v381_v21 = vld [vmem:[%s3105_s1 + $0xad0] sm:$0xff]  ;;  %v314_v22 = vld [vmem:[%s3105_s1 + $0x8b8] sm:$0xff] }
  0x6e   :  { %865 = vmatpush2.msra.mxu1 %v281_v23  ;;  %795 = vmatprep.subr.mxu0 %v216_v24  ;;  %v380_v23 = vld [vmem:[%s3105_s1 + $0xac8] sm:$0xff]  ;;  %v313_v24 = vld [vmem:[%s3105_s1 + $0x8b0] sm:$0xff] }
  0x6f   :  { %866 = vmatprep.subr.mxu1 %v280_v25  ;;  %796 = vmatpush2.msra.mxu0 %v215_v26  ;;  %v379_v25 = vld [vmem:[%s3105_s1 + $0xac0] sm:$0xff]  ;;  %v312_v26 = vld [vmem:[%s3105_s1 + $0x8a8] sm:$0xff] }
  0x70   :  { %867 = vmatpush2.msra.mxu1 %v279_v27  ;;  %797 = vmatprep.subr.mxu0 %v214_v28  ;;  %v378_v27 = vld [vmem:[%s3105_s1 + $0xab8] sm:$0xff]  ;;  %v311_v28 = vld [vmem:[%s3105_s1 + $0x8a0] sm:$0xff] }
  0x71   :  { %868 = vmatprep.subr.mxu1 %v278_v29  ;;  %798 = vmatpush2.msra.mxu0 %v213_v30  ;;  %v377_v29 = vld [vmem:[%s3105_s1 + $0xab0] sm:$0xff]  ;;  %v310_v30 = vld [vmem:[%s3105_s1 + $0x898] sm:$0xff] }
  0x72   :  { %869 = vmatpush2.msra.mxu1 %v277_v31  ;;  %799 = vmatprep.subr.mxu0 %v212_v32  ;;  %v376_v31 = vld [vmem:[%s3105_s1 + $0xaa8] sm:$0xff]  ;;  %v309_v32 = vld [vmem:[%s3105_s1 + $0x890] sm:$0xff] }
  0x73   :  { %870 = vmatprep.subr.mxu1 %v276_v33  ;;  %800 = vmatpush2.msra.mxu0 %v211_v34  ;;  %v375_v33 = vld [vmem:[%s3105_s1 + $0xaa0] sm:$0xff]  ;;  %v308_v34 = vld [vmem:[%s3105_s1 + $0x888] sm:$0xff] }
  0x74   :  { %871 = vmatpush2.msra.mxu1 %v275_v35  ;;  %801 = vmatprep.subr.mxu0 %v210_v36  ;;  %v374_v35 = vld [vmem:[%s3105_s1 + $0xa98] sm:$0xff]  ;;  %v307_v36 = vld [vmem:[%s3105_s1 + $0x880] sm:$0xff] }
  0x75   :  { %872 = vmatprep.subr.mxu1 %v274_v37  ;;  %802 = vmatpush2.msra.mxu0 %v209_v38  ;;  %v373_v37 = vld [vmem:[%s3105_s1 + $0xa90] sm:$0xff]  ;;  %v306_v38 = vld [vmem:[%s3105_s1 + $0x878] sm:$0xff] }
  0x76   :  { %873 = vmatpush2.msra.mxu1 %v273_v39  ;;  %803 = vmatprep.subr.mxu0 %v208_v40  ;;  %v372_v39 = vld [vmem:[%s3105_s1 + $0xa88] sm:$0xff]  ;;  %v305_v40 = vld [vmem:[%s3105_s1 + $0x870] sm:$0xff] }
  0x77   :  { %874 = vmatprep.subr.mxu1 %v272_v41  ;;  %804 = vmatpush2.msra.mxu0 %v207_v42  ;;  %v371_v41 = vld [vmem:[%s3105_s1 + $0xa80] sm:$0xff]  ;;  %v304_v42 = vld [vmem:[%s3105_s1 + $0x868] sm:$0xff] }
  0x78   :  { %875 = vmatpush2.msra.mxu1 %v271_v43  ;;  %805 = vmatprep.subr.mxu0 %v206_v44  ;;  %v370_v43 = vld [vmem:[%s3105_s1 + $0xa78] sm:$0xff]  ;;  %v303_v44 = vld [vmem:[%s3105_s1 + $0x860] sm:$0xff] }
  0x79   :  { %876 = vmatprep.subr.mxu1 %v270_v45  ;;  %806 = vmatpush2.msra.mxu0 %v205_v46  ;;  %v369_v45 = vld [vmem:[%s3105_s1 + $0xa70] sm:$0xff]  ;;  %v302_v46 = vld [vmem:[%s3105_s1 + $0x858] sm:$0xff] }
  0x7a   :  { %877 = vmatpush2.msra.mxu1 %v269_v47  ;;  %807 = vmatprep.subr.mxu0 %v204_v48  ;;  %v368_v47 = vld [vmem:[%s3105_s1 + $0xa68] sm:$0xff]  ;;  %v301_v48 = vld [vmem:[%s3105_s1 + $0x850] sm:$0xff] }
  0x7b   :  { %878 = vmatprep.subr.mxu1 %v268_v49  ;;  %808 = vmatpush2.msra.mxu0 %v203_v50  ;;  %v367_v49 = vld [vmem:[%s3105_s1 + $0xa60] sm:$0xff]  ;;  %v300_v50 = vld [vmem:[%s3105_s1 + $0x848] sm:$0xff] }
  0x7c   :  { %879 = vmatpush2.msra.mxu1 %v267_v51  ;;  %809 = vmatprep.subr.mxu0 %v202_v52  ;;  %v366_v51 = vld [vmem:[%s3105_s1 + $0xa58] sm:$0xff]  ;;  %v299_v52 = vld [vmem:[%s3105_s1 + $0x840] sm:$0xff] }
  0x7d   :  { %880 = vmatprep.subr.mxu1 %v266_v53  ;;  %810 = vmatpush2.msra.mxu0 %v201_v54  ;;  %v365_v53 = vld [vmem:[%s3105_s1 + $0xa50] sm:$0xff]  ;;  %v298_v54 = vld [vmem:[%s3105_s1 + $0x838] sm:$0xff] }
  0x7e   :  { %881 = vmatpush2.msra.mxu1 %v265_v55  ;;  %811 = vmatprep.subr.mxu0 %v200_v56  ;;  %v364_v55 = vld [vmem:[%s3105_s1 + $0xa48] sm:$0xff]  ;;  %v297_v56 = vld [vmem:[%s3105_s1 + $0x830] sm:$0xff] }
  0x7f   :  { %882 = vmatprep.subr.mxu1 %v264_v57  ;;  %812 = vmatpush2.msra.mxu0 %v199_v58  ;;  %v363_v57 = vld [vmem:[%s3105_s1 + $0xa40] sm:$0xff]  ;;  %v296_v58 = vld [vmem:[%s3105_s1 + $0x828] sm:$0xff] }
  0x80   :  { %883 = vmatpush2.msra.mxu1 %v263_v59  ;;  %813 = vmatprep.subr.mxu0 %v198_v60  ;;  %v362_v59 = vld [vmem:[%s3105_s1 + $0xa38] sm:$0xff]  ;;  %v295_v60 = vld [vmem:[%s3105_s1 + $0x820] sm:$0xff] }
  0x81   :  { %884 = vmatprep.subr.mxu1 %v262_v61  ;;  %814 = vmatpush2.msra.mxu0 %v197_v62  ;;  %v361_v61 = vld [vmem:[%s3105_s1 + $0xa30] sm:$0xff]  ;;  %v294_v62 = vld [vmem:[%s3105_s1 + $0x818] sm:$0xff] }
  0x82   :  { %817 = vmatprep.mubr.f32.mxu0 %v22_v63  ;;  %815 = vmatprep.subr.mxu0 %v196_v0  ;;  %v360_v63 = vld [vmem:[%s3105_s1 + $0xa28] sm:$0xff]  ;;  %v293_v0 = vld [vmem:[%s3105_s1 + $0x810] sm:$0xff] }
  0x83   :  { %885 = vmatpush2.msra.mxu1 %v261_v1  ;;  %816 = vmatpush2.msra.mxu0 %v195_v2  ;;  %v359_v1 = vld [vmem:[%s3105_s1 + $0xa20] sm:$0xff]  ;;  %v292_v2 = vld [vmem:[%s3105_s1 + $0x808] sm:$0xff] }
  0x84   :  { %886 = vmatprep.subr.mxu1 %v260_v3  ;;  %818 = vmatmul.mubr.f32.vlgmr.msra.gmra.mxu0 %v21_v4  ;;  %v358_v3 = vld [vmem:[%s3105_s1 + $0xa18] sm:$0xff]  ;;  %v291_v4 = vld [vmem:[%s3105_s1 + $0x800] sm:$0xff] }
  0x85   :  { %895 = vmatprep.subr.mxu0 %v322_v5  ;;  %887 = vmatpush2.msra.mxu1 %v259_v6  ;;  %v357_v5 = vld [vmem:[%s3105_s1 + $0xa10] sm:$0xff]  ;;  %v354_v6 = vld [vmem:[%s3105_s1 + $0x9f8] sm:$0xff] }
  0x86   :  { %888 = vmatprep.mubr.f32.mxu1 %v24_v7  ;;  %896 = vmatpush1.msra.mxu0 %v321_v8  ;;  %v356_v7 = vld [vmem:[%s3105_s1 + $0xa08] sm:$0xff]  ;;  %v353_v8 = vld [vmem:[%s3105_s1 + $0x9f0] sm:$0xff] }
  0x87   :  { %889 = vmatmul.mubr.f32.vlgmr.msra.gmra.mxu1 %v23_v9  ;;  %897 = vmatprep.subr.mxu0 %v320_v10  ;;  %v355_v9 = vld [vmem:[%s3105_s1 + $0xa00] sm:$0xff]  ;;  %v352_v10 = vld [vmem:[%s3105_s1 + $0x9e8] sm:$0xff] }
  0x88   :  { %966 = vmatprep.subr.mxu1 %v386_v11  ;;  %898 = vmatpush1.msra.mxu0 %v319_v12  ;;  %v418_v11 = vld [vmem:[%s3105_s1 + $0xbf8] sm:$0xff]  ;;  %v351_v12 = vld [vmem:[%s3105_s1 + $0x9e0] sm:$0xff] }
  0x89   :  { %967 = vmatpush1.msra.mxu1 %v385_v13  ;;  %899 = vmatprep.subr.mxu0 %v318_v14  ;;  %v417_v13 = vld [vmem:[%s3105_s1 + $0xbf0] sm:$0xff]  ;;  %v350_v14 = vld [vmem:[%s3105_s1 + $0x9d8] sm:$0xff] }
  0x8a   :  { %968 = vmatprep.subr.mxu1 %v384_v15  ;;  %900 = vmatpush1.msra.mxu0 %v317_v16  ;;  %v416_v15 = vld [vmem:[%s3105_s1 + $0xbe8] sm:$0xff]  ;;  %v349_v16 = vld [vmem:[%s3105_s1 + $0x9d0] sm:$0xff] }
  0x8b   :  { %969 = vmatpush1.msra.mxu1 %v383_v17  ;;  %901 = vmatprep.subr.mxu0 %v316_v18  ;;  %v415_v17 = vld [vmem:[%s3105_s1 + $0xbe0] sm:$0xff]  ;;  %v348_v18 = vld [vmem:[%s3105_s1 + $0x9c8] sm:$0xff] }
  0x8c   :  { %970 = vmatprep.subr.mxu1 %v382_v19  ;;  %902 = vmatpush1.msra.mxu0 %v315_v20  ;;  %v414_v19 = vld [vmem:[%s3105_s1 + $0xbd8] sm:$0xff]  ;;  %v347_v20 = vld [vmem:[%s3105_s1 + $0x9c0] sm:$0xff] }
  0x8d   :  { %971 = vmatpush1.msra.mxu1 %v381_v21  ;;  %903 = vmatprep.subr.mxu0 %v314_v22  ;;  %v413_v21 = vld [vmem:[%s3105_s1 + $0xbd0] sm:$0xff]  ;;  %v346_v22 = vld [vmem:[%s3105_s1 + $0x9b8] sm:$0xff] }
  0x8e   :  { %972 = vmatprep.subr.mxu1 %v380_v23  ;;  %904 = vmatpush1.msra.mxu0 %v313_v24  ;;  %v412_v23 = vld [vmem:[%s3105_s1 + $0xbc8] sm:$0xff]  ;;  %v345_v24 = vld [vmem:[%s3105_s1 + $0x9b0] sm:$0xff] }
  0x8f   :  { %973 = vmatpush1.msra.mxu1 %v379_v25  ;;  %905 = vmatprep.subr.mxu0 %v312_v26  ;;  %v411_v25 = vld [vmem:[%s3105_s1 + $0xbc0] sm:$0xff]  ;;  %v344_v26 = vld [vmem:[%s3105_s1 + $0x9a8] sm:$0xff] }
  0x90   :  { %974 = vmatprep.subr.mxu1 %v378_v27  ;;  %906 = vmatpush1.msra.mxu0 %v311_v28  ;;  %v410_v27 = vld [vmem:[%s3105_s1 + $0xbb8] sm:$0xff]  ;;  %v343_v28 = vld [vmem:[%s3105_s1 + $0x9a0] sm:$0xff] }
  0x91   :  { %975 = vmatpush1.msra.mxu1 %v377_v29  ;;  %907 = vmatprep.subr.mxu0 %v310_v30  ;;  %v409_v29 = vld [vmem:[%s3105_s1 + $0xbb0] sm:$0xff]  ;;  %v342_v30 = vld [vmem:[%s3105_s1 + $0x998] sm:$0xff] }
  0x92   :  { %976 = vmatprep.subr.mxu1 %v376_v31  ;;  %908 = vmatpush1.msra.mxu0 %v309_v32  ;;  %v408_v31 = vld [vmem:[%s3105_s1 + $0xba8] sm:$0xff]  ;;  %v341_v32 = vld [vmem:[%s3105_s1 + $0x990] sm:$0xff] }
  0x93   :  { %977 = vmatpush1.msra.mxu1 %v375_v33  ;;  %909 = vmatprep.subr.mxu0 %v308_v34  ;;  %v407_v33 = vld [vmem:[%s3105_s1 + $0xba0] sm:$0xff]  ;;  %v340_v34 = vld [vmem:[%s3105_s1 + $0x988] sm:$0xff] }
  0x94   :  { %978 = vmatprep.subr.mxu1 %v374_v35  ;;  %910 = vmatpush1.msra.mxu0 %v307_v36  ;;  %v406_v35 = vld [vmem:[%s3105_s1 + $0xb98] sm:$0xff]  ;;  %v339_v36 = vld [vmem:[%s3105_s1 + $0x980] sm:$0xff] }
  0x95   :  { %979 = vmatpush1.msra.mxu1 %v373_v37  ;;  %911 = vmatprep.subr.mxu0 %v306_v38  ;;  %v405_v37 = vld [vmem:[%s3105_s1 + $0xb90] sm:$0xff]  ;;  %v338_v38 = vld [vmem:[%s3105_s1 + $0x978] sm:$0xff] }
  0x96   :  { %980 = vmatprep.subr.mxu1 %v372_v39  ;;  %912 = vmatpush1.msra.mxu0 %v305_v40  ;;  %v404_v39 = vld [vmem:[%s3105_s1 + $0xb88] sm:$0xff]  ;;  %v337_v40 = vld [vmem:[%s3105_s1 + $0x970] sm:$0xff] }
  0x97   :  { %981 = vmatpush1.msra.mxu1 %v371_v41  ;;  %913 = vmatprep.subr.mxu0 %v304_v42  ;;  %v403_v41 = vld [vmem:[%s3105_s1 + $0xb80] sm:$0xff]  ;;  %v336_v42 = vld [vmem:[%s3105_s1 + $0x968] sm:$0xff] }
  0x98   :  { %982 = vmatprep.subr.mxu1 %v370_v43  ;;  %914 = vmatpush1.msra.mxu0 %v303_v44  ;;  %v402_v43 = vld [vmem:[%s3105_s1 + $0xb78] sm:$0xff]  ;;  %v335_v44 = vld [vmem:[%s3105_s1 + $0x960] sm:$0xff] }
  0x99   :  { %983 = vmatpush1.msra.mxu1 %v369_v45  ;;  %915 = vmatprep.subr.mxu0 %v302_v46  ;;  %v401_v45 = vld [vmem:[%s3105_s1 + $0xb70] sm:$0xff]  ;;  %v334_v46 = vld [vmem:[%s3105_s1 + $0x958] sm:$0xff] }
  0x9a   :  { %984 = vmatprep.subr.mxu1 %v368_v47  ;;  %916 = vmatpush1.msra.mxu0 %v301_v48  ;;  %v400_v47 = vld [vmem:[%s3105_s1 + $0xb68] sm:$0xff]  ;;  %v333_v48 = vld [vmem:[%s3105_s1 + $0x950] sm:$0xff] }
  0x9b   :  { %985 = vmatpush1.msra.mxu1 %v367_v49  ;;  %917 = vmatprep.subr.mxu0 %v300_v50  ;;  %v399_v49 = vld [vmem:[%s3105_s1 + $0xb60] sm:$0xff]  ;;  %v332_v50 = vld [vmem:[%s3105_s1 + $0x948] sm:$0xff] }
  0x9c   :  { %986 = vmatprep.subr.mxu1 %v366_v51  ;;  %918 = vmatpush1.msra.mxu0 %v299_v52  ;;  %v398_v51 = vld [vmem:[%s3105_s1 + $0xb58] sm:$0xff]  ;;  %v331_v52 = vld [vmem:[%s3105_s1 + $0x940] sm:$0xff] }
  0x9d   :  { %987 = vmatpush1.msra.mxu1 %v365_v53  ;;  %919 = vmatprep.subr.mxu0 %v298_v54  ;;  %v397_v53 = vld [vmem:[%s3105_s1 + $0xb50] sm:$0xff]  ;;  %v330_v54 = vld [vmem:[%s3105_s1 + $0x938] sm:$0xff] }
  0x9e   :  { %988 = vmatprep.subr.mxu1 %v364_v55  ;;  %920 = vmatpush1.msra.mxu0 %v297_v56  ;;  %v396_v55 = vld [vmem:[%s3105_s1 + $0xb48] sm:$0xff]  ;;  %v329_v56 = vld [vmem:[%s3105_s1 + $0x930] sm:$0xff] }
  0x9f   :  { %989 = vmatpush1.msra.mxu1 %v363_v57  ;;  %921 = vmatprep.subr.mxu0 %v296_v58  ;;  %v395_v57 = vld [vmem:[%s3105_s1 + $0xb40] sm:$0xff]  ;;  %v328_v58 = vld [vmem:[%s3105_s1 + $0x928] sm:$0xff] }
  0xa0   :  { %990 = vmatprep.subr.mxu1 %v362_v59  ;;  %922 = vmatpush1.msra.mxu0 %v295_v60  ;;  %v394_v59 = vld [vmem:[%s3105_s1 + $0xb38] sm:$0xff]  ;;  %v327_v60 = vld [vmem:[%s3105_s1 + $0x920] sm:$0xff] }
  0xa1   :  { %991 = vmatpush1.msra.mxu1 %v361_v61  ;;  %923 = vmatprep.subr.mxu0 %v294_v62  ;;  %v393_v61 = vld [vmem:[%s3105_s1 + $0xb30] sm:$0xff]  ;;  %v326_v62 = vld [vmem:[%s3105_s1 + $0x918] sm:$0xff] }
  0xa2   :  { %992 = vmatprep.subr.mxu1 %v360_v63  ;;  %924 = vmatpush1.msra.mxu0 %v293_v0  ;;  %v392_v63 = vld [vmem:[%s3105_s1 + $0xb28] sm:$0xff]  ;;  %v325_v0 = vld [vmem:[%s3105_s1 + $0x910] sm:$0xff] }
  0xa3   :  { %993 = vmatpush1.msra.mxu1 %v359_v1  ;;  %925 = vmatprep.subr.mxu0 %v292_v2  ;;  %v391_v1 = vld [vmem:[%s3105_s1 + $0xb20] sm:$0xff]  ;;  %v324_v2 = vld [vmem:[%s3105_s1 + $0x908] sm:$0xff] }
  0xa4   :  { %994 = vmatprep.subr.mxu1 %v358_v3  ;;  %926 = vmatpush1.msra.mxu0 %v291_v4  ;;  %v390_v3 = vld [vmem:[%s3105_s1 + $0xb18] sm:$0xff]  ;;  %v323_v4 = vld [vmem:[%s3105_s1 + $0x900] sm:$0xff] }
  0xa5   :  { %995 = vmatpush1.msra.mxu1 %v357_v5  ;;  %927 = vmatprep.subr.mxu0 %v354_v6  ;;  %v26_v5 = vld [vmem:[%s3106_s0 + $0x48] sm:$0xff]  ;;  %v389_v6 = vld [vmem:[%s3105_s1 + $0xb10] sm:$0xff] }
  0xa6   :  { %996 = vmatprep.subr.mxu1 %v356_v7  ;;  %928 = vmatpush2.msra.mxu0 %v353_v8  ;;  %v25_v7 = vld [vmem:[%s3106_s0 + $0x40] sm:$0xff]  ;;  %v388_v8 = vld [vmem:[%s3105_s1 + $0xb08] sm:$0xff] }
  0xa7   :  { %997 = vmatpush1.msra.mxu1 %v355_v9  ;;  %929 = vmatprep.subr.mxu0 %v352_v10  ;;  %v450_v9 = vld [vmem:[%s3105_s1 + $0xcf8] sm:$0xff]  ;;  %v387_v10 = vld [vmem:[%s3105_s1 + $0xb00] sm:$0xff] }
  0xa8   :  { %998 = vmatprep.subr.mxu1 %v418_v11  ;;  %930 = vmatpush2.msra.mxu0 %v351_v12  ;;  %v28_v11 = vld [vmem:[%s3106_s0 + $0x58] sm:$0xff]  ;;  %v449_v12 = vld [vmem:[%s3105_s1 + $0xcf0] sm:$0xff] }
  0xa9   :  { %999 = vmatpush2.msra.mxu1 %v417_v13  ;;  %931 = vmatprep.subr.mxu0 %v350_v14  ;;  %v27_v13 = vld [vmem:[%s3106_s0 + $0x50] sm:$0xff]  ;;  %v448_v14 = vld [vmem:[%s3105_s1 + $0xce8] sm:$0xff] }
  0xaa   :  { %1000 = vmatprep.subr.mxu1 %v416_v15  ;;  %932 = vmatpush2.msra.mxu0 %v349_v16  ;;  %v514_v15 = vld [vmem:[%s3105_s1 + $0xef8] sm:$0xff]  ;;  %v447_v16 = vld [vmem:[%s3105_s1 + $0xce0] sm:$0xff] }
  0xab   :  { %1001 = vmatpush2.msra.mxu1 %v415_v17  ;;  %933 = vmatprep.subr.mxu0 %v348_v18  ;;  %v513_v17 = vld [vmem:[%s3105_s1 + $0xef0] sm:$0xff]  ;;  %v446_v18 = vld [vmem:[%s3105_s1 + $0xcd8] sm:$0xff] }
  0xac   :  { %1002 = vmatprep.subr.mxu1 %v414_v19  ;;  %934 = vmatpush2.msra.mxu0 %v347_v20  ;;  %v512_v19 = vld [vmem:[%s3105_s1 + $0xee8] sm:$0xff]  ;;  %v445_v20 = vld [vmem:[%s3105_s1 + $0xcd0] sm:$0xff] }
  0xad   :  { %1003 = vmatpush2.msra.mxu1 %v413_v21  ;;  %935 = vmatprep.subr.mxu0 %v346_v22  ;;  %v511_v21 = vld [vmem:[%s3105_s1 + $0xee0] sm:$0xff]  ;;  %v444_v22 = vld [vmem:[%s3105_s1 + $0xcc8] sm:$0xff] }
  0xae   :  { %1004 = vmatprep.subr.mxu1 %v412_v23  ;;  %936 = vmatpush2.msra.mxu0 %v345_v24  ;;  %v510_v23 = vld [vmem:[%s3105_s1 + $0xed8] sm:$0xff]  ;;  %v443_v24 = vld [vmem:[%s3105_s1 + $0xcc0] sm:$0xff] }
  0xaf   :  { %1005 = vmatpush2.msra.mxu1 %v411_v25  ;;  %937 = vmatprep.subr.mxu0 %v344_v26  ;;  %v509_v25 = vld [vmem:[%s3105_s1 + $0xed0] sm:$0xff]  ;;  %v442_v26 = vld [vmem:[%s3105_s1 + $0xcb8] sm:$0xff] }
  0xb0   :  { %1006 = vmatprep.subr.mxu1 %v410_v27  ;;  %938 = vmatpush2.msra.mxu0 %v343_v28  ;;  %v508_v27 = vld [vmem:[%s3105_s1 + $0xec8] sm:$0xff]  ;;  %v441_v28 = vld [vmem:[%s3105_s1 + $0xcb0] sm:$0xff] }
  0xb1   :  { %1007 = vmatpush2.msra.mxu1 %v409_v29  ;;  %939 = vmatprep.subr.mxu0 %v342_v30  ;;  %v507_v29 = vld [vmem:[%s3105_s1 + $0xec0] sm:$0xff]  ;;  %v440_v30 = vld [vmem:[%s3105_s1 + $0xca8] sm:$0xff] }
  0xb2   :  { %1008 = vmatprep.subr.mxu1 %v408_v31  ;;  %940 = vmatpush2.msra.mxu0 %v341_v32  ;;  %v506_v31 = vld [vmem:[%s3105_s1 + $0xeb8] sm:$0xff]  ;;  %v439_v32 = vld [vmem:[%s3105_s1 + $0xca0] sm:$0xff] }
  0xb3   :  { %1009 = vmatpush2.msra.mxu1 %v407_v33  ;;  %941 = vmatprep.subr.mxu0 %v340_v34  ;;  %v505_v33 = vld [vmem:[%s3105_s1 + $0xeb0] sm:$0xff]  ;;  %v438_v34 = vld [vmem:[%s3105_s1 + $0xc98] sm:$0xff] }
  0xb4   :  { %1010 = vmatprep.subr.mxu1 %v406_v35  ;;  %942 = vmatpush2.msra.mxu0 %v339_v36  ;;  %v504_v35 = vld [vmem:[%s3105_s1 + $0xea8] sm:$0xff]  ;;  %v437_v36 = vld [vmem:[%s3105_s1 + $0xc90] sm:$0xff] }
  0xb5   :  { %1011 = vmatpush2.msra.mxu1 %v405_v37  ;;  %943 = vmatprep.subr.mxu0 %v338_v38  ;;  %v503_v37 = vld [vmem:[%s3105_s1 + $0xea0] sm:$0xff]  ;;  %v436_v38 = vld [vmem:[%s3105_s1 + $0xc88] sm:$0xff] }
  0xb6   :  { %1012 = vmatprep.subr.mxu1 %v404_v39  ;;  %944 = vmatpush2.msra.mxu0 %v337_v40  ;;  %v502_v39 = vld [vmem:[%s3105_s1 + $0xe98] sm:$0xff]  ;;  %v435_v40 = vld [vmem:[%s3105_s1 + $0xc80] sm:$0xff] }
  0xb7   :  { %1013 = vmatpush2.msra.mxu1 %v403_v41  ;;  %945 = vmatprep.subr.mxu0 %v336_v42  ;;  %v501_v41 = vld [vmem:[%s3105_s1 + $0xe90] sm:$0xff]  ;;  %v434_v42 = vld [vmem:[%s3105_s1 + $0xc78] sm:$0xff] }
  0xb8   :  { %1014 = vmatprep.subr.mxu1 %v402_v43  ;;  %946 = vmatpush2.msra.mxu0 %v335_v44  ;;  %v500_v43 = vld [vmem:[%s3105_s1 + $0xe88] sm:$0xff]  ;;  %v433_v44 = vld [vmem:[%s3105_s1 + $0xc70] sm:$0xff] }
  0xb9   :  { %1015 = vmatpush2.msra.mxu1 %v401_v45  ;;  %947 = vmatprep.subr.mxu0 %v334_v46  ;;  %v499_v45 = vld [vmem:[%s3105_s1 + $0xe80] sm:$0xff]  ;;  %v432_v46 = vld [vmem:[%s3105_s1 + $0xc68] sm:$0xff] }
  0xba   :  { %1016 = vmatprep.subr.mxu1 %v400_v47  ;;  %948 = vmatpush2.msra.mxu0 %v333_v48  ;;  %v498_v47 = vld [vmem:[%s3105_s1 + $0xe78] sm:$0xff]  ;;  %v431_v48 = vld [vmem:[%s3105_s1 + $0xc60] sm:$0xff] }
  0xbb   :  { %1017 = vmatpush2.msra.mxu1 %v399_v49  ;;  %949 = vmatprep.subr.mxu0 %v332_v50  ;;  %v497_v49 = vld [vmem:[%s3105_s1 + $0xe70] sm:$0xff]  ;;  %v430_v50 = vld [vmem:[%s3105_s1 + $0xc58] sm:$0xff] }
  0xbc   :  { %1018 = vmatprep.subr.mxu1 %v398_v51  ;;  %950 = vmatpush2.msra.mxu0 %v331_v52  ;;  %v496_v51 = vld [vmem:[%s3105_s1 + $0xe68] sm:$0xff]  ;;  %v429_v52 = vld [vmem:[%s3105_s1 + $0xc50] sm:$0xff] }
  0xbd   :  { %1019 = vmatpush2.msra.mxu1 %v397_v53  ;;  %951 = vmatprep.subr.mxu0 %v330_v54  ;;  %v495_v53 = vld [vmem:[%s3105_s1 + $0xe60] sm:$0xff]  ;;  %v428_v54 = vld [vmem:[%s3105_s1 + $0xc48] sm:$0xff] }
  0xbe   :  { %1020 = vmatprep.subr.mxu1 %v396_v55  ;;  %952 = vmatpush2.msra.mxu0 %v329_v56  ;;  %v494_v55 = vld [vmem:[%s3105_s1 + $0xe58] sm:$0xff]  ;;  %v427_v56 = vld [vmem:[%s3105_s1 + $0xc40] sm:$0xff] }
  0xbf   :  { %1021 = vmatpush2.msra.mxu1 %v395_v57  ;;  %953 = vmatprep.subr.mxu0 %v328_v58  ;;  %v493_v57 = vld [vmem:[%s3105_s1 + $0xe50] sm:$0xff]  ;;  %v426_v58 = vld [vmem:[%s3105_s1 + $0xc38] sm:$0xff] }
  0xc0   :  { %1022 = vmatprep.subr.mxu1 %v394_v59  ;;  %954 = vmatpush2.msra.mxu0 %v327_v60  ;;  %v492_v59 = vld [vmem:[%s3105_s1 + $0xe48] sm:$0xff]  ;;  %v425_v60 = vld [vmem:[%s3105_s1 + $0xc30] sm:$0xff] }
  0xc1   :  { %1023 = vmatpush2.msra.mxu1 %v393_v61  ;;  %955 = vmatprep.subr.mxu0 %v326_v62  ;;  %v491_v61 = vld [vmem:[%s3105_s1 + $0xe40] sm:$0xff]  ;;  %v424_v62 = vld [vmem:[%s3105_s1 + $0xc28] sm:$0xff] }
  0xc2   :  { %1024 = vmatprep.subr.mxu1 %v392_v63  ;;  %956 = vmatpush2.msra.mxu0 %v325_v0  ;;  %v490_v63 = vld [vmem:[%s3105_s1 + $0xe38] sm:$0xff]  ;;  %v423_v0 = vld [vmem:[%s3105_s1 + $0xc20] sm:$0xff] }
  0xc3   :  { %1025 = vmatpush2.msra.mxu1 %v391_v1  ;;  %957 = vmatprep.subr.mxu0 %v324_v2  ;;  %v489_v1 = vld [vmem:[%s3105_s1 + $0xe30] sm:$0xff]  ;;  %v422_v2 = vld [vmem:[%s3105_s1 + $0xc18] sm:$0xff] }
  0xc4   :  { %1026 = vmatprep.subr.mxu1 %v390_v3  ;;  %958 = vmatpush2.msra.mxu0 %v323_v4  ;;  %v488_v3 = vld [vmem:[%s3105_s1 + $0xe28] sm:$0xff]  ;;  %v421_v4 = vld [vmem:[%s3105_s1 + $0xc10] sm:$0xff] }
  0xc5   :  { %959 = vmatprep.mubr.f32.mxu0 %v26_v5  ;;  %1027 = vmatpush2.msra.mxu1 %v389_v6  ;;  %v487_v5 = vld [vmem:[%s3105_s1 + $0xe20] sm:$0xff]  ;;  %v420_v6 = vld [vmem:[%s3105_s1 + $0xc08] sm:$0xff] }
  0xc6   :  { %960 = vmatmul.mubr.f32.vlgmr.msra.gmra.mxu0 %v25_v7  ;;  %1028 = vmatprep.subr.mxu1 %v388_v8  ;;  %v486_v7 = vld [vmem:[%s3105_s1 + $0xe18] sm:$0xff]  ;;  %v419_v8 = vld [vmem:[%s3105_s1 + $0xc00] sm:$0xff] }
  0xc7   :  { %1037 = vmatprep.subr.mxu0 %v450_v9  ;;  %1029 = vmatpush2.msra.mxu1 %v387_v10  ;;  %v485_v9 = vld [vmem:[%s3105_s1 + $0xe10] sm:$0xff]  ;;  %v482_v10 = vld [vmem:[%s3105_s1 + $0xdf8] sm:$0xff] }
  0xc8   :  { %1030 = vmatprep.mubr.f32.mxu1 %v28_v11  ;;  %1038 = vmatpush1.msra.mxu0 %v449_v12  ;;  %v484_v11 = vld [vmem:[%s3105_s1 + $0xe08] sm:$0xff]  ;;  %v481_v12 = vld [vmem:[%s3105_s1 + $0xdf0] sm:$0xff] }
  0xc9   :  { %1031 = vmatmul.mubr.f32.vlgmr.msra.gmra.mxu1 %v27_v13  ;;  %1039 = vmatprep.subr.mxu0 %v448_v14  ;;  %v483_v13 = vld [vmem:[%s3105_s1 + $0xe00] sm:$0xff]  ;;  %v480_v14 = vld [vmem:[%s3105_s1 + $0xde8] sm:$0xff] }
  0xca   :  { %1108 = vmatprep.subr.mxu1 %v514_v15  ;;  %1040 = vmatpush1.msra.mxu0 %v447_v16  ;;  %v546_v15 = vld [vmem:[%s3105_s1 + $0xff8] sm:$0xff]  ;;  %v479_v16 = vld [vmem:[%s3105_s1 + $0xde0] sm:$0xff] }
  0xcb   :  { %1109 = vmatpush1.msra.mxu1 %v513_v17  ;;  %1041 = vmatprep.subr.mxu0 %v446_v18  ;;  %v545_v17 = vld [vmem:[%s3105_s1 + $0xff0] sm:$0xff]  ;;  %v478_v18 = vld [vmem:[%s3105_s1 + $0xdd8] sm:$0xff] }
  0xcc   :  { %1110 = vmatprep.subr.mxu1 %v512_v19  ;;  %1042 = vmatpush1.msra.mxu0 %v445_v20  ;;  %v544_v19 = vld [vmem:[%s3105_s1 + $0xfe8] sm:$0xff]  ;;  %v477_v20 = vld [vmem:[%s3105_s1 + $0xdd0] sm:$0xff] }
  0xcd   :  { %1111 = vmatpush1.msra.mxu1 %v511_v21  ;;  %1043 = vmatprep.subr.mxu0 %v444_v22  ;;  %v543_v21 = vld [vmem:[%s3105_s1 + $0xfe0] sm:$0xff]  ;;  %v476_v22 = vld [vmem:[%s3105_s1 + $0xdc8] sm:$0xff] }
  0xce   :  { %1112 = vmatprep.subr.mxu1 %v510_v23  ;;  %1044 = vmatpush1.msra.mxu0 %v443_v24  ;;  %v542_v23 = vld [vmem:[%s3105_s1 + $0xfd8] sm:$0xff]  ;;  %v475_v24 = vld [vmem:[%s3105_s1 + $0xdc0] sm:$0xff] }
  0xcf   :  { %1113 = vmatpush1.msra.mxu1 %v509_v25  ;;  %1045 = vmatprep.subr.mxu0 %v442_v26  ;;  %v541_v25 = vld [vmem:[%s3105_s1 + $0xfd0] sm:$0xff]  ;;  %v474_v26 = vld [vmem:[%s3105_s1 + $0xdb8] sm:$0xff] }
  0xd0   :  { %1114 = vmatprep.subr.mxu1 %v508_v27  ;;  %1046 = vmatpush1.msra.mxu0 %v441_v28  ;;  %v540_v27 = vld [vmem:[%s3105_s1 + $0xfc8] sm:$0xff]  ;;  %v473_v28 = vld [vmem:[%s3105_s1 + $0xdb0] sm:$0xff] }
  0xd1   :  { %1115 = vmatpush1.msra.mxu1 %v507_v29  ;;  %1047 = vmatprep.subr.mxu0 %v440_v30  ;;  %v539_v29 = vld [vmem:[%s3105_s1 + $0xfc0] sm:$0xff]  ;;  %v472_v30 = vld [vmem:[%s3105_s1 + $0xda8] sm:$0xff] }
  0xd2   :  { %1116 = vmatprep.subr.mxu1 %v506_v31  ;;  %1048 = vmatpush1.msra.mxu0 %v439_v32  ;;  %v538_v31 = vld [vmem:[%s3105_s1 + $0xfb8] sm:$0xff]  ;;  %v471_v32 = vld [vmem:[%s3105_s1 + $0xda0] sm:$0xff] }
  0xd3   :  { %1117 = vmatpush1.msra.mxu1 %v505_v33  ;;  %1049 = vmatprep.subr.mxu0 %v438_v34  ;;  %v537_v33 = vld [vmem:[%s3105_s1 + $0xfb0] sm:$0xff]  ;;  %v470_v34 = vld [vmem:[%s3105_s1 + $0xd98] sm:$0xff] }
  0xd4   :  { %1118 = vmatprep.subr.mxu1 %v504_v35  ;;  %1050 = vmatpush1.msra.mxu0 %v437_v36  ;;  %v536_v35 = vld [vmem:[%s3105_s1 + $0xfa8] sm:$0xff]  ;;  %v469_v36 = vld [vmem:[%s3105_s1 + $0xd90] sm:$0xff] }
  0xd5   :  { %1119 = vmatpush1.msra.mxu1 %v503_v37  ;;  %1051 = vmatprep.subr.mxu0 %v436_v38  ;;  %v535_v37 = vld [vmem:[%s3105_s1 + $0xfa0] sm:$0xff]  ;;  %v468_v38 = vld [vmem:[%s3105_s1 + $0xd88] sm:$0xff] }
  0xd6   :  { %1120 = vmatprep.subr.mxu1 %v502_v39  ;;  %1052 = vmatpush1.msra.mxu0 %v435_v40  ;;  %v534_v39 = vld [vmem:[%s3105_s1 + $0xf98] sm:$0xff]  ;;  %v467_v40 = vld [vmem:[%s3105_s1 + $0xd80] sm:$0xff] }
  0xd7   :  { %1121 = vmatpush1.msra.mxu1 %v501_v41  ;;  %1053 = vmatprep.subr.mxu0 %v434_v42  ;;  %v533_v41 = vld [vmem:[%s3105_s1 + $0xf90] sm:$0xff]  ;;  %v466_v42 = vld [vmem:[%s3105_s1 + $0xd78] sm:$0xff] }
  0xd8   :  { %1122 = vmatprep.subr.mxu1 %v500_v43  ;;  %1054 = vmatpush1.msra.mxu0 %v433_v44  ;;  %v532_v43 = vld [vmem:[%s3105_s1 + $0xf88] sm:$0xff]  ;;  %v465_v44 = vld [vmem:[%s3105_s1 + $0xd70] sm:$0xff] }
  0xd9   :  { %1123 = vmatpush1.msra.mxu1 %v499_v45  ;;  %1055 = vmatprep.subr.mxu0 %v432_v46  ;;  %v531_v45 = vld [vmem:[%s3105_s1 + $0xf80] sm:$0xff]  ;;  %v464_v46 = vld [vmem:[%s3105_s1 + $0xd68] sm:$0xff] }
  0xda   :  { %1124 = vmatprep.subr.mxu1 %v498_v47  ;;  %1056 = vmatpush1.msra.mxu0 %v431_v48  ;;  %v530_v47 = vld [vmem:[%s3105_s1 + $0xf78] sm:$0xff]  ;;  %v463_v48 = vld [vmem:[%s3105_s1 + $0xd60] sm:$0xff] }
  0xdb   :  { %1125 = vmatpush1.msra.mxu1 %v497_v49  ;;  %1057 = vmatprep.subr.mxu0 %v430_v50  ;;  %v529_v49 = vld [vmem:[%s3105_s1 + $0xf70] sm:$0xff]  ;;  %v462_v50 = vld [vmem:[%s3105_s1 + $0xd58] sm:$0xff] }
  0xdc   :  { %1126 = vmatprep.subr.mxu1 %v496_v51  ;;  %1058 = vmatpush1.msra.mxu0 %v429_v52  ;;  %v528_v51 = vld [vmem:[%s3105_s1 + $0xf68] sm:$0xff]  ;;  %v461_v52 = vld [vmem:[%s3105_s1 + $0xd50] sm:$0xff] }
  0xdd   :  { %1127 = vmatpush1.msra.mxu1 %v495_v53  ;;  %1059 = vmatprep.subr.mxu0 %v428_v54  ;;  %v527_v53 = vld [vmem:[%s3105_s1 + $0xf60] sm:$0xff]  ;;  %v460_v54 = vld [vmem:[%s3105_s1 + $0xd48] sm:$0xff] }
  0xde   :  { %1128 = vmatprep.subr.mxu1 %v494_v55  ;;  %1060 = vmatpush1.msra.mxu0 %v427_v56  ;;  %v526_v55 = vld [vmem:[%s3105_s1 + $0xf58] sm:$0xff]  ;;  %v459_v56 = vld [vmem:[%s3105_s1 + $0xd40] sm:$0xff] }
  0xdf   :  { %1129 = vmatpush1.msra.mxu1 %v493_v57  ;;  %1061 = vmatprep.subr.mxu0 %v426_v58  ;;  %v525_v57 = vld [vmem:[%s3105_s1 + $0xf50] sm:$0xff]  ;;  %v458_v58 = vld [vmem:[%s3105_s1 + $0xd38] sm:$0xff] }
  0xe0   :  { %1130 = vmatprep.subr.mxu1 %v492_v59  ;;  %1062 = vmatpush1.msra.mxu0 %v425_v60  ;;  %v524_v59 = vld [vmem:[%s3105_s1 + $0xf48] sm:$0xff]  ;;  %v457_v60 = vld [vmem:[%s3105_s1 + $0xd30] sm:$0xff] }
  0xe1   :  { %1131 = vmatpush1.msra.mxu1 %v491_v61  ;;  %1063 = vmatprep.subr.mxu0 %v424_v62  ;;  %v523_v61 = vld [vmem:[%s3105_s1 + $0xf40] sm:$0xff]  ;;  %v456_v62 = vld [vmem:[%s3105_s1 + $0xd28] sm:$0xff] }
  0xe2   :  { %1132 = vmatprep.subr.mxu1 %v490_v63  ;;  %1064 = vmatpush1.msra.mxu0 %v423_v0  ;;  %v522_v63 = vld [vmem:[%s3105_s1 + $0xf38] sm:$0xff]  ;;  %v455_v0 = vld [vmem:[%s3105_s1 + $0xd20] sm:$0xff] }
  0xe3   :  { %1133 = vmatpush1.msra.mxu1 %v489_v1  ;;  %1065 = vmatprep.subr.mxu0 %v422_v2  ;;  %v521_v1 = vld [vmem:[%s3105_s1 + $0xf30] sm:$0xff]  ;;  %v454_v2 = vld [vmem:[%s3105_s1 + $0xd18] sm:$0xff] }
  0xe4   :  { %1134 = vmatprep.subr.mxu1 %v488_v3  ;;  %1066 = vmatpush1.msra.mxu0 %v421_v4  ;;  %v520_v3 = vld [vmem:[%s3105_s1 + $0xf28] sm:$0xff]  ;;  %v453_v4 = vld [vmem:[%s3105_s1 + $0xd10] sm:$0xff] }
  0xe5   :  { %1135 = vmatpush1.msra.mxu1 %v487_v5  ;;  %1067 = vmatprep.subr.mxu0 %v420_v6  ;;  %v519_v5 = vld [vmem:[%s3105_s1 + $0xf20] sm:$0xff]  ;;  %v452_v6 = vld [vmem:[%s3105_s1 + $0xd08] sm:$0xff] }
  0xe6   :  { %1136 = vmatprep.subr.mxu1 %v486_v7  ;;  %1068 = vmatpush1.msra.mxu0 %v419_v8  ;;  %v518_v7 = vld [vmem:[%s3105_s1 + $0xf18] sm:$0xff]  ;;  %v451_v8 = vld [vmem:[%s3105_s1 + $0xd00] sm:$0xff] }
  0xe7   :  { %1137 = vmatpush1.msra.mxu1 %v485_v9  ;;  %1069 = vmatprep.subr.mxu0 %v482_v10  ;;  %v30_v9 = vld [vmem:[%s3106_s0 + $0x68] sm:$0xff]  ;;  %v517_v10 = vld [vmem:[%s3105_s1 + $0xf10] sm:$0xff] }
  0xe8   :  { %1138 = vmatprep.subr.mxu1 %v484_v11  ;;  %1070 = vmatpush2.msra.mxu0 %v481_v12  ;;  %v29_v11 = vld [vmem:[%s3106_s0 + $0x60] sm:$0xff]  ;;  %v516_v12 = vld [vmem:[%s3105_s1 + $0xf08] sm:$0xff] }
  0xe9   :  { %1139 = vmatpush1.msra.mxu1 %v483_v13  ;;  %1071 = vmatprep.subr.mxu0 %v480_v14  ;;  %v578_v13 = vld [vmem:[%s3105_s1 + $0x10f8] sm:$0xff]  ;;  %v515_v14 = vld [vmem:[%s3105_s1 + $0xf00] sm:$0xff] }
  0xea   :  { %1140 = vmatprep.subr.mxu1 %v546_v15  ;;  %1072 = vmatpush2.msra.mxu0 %v479_v16  ;;  %v32_v15 = vld [vmem:[%s3106_s0 + $0x78] sm:$0xff]  ;;  %v577_v16 = vld [vmem:[%s3105_s1 + $0x10f0] sm:$0xff] }
  0xeb   :  { %1141 = vmatpush2.msra.mxu1 %v545_v17  ;;  %1073 = vmatprep.subr.mxu0 %v478_v18  ;;  %v31_v17 = vld [vmem:[%s3106_s0 + $0x70] sm:$0xff]  ;;  %v576_v18 = vld [vmem:[%s3105_s1 + $0x10e8] sm:$0xff] }
  0xec   :  { %1142 = vmatprep.subr.mxu1 %v544_v19  ;;  %1074 = vmatpush2.msra.mxu0 %v477_v20  ;;  %v34_v19 = vld [vmem:[%s3106_s0 + $0x88] sm:$0xff]  ;;  %v575_v20 = vld [vmem:[%s3105_s1 + $0x10e0] sm:$0xff] }
  0xed   :  { %1143 = vmatpush2.msra.mxu1 %v543_v21  ;;  %1075 = vmatprep.subr.mxu0 %v476_v22  ;;  %v574_v21 = vld [vmem:[%s3105_s1 + $0x10d8] sm:$0xff]  ;;  %v573_v22 = vld [vmem:[%s3105_s1 + $0x10d0] sm:$0xff] }
  0xee   :  { %1144 = vmatprep.subr.mxu1 %v542_v23  ;;  %1076 = vmatpush2.msra.mxu0 %v475_v24  ;;  %v572_v23 = vld [vmem:[%s3105_s1 + $0x10c8] sm:$0xff]  ;;  %v571_v24 = vld [vmem:[%s3105_s1 + $0x10c0] sm:$0xff] }
  0xef   :  { %1145 = vmatpush2.msra.mxu1 %v541_v25  ;;  %1077 = vmatprep.subr.mxu0 %v474_v26  ;;  %v570_v25 = vld [vmem:[%s3105_s1 + $0x10b8] sm:$0xff]  ;;  %v569_v26 = vld [vmem:[%s3105_s1 + $0x10b0] sm:$0xff] }
  0xf0   :  { %1146 = vmatprep.subr.mxu1 %v540_v27  ;;  %1078 = vmatpush2.msra.mxu0 %v473_v28  ;;  %v568_v27 = vld [vmem:[%s3105_s1 + $0x10a8] sm:$0xff]  ;;  %v567_v28 = vld [vmem:[%s3105_s1 + $0x10a0] sm:$0xff] }
  0xf1   :  { %1147 = vmatpush2.msra.mxu1 %v539_v29  ;;  %1079 = vmatprep.subr.mxu0 %v472_v30  ;;  %v566_v29 = vld [vmem:[%s3105_s1 + $0x1098] sm:$0xff]  ;;  %v565_v30 = vld [vmem:[%s3105_s1 + $0x1090] sm:$0xff] }
  0xf2   :  { %1148 = vmatprep.subr.mxu1 %v538_v31  ;;  %1080 = vmatpush2.msra.mxu0 %v471_v32  ;;  %v564_v31 = vld [vmem:[%s3105_s1 + $0x1088] sm:$0xff]  ;;  %v563_v32 = vld [vmem:[%s3105_s1 + $0x1080] sm:$0xff] }
  0xf3   :  { %1149 = vmatpush2.msra.mxu1 %v537_v33  ;;  %1081 = vmatprep.subr.mxu0 %v470_v34  ;;  %v562_v33 = vld [vmem:[%s3105_s1 + $0x1078] sm:$0xff]  ;;  %v561_v34 = vld [vmem:[%s3105_s1 + $0x1070] sm:$0xff] }
  0xf4   :  { %1150 = vmatprep.subr.mxu1 %v536_v35  ;;  %1082 = vmatpush2.msra.mxu0 %v469_v36  ;;  %v560_v35 = vld [vmem:[%s3105_s1 + $0x1068] sm:$0xff]  ;;  %v559_v36 = vld [vmem:[%s3105_s1 + $0x1060] sm:$0xff] }
  0xf5   :  { %1151 = vmatpush2.msra.mxu1 %v535_v37  ;;  %1083 = vmatprep.subr.mxu0 %v468_v38  ;;  %v558_v37 = vld [vmem:[%s3105_s1 + $0x1058] sm:$0xff]  ;;  %v557_v38 = vld [vmem:[%s3105_s1 + $0x1050] sm:$0xff] }
  0xf6   :  { %1152 = vmatprep.subr.mxu1 %v534_v39  ;;  %1084 = vmatpush2.msra.mxu0 %v467_v40  ;;  %v556_v39 = vld [vmem:[%s3105_s1 + $0x1048] sm:$0xff]  ;;  %v555_v40 = vld [vmem:[%s3105_s1 + $0x1040] sm:$0xff] }
  0xf7   :  { %1153 = vmatpush2.msra.mxu1 %v533_v41  ;;  %1085 = vmatprep.subr.mxu0 %v466_v42  ;;  %v554_v41 = vld [vmem:[%s3105_s1 + $0x1038] sm:$0xff]  ;;  %v553_v42 = vld [vmem:[%s3105_s1 + $0x1030] sm:$0xff] }
  0xf8   :  { %1154 = vmatprep.subr.mxu1 %v532_v43  ;;  %1086 = vmatpush2.msra.mxu0 %v465_v44  ;;  %v552_v43 = vld [vmem:[%s3105_s1 + $0x1028] sm:$0xff]  ;;  %v551_v44 = vld [vmem:[%s3105_s1 + $0x1020] sm:$0xff] }
  0xf9   :  { %1155 = vmatpush2.msra.mxu1 %v531_v45  ;;  %1087 = vmatprep.subr.mxu0 %v464_v46  ;;  %v550_v45 = vld [vmem:[%s3105_s1 + $0x1018] sm:$0xff]  ;;  %v549_v46 = vld [vmem:[%s3105_s1 + $0x1010] sm:$0xff] }
  0xfa   :  { %1156 = vmatprep.subr.mxu1 %v530_v47  ;;  %1088 = vmatpush2.msra.mxu0 %v463_v48  ;;  %v548_v47 = vld [vmem:[%s3105_s1 + $0x1008] sm:$0xff]  ;;  %v547_v48 = vld [vmem:[%s3105_s1 + $0x1000] sm:$0xff] }
  0xfb   :  { %1157 = vmatpush2.msra.mxu1 %v529_v49  ;;  %1089 = vmatprep.subr.mxu0 %v462_v50  ;;  %v610_v49 = vld [vmem:[%s3105_s1 + $0x11f8] sm:$0xff]  ;;  %v609_v50 = vld [vmem:[%s3105_s1 + $0x11f0] sm:$0xff] }
  0xfc   :  { %1158 = vmatprep.subr.mxu1 %v528_v51  ;;  %1090 = vmatpush2.msra.mxu0 %v461_v52  ;;  %v608_v51 = vld [vmem:[%s3105_s1 + $0x11e8] sm:$0xff]  ;;  %v607_v52 = vld [vmem:[%s3105_s1 + $0x11e0] sm:$0xff] }
  0xfd   :  { %1159 = vmatpush2.msra.mxu1 %v527_v53  ;;  %1091 = vmatprep.subr.mxu0 %v460_v54  ;;  %v606_v53 = vld [vmem:[%s3105_s1 + $0x11d8] sm:$0xff]  ;;  %v605_v54 = vld [vmem:[%s3105_s1 + $0x11d0] sm:$0xff] }
  0xfe   :  { %1160 = vmatprep.subr.mxu1 %v526_v55  ;;  %1092 = vmatpush2.msra.mxu0 %v459_v56  ;;  %v604_v55 = vld [vmem:[%s3105_s1 + $0x11c8] sm:$0xff]  ;;  %v603_v56 = vld [vmem:[%s3105_s1 + $0x11c0] sm:$0xff] }
  0xff   :  { %1161 = vmatpush2.msra.mxu1 %v525_v57  ;;  %1093 = vmatprep.subr.mxu0 %v458_v58  ;;  %v602_v57 = vld [vmem:[%s3105_s1 + $0x11b8] sm:$0xff]  ;;  %v601_v58 = vld [vmem:[%s3105_s1 + $0x11b0] sm:$0xff] }
 0x100   :  { %1162 = vmatprep.subr.mxu1 %v524_v59  ;;  %1094 = vmatpush2.msra.mxu0 %v457_v60  ;;  %v600_v59 = vld [vmem:[%s3105_s1 + $0x11a8] sm:$0xff]  ;;  %v599_v60 = vld [vmem:[%s3105_s1 + $0x11a0] sm:$0xff] }
 0x101   :  { %1163 = vmatpush2.msra.mxu1 %v523_v61  ;;  %1095 = vmatprep.subr.mxu0 %v456_v62  ;;  %v598_v61 = vld [vmem:[%s3105_s1 + $0x1198] sm:$0xff]  ;;  %v597_v62 = vld [vmem:[%s3105_s1 + $0x1190] sm:$0xff] }
 0x102   :  { %1164 = vmatprep.subr.mxu1 %v522_v63  ;;  %1096 = vmatpush2.msra.mxu0 %v455_v0  ;;  %v596_v63 = vld [vmem:[%s3105_s1 + $0x1188] sm:$0xff]  ;;  %v595_v0 = vld [vmem:[%s3105_s1 + $0x1180] sm:$0xff] }
 0x103   :  { %1165 = vmatpush2.msra.mxu1 %v521_v1  ;;  %1097 = vmatprep.subr.mxu0 %v454_v2  ;;  %v594_v1 = vld [vmem:[%s3105_s1 + $0x1178] sm:$0xff]  ;;  %v593_v2 = vld [vmem:[%s3105_s1 + $0x1170] sm:$0xff] }
 0x104   :  { %1166 = vmatprep.subr.mxu1 %v520_v3  ;;  %1098 = vmatpush2.msra.mxu0 %v453_v4  ;;  %v592_v3 = vld [vmem:[%s3105_s1 + $0x1168] sm:$0xff]  ;;  %v591_v4 = vld [vmem:[%s3105_s1 + $0x1160] sm:$0xff] }
 0x105   :  { %1167 = vmatpush2.msra.mxu1 %v519_v5  ;;  %1099 = vmatprep.subr.mxu0 %v452_v6  ;;  %v590_v5 = vld [vmem:[%s3105_s1 + $0x1158] sm:$0xff]  ;;  %v589_v6 = vld [vmem:[%s3105_s1 + $0x1150] sm:$0xff] }
 0x106   :  { %1168 = vmatprep.subr.mxu1 %v518_v7  ;;  %1100 = vmatpush2.msra.mxu0 %v451_v8  ;;  %v588_v7 = vld [vmem:[%s3105_s1 + $0x1148] sm:$0xff]  ;;  %v587_v8 = vld [vmem:[%s3105_s1 + $0x1140] sm:$0xff] }
 0x107   :  { %1101 = vmatprep.mubr.f32.mxu0 %v30_v9  ;;  %1169 = vmatpush2.msra.mxu1 %v517_v10  ;;  %v586_v9 = vld [vmem:[%s3105_s1 + $0x1138] sm:$0xff]  ;;  %v585_v10 = vld [vmem:[%s3105_s1 + $0x1130] sm:$0xff] }
 0x108   :  { %1102 = vmatmul.mubr.f32.vlgmr.msra.gmra.mxu0 %v29_v11  ;;  %1170 = vmatprep.subr.mxu1 %v516_v12  ;;  %v584_v11 = vld [vmem:[%s3105_s1 + $0x1128] sm:$0xff]  ;;  %v583_v12 = vld [vmem:[%s3105_s1 + $0x1120] sm:$0xff] }
 0x109   :  { %1179 = vmatprep.subr.mxu0 %v578_v13  ;;  %1171 = vmatpush2.msra.mxu1 %v515_v14  ;;  %v582_v13 = vld [vmem:[%s3105_s1 + $0x1118] sm:$0xff]  ;;  %v581_v14 = vld [vmem:[%s3105_s1 + $0x1110] sm:$0xff] }
 0x10a   :  { %1172 = vmatprep.mubr.f32.mxu1 %v32_v15  ;;  %1180 = vmatpush1.msra.mxu0 %v577_v16  ;;  %v580_v15 = vld [vmem:[%s3105_s1 + $0x1108] sm:$0xff]  ;;  %v579_v16 = vld [vmem:[%s3105_s1 + $0x1100] sm:$0xff] }
 0x10b   :  { %1173 = vmatmul.mubr.f32.vlgmr.msra.gmra.mxu1 %v31_v17  ;;  %1181 = vmatprep.subr.mxu0 %v576_v18  ;;  %v33_v17 = vld [vmem:[%s3106_s0 + $0x80] sm:$0xff]  ;;  %v677_v18 = vpop.f32.mrf.mxu0 }
 0x10c   :  { %1243 = vmatprep.mubr.f32.mxu0 %v34_v19  ;;  %1182 = vmatpush1.msra.mxu0 %v575_v20  ;;  %v748_v19 = vpop.f32.mrf.mxu1 }
 0x10d   :  { %1183 = vmatprep.subr.mxu0 %v574_v21  ;;  %v679_v20 = vpop.f32.mrf.mxu0 }
 0x10e   :  { %1184 = vmatpush1.msra.mxu0 %v573_v22  ;;  %v750_v22 = vpop.f32.mrf.mxu1 }
 0x10f   :  { %1185 = vmatprep.subr.mxu0 %v572_v23  ;;  %v749_v23 = vadd.f32 %v748_v19, %v677_v18 }
 0x110   :  { %1186 = vmatpush1.msra.mxu0 %v571_v24 }
 0x111   :  { %1187 = vmatprep.subr.mxu0 %v570_v25 }
 0x112   :  { %1188 = vmatpush1.msra.mxu0 %v569_v26  ;;  %v751_v26 = vadd.f32 %v750_v22, %v679_v20 }
 0x113   :  { %1189 = vmatprep.subr.mxu0 %v568_v27 }
 0x114   :  { %1190 = vmatpush1.msra.mxu0 %v567_v28 }
 0x115   :  { %1191 = vmatprep.subr.mxu0 %v566_v29 }
 0x116   :  { %1192 = vmatpush1.msra.mxu0 %v565_v30 }
 0x117   :  { %1193 = vmatprep.subr.mxu0 %v564_v31 }
 0x118   :  { %1194 = vmatpush1.msra.mxu0 %v563_v32  ;;  %v1252_v32 = vlaneseq }
 0x119   :  { %1195 = vmatprep.subr.mxu0 %v562_v33 }
 0x11a   :  { %1196 = vmatpush1.msra.mxu0 %v561_v34 }
 0x11b   :  { %1197 = vmatprep.subr.mxu0 %v560_v35 }
 0x11c   :  { %1198 = vmatpush1.msra.mxu0 %v559_v36 }
 0x11d   :  { %1199 = vmatprep.subr.mxu0 %v558_v37 }
 0x11e   :  { %1200 = vmatpush1.msra.mxu0 %v557_v38 }
 0x11f   :  { %1201 = vmatprep.subr.mxu0 %v556_v39  ;;  %v1253_v39 = vshrl.u32 %v1252_v32, 7 }
 0x120   :  { %1202 = vmatpush1.msra.mxu0 %v555_v40 }
 0x121   :  { %1203 = vmatprep.subr.mxu0 %v554_v41 }
 0x122   :  { %1204 = vmatpush1.msra.mxu0 %v553_v42 }
 0x123   :  { %1205 = vmatprep.subr.mxu0 %v552_v43 }
 0x124   :  { %1206 = vmatpush1.msra.mxu0 %v551_v44 }
 0x125   :  { %1207 = vmatprep.subr.mxu0 %v550_v45 }
 0x126   :  { %1208 = vmatpush1.msra.mxu0 %v549_v46  ;;  %v1254_v46 = vsub.s32 0, %v1253_v39 }
 0x127   :  { %1209 = vmatprep.subr.mxu0 %v548_v47  ;;  %v1250_v47 = vld [vmem:[%s3107_s2] sm:$0x3] }
 0x128   :  { %1210 = vmatpush1.msra.mxu0 %v547_v48 }
 0x129   :  { %1211 = vmatprep.subr.mxu0 %v610_v49  ;;  %v1258_v49 = vsub.s32 1, %v1253_v39 }
 0x12a   :  { %1212 = vmatpush2.msra.mxu0 %v609_v50 }
 0x12b   :  { %1213 = vmatprep.subr.mxu0 %v608_v51  ;;  %v1264_v51 = vld [vmem:[%s3108_s3] sm:$0x3] }
 0x12c   :  { %1214 = vmatpush2.msra.mxu0 %v607_v52 }
 0x12d   :  { %1215 = vmatprep.subr.mxu0 %v606_v53  ;;  %v1255_v53 = vrot.slane %v1250_v47, %v1254_v46 }
 0x12e   :  { %1216 = vmatpush2.msra.mxu0 %v605_v54 }
 0x12f   :  { %1217 = vmatprep.subr.mxu0 %v604_v55 }
 0x130   :  { %1218 = vmatpush2.msra.mxu0 %v603_v56 }
 0x131   :  { %1219 = vmatprep.subr.mxu0 %v602_v57  ;;  %v1269_v57 = vrot.slane %v1264_v51, %v1254_v46 }
 0x132   :  { %1220 = vmatpush2.msra.mxu0 %v601_v58  ;;  %v1259_v58 = vrot.slane %v1250_v47, %v1258_v49 }
 0x133   :  { %1221 = vmatprep.subr.mxu0 %v600_v59 }
 0x134   :  { %1222 = vmatpush2.msra.mxu0 %v599_v60 }
 0x135   :  { %1223 = vmatprep.subr.mxu0 %v598_v61 }
 0x136   :  { %1224 = vmatpush2.msra.mxu0 %v597_v62  ;;  %v1273_v62 = vrot.slane %v1264_v51, %v1258_v49 }
 0x137   :  { %1225 = vmatprep.subr.mxu0 %v596_v63 }
 0x138   :  { %1226 = vmatpush2.msra.mxu0 %v595_v0 }
 0x139   :  { %1227 = vmatprep.subr.mxu0 %v594_v1 }
 0x13a   :  { %1228 = vmatpush2.msra.mxu0 %v593_v2 }
 0x13b   :  { %1229 = vmatprep.subr.mxu0 %v592_v3 }
 0x13c   :  { %1230 = vmatpush2.msra.mxu0 %v591_v4 }
 0x13d   :  { %1231 = vmatprep.subr.mxu0 %v590_v5 }
 0x13e   :  { %1232 = vmatpush2.msra.mxu0 %v589_v6 }
 0x13f   :  { %1233 = vmatprep.subr.mxu0 %v588_v7 }
 0x140   :  { %1234 = vmatpush2.msra.mxu0 %v587_v8 }
 0x141   :  { %1235 = vmatprep.subr.mxu0 %v586_v9 }
 0x142   :  { %1236 = vmatpush2.msra.mxu0 %v585_v10 }
 0x143   :  { %1237 = vmatprep.subr.mxu0 %v584_v11 }
 0x144   :  { %1238 = vmatpush2.msra.mxu0 %v583_v12  ;;  %v819_v21 = vpop.f32.mrf.mxu0 }
 0x145   :  { %1239 = vmatprep.subr.mxu0 %v582_v13  ;;  %v820_v27 = vadd.f32 %v819_v21, %v749_v23 }
 0x146   :  { %1240 = vmatpush2.msra.mxu0 %v581_v14  ;;  %v821_v24 = vpop.f32.mrf.mxu0 }
 0x147   :  { %1241 = vmatprep.subr.mxu0 %v580_v15  ;;  %v890_v25 = vpop.f32.mrf.mxu1  ;;  %v822_v29 = vadd.f32 %v821_v24, %v751_v26 }
 0x148   :  { %1242 = vmatpush2.msra.mxu0 %v579_v16  ;;  %v891_v31 = vadd.f32 %v890_v25, %v820_v27 }
 0x149   :  { %1244 = vmatmul.mubr.f32.vlgmr.msra.gmra.mxu0 %v33_v17  ;;  %v892_v30 = vpop.f32.mrf.mxu1 }
 0x14a   :  { %v893_v35 = vadd.f32 %v892_v30, %v822_v29 }
 0x186   :  { %v961_v28 = vpop.f32.mrf.mxu0 }
 0x187   :  { %v962_v36 = vadd.f32 %v961_v28, %v891_v31 }
 0x188   :  { %v963_v33 = vpop.f32.mrf.mxu0 }
 0x189   :  { %v1032_v34 = vpop.f32.mrf.mxu1  ;;  %v964_v38 = vadd.f32 %v963_v33, %v893_v35 }
 0x18a   :  { %v1033_v41 = vadd.f32 %v1032_v34, %v962_v36 }
 0x18b   :  { %v1034_v40 = vpop.f32.mrf.mxu1 }
 0x18c   :  { %v1035_v44 = vadd.f32 %v1034_v40, %v964_v38 }
 0x1c8   :  { %v1103_v37 = vpop.f32.mrf.mxu0 }
 0x1c9   :  { %v1104_v45 = vadd.f32 %v1103_v37, %v1033_v41 }
 0x1ca   :  { %v1105_v42 = vpop.f32.mrf.mxu0 }
 0x1cb   :  { %v1174_v43 = vpop.f32.mrf.mxu1  ;;  %v1106_v48 = vadd.f32 %v1105_v42, %v1035_v44 }
 0x1cc   :  { %v1175_v52 = vadd.f32 %v1174_v43, %v1104_v45 }
 0x1cd   :  { %v1176_v50 = vpop.f32.mrf.mxu1 }
 0x1ce   :  { %v1177_v55 = vadd.f32 %v1176_v50, %v1106_v48 }
 0x209   :  { %v1245_v54 = vpop.f32.mrf.mxu0 }
 0x20a   :  { %v1246_v56 = vadd.f32 %v1245_v54, %v1175_v52 }
 0x20b   :  { %v1247_v59 = vpop.f32.mrf.mxu0 }
 0x20c   :  { %v1262_v60 = vmul.f32 %v1255_v53, %v1246_v56  ;;  %v1248_v61 = vadd.f32 %v1247_v59, %v1177_v55 }
 0x20e   :  { %v1276_v63 = vadd.f32 %v1269_v57, %v1262_v60  ;;  %v1263_v0 = vmul.f32 %v1259_v58, %v1248_v61 }
 0x210   :  { %v1278_v1 = vmax.f32 %v1276_v63, 0.0  ;;  %v1277_v2 = vadd.f32 %v1273_v62, %v1263_v0 }
 0x212   :  { %1280 = vst [vmem:[%s3109_s4] sm:$0xff] %v1278_v1  ;;  %v1279_v3 = vmax.f32 %v1277_v2, 0.0 }
 0x214   :  { %1281 = vst [vmem:[%s3109_s4 + $0x8] sm:$0xff] %v1279_v3 }

</bundles_post_ra>
